<compile_context>
chip_gen: v7x
topology: tpu7x:2x2x1
jax: 0.10.0
libtpu: 0.0.40
codegen_flags: <defaults>
</compile_context>

<pallas_src>
import jax
import jax.numpy as jnp
from jax.experimental import pallas as pl
from jax.experimental.pallas import tpu as pltpu


_EPS = 1e-5


# --------------------------------------------------------------------------
# Fused Pallas kernel: conv1/bn1/relu -> pool -> conv2/bn2/relu -> pool ->
# conv3/bn3/relu, one batch tile per grid step, everything in VMEM.
# --------------------------------------------------------------------------
def _fused_kernel(x_ref, w1_ref, s1_ref, b1_ref,
                  w2_ref, s2_ref, b2_ref,
                  w3_ref, s3_ref, b3_ref,
                  o_ref,
                  h1_ref, vm1_ref, x2_ref, vm2_ref, x3_ref):
    bt = x_ref.shape[0]
    f32 = jnp.float32
    bf16 = jnp.bfloat16

    def bn_relu(acc, s_ref, b_ref):
        # Folded eval-mode BatchNorm (conv bias included) + ReLU, all in f32.
        return jnp.maximum(acc * s_ref[...] + b_ref[...], 0.0)

    # ---- conv1 + bn1 + relu : (bt,28,24,15) -> h1_ref (bt,24,24,64) --------
    # x_ref lanes hold (dj, cin) pairs (dj-expanded in the wrapper), so only
    # the 5 `di` taps are needed.  Processed in 3 blocks of 8 output rows to
    # keep the f32 accumulator within the vreg budget.
    m1 = bt * 8 * 24
    for rb in range(3):
        acc = jnp.zeros((m1, 64), f32)
        for di in range(5):
            r0 = rb * 8 + di
            xs = x_ref[:, r0:r0 + 8, :, :].reshape(m1, 15).astype(bf16)
            acc = acc + jnp.dot(xs, w1_ref[di], preferred_element_type=f32)
        y = bn_relu(acc, s1_ref, b1_ref).reshape(bt, 8, 24, 64)
        h1_ref[:, rb * 8:(rb + 1) * 8, :, :] = y

    # ---- pool1 : 3x3 / stride 2, (24,24) -> (11,11) -------------------------
    # Vertical max over full 24-wide rows, then horizontal max written into the
    # zero-padded conv2 input scratch (width 16; columns 11.. stay zero).
    for i in range(11):
        vm1_ref[:, i, :, :] = jnp.maximum(
            jnp.maximum(h1_ref[:, 2 * i, :, :], h1_ref[:, 2 * i + 1, :, :]),
            h1_ref[:, 2 * i + 2, :, :])
    x2_ref[...] = jnp.zeros(x2_ref.shape, f32)
    for j in range(11):
        x2_ref[:, :, j, :] = jnp.maximum(
            jnp.maximum(vm1_ref[:, :, 2 * j, :], vm1_ref[:, :, 2 * j + 1, :]),
            vm1_ref[:, :, 2 * j + 2, :])

    # ---- conv2 + bn2 + relu : (11,11,64) -> (7,7,64) ------------------------
    # Output rows are computed 8 wide (column 7 is garbage and never read) so
    # the reshape to (m, 64) keeps the collapsed sublane dim a multiple of 8.
    m2 = bt * 7 * 8
    acc = jnp.zeros((m2, 64), f32)
    t = 0
    for di in range(5):
        for dj in range(5):
            xs = x2_ref[:, di:di + 7, dj:dj + 8, :].reshape(m2, 64).astype(bf16)
            acc = acc + jnp.dot(xs, w2_ref[t], preferred_element_type=f32)
            t += 1
    h2 = bn_relu(acc, s2_ref, b2_ref).reshape(bt, 7, 8, 64)

    # ---- pool2 : (7,7) -> (3,3), written into conv3's zero-padded input -----
    for i in range(3):
        vm2_ref[:, i, :, :] = jnp.maximum(
            jnp.maximum(h2[:, 2 * i, :, :], h2[:, 2 * i + 1, :, :]),
            h2[:, 2 * i + 2, :, :])
    x3_ref[...] = jnp.zeros(x3_ref.shape, f32)   # zero ring == conv3 padding=2
    for j in range(3):
        x3_ref[:, 2:5, 2 + j, :] = jnp.maximum(
            jnp.maximum(vm2_ref[:, :, 2 * j, :], vm2_ref[:, :, 2 * j + 1, :]),
            vm2_ref[:, :, 2 * j + 2, :])

    # ---- conv3 + bn3 + relu (padding=2) : (3,3,64) -> (3,3,128) --------------
    m3 = bt * 3 * 8
    acc = jnp.zeros((m3, 128), f32)
    t = 0
    for di in range(5):
        for dj in range(5):
            xs = x3_ref[:, di:di + 3, dj:dj + 8, :].reshape(m3, 64).astype(bf16)
            acc = acc + jnp.dot(xs, w3_ref[t], preferred_element_type=f32)
            t += 1
    h3 = bn_relu(acc, s3_ref, b3_ref).reshape(bt, 3, 8, 128)

    # Dropout2d is identity in eval mode; keep only the 3 valid output columns.
    o_ref[...] = h3[:, :, 0:3, :]


# --------------------------------------------------------------------------
# Wrapper glue: BN folding, weight layout, conv1 dj-expansion, pallas_call.
# --------------------------------------------------------------------------
def _fold_bn(conv_bias, gamma, beta, rmean, rvar, eps=_EPS):
    scale = gamma / jnp.sqrt(rvar + eps)
    bias = beta + (conv_bias - rmean) * scale
    return scale, bias


def _prep_conv(p, merge_dj=False):
    w = p["w"]                                   # (cout, cin, 5, 5)
    cout, cin, kh, kw = w.shape
    wt = jnp.transpose(w, (2, 3, 1, 0))          # (kh, kw, cin, cout)
    if merge_dj:
        wt = wt.reshape(kh, kw * cin, cout)      # (5, kw*cin, cout)
    else:
        wt = wt.reshape(kh * kw, cin, cout)      # (25, cin, cout)
    scale, bias = _fold_bn(p["b"], p["gamma"], p["beta"], p["rmean"], p["rvar"])
    return (wt.astype(jnp.bfloat16),
            scale.reshape(1, cout).astype(jnp.float32),
            bias.reshape(1, cout).astype(jnp.float32))


def svhn_extractor_forward(x_nchw, params):
    B = x_nchw.shape[0]
    # input.expand(B, 3, 28, 28)
    x = jnp.broadcast_to(x_nchw, (B, 3, 28, 28)).astype(jnp.float32)
    x = jnp.transpose(x, (0, 2, 3, 1))                       # NHWC (B,28,28,3)
    # conv1 dj-expansion: lane index = dj*3 + c  ->  (B, 28, 24, 15).
    x_rows = jnp.concatenate([x[:, :, dj:dj + 24, :] for dj in range(5)],
                             axis=-1)

    w1, s1, b1 = _prep_conv(params["conv1"], merge_dj=True)   # (5, 15, 64)
    w2, s2, b2 = _prep_conv(params["conv2"])                  # (25, 64, 64)
    w3, s3, b3 = _prep_conv(params["conv3"])                  # (25, 64, 128)

    bt = 1                                                    # batch tile
    const3 = lambda i: (0, 0, 0)
    const2 = lambda i: (0, 0)

    out = pl.pallas_call(
        _fused_kernel,
        out_shape=jax.ShapeDtypeStruct((B, 3, 3, 128), jnp.float32),
        grid=(B // bt,),
        in_specs=[
            pl.BlockSpec((bt, 28, 24, 15), lambda i: (i, 0, 0, 0)),
            pl.BlockSpec((5, 15, 64), const3),
            pl.BlockSpec((1, 64), const2),
            pl.BlockSpec((1, 64), const2),
            pl.BlockSpec((25, 64, 64), const3),
            pl.BlockSpec((1, 64), const2),
            pl.BlockSpec((1, 64), const2),
            pl.BlockSpec((25, 64, 128), const3),
            pl.BlockSpec((1, 128), const2),
            pl.BlockSpec((1, 128), const2),
        ],
        out_specs=pl.BlockSpec((bt, 3, 3, 128), lambda i: (i, 0, 0, 0)),
        scratch_shapes=[
            pltpu.VMEM((bt, 24, 24, 64), jnp.float32),   # h1 (conv1 output)
            pltpu.VMEM((bt, 11, 24, 64), jnp.float32),   # pool1 vertical max
            pltpu.VMEM((bt, 11, 16, 64), jnp.float32),   # conv2 input (padded)
            pltpu.VMEM((bt, 3, 8, 64), jnp.float32),     # pool2 vertical max
            pltpu.VMEM((bt, 7, 16, 64), jnp.float32),    # conv3 input (padded)
        ],
        compiler_params=pltpu.CompilerParams(
            dimension_semantics=("parallel",)),
    )(x_rows, w1, s1, b1, w2, s2, b2, w3, s3, b3)

    # Match torch's x.view(-1, 128*3*3) on NCHW ordering.
    return jnp.transpose(out, (0, 3, 1, 2)).reshape(B, 128 * 3 * 3)


# --------------------------------------------------------------------------
# Parameter init matching SVHN_Extractor.init_params (kaiming fan_out convs,
# zero conv bias, BN gamma=1 / beta=0 / running stats 0/1).
# --------------------------------------------------------------------------
def init_params(key):
    specs = [("conv1", 3, 64, 5), ("conv2", 64, 64, 5), ("conv3", 64, 128, 5)]
    params = {}
    for name, cin, cout, k in specs:
        key, sub = jax.random.split(key)
        fan_out = cout * k * k
        std = (2.0 / fan_out) ** 0.5
        w = jax.random.normal(sub, (cout, cin, k, k), jnp.float32) * std
        params[name] = dict(
            w=w,
            b=jnp.zeros((cout,), jnp.float32),
            gamma=jnp.ones((cout,), jnp.float32),
            beta=jnp.zeros((cout,), jnp.float32),
            rmean=jnp.zeros((cout,), jnp.float32),
            rvar=jnp.ones((cout,), jnp.float32),
        )
    return params


if __name__ == "__main__":
    key = jax.random.PRNGKey(0)
    pkey, xkey = jax.random.split(key)
    params = init_params(pkey)
    # Grayscale-style input (B, 1, 28, 28); expand() broadcasts to 3 channels.
    x = jax.random.normal(xkey, (2, 1, 28, 28), jnp.float32)

    fwd = jax.jit(lambda inp: svhn_extractor_forward(inp, params))
    out = fwd(x)
    jax.block_until_ready(out)
    assert out.shape == (2, 128 * 3 * 3)
    assert bool(jnp.all(jnp.isfinite(out)))
    print("KERNEL_OK")
</pallas_src>

<mosaic_0001>
module attributes {stable_mosaic.version = 11 : i64} {
  func.func @_fused_kernel(%arg0: i32, %arg1: memref<1x28x24x15xf32, #tpu.memory_space<vmem>>, %arg2: memref<5x15x64xbf16, #tpu.memory_space<vmem>>, %arg3: memref<1x64xf32, #tpu.memory_space<vmem>>, %arg4: memref<1x64xf32, #tpu.memory_space<vmem>>, %arg5: memref<25x64x64xbf16, #tpu.memory_space<vmem>>, %arg6: memref<1x64xf32, #tpu.memory_space<vmem>>, %arg7: memref<1x64xf32, #tpu.memory_space<vmem>>, %arg8: memref<25x64x128xbf16, #tpu.memory_space<vmem>>, %arg9: memref<1x128xf32, #tpu.memory_space<vmem>>, %arg10: memref<1x128xf32, #tpu.memory_space<vmem>>, %arg11: memref<1x3x3x128xf32, #tpu.memory_space<vmem>>, %arg12: memref<1x24x24x64xf32, #tpu.memory_space<vmem>>, %arg13: memref<1x11x24x64xf32, #tpu.memory_space<vmem>>, %arg14: memref<1x11x16x64xf32, #tpu.memory_space<vmem>>, %arg15: memref<1x3x8x64xf32, #tpu.memory_space<vmem>>, %arg16: memref<1x7x16x64xf32, #tpu.memory_space<vmem>>) attributes {dimension_semantics = [#tpu.dimension_semantics<parallel>], iteration_bounds = array<i64: 2>, scalar_prefetch = 0 : i64, scratch_operands = 5 : i64, tpu.core_type = #tpu.core_type<tc>, window_params = [{transform_indices = @transform_0, window_bounds = array<i64: 1, 28, 24, 15>}, {pipeline_mode = #tpu.pipeline_mode<synchronous>, transform_indices = @transform_1, window_bounds = array<i64: 5, 15, 64>}, {pipeline_mode = #tpu.pipeline_mode<synchronous>, transform_indices = @transform_2, window_bounds = array<i64: 1, 64>}, {pipeline_mode = #tpu.pipeline_mode<synchronous>, transform_indices = @transform_3, window_bounds = array<i64: 1, 64>}, {pipeline_mode = #tpu.pipeline_mode<synchronous>, transform_indices = @transform_4, window_bounds = array<i64: 25, 64, 64>}, {pipeline_mode = #tpu.pipeline_mode<synchronous>, transform_indices = @transform_5, window_bounds = array<i64: 1, 64>}, {pipeline_mode = #tpu.pipeline_mode<synchronous>, transform_indices = @transform_6, window_bounds = array<i64: 1, 64>}, {pipeline_mode = #tpu.pipeline_mode<synchronous>, transform_indices = @transform_7, window_bounds = array<i64: 25, 64, 128>}, {pipeline_mode = #tpu.pipeline_mode<synchronous>, transform_indices = @transform_8, window_bounds = array<i64: 1, 128>}, {pipeline_mode = #tpu.pipeline_mode<synchronous>, transform_indices = @transform_9, window_bounds = array<i64: 1, 128>}, {transform_indices = @transform_10, window_bounds = array<i64: 1, 3, 3, 128>}]} {
    %cst = arith.constant 0.000000e+00 : f32
    %0 = vector.broadcast %cst : f32 to vector<192x64xf32>
    %c0 = arith.constant 0 : index
    %c0_0 = arith.constant 0 : index
    %c0_1 = arith.constant 0 : index
    %c0_2 = arith.constant 0 : index
    %1 = vector.load %arg1[%c0, %c0_0, %c0_1, %c0_2] : memref<1x28x24x15xf32, #tpu.memory_space<vmem>>, vector<1x8x24x15xf32>
    %2 = vector.shape_cast %1 : vector<1x8x24x15xf32> to vector<192x15xf32>
    %3 = arith.truncf %2 : vector<192x15xf32> to vector<192x15xbf16>
    %c0_3 = arith.constant 0 : index
    %c0_4 = arith.constant 0 : index
    %c0_5 = arith.constant 0 : index
    %4 = vector.load %arg2[%c0_3, %c0_4, %c0_5] : memref<5x15x64xbf16, #tpu.memory_space<vmem>>, vector<1x15x64xbf16>
    %5 = vector.shape_cast %4 : vector<1x15x64xbf16> to vector<15x64xbf16>
    %cst_6 = arith.constant dense<0.000000e+00> : vector<192x64xf32>
    %6 = tpu.matmul %3, %5, %cst_6 {dimension_numbers = #tpu.dot_dimension_numbers<[1], [0], [0], [1], [0, 0, 1, 1], [], []>} : vector<192x15xbf16>, vector<15x64xbf16>, vector<192x64xf32> -> vector<192x64xf32>
    %7 = arith.addf %0, %6 : vector<192x64xf32>
    %c0_7 = arith.constant 0 : index
    %c1 = arith.constant 1 : index
    %c0_8 = arith.constant 0 : index
    %c0_9 = arith.constant 0 : index
    %8 = vector.load %arg1[%c0_7, %c1, %c0_8, %c0_9] : memref<1x28x24x15xf32, #tpu.memory_space<vmem>>, vector<1x8x24x15xf32>
    %9 = vector.shape_cast %8 : vector<1x8x24x15xf32> to vector<192x15xf32>
    %10 = arith.truncf %9 : vector<192x15xf32> to vector<192x15xbf16>
    %c1_10 = arith.constant 1 : index
    %c0_11 = arith.constant 0 : index
    %c0_12 = arith.constant 0 : index
    %11 = vector.load %arg2[%c1_10, %c0_11, %c0_12] : memref<5x15x64xbf16, #tpu.memory_space<vmem>>, vector<1x15x64xbf16>
    %12 = vector.shape_cast %11 : vector<1x15x64xbf16> to vector<15x64xbf16>
    %cst_13 = arith.constant dense<0.000000e+00> : vector<192x64xf32>
    %13 = tpu.matmul %10, %12, %cst_13 {dimension_numbers = #tpu.dot_dimension_numbers<[1], [0], [0], [1], [0, 0, 1, 1], [], []>} : vector<192x15xbf16>, vector<15x64xbf16>, vector<192x64xf32> -> vector<192x64xf32>
    %14 = arith.addf %7, %13 : vector<192x64xf32>
    %c0_14 = arith.constant 0 : index
    %c2 = arith.constant 2 : index
    %c0_15 = arith.constant 0 : index
    %c0_16 = arith.constant 0 : index
    %15 = vector.load %arg1[%c0_14, %c2, %c0_15, %c0_16] : memref<1x28x24x15xf32, #tpu.memory_space<vmem>>, vector<1x8x24x15xf32>
    %16 = vector.shape_cast %15 : vector<1x8x24x15xf32> to vector<192x15xf32>
    %17 = arith.truncf %16 : vector<192x15xf32> to vector<192x15xbf16>
    %c2_17 = arith.constant 2 : index
    %c0_18 = arith.constant 0 : index
    %c0_19 = arith.constant 0 : index
    %18 = vector.load %arg2[%c2_17, %c0_18, %c0_19] : memref<5x15x64xbf16, #tpu.memory_space<vmem>>, vector<1x15x64xbf16>
    %19 = vector.shape_cast %18 : vector<1x15x64xbf16> to vector<15x64xbf16>
    %cst_20 = arith.constant dense<0.000000e+00> : vector<192x64xf32>
    %20 = tpu.matmul %17, %19, %cst_20 {dimension_numbers = #tpu.dot_dimension_numbers<[1], [0], [0], [1], [0, 0, 1, 1], [], []>} : vector<192x15xbf16>, vector<15x64xbf16>, vector<192x64xf32> -> vector<192x64xf32>
    %21 = arith.addf %14, %20 : vector<192x64xf32>
    %c0_21 = arith.constant 0 : index
    %c3 = arith.constant 3 : index
    %c0_22 = arith.constant 0 : index
    %c0_23 = arith.constant 0 : index
    %22 = vector.load %arg1[%c0_21, %c3, %c0_22, %c0_23] : memref<1x28x24x15xf32, #tpu.memory_space<vmem>>, vector<1x8x24x15xf32>
    %23 = vector.shape_cast %22 : vector<1x8x24x15xf32> to vector<192x15xf32>
    %24 = arith.truncf %23 : vector<192x15xf32> to vector<192x15xbf16>
    %c3_24 = arith.constant 3 : index
    %c0_25 = arith.constant 0 : index
    %c0_26 = arith.constant 0 : index
    %25 = vector.load %arg2[%c3_24, %c0_25, %c0_26] : memref<5x15x64xbf16, #tpu.memory_space<vmem>>, vector<1x15x64xbf16>
    %26 = vector.shape_cast %25 : vector<1x15x64xbf16> to vector<15x64xbf16>
    %cst_27 = arith.constant dense<0.000000e+00> : vector<192x64xf32>
    %27 = tpu.matmul %24, %26, %cst_27 {dimension_numbers = #tpu.dot_dimension_numbers<[1], [0], [0], [1], [0, 0, 1, 1], [], []>} : vector<192x15xbf16>, vector<15x64xbf16>, vector<192x64xf32> -> vector<192x64xf32>
    %28 = arith.addf %21, %27 : vector<192x64xf32>
    %c0_28 = arith.constant 0 : index
    %c4 = arith.constant 4 : index
    %c0_29 = arith.constant 0 : index
    %c0_30 = arith.constant 0 : index
    %29 = vector.load %arg1[%c0_28, %c4, %c0_29, %c0_30] : memref<1x28x24x15xf32, #tpu.memory_space<vmem>>, vector<1x8x24x15xf32>
    %30 = vector.shape_cast %29 : vector<1x8x24x15xf32> to vector<192x15xf32>
    %31 = arith.truncf %30 : vector<192x15xf32> to vector<192x15xbf16>
    %c4_31 = arith.constant 4 : index
    %c0_32 = arith.constant 0 : index
    %c0_33 = arith.constant 0 : index
    %32 = vector.load %arg2[%c4_31, %c0_32, %c0_33] : memref<5x15x64xbf16, #tpu.memory_space<vmem>>, vector<1x15x64xbf16>
    %33 = vector.shape_cast %32 : vector<1x15x64xbf16> to vector<15x64xbf16>
    %cst_34 = arith.constant dense<0.000000e+00> : vector<192x64xf32>
    %34 = tpu.matmul %31, %33, %cst_34 {dimension_numbers = #tpu.dot_dimension_numbers<[1], [0], [0], [1], [0, 0, 1, 1], [], []>} : vector<192x15xbf16>, vector<15x64xbf16>, vector<192x64xf32> -> vector<192x64xf32>
    %35 = arith.addf %28, %34 : vector<192x64xf32>
    %c0_35 = arith.constant 0 : index
    %c0_36 = arith.constant 0 : index
    %36 = vector.load %arg3[%c0_35, %c0_36] : memref<1x64xf32, #tpu.memory_space<vmem>>, vector<1x64xf32>
    %37 = vector.broadcast %36 : vector<1x64xf32> to vector<192x64xf32>
    %38 = arith.mulf %35, %37 : vector<192x64xf32>
    %c0_37 = arith.constant 0 : index
    %c0_38 = arith.constant 0 : index
    %39 = vector.load %arg4[%c0_37, %c0_38] : memref<1x64xf32, #tpu.memory_space<vmem>>, vector<1x64xf32>
    %40 = vector.broadcast %39 : vector<1x64xf32> to vector<192x64xf32>
    %41 = arith.addf %38, %40 : vector<192x64xf32>
    %cst_39 = arith.constant 0.000000e+00 : f32
    %42 = vector.broadcast %cst_39 : f32 to vector<192x64xf32>
    %43 = arith.maximumf %41, %42 : vector<192x64xf32>
    %44 = vector.shape_cast %43 : vector<192x64xf32> to vector<1x8x24x64xf32>
    %c0_40 = arith.constant 0 : index
    %c0_41 = arith.constant 0 : index
    %c0_42 = arith.constant 0 : index
    %c0_43 = arith.constant 0 : index
    %45 = vector.load %arg12[%c0_40, %c0_41, %c0_42, %c0_43] : memref<1x24x24x64xf32, #tpu.memory_space<vmem>>, vector<1x8x24x64xf32>
    tpu.vector_store %arg12[%c0_40, %c0_41, %c0_42, %c0_43], %44 {strides = array<i32>} : memref<1x24x24x64xf32, #tpu.memory_space<vmem>>, vector<1x8x24x64xf32>,
    %cst_44 = arith.constant 0.000000e+00 : f32
    %46 = vector.broadcast %cst_44 : f32 to vector<192x64xf32>
    %c0_45 = arith.constant 0 : index
    %c8 = arith.constant 8 : index
    %c0_46 = arith.constant 0 : index
    %c0_47 = arith.constant 0 : index
    %47 = vector.load %arg1[%c0_45, %c8, %c0_46, %c0_47] : memref<1x28x24x15xf32, #tpu.memory_space<vmem>>, vector<1x8x24x15xf32>
    %48 = vector.shape_cast %47 : vector<1x8x24x15xf32> to vector<192x15xf32>
    %49 = arith.truncf %48 : vector<192x15xf32> to vector<192x15xbf16>
    %c0_48 = arith.constant 0 : index
    %c0_49 = arith.constant 0 : index
    %c0_50 = arith.constant 0 : index
    %50 = vector.load %arg2[%c0_48, %c0_49, %c0_50] : memref<5x15x64xbf16, #tpu.memory_space<vmem>>, vector<1x15x64xbf16>
    %51 = vector.shape_cast %50 : vector<1x15x64xbf16> to vector<15x64xbf16>
    %cst_51 = arith.constant dense<0.000000e+00> : vector<192x64xf32>
    %52 = tpu.matmul %49, %51, %cst_51 {dimension_numbers = #tpu.dot_dimension_numbers<[1], [0], [0], [1], [0, 0, 1, 1], [], []>} : vector<192x15xbf16>, vector<15x64xbf16>, vector<192x64xf32> -> vector<192x64xf32>
    %53 = arith.addf %46, %52 : vector<192x64xf32>
    %c0_52 = arith.constant 0 : index
    %c9 = arith.constant 9 : index
    %c0_53 = arith.constant 0 : index
    %c0_54 = arith.constant 0 : index
    %54 = vector.load %arg1[%c0_52, %c9, %c0_53, %c0_54] : memref<1x28x24x15xf32, #tpu.memory_space<vmem>>, vector<1x8x24x15xf32>
    %55 = vector.shape_cast %54 : vector<1x8x24x15xf32> to vector<192x15xf32>
    %56 = arith.truncf %55 : vector<192x15xf32> to vector<192x15xbf16>
    %c1_55 = arith.constant 1 : index
    %c0_56 = arith.constant 0 : index
    %c0_57 = arith.constant 0 : index
    %57 = vector.load %arg2[%c1_55, %c0_56, %c0_57] : memref<5x15x64xbf16, #tpu.memory_space<vmem>>, vector<1x15x64xbf16>
    %58 = vector.shape_cast %57 : vector<1x15x64xbf16> to vector<15x64xbf16>
    %cst_58 = arith.constant dense<0.000000e+00> : vector<192x64xf32>
    %59 = tpu.matmul %56, %58, %cst_58 {dimension_numbers = #tpu.dot_dimension_numbers<[1], [0], [0], [1], [0, 0, 1, 1], [], []>} : vector<192x15xbf16>, vector<15x64xbf16>, vector<192x64xf32> -> vector<192x64xf32>
    %60 = arith.addf %53, %59 : vector<192x64xf32>
    %c0_59 = arith.constant 0 : index
    %c10 = arith.constant 10 : index
    %c0_60 = arith.constant 0 : index
    %c0_61 = arith.constant 0 : index
    %61 = vector.load %arg1[%c0_59, %c10, %c0_60, %c0_61] : memref<1x28x24x15xf32, #tpu.memory_space<vmem>>, vector<1x8x24x15xf32>
    %62 = vector.shape_cast %61 : vector<1x8x24x15xf32> to vector<192x15xf32>
    %63 = arith.truncf %62 : vector<192x15xf32> to vector<192x15xbf16>
    %c2_62 = arith.constant 2 : index
    %c0_63 = arith.constant 0 : index
    %c0_64 = arith.constant 0 : index
    %64 = vector.load %arg2[%c2_62, %c0_63, %c0_64] : memref<5x15x64xbf16, #tpu.memory_space<vmem>>, vector<1x15x64xbf16>
    %65 = vector.shape_cast %64 : vector<1x15x64xbf16> to vector<15x64xbf16>
    %cst_65 = arith.constant dense<0.000000e+00> : vector<192x64xf32>
    %66 = tpu.matmul %63, %65, %cst_65 {dimension_numbers = #tpu.dot_dimension_numbers<[1], [0], [0], [1], [0, 0, 1, 1], [], []>} : vector<192x15xbf16>, vector<15x64xbf16>, vector<192x64xf32> -> vector<192x64xf32>
    %67 = arith.addf %60, %66 : vector<192x64xf32>
    %c0_66 = arith.constant 0 : index
    %c11 = arith.constant 11 : index
    %c0_67 = arith.constant 0 : index
    %c0_68 = arith.constant 0 : index
    %68 = vector.load %arg1[%c0_66, %c11, %c0_67, %c0_68] : memref<1x28x24x15xf32, #tpu.memory_space<vmem>>, vector<1x8x24x15xf32>
    %69 = vector.shape_cast %68 : vector<1x8x24x15xf32> to vector<192x15xf32>
    %70 = arith.truncf %69 : vector<192x15xf32> to vector<192x15xbf16>
    %c3_69 = arith.constant 3 : index
    %c0_70 = arith.constant 0 : index
    %c0_71 = arith.constant 0 : index
    %71 = vector.load %arg2[%c3_69, %c0_70, %c0_71] : memref<5x15x64xbf16, #tpu.memory_space<vmem>>, vector<1x15x64xbf16>
    %72 = vector.shape_cast %71 : vector<1x15x64xbf16> to vector<15x64xbf16>
    %cst_72 = arith.constant dense<0.000000e+00> : vector<192x64xf32>
    %73 = tpu.matmul %70, %72, %cst_72 {dimension_numbers = #tpu.dot_dimension_numbers<[1], [0], [0], [1], [0, 0, 1, 1], [], []>} : vector<192x15xbf16>, vector<15x64xbf16>, vector<192x64xf32> -> vector<192x64xf32>
    %74 = arith.addf %67, %73 : vector<192x64xf32>
    %c0_73 = arith.constant 0 : index
    %c12 = arith.constant 12 : index
    %c0_74 = arith.constant 0 : index
    %c0_75 = arith.constant 0 : index
    %75 = vector.load %arg1[%c0_73, %c12, %c0_74, %c0_75] : memref<1x28x24x15xf32, #tpu.memory_space<vmem>>, vector<1x8x24x15xf32>
    %76 = vector.shape_cast %75 : vector<1x8x24x15xf32> to vector<192x15xf32>
    %77 = arith.truncf %76 : vector<192x15xf32> to vector<192x15xbf16>
    %c4_76 = arith.constant 4 : index
    %c0_77 = arith.constant 0 : index
    %c0_78 = arith.constant 0 : index
    %78 = vector.load %arg2[%c4_76, %c0_77, %c0_78] : memref<5x15x64xbf16, #tpu.memory_space<vmem>>, vector<1x15x64xbf16>
    %79 = vector.shape_cast %78 : vector<1x15x64xbf16> to vector<15x64xbf16>
    %cst_79 = arith.constant dense<0.000000e+00> : vector<192x64xf32>
    %80 = tpu.matmul %77, %79, %cst_79 {dimension_numbers = #tpu.dot_dimension_numbers<[1], [0], [0], [1], [0, 0, 1, 1], [], []>} : vector<192x15xbf16>, vector<15x64xbf16>, vector<192x64xf32> -> vector<192x64xf32>
    %81 = arith.addf %74, %80 : vector<192x64xf32>
    %c0_80 = arith.constant 0 : index
    %c0_81 = arith.constant 0 : index
    %82 = vector.load %arg3[%c0_80, %c0_81] : memref<1x64xf32, #tpu.memory_space<vmem>>, vector<1x64xf32>
    %83 = vector.broadcast %82 : vector<1x64xf32> to vector<192x64xf32>
    %84 = arith.mulf %81, %83 : vector<192x64xf32>
    %c0_82 = arith.constant 0 : index
    %c0_83 = arith.constant 0 : index
    %85 = vector.load %arg4[%c0_82, %c0_83] : memref<1x64xf32, #tpu.memory_space<vmem>>, vector<1x64xf32>
    %86 = vector.broadcast %85 : vector<1x64xf32> to vector<192x64xf32>
    %87 = arith.addf %84, %86 : vector<192x64xf32>
    %cst_84 = arith.constant 0.000000e+00 : f32
    %88 = vector.broadcast %cst_84 : f32 to vector<192x64xf32>
    %89 = arith.maximumf %87, %88 : vector<192x64xf32>
    %90 = vector.shape_cast %89 : vector<192x64xf32> to vector<1x8x24x64xf32>
    %c0_85 = arith.constant 0 : index
    %c8_86 = arith.constant 8 : index
    %c0_87 = arith.constant 0 : index
    %c0_88 = arith.constant 0 : index
    %91 = vector.load %arg12[%c0_85, %c8_86, %c0_87, %c0_88] : memref<1x24x24x64xf32, #tpu.memory_space<vmem>>, vector<1x8x24x64xf32>
    tpu.vector_store %arg12[%c0_85, %c8_86, %c0_87, %c0_88], %90 {strides = array<i32>} : memref<1x24x24x64xf32, #tpu.memory_space<vmem>>, vector<1x8x24x64xf32>,
    %cst_89 = arith.constant 0.000000e+00 : f32
    %92 = vector.broadcast %cst_89 : f32 to vector<192x64xf32>
    %c0_90 = arith.constant 0 : index
    %c16 = arith.constant 16 : index
    %c0_91 = arith.constant 0 : index
    %c0_92 = arith.constant 0 : index
    %93 = vector.load %arg1[%c0_90, %c16, %c0_91, %c0_92] : memref<1x28x24x15xf32, #tpu.memory_space<vmem>>, vector<1x8x24x15xf32>
    %94 = vector.shape_cast %93 : vector<1x8x24x15xf32> to vector<192x15xf32>
    %95 = arith.truncf %94 : vector<192x15xf32> to vector<192x15xbf16>
    %c0_93 = arith.constant 0 : index
    %c0_94 = arith.constant 0 : index
    %c0_95 = arith.constant 0 : index
    %96 = vector.load %arg2[%c0_93, %c0_94, %c0_95] : memref<5x15x64xbf16, #tpu.memory_space<vmem>>, vector<1x15x64xbf16>
    %97 = vector.shape_cast %96 : vector<1x15x64xbf16> to vector<15x64xbf16>
    %cst_96 = arith.constant dense<0.000000e+00> : vector<192x64xf32>
    %98 = tpu.matmul %95, %97, %cst_96 {dimension_numbers = #tpu.dot_dimension_numbers<[1], [0], [0], [1], [0, 0, 1, 1], [], []>} : vector<192x15xbf16>, vector<15x64xbf16>, vector<192x64xf32> -> vector<192x64xf32>
    %99 = arith.addf %92, %98 : vector<192x64xf32>
    %c0_97 = arith.constant 0 : index
    %c17 = arith.constant 17 : index
    %c0_98 = arith.constant 0 : index
    %c0_99 = arith.constant 0 : index
    %100 = vector.load %arg1[%c0_97, %c17, %c0_98, %c0_99] : memref<1x28x24x15xf32, #tpu.memory_space<vmem>>, vector<1x8x24x15xf32>
    %101 = vector.shape_cast %100 : vector<1x8x24x15xf32> to vector<192x15xf32>
    %102 = arith.truncf %101 : vector<192x15xf32> to vector<192x15xbf16>
    %c1_100 = arith.constant 1 : index
    %c0_101 = arith.constant 0 : index
    %c0_102 = arith.constant 0 : index
    %103 = vector.load %arg2[%c1_100, %c0_101, %c0_102] : memref<5x15x64xbf16, #tpu.memory_space<vmem>>, vector<1x15x64xbf16>
    %104 = vector.shape_cast %103 : vector<1x15x64xbf16> to vector<15x64xbf16>
    %cst_103 = arith.constant dense<0.000000e+00> : vector<192x64xf32>
    %105 = tpu.matmul %102, %104, %cst_103 {dimension_numbers = #tpu.dot_dimension_numbers<[1], [0], [0], [1], [0, 0, 1, 1], [], []>} : vector<192x15xbf16>, vector<15x64xbf16>, vector<192x64xf32> -> vector<192x64xf32>
    %106 = arith.addf %99, %105 : vector<192x64xf32>
    %c0_104 = arith.constant 0 : index
    %c18 = arith.constant 18 : index
    %c0_105 = arith.constant 0 : index
    %c0_106 = arith.constant 0 : index
    %107 = vector.load %arg1[%c0_104, %c18, %c0_105, %c0_106] : memref<1x28x24x15xf32, #tpu.memory_space<vmem>>, vector<1x8x24x15xf32>
    %108 = vector.shape_cast %107 : vector<1x8x24x15xf32> to vector<192x15xf32>
    %109 = arith.truncf %108 : vector<192x15xf32> to vector<192x15xbf16>
    %c2_107 = arith.constant 2 : index
    %c0_108 = arith.constant 0 : index
    %c0_109 = arith.constant 0 : index
    %110 = vector.load %arg2[%c2_107, %c0_108, %c0_109] : memref<5x15x64xbf16, #tpu.memory_space<vmem>>, vector<1x15x64xbf16>
    %111 = vector.shape_cast %110 : vector<1x15x64xbf16> to vector<15x64xbf16>
    %cst_110 = arith.constant dense<0.000000e+00> : vector<192x64xf32>
    %112 = tpu.matmul %109, %111, %cst_110 {dimension_numbers = #tpu.dot_dimension_numbers<[1], [0], [0], [1], [0, 0, 1, 1], [], []>} : vector<192x15xbf16>, vector<15x64xbf16>, vector<192x64xf32> -> vector<192x64xf32>
    %113 = arith.addf %106, %112 : vector<192x64xf32>
    %c0_111 = arith.constant 0 : index
    %c19 = arith.constant 19 : index
    %c0_112 = arith.constant 0 : index
    %c0_113 = arith.constant 0 : index
    %114 = vector.load %arg1[%c0_111, %c19, %c0_112, %c0_113] : memref<1x28x24x15xf32, #tpu.memory_space<vmem>>, vector<1x8x24x15xf32>
    %115 = vector.shape_cast %114 : vector<1x8x24x15xf32> to vector<192x15xf32>
    %116 = arith.truncf %115 : vector<192x15xf32> to vector<192x15xbf16>
    %c3_114 = arith.constant 3 : index
    %c0_115 = arith.constant 0 : index
    %c0_116 = arith.constant 0 : index
    %117 = vector.load %arg2[%c3_114, %c0_115, %c0_116] : memref<5x15x64xbf16, #tpu.memory_space<vmem>>, vector<1x15x64xbf16>
    %118 = vector.shape_cast %117 : vector<1x15x64xbf16> to vector<15x64xbf16>
    %cst_117 = arith.constant dense<0.000000e+00> : vector<192x64xf32>
    %119 = tpu.matmul %116, %118, %cst_117 {dimension_numbers = #tpu.dot_dimension_numbers<[1], [0], [0], [1], [0, 0, 1, 1], [], []>} : vector<192x15xbf16>, vector<15x64xbf16>, vector<192x64xf32> -> vector<192x64xf32>
    %120 = arith.addf %113, %119 : vector<192x64xf32>
    %c0_118 = arith.constant 0 : index
    %c20 = arith.constant 20 : index
    %c0_119 = arith.constant 0 : index
    %c0_120 = arith.constant 0 : index
    %121 = vector.load %arg1[%c0_118, %c20, %c0_119, %c0_120] : memref<1x28x24x15xf32, #tpu.memory_space<vmem>>, vector<1x8x24x15xf32>
    %122 = vector.shape_cast %121 : vector<1x8x24x15xf32> to vector<192x15xf32>
    %123 = arith.truncf %122 : vector<192x15xf32> to vector<192x15xbf16>
    %c4_121 = arith.constant 4 : index
    %c0_122 = arith.constant 0 : index
    %c0_123 = arith.constant 0 : index
    %124 = vector.load %arg2[%c4_121, %c0_122, %c0_123] : memref<5x15x64xbf16, #tpu.memory_space<vmem>>, vector<1x15x64xbf16>
    %125 = vector.shape_cast %124 : vector<1x15x64xbf16> to vector<15x64xbf16>
    %cst_124 = arith.constant dense<0.000000e+00> : vector<192x64xf32>
    %126 = tpu.matmul %123, %125, %cst_124 {dimension_numbers = #tpu.dot_dimension_numbers<[1], [0], [0], [1], [0, 0, 1, 1], [], []>} : vector<192x15xbf16>, vector<15x64xbf16>, vector<192x64xf32> -> vector<192x64xf32>
    %127 = arith.addf %120, %126 : vector<192x64xf32>
    %c0_125 = arith.constant 0 : index
    %c0_126 = arith.constant 0 : index
    %128 = vector.load %arg3[%c0_125, %c0_126] : memref<1x64xf32, #tpu.memory_space<vmem>>, vector<1x64xf32>
    %129 = vector.broadcast %128 : vector<1x64xf32> to vector<192x64xf32>
    %130 = arith.mulf %127, %129 : vector<192x64xf32>
    %c0_127 = arith.constant 0 : index
    %c0_128 = arith.constant 0 : index
    %131 = vector.load %arg4[%c0_127, %c0_128] : memref<1x64xf32, #tpu.memory_space<vmem>>, vector<1x64xf32>
    %132 = vector.broadcast %131 : vector<1x64xf32> to vector<192x64xf32>
    %133 = arith.addf %130, %132 : vector<192x64xf32>
    %cst_129 = arith.constant 0.000000e+00 : f32
    %134 = vector.broadcast %cst_129 : f32 to vector<192x64xf32>
    %135 = arith.maximumf %133, %134 : vector<192x64xf32>
    %136 = vector.shape_cast %135 : vector<192x64xf32> to vector<1x8x24x64xf32>
    %c0_130 = arith.constant 0 : index
    %c16_131 = arith.constant 16 : index
    %c0_132 = arith.constant 0 : index
    %c0_133 = arith.constant 0 : index
    %137 = vector.load %arg12[%c0_130, %c16_131, %c0_132, %c0_133] : memref<1x24x24x64xf32, #tpu.memory_space<vmem>>, vector<1x8x24x64xf32>
    tpu.vector_store %arg12[%c0_130, %c16_131, %c0_132, %c0_133], %136 {strides = array<i32>} : memref<1x24x24x64xf32, #tpu.memory_space<vmem>>, vector<1x8x24x64xf32>,
    %c0_134 = arith.constant 0 : index
    %c0_135 = arith.constant 0 : index
    %c0_136 = arith.constant 0 : index
    %c0_137 = arith.constant 0 : index
    %138 = vector.load %arg12[%c0_134, %c0_135, %c0_136, %c0_137] : memref<1x24x24x64xf32, #tpu.memory_space<vmem>>, vector<1x1x24x64xf32>
    %139 = vector.shape_cast %138 : vector<1x1x24x64xf32> to vector<1x24x64xf32>
    %c0_138 = arith.constant 0 : index
    %c1_139 = arith.constant 1 : index
    %c0_140 = arith.constant 0 : index
    %c0_141 = arith.constant 0 : index
    %140 = vector.load %arg12[%c0_138, %c1_139, %c0_140, %c0_141] : memref<1x24x24x64xf32, #tpu.memory_space<vmem>>, vector<1x1x24x64xf32>
    %141 = vector.shape_cast %140 : vector<1x1x24x64xf32> to vector<1x24x64xf32>
    %142 = arith.maximumf %139, %141 : vector<1x24x64xf32>
    %c0_142 = arith.constant 0 : index
    %c2_143 = arith.constant 2 : index
    %c0_144 = arith.constant 0 : index
    %c0_145 = arith.constant 0 : index
    %143 = vector.load %arg12[%c0_142, %c2_143, %c0_144, %c0_145] : memref<1x24x24x64xf32, #tpu.memory_space<vmem>>, vector<1x1x24x64xf32>
    %144 = vector.shape_cast %143 : vector<1x1x24x64xf32> to vector<1x24x64xf32>
    %145 = arith.maximumf %142, %144 : vector<1x24x64xf32>
    %c0_146 = arith.constant 0 : index
    %c0_147 = arith.constant 0 : index
    %c0_148 = arith.constant 0 : index
    %c0_149 = arith.constant 0 : index
    %146 = vector.load %arg13[%c0_146, %c0_147, %c0_148, %c0_149] : memref<1x11x24x64xf32, #tpu.memory_space<vmem>>, vector<1x1x24x64xf32>
    %147 = vector.shape_cast %146 : vector<1x1x24x64xf32> to vector<1x24x64xf32>
    %148 = vector.shape_cast %145 : vector<1x24x64xf32> to vector<1x1x24x64xf32>
    tpu.vector_store %arg13[%c0_146, %c0_147, %c0_148, %c0_149], %148 {strides = array<i32>} : memref<1x11x24x64xf32, #tpu.memory_space<vmem>>, vector<1x1x24x64xf32>,
    %c0_150 = arith.constant 0 : index
    %c2_151 = arith.constant 2 : index
    %c0_152 = arith.constant 0 : index
    %c0_153 = arith.constant 0 : index
    %149 = vector.load %arg12[%c0_150, %c2_151, %c0_152, %c0_153] : memref<1x24x24x64xf32, #tpu.memory_space<vmem>>, vector<1x1x24x64xf32>
    %150 = vector.shape_cast %149 : vector<1x1x24x64xf32> to vector<1x24x64xf32>
    %c0_154 = arith.constant 0 : index
    %c3_155 = arith.constant 3 : index
    %c0_156 = arith.constant 0 : index
    %c0_157 = arith.constant 0 : index
    %151 = vector.load %arg12[%c0_154, %c3_155, %c0_156, %c0_157] : memref<1x24x24x64xf32, #tpu.memory_space<vmem>>, vector<1x1x24x64xf32>
    %152 = vector.shape_cast %151 : vector<1x1x24x64xf32> to vector<1x24x64xf32>
    %153 = arith.maximumf %150, %152 : vector<1x24x64xf32>
    %c0_158 = arith.constant 0 : index
    %c4_159 = arith.constant 4 : index
    %c0_160 = arith.constant 0 : index
    %c0_161 = arith.constant 0 : index
    %154 = vector.load %arg12[%c0_158, %c4_159, %c0_160, %c0_161] : memref<1x24x24x64xf32, #tpu.memory_space<vmem>>, vector<1x1x24x64xf32>
    %155 = vector.shape_cast %154 : vector<1x1x24x64xf32> to vector<1x24x64xf32>
    %156 = arith.maximumf %153, %155 : vector<1x24x64xf32>
    %c0_162 = arith.constant 0 : index
    %c1_163 = arith.constant 1 : index
    %c0_164 = arith.constant 0 : index
    %c0_165 = arith.constant 0 : index
    %157 = vector.load %arg13[%c0_162, %c1_163, %c0_164, %c0_165] : memref<1x11x24x64xf32, #tpu.memory_space<vmem>>, vector<1x1x24x64xf32>
    %158 = vector.shape_cast %157 : vector<1x1x24x64xf32> to vector<1x24x64xf32>
    %159 = vector.shape_cast %156 : vector<1x24x64xf32> to vector<1x1x24x64xf32>
    tpu.vector_store %arg13[%c0_162, %c1_163, %c0_164, %c0_165], %159 {strides = array<i32>} : memref<1x11x24x64xf32, #tpu.memory_space<vmem>>, vector<1x1x24x64xf32>,
    %c0_166 = arith.constant 0 : index
    %c4_167 = arith.constant 4 : index
    %c0_168 = arith.constant 0 : index
    %c0_169 = arith.constant 0 : index
    %160 = vector.load %arg12[%c0_166, %c4_167, %c0_168, %c0_169] : memref<1x24x24x64xf32, #tpu.memory_space<vmem>>, vector<1x1x24x64xf32>
    %161 = vector.shape_cast %160 : vector<1x1x24x64xf32> to vector<1x24x64xf32>
    %c0_170 = arith.constant 0 : index
    %c5 = arith.constant 5 : index
    %c0_171 = arith.constant 0 : index
    %c0_172 = arith.constant 0 : index
    %162 = vector.load %arg12[%c0_170, %c5, %c0_171, %c0_172] : memref<1x24x24x64xf32, #tpu.memory_space<vmem>>, vector<1x1x24x64xf32>
    %163 = vector.shape_cast %162 : vector<1x1x24x64xf32> to vector<1x24x64xf32>
    %164 = arith.maximumf %161, %163 : vector<1x24x64xf32>
    %c0_173 = arith.constant 0 : index
    %c6 = arith.constant 6 : index
    %c0_174 = arith.constant 0 : index
    %c0_175 = arith.constant 0 : index
    %165 = vector.load %arg12[%c0_173, %c6, %c0_174, %c0_175] : memref<1x24x24x64xf32, #tpu.memory_space<vmem>>, vector<1x1x24x64xf32>
    %166 = vector.shape_cast %165 : vector<1x1x24x64xf32> to vector<1x24x64xf32>
    %167 = arith.maximumf %164, %166 : vector<1x24x64xf32>
    %c0_176 = arith.constant 0 : index
    %c2_177 = arith.constant 2 : index
    %c0_178 = arith.constant 0 : index
    %c0_179 = arith.constant 0 : index
    %168 = vector.load %arg13[%c0_176, %c2_177, %c0_178, %c0_179] : memref<1x11x24x64xf32, #tpu.memory_space<vmem>>, vector<1x1x24x64xf32>
    %169 = vector.shape_cast %168 : vector<1x1x24x64xf32> to vector<1x24x64xf32>
    %170 = vector.shape_cast %167 : vector<1x24x64xf32> to vector<1x1x24x64xf32>
    tpu.vector_store %arg13[%c0_176, %c2_177, %c0_178, %c0_179], %170 {strides = array<i32>} : memref<1x11x24x64xf32, #tpu.memory_space<vmem>>, vector<1x1x24x64xf32>,
    %c0_180 = arith.constant 0 : index
    %c6_181 = arith.constant 6 : index
    %c0_182 = arith.constant 0 : index
    %c0_183 = arith.constant 0 : index
    %171 = vector.load %arg12[%c0_180, %c6_181, %c0_182, %c0_183] : memref<1x24x24x64xf32, #tpu.memory_space<vmem>>, vector<1x1x24x64xf32>
    %172 = vector.shape_cast %171 : vector<1x1x24x64xf32> to vector<1x24x64xf32>
    %c0_184 = arith.constant 0 : index
    %c7 = arith.constant 7 : index
    %c0_185 = arith.constant 0 : index
    %c0_186 = arith.constant 0 : index
    %173 = vector.load %arg12[%c0_184, %c7, %c0_185, %c0_186] : memref<1x24x24x64xf32, #tpu.memory_space<vmem>>, vector<1x1x24x64xf32>
    %174 = vector.shape_cast %173 : vector<1x1x24x64xf32> to vector<1x24x64xf32>
    %175 = arith.maximumf %172, %174 : vector<1x24x64xf32>
    %c0_187 = arith.constant 0 : index
    %c8_188 = arith.constant 8 : index
    %c0_189 = arith.constant 0 : index
    %c0_190 = arith.constant 0 : index
    %176 = vector.load %arg12[%c0_187, %c8_188, %c0_189, %c0_190] : memref<1x24x24x64xf32, #tpu.memory_space<vmem>>, vector<1x1x24x64xf32>
    %177 = vector.shape_cast %176 : vector<1x1x24x64xf32> to vector<1x24x64xf32>
    %178 = arith.maximumf %175, %177 : vector<1x24x64xf32>
    %c0_191 = arith.constant 0 : index
    %c3_192 = arith.constant 3 : index
    %c0_193 = arith.constant 0 : index
    %c0_194 = arith.constant 0 : index
    %179 = vector.load %arg13[%c0_191, %c3_192, %c0_193, %c0_194] : memref<1x11x24x64xf32, #tpu.memory_space<vmem>>, vector<1x1x24x64xf32>
    %180 = vector.shape_cast %179 : vector<1x1x24x64xf32> to vector<1x24x64xf32>
    %181 = vector.shape_cast %178 : vector<1x24x64xf32> to vector<1x1x24x64xf32>
    tpu.vector_store %arg13[%c0_191, %c3_192, %c0_193, %c0_194], %181 {strides = array<i32>} : memref<1x11x24x64xf32, #tpu.memory_space<vmem>>, vector<1x1x24x64xf32>,
    %c0_195 = arith.constant 0 : index
    %c8_196 = arith.constant 8 : index
    %c0_197 = arith.constant 0 : index
    %c0_198 = arith.constant 0 : index
    %182 = vector.load %arg12[%c0_195, %c8_196, %c0_197, %c0_198] : memref<1x24x24x64xf32, #tpu.memory_space<vmem>>, vector<1x1x24x64xf32>
    %183 = vector.shape_cast %182 : vector<1x1x24x64xf32> to vector<1x24x64xf32>
    %c0_199 = arith.constant 0 : index
    %c9_200 = arith.constant 9 : index
    %c0_201 = arith.constant 0 : index
    %c0_202 = arith.constant 0 : index
    %184 = vector.load %arg12[%c0_199, %c9_200, %c0_201, %c0_202] : memref<1x24x24x64xf32, #tpu.memory_space<vmem>>, vector<1x1x24x64xf32>
    %185 = vector.shape_cast %184 : vector<1x1x24x64xf32> to vector<1x24x64xf32>
    %186 = arith.maximumf %183, %185 : vector<1x24x64xf32>
    %c0_203 = arith.constant 0 : index
    %c10_204 = arith.constant 10 : index
    %c0_205 = arith.constant 0 : index
    %c0_206 = arith.constant 0 : index
    %187 = vector.load %arg12[%c0_203, %c10_204, %c0_205, %c0_206] : memref<1x24x24x64xf32, #tpu.memory_space<vmem>>, vector<1x1x24x64xf32>
    %188 = vector.shape_cast %187 : vector<1x1x24x64xf32> to vector<1x24x64xf32>
    %189 = arith.maximumf %186, %188 : vector<1x24x64xf32>
    %c0_207 = arith.constant 0 : index
    %c4_208 = arith.constant 4 : index
    %c0_209 = arith.constant 0 : index
    %c0_210 = arith.constant 0 : index
    %190 = vector.load %arg13[%c0_207, %c4_208, %c0_209, %c0_210] : memref<1x11x24x64xf32, #tpu.memory_space<vmem>>, vector<1x1x24x64xf32>
    %191 = vector.shape_cast %190 : vector<1x1x24x64xf32> to vector<1x24x64xf32>
    %192 = vector.shape_cast %189 : vector<1x24x64xf32> to vector<1x1x24x64xf32>
    tpu.vector_store %arg13[%c0_207, %c4_208, %c0_209, %c0_210], %192 {strides = array<i32>} : memref<1x11x24x64xf32, #tpu.memory_space<vmem>>, vector<1x1x24x64xf32>,
    %c0_211 = arith.constant 0 : index
    %c10_212 = arith.constant 10 : index
    %c0_213 = arith.constant 0 : index
    %c0_214 = arith.constant 0 : index
    %193 = vector.load %arg12[%c0_211, %c10_212, %c0_213, %c0_214] : memref<1x24x24x64xf32, #tpu.memory_space<vmem>>, vector<1x1x24x64xf32>
    %194 = vector.shape_cast %193 : vector<1x1x24x64xf32> to vector<1x24x64xf32>
    %c0_215 = arith.constant 0 : index
    %c11_216 = arith.constant 11 : index
    %c0_217 = arith.constant 0 : index
    %c0_218 = arith.constant 0 : index
    %195 = vector.load %arg12[%c0_215, %c11_216, %c0_217, %c0_218] : memref<1x24x24x64xf32, #tpu.memory_space<vmem>>, vector<1x1x24x64xf32>
    %196 = vector.shape_cast %195 : vector<1x1x24x64xf32> to vector<1x24x64xf32>
    %197 = arith.maximumf %194, %196 : vector<1x24x64xf32>
    %c0_219 = arith.constant 0 : index
    %c12_220 = arith.constant 12 : index
    %c0_221 = arith.constant 0 : index
    %c0_222 = arith.constant 0 : index
    %198 = vector.load %arg12[%c0_219, %c12_220, %c0_221, %c0_222] : memref<1x24x24x64xf32, #tpu.memory_space<vmem>>, vector<1x1x24x64xf32>
    %199 = vector.shape_cast %198 : vector<1x1x24x64xf32> to vector<1x24x64xf32>
    %200 = arith.maximumf %197, %199 : vector<1x24x64xf32>
    %c0_223 = arith.constant 0 : index
    %c5_224 = arith.constant 5 : index
    %c0_225 = arith.constant 0 : index
    %c0_226 = arith.constant 0 : index
    %201 = vector.load %arg13[%c0_223, %c5_224, %c0_225, %c0_226] : memref<1x11x24x64xf32, #tpu.memory_space<vmem>>, vector<1x1x24x64xf32>
    %202 = vector.shape_cast %201 : vector<1x1x24x64xf32> to vector<1x24x64xf32>
    %203 = vector.shape_cast %200 : vector<1x24x64xf32> to vector<1x1x24x64xf32>
    tpu.vector_store %arg13[%c0_223, %c5_224, %c0_225, %c0_226], %203 {strides = array<i32>} : memref<1x11x24x64xf32, #tpu.memory_space<vmem>>, vector<1x1x24x64xf32>,
    %c0_227 = arith.constant 0 : index
    %c12_228 = arith.constant 12 : index
    %c0_229 = arith.constant 0 : index
    %c0_230 = arith.constant 0 : index
    %204 = vector.load %arg12[%c0_227, %c12_228, %c0_229, %c0_230] : memref<1x24x24x64xf32, #tpu.memory_space<vmem>>, vector<1x1x24x64xf32>
    %205 = vector.shape_cast %204 : vector<1x1x24x64xf32> to vector<1x24x64xf32>
    %c0_231 = arith.constant 0 : index
    %c13 = arith.constant 13 : index
    %c0_232 = arith.constant 0 : index
    %c0_233 = arith.constant 0 : index
    %206 = vector.load %arg12[%c0_231, %c13, %c0_232, %c0_233] : memref<1x24x24x64xf32, #tpu.memory_space<vmem>>, vector<1x1x24x64xf32>
    %207 = vector.shape_cast %206 : vector<1x1x24x64xf32> to vector<1x24x64xf32>
    %208 = arith.maximumf %205, %207 : vector<1x24x64xf32>
    %c0_234 = arith.constant 0 : index
    %c14 = arith.constant 14 : index
    %c0_235 = arith.constant 0 : index
    %c0_236 = arith.constant 0 : index
    %209 = vector.load %arg12[%c0_234, %c14, %c0_235, %c0_236] : memref<1x24x24x64xf32, #tpu.memory_space<vmem>>, vector<1x1x24x64xf32>
    %210 = vector.shape_cast %209 : vector<1x1x24x64xf32> to vector<1x24x64xf32>
    %211 = arith.maximumf %208, %210 : vector<1x24x64xf32>
    %c0_237 = arith.constant 0 : index
    %c6_238 = arith.constant 6 : index
    %c0_239 = arith.constant 0 : index
    %c0_240 = arith.constant 0 : index
    %212 = vector.load %arg13[%c0_237, %c6_238, %c0_239, %c0_240] : memref<1x11x24x64xf32, #tpu.memory_space<vmem>>, vector<1x1x24x64xf32>
    %213 = vector.shape_cast %212 : vector<1x1x24x64xf32> to vector<1x24x64xf32>
    %214 = vector.shape_cast %211 : vector<1x24x64xf32> to vector<1x1x24x64xf32>
    tpu.vector_store %arg13[%c0_237, %c6_238, %c0_239, %c0_240], %214 {strides = array<i32>} : memref<1x11x24x64xf32, #tpu.memory_space<vmem>>, vector<1x1x24x64xf32>,
    %c0_241 = arith.constant 0 : index
    %c14_242 = arith.constant 14 : index
    %c0_243 = arith.constant 0 : index
    %c0_244 = arith.constant 0 : index
    %215 = vector.load %arg12[%c0_241, %c14_242, %c0_243, %c0_244] : memref<1x24x24x64xf32, #tpu.memory_space<vmem>>, vector<1x1x24x64xf32>
    %216 = vector.shape_cast %215 : vector<1x1x24x64xf32> to vector<1x24x64xf32>
    %c0_245 = arith.constant 0 : index
    %c15 = arith.constant 15 : index
    %c0_246 = arith.constant 0 : index
    %c0_247 = arith.constant 0 : index
    %217 = vector.load %arg12[%c0_245, %c15, %c0_246, %c0_247] : memref<1x24x24x64xf32, #tpu.memory_space<vmem>>, vector<1x1x24x64xf32>
    %218 = vector.shape_cast %217 : vector<1x1x24x64xf32> to vector<1x24x64xf32>
    %219 = arith.maximumf %216, %218 : vector<1x24x64xf32>
    %c0_248 = arith.constant 0 : index
    %c16_249 = arith.constant 16 : index
    %c0_250 = arith.constant 0 : index
    %c0_251 = arith.constant 0 : index
    %220 = vector.load %arg12[%c0_248, %c16_249, %c0_250, %c0_251] : memref<1x24x24x64xf32, #tpu.memory_space<vmem>>, vector<1x1x24x64xf32>
    %221 = vector.shape_cast %220 : vector<1x1x24x64xf32> to vector<1x24x64xf32>
    %222 = arith.maximumf %219, %221 : vector<1x24x64xf32>
    %c0_252 = arith.constant 0 : index
    %c7_253 = arith.constant 7 : index
    %c0_254 = arith.constant 0 : index
    %c0_255 = arith.constant 0 : index
    %223 = vector.load %arg13[%c0_252, %c7_253, %c0_254, %c0_255] : memref<1x11x24x64xf32, #tpu.memory_space<vmem>>, vector<1x1x24x64xf32>
    %224 = vector.shape_cast %223 : vector<1x1x24x64xf32> to vector<1x24x64xf32>
    %225 = vector.shape_cast %222 : vector<1x24x64xf32> to vector<1x1x24x64xf32>
    tpu.vector_store %arg13[%c0_252, %c7_253, %c0_254, %c0_255], %225 {strides = array<i32>} : memref<1x11x24x64xf32, #tpu.memory_space<vmem>>, vector<1x1x24x64xf32>,
    %c0_256 = arith.constant 0 : index
    %c16_257 = arith.constant 16 : index
    %c0_258 = arith.constant 0 : index
    %c0_259 = arith.constant 0 : index
    %226 = vector.load %arg12[%c0_256, %c16_257, %c0_258, %c0_259] : memref<1x24x24x64xf32, #tpu.memory_space<vmem>>, vector<1x1x24x64xf32>
    %227 = vector.shape_cast %226 : vector<1x1x24x64xf32> to vector<1x24x64xf32>
    %c0_260 = arith.constant 0 : index
    %c17_261 = arith.constant 17 : index
    %c0_262 = arith.constant 0 : index
    %c0_263 = arith.constant 0 : index
    %228 = vector.load %arg12[%c0_260, %c17_261, %c0_262, %c0_263] : memref<1x24x24x64xf32, #tpu.memory_space<vmem>>, vector<1x1x24x64xf32>
    %229 = vector.shape_cast %228 : vector<1x1x24x64xf32> to vector<1x24x64xf32>
    %230 = arith.maximumf %227, %229 : vector<1x24x64xf32>
    %c0_264 = arith.constant 0 : index
    %c18_265 = arith.constant 18 : index
    %c0_266 = arith.constant 0 : index
    %c0_267 = arith.constant 0 : index
    %231 = vector.load %arg12[%c0_264, %c18_265, %c0_266, %c0_267] : memref<1x24x24x64xf32, #tpu.memory_space<vmem>>, vector<1x1x24x64xf32>
    %232 = vector.shape_cast %231 : vector<1x1x24x64xf32> to vector<1x24x64xf32>
    %233 = arith.maximumf %230, %232 : vector<1x24x64xf32>
    %c0_268 = arith.constant 0 : index
    %c8_269 = arith.constant 8 : index
    %c0_270 = arith.constant 0 : index
    %c0_271 = arith.constant 0 : index
    %234 = vector.load %arg13[%c0_268, %c8_269, %c0_270, %c0_271] : memref<1x11x24x64xf32, #tpu.memory_space<vmem>>, vector<1x1x24x64xf32>
    %235 = vector.shape_cast %234 : vector<1x1x24x64xf32> to vector<1x24x64xf32>
    %236 = vector.shape_cast %233 : vector<1x24x64xf32> to vector<1x1x24x64xf32>
    tpu.vector_store %arg13[%c0_268, %c8_269, %c0_270, %c0_271], %236 {strides = array<i32>} : memref<1x11x24x64xf32, #tpu.memory_space<vmem>>, vector<1x1x24x64xf32>,
    %c0_272 = arith.constant 0 : index
    %c18_273 = arith.constant 18 : index
    %c0_274 = arith.constant 0 : index
    %c0_275 = arith.constant 0 : index
    %237 = vector.load %arg12[%c0_272, %c18_273, %c0_274, %c0_275] : memref<1x24x24x64xf32, #tpu.memory_space<vmem>>, vector<1x1x24x64xf32>
    %238 = vector.shape_cast %237 : vector<1x1x24x64xf32> to vector<1x24x64xf32>
    %c0_276 = arith.constant 0 : index
    %c19_277 = arith.constant 19 : index
    %c0_278 = arith.constant 0 : index
    %c0_279 = arith.constant 0 : index
    %239 = vector.load %arg12[%c0_276, %c19_277, %c0_278, %c0_279] : memref<1x24x24x64xf32, #tpu.memory_space<vmem>>, vector<1x1x24x64xf32>
    %240 = vector.shape_cast %239 : vector<1x1x24x64xf32> to vector<1x24x64xf32>
    %241 = arith.maximumf %238, %240 : vector<1x24x64xf32>
    %c0_280 = arith.constant 0 : index
    %c20_281 = arith.constant 20 : index
    %c0_282 = arith.constant 0 : index
    %c0_283 = arith.constant 0 : index
    %242 = vector.load %arg12[%c0_280, %c20_281, %c0_282, %c0_283] : memref<1x24x24x64xf32, #tpu.memory_space<vmem>>, vector<1x1x24x64xf32>
    %243 = vector.shape_cast %242 : vector<1x1x24x64xf32> to vector<1x24x64xf32>
    %244 = arith.maximumf %241, %243 : vector<1x24x64xf32>
    %c0_284 = arith.constant 0 : index
    %c9_285 = arith.constant 9 : index
    %c0_286 = arith.constant 0 : index
    %c0_287 = arith.constant 0 : index
    %245 = vector.load %arg13[%c0_284, %c9_285, %c0_286, %c0_287] : memref<1x11x24x64xf32, #tpu.memory_space<vmem>>, vector<1x1x24x64xf32>
    %246 = vector.shape_cast %245 : vector<1x1x24x64xf32> to vector<1x24x64xf32>
    %247 = vector.shape_cast %244 : vector<1x24x64xf32> to vector<1x1x24x64xf32>
    tpu.vector_store %arg13[%c0_284, %c9_285, %c0_286, %c0_287], %247 {strides = array<i32>} : memref<1x11x24x64xf32, #tpu.memory_space<vmem>>, vector<1x1x24x64xf32>,
    %c0_288 = arith.constant 0 : index
    %c20_289 = arith.constant 20 : index
    %c0_290 = arith.constant 0 : index
    %c0_291 = arith.constant 0 : index
    %248 = vector.load %arg12[%c0_288, %c20_289, %c0_290, %c0_291] : memref<1x24x24x64xf32, #tpu.memory_space<vmem>>, vector<1x1x24x64xf32>
    %249 = vector.shape_cast %248 : vector<1x1x24x64xf32> to vector<1x24x64xf32>
    %c0_292 = arith.constant 0 : index
    %c21 = arith.constant 21 : index
    %c0_293 = arith.constant 0 : index
    %c0_294 = arith.constant 0 : index
    %250 = vector.load %arg12[%c0_292, %c21, %c0_293, %c0_294] : memref<1x24x24x64xf32, #tpu.memory_space<vmem>>, vector<1x1x24x64xf32>
    %251 = vector.shape_cast %250 : vector<1x1x24x64xf32> to vector<1x24x64xf32>
    %252 = arith.maximumf %249, %251 : vector<1x24x64xf32>
    %c0_295 = arith.constant 0 : index
    %c22 = arith.constant 22 : index
    %c0_296 = arith.constant 0 : index
    %c0_297 = arith.constant 0 : index
    %253 = vector.load %arg12[%c0_295, %c22, %c0_296, %c0_297] : memref<1x24x24x64xf32, #tpu.memory_space<vmem>>, vector<1x1x24x64xf32>
    %254 = vector.shape_cast %253 : vector<1x1x24x64xf32> to vector<1x24x64xf32>
    %255 = arith.maximumf %252, %254 : vector<1x24x64xf32>
    %c0_298 = arith.constant 0 : index
    %c10_299 = arith.constant 10 : index
    %c0_300 = arith.constant 0 : index
    %c0_301 = arith.constant 0 : index
    %256 = vector.load %arg13[%c0_298, %c10_299, %c0_300, %c0_301] : memref<1x11x24x64xf32, #tpu.memory_space<vmem>>, vector<1x1x24x64xf32>
    %257 = vector.shape_cast %256 : vector<1x1x24x64xf32> to vector<1x24x64xf32>
    %258 = vector.shape_cast %255 : vector<1x24x64xf32> to vector<1x1x24x64xf32>
    tpu.vector_store %arg13[%c0_298, %c10_299, %c0_300, %c0_301], %258 {strides = array<i32>} : memref<1x11x24x64xf32, #tpu.memory_space<vmem>>, vector<1x1x24x64xf32>,
    %cst_302 = arith.constant 0.000000e+00 : f32
    %259 = vector.broadcast %cst_302 : f32 to vector<1x11x16x64xf32>
    %c0_303 = arith.constant 0 : index
    %c0_304 = arith.constant 0 : index
    %c0_305 = arith.constant 0 : index
    %c0_306 = arith.constant 0 : index
    %260 = vector.load %arg14[%c0_303, %c0_304, %c0_305, %c0_306] : memref<1x11x16x64xf32, #tpu.memory_space<vmem>>, vector<1x11x16x64xf32>
    tpu.vector_store %arg14[%c0_303, %c0_304, %c0_305, %c0_306], %259 {strides = array<i32>} : memref<1x11x16x64xf32, #tpu.memory_space<vmem>>, vector<1x11x16x64xf32>,
    %c0_307 = arith.constant 0 : index
    %c0_308 = arith.constant 0 : index
    %c0_309 = arith.constant 0 : index
    %c0_310 = arith.constant 0 : index
    %261 = vector.load %arg13[%c0_307, %c0_308, %c0_309, %c0_310] : memref<1x11x24x64xf32, #tpu.memory_space<vmem>>, vector<1x11x1x64xf32>
    %262 = vector.shape_cast %261 : vector<1x11x1x64xf32> to vector<1x11x64xf32>
    %c0_311 = arith.constant 0 : index
    %c0_312 = arith.constant 0 : index
    %c1_313 = arith.constant 1 : index
    %c0_314 = arith.constant 0 : index
    %263 = vector.load %arg13[%c0_311, %c0_312, %c1_313, %c0_314] : memref<1x11x24x64xf32, #tpu.memory_space<vmem>>, vector<1x11x1x64xf32>
    %264 = vector.shape_cast %263 : vector<1x11x1x64xf32> to vector<1x11x64xf32>
    %265 = arith.maximumf %262, %264 : vector<1x11x64xf32>
    %c0_315 = arith.constant 0 : index
    %c0_316 = arith.constant 0 : index
    %c2_317 = arith.constant 2 : index
    %c0_318 = arith.constant 0 : index
    %266 = vector.load %arg13[%c0_315, %c0_316, %c2_317, %c0_318] : memref<1x11x24x64xf32, #tpu.memory_space<vmem>>, vector<1x11x1x64xf32>
    %267 = vector.shape_cast %266 : vector<1x11x1x64xf32> to vector<1x11x64xf32>
    %268 = arith.maximumf %265, %267 : vector<1x11x64xf32>
    %c0_319 = arith.constant 0 : index
    %c0_320 = arith.constant 0 : index
    %c0_321 = arith.constant 0 : index
    %c0_322 = arith.constant 0 : index
    %269 = vector.load %arg14[%c0_319, %c0_320, %c0_321, %c0_322] : memref<1x11x16x64xf32, #tpu.memory_space<vmem>>, vector<1x11x1x64xf32>
    %270 = vector.shape_cast %269 : vector<1x11x1x64xf32> to vector<1x11x64xf32>
    %271 = vector.shape_cast %268 : vector<1x11x64xf32> to vector<1x11x1x64xf32>
    tpu.vector_store %arg14[%c0_319, %c0_320, %c0_321, %c0_322], %271 {strides = array<i32>} : memref<1x11x16x64xf32, #tpu.memory_space<vmem>>, vector<1x11x1x64xf32>,
    %c0_323 = arith.constant 0 : index
    %c0_324 = arith.constant 0 : index
    %c2_325 = arith.constant 2 : index
    %c0_326 = arith.constant 0 : index
    %272 = vector.load %arg13[%c0_323, %c0_324, %c2_325, %c0_326] : memref<1x11x24x64xf32, #tpu.memory_space<vmem>>, vector<1x11x1x64xf32>
    %273 = vector.shape_cast %272 : vector<1x11x1x64xf32> to vector<1x11x64xf32>
    %c0_327 = arith.constant 0 : index
    %c0_328 = arith.constant 0 : index
    %c3_329 = arith.constant 3 : index
    %c0_330 = arith.constant 0 : index
    %274 = vector.load %arg13[%c0_327, %c0_328, %c3_329, %c0_330] : memref<1x11x24x64xf32, #tpu.memory_space<vmem>>, vector<1x11x1x64xf32>
    %275 = vector.shape_cast %274 : vector<1x11x1x64xf32> to vector<1x11x64xf32>
    %276 = arith.maximumf %273, %275 : vector<1x11x64xf32>
    %c0_331 = arith.constant 0 : index
    %c0_332 = arith.constant 0 : index
    %c4_333 = arith.constant 4 : index
    %c0_334 = arith.constant 0 : index
    %277 = vector.load %arg13[%c0_331, %c0_332, %c4_333, %c0_334] : memref<1x11x24x64xf32, #tpu.memory_space<vmem>>, vector<1x11x1x64xf32>
    %278 = vector.shape_cast %277 : vector<1x11x1x64xf32> to vector<1x11x64xf32>
    %279 = arith.maximumf %276, %278 : vector<1x11x64xf32>
    %c0_335 = arith.constant 0 : index
    %c0_336 = arith.constant 0 : index
    %c1_337 = arith.constant 1 : index
    %c0_338 = arith.constant 0 : index
    %280 = vector.load %arg14[%c0_335, %c0_336, %c1_337, %c0_338] : memref<1x11x16x64xf32, #tpu.memory_space<vmem>>, vector<1x11x1x64xf32>
    %281 = vector.shape_cast %280 : vector<1x11x1x64xf32> to vector<1x11x64xf32>
    %282 = vector.shape_cast %279 : vector<1x11x64xf32> to vector<1x11x1x64xf32>
    tpu.vector_store %arg14[%c0_335, %c0_336, %c1_337, %c0_338], %282 {strides = array<i32>} : memref<1x11x16x64xf32, #tpu.memory_space<vmem>>, vector<1x11x1x64xf32>,
    %c0_339 = arith.constant 0 : index
    %c0_340 = arith.constant 0 : index
    %c4_341 = arith.constant 4 : index
    %c0_342 = arith.constant 0 : index
    %283 = vector.load %arg13[%c0_339, %c0_340, %c4_341, %c0_342] : memref<1x11x24x64xf32, #tpu.memory_space<vmem>>, vector<1x11x1x64xf32>
    %284 = vector.shape_cast %283 : vector<1x11x1x64xf32> to vector<1x11x64xf32>
    %c0_343 = arith.constant 0 : index
    %c0_344 = arith.constant 0 : index
    %c5_345 = arith.constant 5 : index
    %c0_346 = arith.constant 0 : index
    %285 = vector.load %arg13[%c0_343, %c0_344, %c5_345, %c0_346] : memref<1x11x24x64xf32, #tpu.memory_space<vmem>>, vector<1x11x1x64xf32>
    %286 = vector.shape_cast %285 : vector<1x11x1x64xf32> to vector<1x11x64xf32>
    %287 = arith.maximumf %284, %286 : vector<1x11x64xf32>
    %c0_347 = arith.constant 0 : index
    %c0_348 = arith.constant 0 : index
    %c6_349 = arith.constant 6 : index
    %c0_350 = arith.constant 0 : index
    %288 = vector.load %arg13[%c0_347, %c0_348, %c6_349, %c0_350] : memref<1x11x24x64xf32, #tpu.memory_space<vmem>>, vector<1x11x1x64xf32>
    %289 = vector.shape_cast %288 : vector<1x11x1x64xf32> to vector<1x11x64xf32>
    %290 = arith.maximumf %287, %289 : vector<1x11x64xf32>
    %c0_351 = arith.constant 0 : index
    %c0_352 = arith.constant 0 : index
    %c2_353 = arith.constant 2 : index
    %c0_354 = arith.constant 0 : index
    %291 = vector.load %arg14[%c0_351, %c0_352, %c2_353, %c0_354] : memref<1x11x16x64xf32, #tpu.memory_space<vmem>>, vector<1x11x1x64xf32>
    %292 = vector.shape_cast %291 : vector<1x11x1x64xf32> to vector<1x11x64xf32>
    %293 = vector.shape_cast %290 : vector<1x11x64xf32> to vector<1x11x1x64xf32>
    tpu.vector_store %arg14[%c0_351, %c0_352, %c2_353, %c0_354], %293 {strides = array<i32>} : memref<1x11x16x64xf32, #tpu.memory_space<vmem>>, vector<1x11x1x64xf32>,
    %c0_355 = arith.constant 0 : index
    %c0_356 = arith.constant 0 : index
    %c6_357 = arith.constant 6 : index
    %c0_358 = arith.constant 0 : index
    %294 = vector.load %arg13[%c0_355, %c0_356, %c6_357, %c0_358] : memref<1x11x24x64xf32, #tpu.memory_space<vmem>>, vector<1x11x1x64xf32>
    %295 = vector.shape_cast %294 : vector<1x11x1x64xf32> to vector<1x11x64xf32>
    %c0_359 = arith.constant 0 : index
    %c0_360 = arith.constant 0 : index
    %c7_361 = arith.constant 7 : index
    %c0_362 = arith.constant 0 : index
    %296 = vector.load %arg13[%c0_359, %c0_360, %c7_361, %c0_362] : memref<1x11x24x64xf32, #tpu.memory_space<vmem>>, vector<1x11x1x64xf32>
    %297 = vector.shape_cast %296 : vector<1x11x1x64xf32> to vector<1x11x64xf32>
    %298 = arith.maximumf %295, %297 : vector<1x11x64xf32>
    %c0_363 = arith.constant 0 : index
    %c0_364 = arith.constant 0 : index
    %c8_365 = arith.constant 8 : index
    %c0_366 = arith.constant 0 : index
    %299 = vector.load %arg13[%c0_363, %c0_364, %c8_365, %c0_366] : memref<1x11x24x64xf32, #tpu.memory_space<vmem>>, vector<1x11x1x64xf32>
    %300 = vector.shape_cast %299 : vector<1x11x1x64xf32> to vector<1x11x64xf32>
    %301 = arith.maximumf %298, %300 : vector<1x11x64xf32>
    %c0_367 = arith.constant 0 : index
    %c0_368 = arith.constant 0 : index
    %c3_369 = arith.constant 3 : index
    %c0_370 = arith.constant 0 : index
    %302 = vector.load %arg14[%c0_367, %c0_368, %c3_369, %c0_370] : memref<1x11x16x64xf32, #tpu.memory_space<vmem>>, vector<1x11x1x64xf32>
    %303 = vector.shape_cast %302 : vector<1x11x1x64xf32> to vector<1x11x64xf32>
    %304 = vector.shape_cast %301 : vector<1x11x64xf32> to vector<1x11x1x64xf32>
    tpu.vector_store %arg14[%c0_367, %c0_368, %c3_369, %c0_370], %304 {strides = array<i32>} : memref<1x11x16x64xf32, #tpu.memory_space<vmem>>, vector<1x11x1x64xf32>,
    %c0_371 = arith.constant 0 : index
    %c0_372 = arith.constant 0 : index
    %c8_373 = arith.constant 8 : index
    %c0_374 = arith.constant 0 : index
    %305 = vector.load %arg13[%c0_371, %c0_372, %c8_373, %c0_374] : memref<1x11x24x64xf32, #tpu.memory_space<vmem>>, vector<1x11x1x64xf32>
    %306 = vector.shape_cast %305 : vector<1x11x1x64xf32> to vector<1x11x64xf32>
    %c0_375 = arith.constant 0 : index
    %c0_376 = arith.constant 0 : index
    %c9_377 = arith.constant 9 : index
    %c0_378 = arith.constant 0 : index
    %307 = vector.load %arg13[%c0_375, %c0_376, %c9_377, %c0_378] : memref<1x11x24x64xf32, #tpu.memory_space<vmem>>, vector<1x11x1x64xf32>
    %308 = vector.shape_cast %307 : vector<1x11x1x64xf32> to vector<1x11x64xf32>
    %309 = arith.maximumf %306, %308 : vector<1x11x64xf32>
    %c0_379 = arith.constant 0 : index
    %c0_380 = arith.constant 0 : index
    %c10_381 = arith.constant 10 : index
    %c0_382 = arith.constant 0 : index
    %310 = vector.load %arg13[%c0_379, %c0_380, %c10_381, %c0_382] : memref<1x11x24x64xf32, #tpu.memory_space<vmem>>, vector<1x11x1x64xf32>
    %311 = vector.shape_cast %310 : vector<1x11x1x64xf32> to vector<1x11x64xf32>
    %312 = arith.maximumf %309, %311 : vector<1x11x64xf32>
    %c0_383 = arith.constant 0 : index
    %c0_384 = arith.constant 0 : index
    %c4_385 = arith.constant 4 : index
    %c0_386 = arith.constant 0 : index
    %313 = vector.load %arg14[%c0_383, %c0_384, %c4_385, %c0_386] : memref<1x11x16x64xf32, #tpu.memory_space<vmem>>, vector<1x11x1x64xf32>
    %314 = vector.shape_cast %313 : vector<1x11x1x64xf32> to vector<1x11x64xf32>
    %315 = vector.shape_cast %312 : vector<1x11x64xf32> to vector<1x11x1x64xf32>
    tpu.vector_store %arg14[%c0_383, %c0_384, %c4_385, %c0_386], %315 {strides = array<i32>} : memref<1x11x16x64xf32, #tpu.memory_space<vmem>>, vector<1x11x1x64xf32>,
    %c0_387 = arith.constant 0 : index
    %c0_388 = arith.constant 0 : index
    %c10_389 = arith.constant 10 : index
    %c0_390 = arith.constant 0 : index
    %316 = vector.load %arg13[%c0_387, %c0_388, %c10_389, %c0_390] : memref<1x11x24x64xf32, #tpu.memory_space<vmem>>, vector<1x11x1x64xf32>
    %317 = vector.shape_cast %316 : vector<1x11x1x64xf32> to vector<1x11x64xf32>
    %c0_391 = arith.constant 0 : index
    %c0_392 = arith.constant 0 : index
    %c11_393 = arith.constant 11 : index
    %c0_394 = arith.constant 0 : index
    %318 = vector.load %arg13[%c0_391, %c0_392, %c11_393, %c0_394] : memref<1x11x24x64xf32, #tpu.memory_space<vmem>>, vector<1x11x1x64xf32>
    %319 = vector.shape_cast %318 : vector<1x11x1x64xf32> to vector<1x11x64xf32>
    %320 = arith.maximumf %317, %319 : vector<1x11x64xf32>
    %c0_395 = arith.constant 0 : index
    %c0_396 = arith.constant 0 : index
    %c12_397 = arith.constant 12 : index
    %c0_398 = arith.constant 0 : index
    %321 = vector.load %arg13[%c0_395, %c0_396, %c12_397, %c0_398] : memref<1x11x24x64xf32, #tpu.memory_space<vmem>>, vector<1x11x1x64xf32>
    %322 = vector.shape_cast %321 : vector<1x11x1x64xf32> to vector<1x11x64xf32>
    %323 = arith.maximumf %320, %322 : vector<1x11x64xf32>
    %c0_399 = arith.constant 0 : index
    %c0_400 = arith.constant 0 : index
    %c5_401 = arith.constant 5 : index
    %c0_402 = arith.constant 0 : index
    %324 = vector.load %arg14[%c0_399, %c0_400, %c5_401, %c0_402] : memref<1x11x16x64xf32, #tpu.memory_space<vmem>>, vector<1x11x1x64xf32>
    %325 = vector.shape_cast %324 : vector<1x11x1x64xf32> to vector<1x11x64xf32>
    %326 = vector.shape_cast %323 : vector<1x11x64xf32> to vector<1x11x1x64xf32>
    tpu.vector_store %arg14[%c0_399, %c0_400, %c5_401, %c0_402], %326 {strides = array<i32>} : memref<1x11x16x64xf32, #tpu.memory_space<vmem>>, vector<1x11x1x64xf32>,
    %c0_403 = arith.constant 0 : index
    %c0_404 = arith.constant 0 : index
    %c12_405 = arith.constant 12 : index
    %c0_406 = arith.constant 0 : index
    %327 = vector.load %arg13[%c0_403, %c0_404, %c12_405, %c0_406] : memref<1x11x24x64xf32, #tpu.memory_space<vmem>>, vector<1x11x1x64xf32>
    %328 = vector.shape_cast %327 : vector<1x11x1x64xf32> to vector<1x11x64xf32>
    %c0_407 = arith.constant 0 : index
    %c0_408 = arith.constant 0 : index
    %c13_409 = arith.constant 13 : index
    %c0_410 = arith.constant 0 : index
    %329 = vector.load %arg13[%c0_407, %c0_408, %c13_409, %c0_410] : memref<1x11x24x64xf32, #tpu.memory_space<vmem>>, vector<1x11x1x64xf32>
    %330 = vector.shape_cast %329 : vector<1x11x1x64xf32> to vector<1x11x64xf32>
    %331 = arith.maximumf %328, %330 : vector<1x11x64xf32>
    %c0_411 = arith.constant 0 : index
    %c0_412 = arith.constant 0 : index
    %c14_413 = arith.constant 14 : index
    %c0_414 = arith.constant 0 : index
    %332 = vector.load %arg13[%c0_411, %c0_412, %c14_413, %c0_414] : memref<1x11x24x64xf32, #tpu.memory_space<vmem>>, vector<1x11x1x64xf32>
    %333 = vector.shape_cast %332 : vector<1x11x1x64xf32> to vector<1x11x64xf32>
    %334 = arith.maximumf %331, %333 : vector<1x11x64xf32>
    %c0_415 = arith.constant 0 : index
    %c0_416 = arith.constant 0 : index
    %c6_417 = arith.constant 6 : index
    %c0_418 = arith.constant 0 : index
    %335 = vector.load %arg14[%c0_415, %c0_416, %c6_417, %c0_418] : memref<1x11x16x64xf32, #tpu.memory_space<vmem>>, vector<1x11x1x64xf32>
    %336 = vector.shape_cast %335 : vector<1x11x1x64xf32> to vector<1x11x64xf32>
    %337 = vector.shape_cast %334 : vector<1x11x64xf32> to vector<1x11x1x64xf32>
    tpu.vector_store %arg14[%c0_415, %c0_416, %c6_417, %c0_418], %337 {strides = array<i32>} : memref<1x11x16x64xf32, #tpu.memory_space<vmem>>, vector<1x11x1x64xf32>,
    %c0_419 = arith.constant 0 : index
    %c0_420 = arith.constant 0 : index
    %c14_421 = arith.constant 14 : index
    %c0_422 = arith.constant 0 : index
    %338 = vector.load %arg13[%c0_419, %c0_420, %c14_421, %c0_422] : memref<1x11x24x64xf32, #tpu.memory_space<vmem>>, vector<1x11x1x64xf32>
    %339 = vector.shape_cast %338 : vector<1x11x1x64xf32> to vector<1x11x64xf32>
    %c0_423 = arith.constant 0 : index
    %c0_424 = arith.constant 0 : index
    %c15_425 = arith.constant 15 : index
    %c0_426 = arith.constant 0 : index
    %340 = vector.load %arg13[%c0_423, %c0_424, %c15_425, %c0_426] : memref<1x11x24x64xf32, #tpu.memory_space<vmem>>, vector<1x11x1x64xf32>
    %341 = vector.shape_cast %340 : vector<1x11x1x64xf32> to vector<1x11x64xf32>
    %342 = arith.maximumf %339, %341 : vector<1x11x64xf32>
    %c0_427 = arith.constant 0 : index
    %c0_428 = arith.constant 0 : index
    %c16_429 = arith.constant 16 : index
    %c0_430 = arith.constant 0 : index
    %343 = vector.load %arg13[%c0_427, %c0_428, %c16_429, %c0_430] : memref<1x11x24x64xf32, #tpu.memory_space<vmem>>, vector<1x11x1x64xf32>
    %344 = vector.shape_cast %343 : vector<1x11x1x64xf32> to vector<1x11x64xf32>
    %345 = arith.maximumf %342, %344 : vector<1x11x64xf32>
    %c0_431 = arith.constant 0 : index
    %c0_432 = arith.constant 0 : index
    %c7_433 = arith.constant 7 : index
    %c0_434 = arith.constant 0 : index
    %346 = vector.load %arg14[%c0_431, %c0_432, %c7_433, %c0_434] : memref<1x11x16x64xf32, #tpu.memory_space<vmem>>, vector<1x11x1x64xf32>
    %347 = vector.shape_cast %346 : vector<1x11x1x64xf32> to vector<1x11x64xf32>
    %348 = vector.shape_cast %345 : vector<1x11x64xf32> to vector<1x11x1x64xf32>
    tpu.vector_store %arg14[%c0_431, %c0_432, %c7_433, %c0_434], %348 {strides = array<i32>} : memref<1x11x16x64xf32, #tpu.memory_space<vmem>>, vector<1x11x1x64xf32>,
    %c0_435 = arith.constant 0 : index
    %c0_436 = arith.constant 0 : index
    %c16_437 = arith.constant 16 : index
    %c0_438 = arith.constant 0 : index
    %349 = vector.load %arg13[%c0_435, %c0_436, %c16_437, %c0_438] : memref<1x11x24x64xf32, #tpu.memory_space<vmem>>, vector<1x11x1x64xf32>
    %350 = vector.shape_cast %349 : vector<1x11x1x64xf32> to vector<1x11x64xf32>
    %c0_439 = arith.constant 0 : index
    %c0_440 = arith.constant 0 : index
    %c17_441 = arith.constant 17 : index
    %c0_442 = arith.constant 0 : index
    %351 = vector.load %arg13[%c0_439, %c0_440, %c17_441, %c0_442] : memref<1x11x24x64xf32, #tpu.memory_space<vmem>>, vector<1x11x1x64xf32>
    %352 = vector.shape_cast %351 : vector<1x11x1x64xf32> to vector<1x11x64xf32>
    %353 = arith.maximumf %350, %352 : vector<1x11x64xf32>
    %c0_443 = arith.constant 0 : index
    %c0_444 = arith.constant 0 : index
    %c18_445 = arith.constant 18 : index
    %c0_446 = arith.constant 0 : index
    %354 = vector.load %arg13[%c0_443, %c0_444, %c18_445, %c0_446] : memref<1x11x24x64xf32, #tpu.memory_space<vmem>>, vector<1x11x1x64xf32>
    %355 = vector.shape_cast %354 : vector<1x11x1x64xf32> to vector<1x11x64xf32>
    %356 = arith.maximumf %353, %355 : vector<1x11x64xf32>
    %c0_447 = arith.constant 0 : index
    %c0_448 = arith.constant 0 : index
    %c8_449 = arith.constant 8 : index
    %c0_450 = arith.constant 0 : index
    %357 = vector.load %arg14[%c0_447, %c0_448, %c8_449, %c0_450] : memref<1x11x16x64xf32, #tpu.memory_space<vmem>>, vector<1x11x1x64xf32>
    %358 = vector.shape_cast %357 : vector<1x11x1x64xf32> to vector<1x11x64xf32>
    %359 = vector.shape_cast %356 : vector<1x11x64xf32> to vector<1x11x1x64xf32>
    tpu.vector_store %arg14[%c0_447, %c0_448, %c8_449, %c0_450], %359 {strides = array<i32>} : memref<1x11x16x64xf32, #tpu.memory_space<vmem>>, vector<1x11x1x64xf32>,
    %c0_451 = arith.constant 0 : index
    %c0_452 = arith.constant 0 : index
    %c18_453 = arith.constant 18 : index
    %c0_454 = arith.constant 0 : index
    %360 = vector.load %arg13[%c0_451, %c0_452, %c18_453, %c0_454] : memref<1x11x24x64xf32, #tpu.memory_space<vmem>>, vector<1x11x1x64xf32>
    %361 = vector.shape_cast %360 : vector<1x11x1x64xf32> to vector<1x11x64xf32>
    %c0_455 = arith.constant 0 : index
    %c0_456 = arith.constant 0 : index
    %c19_457 = arith.constant 19 : index
    %c0_458 = arith.constant 0 : index
    %362 = vector.load %arg13[%c0_455, %c0_456, %c19_457, %c0_458] : memref<1x11x24x64xf32, #tpu.memory_space<vmem>>, vector<1x11x1x64xf32>
    %363 = vector.shape_cast %362 : vector<1x11x1x64xf32> to vector<1x11x64xf32>
    %364 = arith.maximumf %361, %363 : vector<1x11x64xf32>
    %c0_459 = arith.constant 0 : index
    %c0_460 = arith.constant 0 : index
    %c20_461 = arith.constant 20 : index
    %c0_462 = arith.constant 0 : index
    %365 = vector.load %arg13[%c0_459, %c0_460, %c20_461, %c0_462] : memref<1x11x24x64xf32, #tpu.memory_space<vmem>>, vector<1x11x1x64xf32>
    %366 = vector.shape_cast %365 : vector<1x11x1x64xf32> to vector<1x11x64xf32>
    %367 = arith.maximumf %364, %366 : vector<1x11x64xf32>
    %c0_463 = arith.constant 0 : index
    %c0_464 = arith.constant 0 : index
    %c9_465 = arith.constant 9 : index
    %c0_466 = arith.constant 0 : index
    %368 = vector.load %arg14[%c0_463, %c0_464, %c9_465, %c0_466] : memref<1x11x16x64xf32, #tpu.memory_space<vmem>>, vector<1x11x1x64xf32>
    %369 = vector.shape_cast %368 : vector<1x11x1x64xf32> to vector<1x11x64xf32>
    %370 = vector.shape_cast %367 : vector<1x11x64xf32> to vector<1x11x1x64xf32>
    tpu.vector_store %arg14[%c0_463, %c0_464, %c9_465, %c0_466], %370 {strides = array<i32>} : memref<1x11x16x64xf32, #tpu.memory_space<vmem>>, vector<1x11x1x64xf32>,
    %c0_467 = arith.constant 0 : index
    %c0_468 = arith.constant 0 : index
    %c20_469 = arith.constant 20 : index
    %c0_470 = arith.constant 0 : index
    %371 = vector.load %arg13[%c0_467, %c0_468, %c20_469, %c0_470] : memref<1x11x24x64xf32, #tpu.memory_space<vmem>>, vector<1x11x1x64xf32>
    %372 = vector.shape_cast %371 : vector<1x11x1x64xf32> to vector<1x11x64xf32>
    %c0_471 = arith.constant 0 : index
    %c0_472 = arith.constant 0 : index
    %c21_473 = arith.constant 21 : index
    %c0_474 = arith.constant 0 : index
    %373 = vector.load %arg13[%c0_471, %c0_472, %c21_473, %c0_474] : memref<1x11x24x64xf32, #tpu.memory_space<vmem>>, vector<1x11x1x64xf32>
    %374 = vector.shape_cast %373 : vector<1x11x1x64xf32> to vector<1x11x64xf32>
    %375 = arith.maximumf %372, %374 : vector<1x11x64xf32>
    %c0_475 = arith.constant 0 : index
    %c0_476 = arith.constant 0 : index
    %c22_477 = arith.constant 22 : index
    %c0_478 = arith.constant 0 : index
    %376 = vector.load %arg13[%c0_475, %c0_476, %c22_477, %c0_478] : memref<1x11x24x64xf32, #tpu.memory_space<vmem>>, vector<1x11x1x64xf32>
    %377 = vector.shape_cast %376 : vector<1x11x1x64xf32> to vector<1x11x64xf32>
    %378 = arith.maximumf %375, %377 : vector<1x11x64xf32>
    %c0_479 = arith.constant 0 : index
    %c0_480 = arith.constant 0 : index
    %c10_481 = arith.constant 10 : index
    %c0_482 = arith.constant 0 : index
    %379 = vector.load %arg14[%c0_479, %c0_480, %c10_481, %c0_482] : memref<1x11x16x64xf32, #tpu.memory_space<vmem>>, vector<1x11x1x64xf32>
    %380 = vector.shape_cast %379 : vector<1x11x1x64xf32> to vector<1x11x64xf32>
    %381 = vector.shape_cast %378 : vector<1x11x64xf32> to vector<1x11x1x64xf32>
    tpu.vector_store %arg14[%c0_479, %c0_480, %c10_481, %c0_482], %381 {strides = array<i32>} : memref<1x11x16x64xf32, #tpu.memory_space<vmem>>, vector<1x11x1x64xf32>,
    %cst_483 = arith.constant 0.000000e+00 : f32
    %382 = vector.broadcast %cst_483 : f32 to vector<56x64xf32>
    %c0_484 = arith.constant 0 : index
    %c0_485 = arith.constant 0 : index
    %c0_486 = arith.constant 0 : index
    %c0_487 = arith.constant 0 : index
    %383 = vector.load %arg14[%c0_484, %c0_485, %c0_486, %c0_487] : memref<1x11x16x64xf32, #tpu.memory_space<vmem>>, vector<1x7x8x64xf32>
    %384 = vector.shape_cast %383 : vector<1x7x8x64xf32> to vector<56x64xf32>
    %385 = arith.truncf %384 : vector<56x64xf32> to vector<56x64xbf16>
    %c0_488 = arith.constant 0 : index
    %c0_489 = arith.constant 0 : index
    %c0_490 = arith.constant 0 : index
    %386 = vector.load %arg5[%c0_488, %c0_489, %c0_490] : memref<25x64x64xbf16, #tpu.memory_space<vmem>>, vector<1x64x64xbf16>
    %387 = vector.shape_cast %386 : vector<1x64x64xbf16> to vector<64x64xbf16>
    %cst_491 = arith.constant dense<0.000000e+00> : vector<56x64xf32>
    %388 = tpu.matmul %385, %387, %cst_491 {dimension_numbers = #tpu.dot_dimension_numbers<[1], [0], [0], [1], [0, 0, 1, 1], [], []>} : vector<56x64xbf16>, vector<64x64xbf16>, vector<56x64xf32> -> vector<56x64xf32>
    %389 = arith.addf %382, %388 : vector<56x64xf32>
    %c0_492 = arith.constant 0 : index
    %c0_493 = arith.constant 0 : index
    %c1_494 = arith.constant 1 : index
    %c0_495 = arith.constant 0 : index
    %390 = vector.load %arg14[%c0_492, %c0_493, %c1_494, %c0_495] : memref<1x11x16x64xf32, #tpu.memory_space<vmem>>, vector<1x7x8x64xf32>
    %391 = vector.shape_cast %390 : vector<1x7x8x64xf32> to vector<56x64xf32>
    %392 = arith.truncf %391 : vector<56x64xf32> to vector<56x64xbf16>
    %c1_496 = arith.constant 1 : index
    %c0_497 = arith.constant 0 : index
    %c0_498 = arith.constant 0 : index
    %393 = vector.load %arg5[%c1_496, %c0_497, %c0_498] : memref<25x64x64xbf16, #tpu.memory_space<vmem>>, vector<1x64x64xbf16>
    %394 = vector.shape_cast %393 : vector<1x64x64xbf16> to vector<64x64xbf16>
    %cst_499 = arith.constant dense<0.000000e+00> : vector<56x64xf32>
    %395 = tpu.matmul %392, %394, %cst_499 {dimension_numbers = #tpu.dot_dimension_numbers<[1], [0], [0], [1], [0, 0, 1, 1], [], []>} : vector<56x64xbf16>, vector<64x64xbf16>, vector<56x64xf32> -> vector<56x64xf32>
    %396 = arith.addf %389, %395 : vector<56x64xf32>
    %c0_500 = arith.constant 0 : index
    %c0_501 = arith.constant 0 : index
    %c2_502 = arith.constant 2 : index
    %c0_503 = arith.constant 0 : index
    %397 = vector.load %arg14[%c0_500, %c0_501, %c2_502, %c0_503] : memref<1x11x16x64xf32, #tpu.memory_space<vmem>>, vector<1x7x8x64xf32>
    %398 = vector.shape_cast %397 : vector<1x7x8x64xf32> to vector<56x64xf32>
    %399 = arith.truncf %398 : vector<56x64xf32> to vector<56x64xbf16>
    %c2_504 = arith.constant 2 : index
    %c0_505 = arith.constant 0 : index
    %c0_506 = arith.constant 0 : index
    %400 = vector.load %arg5[%c2_504, %c0_505, %c0_506] : memref<25x64x64xbf16, #tpu.memory_space<vmem>>, vector<1x64x64xbf16>
    %401 = vector.shape_cast %400 : vector<1x64x64xbf16> to vector<64x64xbf16>
    %cst_507 = arith.constant dense<0.000000e+00> : vector<56x64xf32>
    %402 = tpu.matmul %399, %401, %cst_507 {dimension_numbers = #tpu.dot_dimension_numbers<[1], [0], [0], [1], [0, 0, 1, 1], [], []>} : vector<56x64xbf16>, vector<64x64xbf16>, vector<56x64xf32> -> vector<56x64xf32>
    %403 = arith.addf %396, %402 : vector<56x64xf32>
    %c0_508 = arith.constant 0 : index
    %c0_509 = arith.constant 0 : index
    %c3_510 = arith.constant 3 : index
    %c0_511 = arith.constant 0 : index
    %404 = vector.load %arg14[%c0_508, %c0_509, %c3_510, %c0_511] : memref<1x11x16x64xf32, #tpu.memory_space<vmem>>, vector<1x7x8x64xf32>
    %405 = vector.shape_cast %404 : vector<1x7x8x64xf32> to vector<56x64xf32>
    %406 = arith.truncf %405 : vector<56x64xf32> to vector<56x64xbf16>
    %c3_512 = arith.constant 3 : index
    %c0_513 = arith.constant 0 : index
    %c0_514 = arith.constant 0 : index
    %407 = vector.load %arg5[%c3_512, %c0_513, %c0_514] : memref<25x64x64xbf16, #tpu.memory_space<vmem>>, vector<1x64x64xbf16>
    %408 = vector.shape_cast %407 : vector<1x64x64xbf16> to vector<64x64xbf16>
    %cst_515 = arith.constant dense<0.000000e+00> : vector<56x64xf32>
    %409 = tpu.matmul %406, %408, %cst_515 {dimension_numbers = #tpu.dot_dimension_numbers<[1], [0], [0], [1], [0, 0, 1, 1], [], []>} : vector<56x64xbf16>, vector<64x64xbf16>, vector<56x64xf32> -> vector<56x64xf32>
    %410 = arith.addf %403, %409 : vector<56x64xf32>
    %c0_516 = arith.constant 0 : index
    %c0_517 = arith.constant 0 : index
    %c4_518 = arith.constant 4 : index
    %c0_519 = arith.constant 0 : index
    %411 = vector.load %arg14[%c0_516, %c0_517, %c4_518, %c0_519] : memref<1x11x16x64xf32, #tpu.memory_space<vmem>>, vector<1x7x8x64xf32>
    %412 = vector.shape_cast %411 : vector<1x7x8x64xf32> to vector<56x64xf32>
    %413 = arith.truncf %412 : vector<56x64xf32> to vector<56x64xbf16>
    %c4_520 = arith.constant 4 : index
    %c0_521 = arith.constant 0 : index
    %c0_522 = arith.constant 0 : index
    %414 = vector.load %arg5[%c4_520, %c0_521, %c0_522] : memref<25x64x64xbf16, #tpu.memory_space<vmem>>, vector<1x64x64xbf16>
    %415 = vector.shape_cast %414 : vector<1x64x64xbf16> to vector<64x64xbf16>
    %cst_523 = arith.constant dense<0.000000e+00> : vector<56x64xf32>
    %416 = tpu.matmul %413, %415, %cst_523 {dimension_numbers = #tpu.dot_dimension_numbers<[1], [0], [0], [1], [0, 0, 1, 1], [], []>} : vector<56x64xbf16>, vector<64x64xbf16>, vector<56x64xf32> -> vector<56x64xf32>
    %417 = arith.addf %410, %416 : vector<56x64xf32>
    %c0_524 = arith.constant 0 : index
    %c1_525 = arith.constant 1 : index
    %c0_526 = arith.constant 0 : index
    %c0_527 = arith.constant 0 : index
    %418 = vector.load %arg14[%c0_524, %c1_525, %c0_526, %c0_527] : memref<1x11x16x64xf32, #tpu.memory_space<vmem>>, vector<1x7x8x64xf32>
    %419 = vector.shape_cast %418 : vector<1x7x8x64xf32> to vector<56x64xf32>
    %420 = arith.truncf %419 : vector<56x64xf32> to vector<56x64xbf16>
    %c5_528 = arith.constant 5 : index
    %c0_529 = arith.constant 0 : index
    %c0_530 = arith.constant 0 : index
    %421 = vector.load %arg5[%c5_528, %c0_529, %c0_530] : memref<25x64x64xbf16, #tpu.memory_space<vmem>>, vector<1x64x64xbf16>
    %422 = vector.shape_cast %421 : vector<1x64x64xbf16> to vector<64x64xbf16>
    %cst_531 = arith.constant dense<0.000000e+00> : vector<56x64xf32>
    %423 = tpu.matmul %420, %422, %cst_531 {dimension_numbers = #tpu.dot_dimension_numbers<[1], [0], [0], [1], [0, 0, 1, 1], [], []>} : vector<56x64xbf16>, vector<64x64xbf16>, vector<56x64xf32> -> vector<56x64xf32>
    %424 = arith.addf %417, %423 : vector<56x64xf32>
    %c0_532 = arith.constant 0 : index
    %c1_533 = arith.constant 1 : index
    %c1_534 = arith.constant 1 : index
    %c0_535 = arith.constant 0 : index
    %425 = vector.load %arg14[%c0_532, %c1_533, %c1_534, %c0_535] : memref<1x11x16x64xf32, #tpu.memory_space<vmem>>, vector<1x7x8x64xf32>
    %426 = vector.shape_cast %425 : vector<1x7x8x64xf32> to vector<56x64xf32>
    %427 = arith.truncf %426 : vector<56x64xf32> to vector<56x64xbf16>
    %c6_536 = arith.constant 6 : index
    %c0_537 = arith.constant 0 : index
    %c0_538 = arith.constant 0 : index
    %428 = vector.load %arg5[%c6_536, %c0_537, %c0_538] : memref<25x64x64xbf16, #tpu.memory_space<vmem>>, vector<1x64x64xbf16>
    %429 = vector.shape_cast %428 : vector<1x64x64xbf16> to vector<64x64xbf16>
    %cst_539 = arith.constant dense<0.000000e+00> : vector<56x64xf32>
    %430 = tpu.matmul %427, %429, %cst_539 {dimension_numbers = #tpu.dot_dimension_numbers<[1], [0], [0], [1], [0, 0, 1, 1], [], []>} : vector<56x64xbf16>, vector<64x64xbf16>, vector<56x64xf32> -> vector<56x64xf32>
    %431 = arith.addf %424, %430 : vector<56x64xf32>
    %c0_540 = arith.constant 0 : index
    %c1_541 = arith.constant 1 : index
    %c2_542 = arith.constant 2 : index
    %c0_543 = arith.constant 0 : index
    %432 = vector.load %arg14[%c0_540, %c1_541, %c2_542, %c0_543] : memref<1x11x16x64xf32, #tpu.memory_space<vmem>>, vector<1x7x8x64xf32>
    %433 = vector.shape_cast %432 : vector<1x7x8x64xf32> to vector<56x64xf32>
    %434 = arith.truncf %433 : vector<56x64xf32> to vector<56x64xbf16>
    %c7_544 = arith.constant 7 : index
    %c0_545 = arith.constant 0 : index
    %c0_546 = arith.constant 0 : index
    %435 = vector.load %arg5[%c7_544, %c0_545, %c0_546] : memref<25x64x64xbf16, #tpu.memory_space<vmem>>, vector<1x64x64xbf16>
    %436 = vector.shape_cast %435 : vector<1x64x64xbf16> to vector<64x64xbf16>
    %cst_547 = arith.constant dense<0.000000e+00> : vector<56x64xf32>
    %437 = tpu.matmul %434, %436, %cst_547 {dimension_numbers = #tpu.dot_dimension_numbers<[1], [0], [0], [1], [0, 0, 1, 1], [], []>} : vector<56x64xbf16>, vector<64x64xbf16>, vector<56x64xf32> -> vector<56x64xf32>
    %438 = arith.addf %431, %437 : vector<56x64xf32>
    %c0_548 = arith.constant 0 : index
    %c1_549 = arith.constant 1 : index
    %c3_550 = arith.constant 3 : index
    %c0_551 = arith.constant 0 : index
    %439 = vector.load %arg14[%c0_548, %c1_549, %c3_550, %c0_551] : memref<1x11x16x64xf32, #tpu.memory_space<vmem>>, vector<1x7x8x64xf32>
    %440 = vector.shape_cast %439 : vector<1x7x8x64xf32> to vector<56x64xf32>
    %441 = arith.truncf %440 : vector<56x64xf32> to vector<56x64xbf16>
    %c8_552 = arith.constant 8 : index
    %c0_553 = arith.constant 0 : index
    %c0_554 = arith.constant 0 : index
    %442 = vector.load %arg5[%c8_552, %c0_553, %c0_554] : memref<25x64x64xbf16, #tpu.memory_space<vmem>>, vector<1x64x64xbf16>
    %443 = vector.shape_cast %442 : vector<1x64x64xbf16> to vector<64x64xbf16>
    %cst_555 = arith.constant dense<0.000000e+00> : vector<56x64xf32>
    %444 = tpu.matmul %441, %443, %cst_555 {dimension_numbers = #tpu.dot_dimension_numbers<[1], [0], [0], [1], [0, 0, 1, 1], [], []>} : vector<56x64xbf16>, vector<64x64xbf16>, vector<56x64xf32> -> vector<56x64xf32>
    %445 = arith.addf %438, %444 : vector<56x64xf32>
    %c0_556 = arith.constant 0 : index
    %c1_557 = arith.constant 1 : index
    %c4_558 = arith.constant 4 : index
    %c0_559 = arith.constant 0 : index
    %446 = vector.load %arg14[%c0_556, %c1_557, %c4_558, %c0_559] : memref<1x11x16x64xf32, #tpu.memory_space<vmem>>, vector<1x7x8x64xf32>
    %447 = vector.shape_cast %446 : vector<1x7x8x64xf32> to vector<56x64xf32>
    %448 = arith.truncf %447 : vector<56x64xf32> to vector<56x64xbf16>
    %c9_560 = arith.constant 9 : index
    %c0_561 = arith.constant 0 : index
    %c0_562 = arith.constant 0 : index
    %449 = vector.load %arg5[%c9_560, %c0_561, %c0_562] : memref<25x64x64xbf16, #tpu.memory_space<vmem>>, vector<1x64x64xbf16>
    %450 = vector.shape_cast %449 : vector<1x64x64xbf16> to vector<64x64xbf16>
    %cst_563 = arith.constant dense<0.000000e+00> : vector<56x64xf32>
    %451 = tpu.matmul %448, %450, %cst_563 {dimension_numbers = #tpu.dot_dimension_numbers<[1], [0], [0], [1], [0, 0, 1, 1], [], []>} : vector<56x64xbf16>, vector<64x64xbf16>, vector<56x64xf32> -> vector<56x64xf32>
    %452 = arith.addf %445, %451 : vector<56x64xf32>
    %c0_564 = arith.constant 0 : index
    %c2_565 = arith.constant 2 : index
    %c0_566 = arith.constant 0 : index
    %c0_567 = arith.constant 0 : index
    %453 = vector.load %arg14[%c0_564, %c2_565, %c0_566, %c0_567] : memref<1x11x16x64xf32, #tpu.memory_space<vmem>>, vector<1x7x8x64xf32>
    %454 = vector.shape_cast %453 : vector<1x7x8x64xf32> to vector<56x64xf32>
    %455 = arith.truncf %454 : vector<56x64xf32> to vector<56x64xbf16>
    %c10_568 = arith.constant 10 : index
    %c0_569 = arith.constant 0 : index
    %c0_570 = arith.constant 0 : index
    %456 = vector.load %arg5[%c10_568, %c0_569, %c0_570] : memref<25x64x64xbf16, #tpu.memory_space<vmem>>, vector<1x64x64xbf16>
    %457 = vector.shape_cast %456 : vector<1x64x64xbf16> to vector<64x64xbf16>
    %cst_571 = arith.constant dense<0.000000e+00> : vector<56x64xf32>
    %458 = tpu.matmul %455, %457, %cst_571 {dimension_numbers = #tpu.dot_dimension_numbers<[1], [0], [0], [1], [0, 0, 1, 1], [], []>} : vector<56x64xbf16>, vector<64x64xbf16>, vector<56x64xf32> -> vector<56x64xf32>
    %459 = arith.addf %452, %458 : vector<56x64xf32>
    %c0_572 = arith.constant 0 : index
    %c2_573 = arith.constant 2 : index
    %c1_574 = arith.constant 1 : index
    %c0_575 = arith.constant 0 : index
    %460 = vector.load %arg14[%c0_572, %c2_573, %c1_574, %c0_575] : memref<1x11x16x64xf32, #tpu.memory_space<vmem>>, vector<1x7x8x64xf32>
    %461 = vector.shape_cast %460 : vector<1x7x8x64xf32> to vector<56x64xf32>
    %462 = arith.truncf %461 : vector<56x64xf32> to vector<56x64xbf16>
    %c11_576 = arith.constant 11 : index
    %c0_577 = arith.constant 0 : index
    %c0_578 = arith.constant 0 : index
    %463 = vector.load %arg5[%c11_576, %c0_577, %c0_578] : memref<25x64x64xbf16, #tpu.memory_space<vmem>>, vector<1x64x64xbf16>
    %464 = vector.shape_cast %463 : vector<1x64x64xbf16> to vector<64x64xbf16>
    %cst_579 = arith.constant dense<0.000000e+00> : vector<56x64xf32>
    %465 = tpu.matmul %462, %464, %cst_579 {dimension_numbers = #tpu.dot_dimension_numbers<[1], [0], [0], [1], [0, 0, 1, 1], [], []>} : vector<56x64xbf16>, vector<64x64xbf16>, vector<56x64xf32> -> vector<56x64xf32>
    %466 = arith.addf %459, %465 : vector<56x64xf32>
    %c0_580 = arith.constant 0 : index
    %c2_581 = arith.constant 2 : index
    %c2_582 = arith.constant 2 : index
    %c0_583 = arith.constant 0 : index
    %467 = vector.load %arg14[%c0_580, %c2_581, %c2_582, %c0_583] : memref<1x11x16x64xf32, #tpu.memory_space<vmem>>, vector<1x7x8x64xf32>
    %468 = vector.shape_cast %467 : vector<1x7x8x64xf32> to vector<56x64xf32>
    %469 = arith.truncf %468 : vector<56x64xf32> to vector<56x64xbf16>
    %c12_584 = arith.constant 12 : index
    %c0_585 = arith.constant 0 : index
    %c0_586 = arith.constant 0 : index
    %470 = vector.load %arg5[%c12_584, %c0_585, %c0_586] : memref<25x64x64xbf16, #tpu.memory_space<vmem>>, vector<1x64x64xbf16>
    %471 = vector.shape_cast %470 : vector<1x64x64xbf16> to vector<64x64xbf16>
    %cst_587 = arith.constant dense<0.000000e+00> : vector<56x64xf32>
    %472 = tpu.matmul %469, %471, %cst_587 {dimension_numbers = #tpu.dot_dimension_numbers<[1], [0], [0], [1], [0, 0, 1, 1], [], []>} : vector<56x64xbf16>, vector<64x64xbf16>, vector<56x64xf32> -> vector<56x64xf32>
    %473 = arith.addf %466, %472 : vector<56x64xf32>
    %c0_588 = arith.constant 0 : index
    %c2_589 = arith.constant 2 : index
    %c3_590 = arith.constant 3 : index
    %c0_591 = arith.constant 0 : index
    %474 = vector.load %arg14[%c0_588, %c2_589, %c3_590, %c0_591] : memref<1x11x16x64xf32, #tpu.memory_space<vmem>>, vector<1x7x8x64xf32>
    %475 = vector.shape_cast %474 : vector<1x7x8x64xf32> to vector<56x64xf32>
    %476 = arith.truncf %475 : vector<56x64xf32> to vector<56x64xbf16>
    %c13_592 = arith.constant 13 : index
    %c0_593 = arith.constant 0 : index
    %c0_594 = arith.constant 0 : index
    %477 = vector.load %arg5[%c13_592, %c0_593, %c0_594] : memref<25x64x64xbf16, #tpu.memory_space<vmem>>, vector<1x64x64xbf16>
    %478 = vector.shape_cast %477 : vector<1x64x64xbf16> to vector<64x64xbf16>
    %cst_595 = arith.constant dense<0.000000e+00> : vector<56x64xf32>
    %479 = tpu.matmul %476, %478, %cst_595 {dimension_numbers = #tpu.dot_dimension_numbers<[1], [0], [0], [1], [0, 0, 1, 1], [], []>} : vector<56x64xbf16>, vector<64x64xbf16>, vector<56x64xf32> -> vector<56x64xf32>
    %480 = arith.addf %473, %479 : vector<56x64xf32>
    %c0_596 = arith.constant 0 : index
    %c2_597 = arith.constant 2 : index
    %c4_598 = arith.constant 4 : index
    %c0_599 = arith.constant 0 : index
    %481 = vector.load %arg14[%c0_596, %c2_597, %c4_598, %c0_599] : memref<1x11x16x64xf32, #tpu.memory_space<vmem>>, vector<1x7x8x64xf32>
    %482 = vector.shape_cast %481 : vector<1x7x8x64xf32> to vector<56x64xf32>
    %483 = arith.truncf %482 : vector<56x64xf32> to vector<56x64xbf16>
    %c14_600 = arith.constant 14 : index
    %c0_601 = arith.constant 0 : index
    %c0_602 = arith.constant 0 : index
    %484 = vector.load %arg5[%c14_600, %c0_601, %c0_602] : memref<25x64x64xbf16, #tpu.memory_space<vmem>>, vector<1x64x64xbf16>
    %485 = vector.shape_cast %484 : vector<1x64x64xbf16> to vector<64x64xbf16>
    %cst_603 = arith.constant dense<0.000000e+00> : vector<56x64xf32>
    %486 = tpu.matmul %483, %485, %cst_603 {dimension_numbers = #tpu.dot_dimension_numbers<[1], [0], [0], [1], [0, 0, 1, 1], [], []>} : vector<56x64xbf16>, vector<64x64xbf16>, vector<56x64xf32> -> vector<56x64xf32>
    %487 = arith.addf %480, %486 : vector<56x64xf32>
    %c0_604 = arith.constant 0 : index
    %c3_605 = arith.constant 3 : index
    %c0_606 = arith.constant 0 : index
    %c0_607 = arith.constant 0 : index
    %488 = vector.load %arg14[%c0_604, %c3_605, %c0_606, %c0_607] : memref<1x11x16x64xf32, #tpu.memory_space<vmem>>, vector<1x7x8x64xf32>
    %489 = vector.shape_cast %488 : vector<1x7x8x64xf32> to vector<56x64xf32>
    %490 = arith.truncf %489 : vector<56x64xf32> to vector<56x64xbf16>
    %c15_608 = arith.constant 15 : index
    %c0_609 = arith.constant 0 : index
    %c0_610 = arith.constant 0 : index
    %491 = vector.load %arg5[%c15_608, %c0_609, %c0_610] : memref<25x64x64xbf16, #tpu.memory_space<vmem>>, vector<1x64x64xbf16>
    %492 = vector.shape_cast %491 : vector<1x64x64xbf16> to vector<64x64xbf16>
    %cst_611 = arith.constant dense<0.000000e+00> : vector<56x64xf32>
    %493 = tpu.matmul %490, %492, %cst_611 {dimension_numbers = #tpu.dot_dimension_numbers<[1], [0], [0], [1], [0, 0, 1, 1], [], []>} : vector<56x64xbf16>, vector<64x64xbf16>, vector<56x64xf32> -> vector<56x64xf32>
    %494 = arith.addf %487, %493 : vector<56x64xf32>
    %c0_612 = arith.constant 0 : index
    %c3_613 = arith.constant 3 : index
    %c1_614 = arith.constant 1 : index
    %c0_615 = arith.constant 0 : index
    %495 = vector.load %arg14[%c0_612, %c3_613, %c1_614, %c0_615] : memref<1x11x16x64xf32, #tpu.memory_space<vmem>>, vector<1x7x8x64xf32>
    %496 = vector.shape_cast %495 : vector<1x7x8x64xf32> to vector<56x64xf32>
    %497 = arith.truncf %496 : vector<56x64xf32> to vector<56x64xbf16>
    %c16_616 = arith.constant 16 : index
    %c0_617 = arith.constant 0 : index
    %c0_618 = arith.constant 0 : index
    %498 = vector.load %arg5[%c16_616, %c0_617, %c0_618] : memref<25x64x64xbf16, #tpu.memory_space<vmem>>, vector<1x64x64xbf16>
    %499 = vector.shape_cast %498 : vector<1x64x64xbf16> to vector<64x64xbf16>
    %cst_619 = arith.constant dense<0.000000e+00> : vector<56x64xf32>
    %500 = tpu.matmul %497, %499, %cst_619 {dimension_numbers = #tpu.dot_dimension_numbers<[1], [0], [0], [1], [0, 0, 1, 1], [], []>} : vector<56x64xbf16>, vector<64x64xbf16>, vector<56x64xf32> -> vector<56x64xf32>
    %501 = arith.addf %494, %500 : vector<56x64xf32>
    %c0_620 = arith.constant 0 : index
    %c3_621 = arith.constant 3 : index
    %c2_622 = arith.constant 2 : index
    %c0_623 = arith.constant 0 : index
    %502 = vector.load %arg14[%c0_620, %c3_621, %c2_622, %c0_623] : memref<1x11x16x64xf32, #tpu.memory_space<vmem>>, vector<1x7x8x64xf32>
    %503 = vector.shape_cast %502 : vector<1x7x8x64xf32> to vector<56x64xf32>
    %504 = arith.truncf %503 : vector<56x64xf32> to vector<56x64xbf16>
    %c17_624 = arith.constant 17 : index
    %c0_625 = arith.constant 0 : index
    %c0_626 = arith.constant 0 : index
    %505 = vector.load %arg5[%c17_624, %c0_625, %c0_626] : memref<25x64x64xbf16, #tpu.memory_space<vmem>>, vector<1x64x64xbf16>
    %506 = vector.shape_cast %505 : vector<1x64x64xbf16> to vector<64x64xbf16>
    %cst_627 = arith.constant dense<0.000000e+00> : vector<56x64xf32>
    %507 = tpu.matmul %504, %506, %cst_627 {dimension_numbers = #tpu.dot_dimension_numbers<[1], [0], [0], [1], [0, 0, 1, 1], [], []>} : vector<56x64xbf16>, vector<64x64xbf16>, vector<56x64xf32> -> vector<56x64xf32>
    %508 = arith.addf %501, %507 : vector<56x64xf32>
    %c0_628 = arith.constant 0 : index
    %c3_629 = arith.constant 3 : index
    %c3_630 = arith.constant 3 : index
    %c0_631 = arith.constant 0 : index
    %509 = vector.load %arg14[%c0_628, %c3_629, %c3_630, %c0_631] : memref<1x11x16x64xf32, #tpu.memory_space<vmem>>, vector<1x7x8x64xf32>
    %510 = vector.shape_cast %509 : vector<1x7x8x64xf32> to vector<56x64xf32>
    %511 = arith.truncf %510 : vector<56x64xf32> to vector<56x64xbf16>
    %c18_632 = arith.constant 18 : index
    %c0_633 = arith.constant 0 : index
    %c0_634 = arith.constant 0 : index
    %512 = vector.load %arg5[%c18_632, %c0_633, %c0_634] : memref<25x64x64xbf16, #tpu.memory_space<vmem>>, vector<1x64x64xbf16>
    %513 = vector.shape_cast %512 : vector<1x64x64xbf16> to vector<64x64xbf16>
    %cst_635 = arith.constant dense<0.000000e+00> : vector<56x64xf32>
    %514 = tpu.matmul %511, %513, %cst_635 {dimension_numbers = #tpu.dot_dimension_numbers<[1], [0], [0], [1], [0, 0, 1, 1], [], []>} : vector<56x64xbf16>, vector<64x64xbf16>, vector<56x64xf32> -> vector<56x64xf32>
    %515 = arith.addf %508, %514 : vector<56x64xf32>
    %c0_636 = arith.constant 0 : index
    %c3_637 = arith.constant 3 : index
    %c4_638 = arith.constant 4 : index
    %c0_639 = arith.constant 0 : index
    %516 = vector.load %arg14[%c0_636, %c3_637, %c4_638, %c0_639] : memref<1x11x16x64xf32, #tpu.memory_space<vmem>>, vector<1x7x8x64xf32>
    %517 = vector.shape_cast %516 : vector<1x7x8x64xf32> to vector<56x64xf32>
    %518 = arith.truncf %517 : vector<56x64xf32> to vector<56x64xbf16>
    %c19_640 = arith.constant 19 : index
    %c0_641 = arith.constant 0 : index
    %c0_642 = arith.constant 0 : index
    %519 = vector.load %arg5[%c19_640, %c0_641, %c0_642] : memref<25x64x64xbf16, #tpu.memory_space<vmem>>, vector<1x64x64xbf16>
    %520 = vector.shape_cast %519 : vector<1x64x64xbf16> to vector<64x64xbf16>
    %cst_643 = arith.constant dense<0.000000e+00> : vector<56x64xf32>
    %521 = tpu.matmul %518, %520, %cst_643 {dimension_numbers = #tpu.dot_dimension_numbers<[1], [0], [0], [1], [0, 0, 1, 1], [], []>} : vector<56x64xbf16>, vector<64x64xbf16>, vector<56x64xf32> -> vector<56x64xf32>
    %522 = arith.addf %515, %521 : vector<56x64xf32>
    %c0_644 = arith.constant 0 : index
    %c4_645 = arith.constant 4 : index
    %c0_646 = arith.constant 0 : index
    %c0_647 = arith.constant 0 : index
    %523 = vector.load %arg14[%c0_644, %c4_645, %c0_646, %c0_647] : memref<1x11x16x64xf32, #tpu.memory_space<vmem>>, vector<1x7x8x64xf32>
    %524 = vector.shape_cast %523 : vector<1x7x8x64xf32> to vector<56x64xf32>
    %525 = arith.truncf %524 : vector<56x64xf32> to vector<56x64xbf16>
    %c20_648 = arith.constant 20 : index
    %c0_649 = arith.constant 0 : index
    %c0_650 = arith.constant 0 : index
    %526 = vector.load %arg5[%c20_648, %c0_649, %c0_650] : memref<25x64x64xbf16, #tpu.memory_space<vmem>>, vector<1x64x64xbf16>
    %527 = vector.shape_cast %526 : vector<1x64x64xbf16> to vector<64x64xbf16>
    %cst_651 = arith.constant dense<0.000000e+00> : vector<56x64xf32>
    %528 = tpu.matmul %525, %527, %cst_651 {dimension_numbers = #tpu.dot_dimension_numbers<[1], [0], [0], [1], [0, 0, 1, 1], [], []>} : vector<56x64xbf16>, vector<64x64xbf16>, vector<56x64xf32> -> vector<56x64xf32>
    %529 = arith.addf %522, %528 : vector<56x64xf32>
    %c0_652 = arith.constant 0 : index
    %c4_653 = arith.constant 4 : index
    %c1_654 = arith.constant 1 : index
    %c0_655 = arith.constant 0 : index
    %530 = vector.load %arg14[%c0_652, %c4_653, %c1_654, %c0_655] : memref<1x11x16x64xf32, #tpu.memory_space<vmem>>, vector<1x7x8x64xf32>
    %531 = vector.shape_cast %530 : vector<1x7x8x64xf32> to vector<56x64xf32>
    %532 = arith.truncf %531 : vector<56x64xf32> to vector<56x64xbf16>
    %c21_656 = arith.constant 21 : index
    %c0_657 = arith.constant 0 : index
    %c0_658 = arith.constant 0 : index
    %533 = vector.load %arg5[%c21_656, %c0_657, %c0_658] : memref<25x64x64xbf16, #tpu.memory_space<vmem>>, vector<1x64x64xbf16>
    %534 = vector.shape_cast %533 : vector<1x64x64xbf16> to vector<64x64xbf16>
    %cst_659 = arith.constant dense<0.000000e+00> : vector<56x64xf32>
    %535 = tpu.matmul %532, %534, %cst_659 {dimension_numbers = #tpu.dot_dimension_numbers<[1], [0], [0], [1], [0, 0, 1, 1], [], []>} : vector<56x64xbf16>, vector<64x64xbf16>, vector<56x64xf32> -> vector<56x64xf32>
    %536 = arith.addf %529, %535 : vector<56x64xf32>
    %c0_660 = arith.constant 0 : index
    %c4_661 = arith.constant 4 : index
    %c2_662 = arith.constant 2 : index
    %c0_663 = arith.constant 0 : index
    %537 = vector.load %arg14[%c0_660, %c4_661, %c2_662, %c0_663] : memref<1x11x16x64xf32, #tpu.memory_space<vmem>>, vector<1x7x8x64xf32>
    %538 = vector.shape_cast %537 : vector<1x7x8x64xf32> to vector<56x64xf32>
    %539 = arith.truncf %538 : vector<56x64xf32> to vector<56x64xbf16>
    %c22_664 = arith.constant 22 : index
    %c0_665 = arith.constant 0 : index
    %c0_666 = arith.constant 0 : index
    %540 = vector.load %arg5[%c22_664, %c0_665, %c0_666] : memref<25x64x64xbf16, #tpu.memory_space<vmem>>, vector<1x64x64xbf16>
    %541 = vector.shape_cast %540 : vector<1x64x64xbf16> to vector<64x64xbf16>
    %cst_667 = arith.constant dense<0.000000e+00> : vector<56x64xf32>
    %542 = tpu.matmul %539, %541, %cst_667 {dimension_numbers = #tpu.dot_dimension_numbers<[1], [0], [0], [1], [0, 0, 1, 1], [], []>} : vector<56x64xbf16>, vector<64x64xbf16>, vector<56x64xf32> -> vector<56x64xf32>
    %543 = arith.addf %536, %542 : vector<56x64xf32>
    %c0_668 = arith.constant 0 : index
    %c4_669 = arith.constant 4 : index
    %c3_670 = arith.constant 3 : index
    %c0_671 = arith.constant 0 : index
    %544 = vector.load %arg14[%c0_668, %c4_669, %c3_670, %c0_671] : memref<1x11x16x64xf32, #tpu.memory_space<vmem>>, vector<1x7x8x64xf32>
    %545 = vector.shape_cast %544 : vector<1x7x8x64xf32> to vector<56x64xf32>
    %546 = arith.truncf %545 : vector<56x64xf32> to vector<56x64xbf16>
    %c23 = arith.constant 23 : index
    %c0_672 = arith.constant 0 : index
    %c0_673 = arith.constant 0 : index
    %547 = vector.load %arg5[%c23, %c0_672, %c0_673] : memref<25x64x64xbf16, #tpu.memory_space<vmem>>, vector<1x64x64xbf16>
    %548 = vector.shape_cast %547 : vector<1x64x64xbf16> to vector<64x64xbf16>
    %cst_674 = arith.constant dense<0.000000e+00> : vector<56x64xf32>
    %549 = tpu.matmul %546, %548, %cst_674 {dimension_numbers = #tpu.dot_dimension_numbers<[1], [0], [0], [1], [0, 0, 1, 1], [], []>} : vector<56x64xbf16>, vector<64x64xbf16>, vector<56x64xf32> -> vector<56x64xf32>
    %550 = arith.addf %543, %549 : vector<56x64xf32>
    %c0_675 = arith.constant 0 : index
    %c4_676 = arith.constant 4 : index
    %c4_677 = arith.constant 4 : index
    %c0_678 = arith.constant 0 : index
    %551 = vector.load %arg14[%c0_675, %c4_676, %c4_677, %c0_678] : memref<1x11x16x64xf32, #tpu.memory_space<vmem>>, vector<1x7x8x64xf32>
    %552 = vector.shape_cast %551 : vector<1x7x8x64xf32> to vector<56x64xf32>
    %553 = arith.truncf %552 : vector<56x64xf32> to vector<56x64xbf16>
    %c24 = arith.constant 24 : index
    %c0_679 = arith.constant 0 : index
    %c0_680 = arith.constant 0 : index
    %554 = vector.load %arg5[%c24, %c0_679, %c0_680] : memref<25x64x64xbf16, #tpu.memory_space<vmem>>, vector<1x64x64xbf16>
    %555 = vector.shape_cast %554 : vector<1x64x64xbf16> to vector<64x64xbf16>
    %cst_681 = arith.constant dense<0.000000e+00> : vector<56x64xf32>
    %556 = tpu.matmul %553, %555, %cst_681 {dimension_numbers = #tpu.dot_dimension_numbers<[1], [0], [0], [1], [0, 0, 1, 1], [], []>} : vector<56x64xbf16>, vector<64x64xbf16>, vector<56x64xf32> -> vector<56x64xf32>
    %557 = arith.addf %550, %556 : vector<56x64xf32>
    %c0_682 = arith.constant 0 : index
    %c0_683 = arith.constant 0 : index
    %558 = vector.load %arg6[%c0_682, %c0_683] : memref<1x64xf32, #tpu.memory_space<vmem>>, vector<1x64xf32>
    %559 = vector.broadcast %558 : vector<1x64xf32> to vector<56x64xf32>
    %560 = arith.mulf %557, %559 : vector<56x64xf32>
    %c0_684 = arith.constant 0 : index
    %c0_685 = arith.constant 0 : index
    %561 = vector.load %arg7[%c0_684, %c0_685] : memref<1x64xf32, #tpu.memory_space<vmem>>, vector<1x64xf32>
    %562 = vector.broadcast %561 : vector<1x64xf32> to vector<56x64xf32>
    %563 = arith.addf %560, %562 : vector<56x64xf32>
    %cst_686 = arith.constant 0.000000e+00 : f32
    %564 = vector.broadcast %cst_686 : f32 to vector<56x64xf32>
    %565 = arith.maximumf %563, %564 : vector<56x64xf32>
    %566 = vector.shape_cast %565 : vector<56x64xf32> to vector<1x7x8x64xf32>
    %567 = vector.extract_strided_slice %566 {offsets = [0, 0, 0, 0], sizes = [1, 1, 8, 64], strides = [1, 1, 1, 1]} : vector<1x7x8x64xf32> to vector<1x1x8x64xf32>
    %568 = vector.shape_cast %567 : vector<1x1x8x64xf32> to vector<1x8x64xf32>
    %569 = vector.extract_strided_slice %566 {offsets = [0, 1, 0, 0], sizes = [1, 1, 8, 64], strides = [1, 1, 1, 1]} : vector<1x7x8x64xf32> to vector<1x1x8x64xf32>
    %570 = vector.shape_cast %569 : vector<1x1x8x64xf32> to vector<1x8x64xf32>
    %571 = arith.maximumf %568, %570 : vector<1x8x64xf32>
    %572 = vector.extract_strided_slice %566 {offsets = [0, 2, 0, 0], sizes = [1, 1, 8, 64], strides = [1, 1, 1, 1]} : vector<1x7x8x64xf32> to vector<1x1x8x64xf32>
    %573 = vector.shape_cast %572 : vector<1x1x8x64xf32> to vector<1x8x64xf32>
    %574 = arith.maximumf %571, %573 : vector<1x8x64xf32>
    %c0_687 = arith.constant 0 : index
    %c0_688 = arith.constant 0 : index
    %c0_689 = arith.constant 0 : index
    %c0_690 = arith.constant 0 : index
    %575 = vector.load %arg15[%c0_687, %c0_688, %c0_689, %c0_690] : memref<1x3x8x64xf32, #tpu.memory_space<vmem>>, vector<1x1x8x64xf32>
    %576 = vector.shape_cast %575 : vector<1x1x8x64xf32> to vector<1x8x64xf32>
    %577 = vector.shape_cast %574 : vector<1x8x64xf32> to vector<1x1x8x64xf32>
    tpu.vector_store %arg15[%c0_687, %c0_688, %c0_689, %c0_690], %577 {strides = array<i32>} : memref<1x3x8x64xf32, #tpu.memory_space<vmem>>, vector<1x1x8x64xf32>,
    %578 = vector.extract_strided_slice %566 {offsets = [0, 2, 0, 0], sizes = [1, 1, 8, 64], strides = [1, 1, 1, 1]} : vector<1x7x8x64xf32> to vector<1x1x8x64xf32>
    %579 = vector.shape_cast %578 : vector<1x1x8x64xf32> to vector<1x8x64xf32>
    %580 = vector.extract_strided_slice %566 {offsets = [0, 3, 0, 0], sizes = [1, 1, 8, 64], strides = [1, 1, 1, 1]} : vector<1x7x8x64xf32> to vector<1x1x8x64xf32>
    %581 = vector.shape_cast %580 : vector<1x1x8x64xf32> to vector<1x8x64xf32>
    %582 = arith.maximumf %579, %581 : vector<1x8x64xf32>
    %583 = vector.extract_strided_slice %566 {offsets = [0, 4, 0, 0], sizes = [1, 1, 8, 64], strides = [1, 1, 1, 1]} : vector<1x7x8x64xf32> to vector<1x1x8x64xf32>
    %584 = vector.shape_cast %583 : vector<1x1x8x64xf32> to vector<1x8x64xf32>
    %585 = arith.maximumf %582, %584 : vector<1x8x64xf32>
    %c0_691 = arith.constant 0 : index
    %c1_692 = arith.constant 1 : index
    %c0_693 = arith.constant 0 : index
    %c0_694 = arith.constant 0 : index
    %586 = vector.load %arg15[%c0_691, %c1_692, %c0_693, %c0_694] : memref<1x3x8x64xf32, #tpu.memory_space<vmem>>, vector<1x1x8x64xf32>
    %587 = vector.shape_cast %586 : vector<1x1x8x64xf32> to vector<1x8x64xf32>
    %588 = vector.shape_cast %585 : vector<1x8x64xf32> to vector<1x1x8x64xf32>
    tpu.vector_store %arg15[%c0_691, %c1_692, %c0_693, %c0_694], %588 {strides = array<i32>} : memref<1x3x8x64xf32, #tpu.memory_space<vmem>>, vector<1x1x8x64xf32>,
    %589 = vector.extract_strided_slice %566 {offsets = [0, 4, 0, 0], sizes = [1, 1, 8, 64], strides = [1, 1, 1, 1]} : vector<1x7x8x64xf32> to vector<1x1x8x64xf32>
    %590 = vector.shape_cast %589 : vector<1x1x8x64xf32> to vector<1x8x64xf32>
    %591 = vector.extract_strided_slice %566 {offsets = [0, 5, 0, 0], sizes = [1, 1, 8, 64], strides = [1, 1, 1, 1]} : vector<1x7x8x64xf32> to vector<1x1x8x64xf32>
    %592 = vector.shape_cast %591 : vector<1x1x8x64xf32> to vector<1x8x64xf32>
    %593 = arith.maximumf %590, %592 : vector<1x8x64xf32>
    %594 = vector.extract_strided_slice %566 {offsets = [0, 6, 0, 0], sizes = [1, 1, 8, 64], strides = [1, 1, 1, 1]} : vector<1x7x8x64xf32> to vector<1x1x8x64xf32>
    %595 = vector.shape_cast %594 : vector<1x1x8x64xf32> to vector<1x8x64xf32>
    %596 = arith.maximumf %593, %595 : vector<1x8x64xf32>
    %c0_695 = arith.constant 0 : index
    %c2_696 = arith.constant 2 : index
    %c0_697 = arith.constant 0 : index
    %c0_698 = arith.constant 0 : index
    %597 = vector.load %arg15[%c0_695, %c2_696, %c0_697, %c0_698] : memref<1x3x8x64xf32, #tpu.memory_space<vmem>>, vector<1x1x8x64xf32>
    %598 = vector.shape_cast %597 : vector<1x1x8x64xf32> to vector<1x8x64xf32>
    %599 = vector.shape_cast %596 : vector<1x8x64xf32> to vector<1x1x8x64xf32>
    tpu.vector_store %arg15[%c0_695, %c2_696, %c0_697, %c0_698], %599 {strides = array<i32>} : memref<1x3x8x64xf32, #tpu.memory_space<vmem>>, vector<1x1x8x64xf32>,
    %cst_699 = arith.constant 0.000000e+00 : f32
    %600 = vector.broadcast %cst_699 : f32 to vector<1x7x16x64xf32>
    %c0_700 = arith.constant 0 : index
    %c0_701 = arith.constant 0 : index
    %c0_702 = arith.constant 0 : index
    %c0_703 = arith.constant 0 : index
    %601 = vector.load %arg16[%c0_700, %c0_701, %c0_702, %c0_703] : memref<1x7x16x64xf32, #tpu.memory_space<vmem>>, vector<1x7x16x64xf32>
    tpu.vector_store %arg16[%c0_700, %c0_701, %c0_702, %c0_703], %600 {strides = array<i32>} : memref<1x7x16x64xf32, #tpu.memory_space<vmem>>, vector<1x7x16x64xf32>,
    %c0_704 = arith.constant 0 : index
    %c0_705 = arith.constant 0 : index
    %c0_706 = arith.constant 0 : index
    %c0_707 = arith.constant 0 : index
    %602 = vector.load %arg15[%c0_704, %c0_705, %c0_706, %c0_707] : memref<1x3x8x64xf32, #tpu.memory_space<vmem>>, vector<1x3x1x64xf32>
    %603 = vector.shape_cast %602 : vector<1x3x1x64xf32> to vector<1x3x64xf32>
    %c0_708 = arith.constant 0 : index
    %c0_709 = arith.constant 0 : index
    %c1_710 = arith.constant 1 : index
    %c0_711 = arith.constant 0 : index
    %604 = vector.load %arg15[%c0_708, %c0_709, %c1_710, %c0_711] : memref<1x3x8x64xf32, #tpu.memory_space<vmem>>, vector<1x3x1x64xf32>
    %605 = vector.shape_cast %604 : vector<1x3x1x64xf32> to vector<1x3x64xf32>
    %606 = arith.maximumf %603, %605 : vector<1x3x64xf32>
    %c0_712 = arith.constant 0 : index
    %c0_713 = arith.constant 0 : index
    %c2_714 = arith.constant 2 : index
    %c0_715 = arith.constant 0 : index
    %607 = vector.load %arg15[%c0_712, %c0_713, %c2_714, %c0_715] : memref<1x3x8x64xf32, #tpu.memory_space<vmem>>, vector<1x3x1x64xf32>
    %608 = vector.shape_cast %607 : vector<1x3x1x64xf32> to vector<1x3x64xf32>
    %609 = arith.maximumf %606, %608 : vector<1x3x64xf32>
    %c0_716 = arith.constant 0 : index
    %c2_717 = arith.constant 2 : index
    %c2_718 = arith.constant 2 : index
    %c0_719 = arith.constant 0 : index
    %610 = vector.load %arg16[%c0_716, %c2_717, %c2_718, %c0_719] : memref<1x7x16x64xf32, #tpu.memory_space<vmem>>, vector<1x3x1x64xf32>
    %611 = vector.shape_cast %610 : vector<1x3x1x64xf32> to vector<1x3x64xf32>
    %612 = vector.shape_cast %609 : vector<1x3x64xf32> to vector<1x3x1x64xf32>
    tpu.vector_store %arg16[%c0_716, %c2_717, %c2_718, %c0_719], %612 {strides = array<i32>} : memref<1x7x16x64xf32, #tpu.memory_space<vmem>>, vector<1x3x1x64xf32>,
    %c0_720 = arith.constant 0 : index
    %c0_721 = arith.constant 0 : index
    %c2_722 = arith.constant 2 : index
    %c0_723 = arith.constant 0 : index
    %613 = vector.load %arg15[%c0_720, %c0_721, %c2_722, %c0_723] : memref<1x3x8x64xf32, #tpu.memory_space<vmem>>, vector<1x3x1x64xf32>
    %614 = vector.shape_cast %613 : vector<1x3x1x64xf32> to vector<1x3x64xf32>
    %c0_724 = arith.constant 0 : index
    %c0_725 = arith.constant 0 : index
    %c3_726 = arith.constant 3 : index
    %c0_727 = arith.constant 0 : index
    %615 = vector.load %arg15[%c0_724, %c0_725, %c3_726, %c0_727] : memref<1x3x8x64xf32, #tpu.memory_space<vmem>>, vector<1x3x1x64xf32>
    %616 = vector.shape_cast %615 : vector<1x3x1x64xf32> to vector<1x3x64xf32>
    %617 = arith.maximumf %614, %616 : vector<1x3x64xf32>
    %c0_728 = arith.constant 0 : index
    %c0_729 = arith.constant 0 : index
    %c4_730 = arith.constant 4 : index
    %c0_731 = arith.constant 0 : index
    %618 = vector.load %arg15[%c0_728, %c0_729, %c4_730, %c0_731] : memref<1x3x8x64xf32, #tpu.memory_space<vmem>>, vector<1x3x1x64xf32>
    %619 = vector.shape_cast %618 : vector<1x3x1x64xf32> to vector<1x3x64xf32>
    %620 = arith.maximumf %617, %619 : vector<1x3x64xf32>
    %c0_732 = arith.constant 0 : index
    %c2_733 = arith.constant 2 : index
    %c3_734 = arith.constant 3 : index
    %c0_735 = arith.constant 0 : index
    %621 = vector.load %arg16[%c0_732, %c2_733, %c3_734, %c0_735] : memref<1x7x16x64xf32, #tpu.memory_space<vmem>>, vector<1x3x1x64xf32>
    %622 = vector.shape_cast %621 : vector<1x3x1x64xf32> to vector<1x3x64xf32>
    %623 = vector.shape_cast %620 : vector<1x3x64xf32> to vector<1x3x1x64xf32>
    tpu.vector_store %arg16[%c0_732, %c2_733, %c3_734, %c0_735], %623 {strides = array<i32>} : memref<1x7x16x64xf32, #tpu.memory_space<vmem>>, vector<1x3x1x64xf32>,
    %c0_736 = arith.constant 0 : index
    %c0_737 = arith.constant 0 : index
    %c4_738 = arith.constant 4 : index
    %c0_739 = arith.constant 0 : index
    %624 = vector.load %arg15[%c0_736, %c0_737, %c4_738, %c0_739] : memref<1x3x8x64xf32, #tpu.memory_space<vmem>>, vector<1x3x1x64xf32>
    %625 = vector.shape_cast %624 : vector<1x3x1x64xf32> to vector<1x3x64xf32>
    %c0_740 = arith.constant 0 : index
    %c0_741 = arith.constant 0 : index
    %c5_742 = arith.constant 5 : index
    %c0_743 = arith.constant 0 : index
    %626 = vector.load %arg15[%c0_740, %c0_741, %c5_742, %c0_743] : memref<1x3x8x64xf32, #tpu.memory_space<vmem>>, vector<1x3x1x64xf32>
    %627 = vector.shape_cast %626 : vector<1x3x1x64xf32> to vector<1x3x64xf32>
    %628 = arith.maximumf %625, %627 : vector<1x3x64xf32>
    %c0_744 = arith.constant 0 : index
    %c0_745 = arith.constant 0 : index
    %c6_746 = arith.constant 6 : index
    %c0_747 = arith.constant 0 : index
    %629 = vector.load %arg15[%c0_744, %c0_745, %c6_746, %c0_747] : memref<1x3x8x64xf32, #tpu.memory_space<vmem>>, vector<1x3x1x64xf32>
    %630 = vector.shape_cast %629 : vector<1x3x1x64xf32> to vector<1x3x64xf32>
    %631 = arith.maximumf %628, %630 : vector<1x3x64xf32>
    %c0_748 = arith.constant 0 : index
    %c2_749 = arith.constant 2 : index
    %c4_750 = arith.constant 4 : index
    %c0_751 = arith.constant 0 : index
    %632 = vector.load %arg16[%c0_748, %c2_749, %c4_750, %c0_751] : memref<1x7x16x64xf32, #tpu.memory_space<vmem>>, vector<1x3x1x64xf32>
    %633 = vector.shape_cast %632 : vector<1x3x1x64xf32> to vector<1x3x64xf32>
    %634 = vector.shape_cast %631 : vector<1x3x64xf32> to vector<1x3x1x64xf32>
    tpu.vector_store %arg16[%c0_748, %c2_749, %c4_750, %c0_751], %634 {strides = array<i32>} : memref<1x7x16x64xf32, #tpu.memory_space<vmem>>, vector<1x3x1x64xf32>,
    %cst_752 = arith.constant 0.000000e+00 : f32
    %635 = vector.broadcast %cst_752 : f32 to vector<24x128xf32>
    %c0_753 = arith.constant 0 : index
    %c0_754 = arith.constant 0 : index
    %c0_755 = arith.constant 0 : index
    %c0_756 = arith.constant 0 : index
    %636 = vector.load %arg16[%c0_753, %c0_754, %c0_755, %c0_756] : memref<1x7x16x64xf32, #tpu.memory_space<vmem>>, vector<1x3x8x64xf32>
    %637 = vector.shape_cast %636 : vector<1x3x8x64xf32> to vector<24x64xf32>
    %638 = arith.truncf %637 : vector<24x64xf32> to vector<24x64xbf16>
    %c0_757 = arith.constant 0 : index
    %c0_758 = arith.constant 0 : index
    %c0_759 = arith.constant 0 : index
    %639 = vector.load %arg8[%c0_757, %c0_758, %c0_759] : memref<25x64x128xbf16, #tpu.memory_space<vmem>>, vector<1x64x128xbf16>
    %640 = vector.shape_cast %639 : vector<1x64x128xbf16> to vector<64x128xbf16>
    %cst_760 = arith.constant dense<0.000000e+00> : vector<24x128xf32>
    %641 = tpu.matmul %638, %640, %cst_760 {dimension_numbers = #tpu.dot_dimension_numbers<[1], [0], [0], [1], [0, 0, 1, 1], [], []>} : vector<24x64xbf16>, vector<64x128xbf16>, vector<24x128xf32> -> vector<24x128xf32>
    %642 = arith.addf %635, %641 : vector<24x128xf32>
    %c0_761 = arith.constant 0 : index
    %c0_762 = arith.constant 0 : index
    %c1_763 = arith.constant 1 : index
    %c0_764 = arith.constant 0 : index
    %643 = vector.load %arg16[%c0_761, %c0_762, %c1_763, %c0_764] : memref<1x7x16x64xf32, #tpu.memory_space<vmem>>, vector<1x3x8x64xf32>
    %644 = vector.shape_cast %643 : vector<1x3x8x64xf32> to vector<24x64xf32>
    %645 = arith.truncf %644 : vector<24x64xf32> to vector<24x64xbf16>
    %c1_765 = arith.constant 1 : index
    %c0_766 = arith.constant 0 : index
    %c0_767 = arith.constant 0 : index
    %646 = vector.load %arg8[%c1_765, %c0_766, %c0_767] : memref<25x64x128xbf16, #tpu.memory_space<vmem>>, vector<1x64x128xbf16>
    %647 = vector.shape_cast %646 : vector<1x64x128xbf16> to vector<64x128xbf16>
    %cst_768 = arith.constant dense<0.000000e+00> : vector<24x128xf32>
    %648 = tpu.matmul %645, %647, %cst_768 {dimension_numbers = #tpu.dot_dimension_numbers<[1], [0], [0], [1], [0, 0, 1, 1], [], []>} : vector<24x64xbf16>, vector<64x128xbf16>, vector<24x128xf32> -> vector<24x128xf32>
    %649 = arith.addf %642, %648 : vector<24x128xf32>
    %c0_769 = arith.constant 0 : index
    %c0_770 = arith.constant 0 : index
    %c2_771 = arith.constant 2 : index
    %c0_772 = arith.constant 0 : index
    %650 = vector.load %arg16[%c0_769, %c0_770, %c2_771, %c0_772] : memref<1x7x16x64xf32, #tpu.memory_space<vmem>>, vector<1x3x8x64xf32>
    %651 = vector.shape_cast %650 : vector<1x3x8x64xf32> to vector<24x64xf32>
    %652 = arith.truncf %651 : vector<24x64xf32> to vector<24x64xbf16>
    %c2_773 = arith.constant 2 : index
    %c0_774 = arith.constant 0 : index
    %c0_775 = arith.constant 0 : index
    %653 = vector.load %arg8[%c2_773, %c0_774, %c0_775] : memref<25x64x128xbf16, #tpu.memory_space<vmem>>, vector<1x64x128xbf16>
    %654 = vector.shape_cast %653 : vector<1x64x128xbf16> to vector<64x128xbf16>
    %cst_776 = arith.constant dense<0.000000e+00> : vector<24x128xf32>
    %655 = tpu.matmul %652, %654, %cst_776 {dimension_numbers = #tpu.dot_dimension_numbers<[1], [0], [0], [1], [0, 0, 1, 1], [], []>} : vector<24x64xbf16>, vector<64x128xbf16>, vector<24x128xf32> -> vector<24x128xf32>
    %656 = arith.addf %649, %655 : vector<24x128xf32>
    %c0_777 = arith.constant 0 : index
    %c0_778 = arith.constant 0 : index
    %c3_779 = arith.constant 3 : index
    %c0_780 = arith.constant 0 : index
    %657 = vector.load %arg16[%c0_777, %c0_778, %c3_779, %c0_780] : memref<1x7x16x64xf32, #tpu.memory_space<vmem>>, vector<1x3x8x64xf32>
    %658 = vector.shape_cast %657 : vector<1x3x8x64xf32> to vector<24x64xf32>
    %659 = arith.truncf %658 : vector<24x64xf32> to vector<24x64xbf16>
    %c3_781 = arith.constant 3 : index
    %c0_782 = arith.constant 0 : index
    %c0_783 = arith.constant 0 : index
    %660 = vector.load %arg8[%c3_781, %c0_782, %c0_783] : memref<25x64x128xbf16, #tpu.memory_space<vmem>>, vector<1x64x128xbf16>
    %661 = vector.shape_cast %660 : vector<1x64x128xbf16> to vector<64x128xbf16>
    %cst_784 = arith.constant dense<0.000000e+00> : vector<24x128xf32>
    %662 = tpu.matmul %659, %661, %cst_784 {dimension_numbers = #tpu.dot_dimension_numbers<[1], [0], [0], [1], [0, 0, 1, 1], [], []>} : vector<24x64xbf16>, vector<64x128xbf16>, vector<24x128xf32> -> vector<24x128xf32>
    %663 = arith.addf %656, %662 : vector<24x128xf32>
    %c0_785 = arith.constant 0 : index
    %c0_786 = arith.constant 0 : index
    %c4_787 = arith.constant 4 : index
    %c0_788 = arith.constant 0 : index
    %664 = vector.load %arg16[%c0_785, %c0_786, %c4_787, %c0_788] : memref<1x7x16x64xf32, #tpu.memory_space<vmem>>, vector<1x3x8x64xf32>
    %665 = vector.shape_cast %664 : vector<1x3x8x64xf32> to vector<24x64xf32>
    %666 = arith.truncf %665 : vector<24x64xf32> to vector<24x64xbf16>
    %c4_789 = arith.constant 4 : index
    %c0_790 = arith.constant 0 : index
    %c0_791 = arith.constant 0 : index
    %667 = vector.load %arg8[%c4_789, %c0_790, %c0_791] : memref<25x64x128xbf16, #tpu.memory_space<vmem>>, vector<1x64x128xbf16>
    %668 = vector.shape_cast %667 : vector<1x64x128xbf16> to vector<64x128xbf16>
    %cst_792 = arith.constant dense<0.000000e+00> : vector<24x128xf32>
    %669 = tpu.matmul %666, %668, %cst_792 {dimension_numbers = #tpu.dot_dimension_numbers<[1], [0], [0], [1], [0, 0, 1, 1], [], []>} : vector<24x64xbf16>, vector<64x128xbf16>, vector<24x128xf32> -> vector<24x128xf32>
    %670 = arith.addf %663, %669 : vector<24x128xf32>
    %c0_793 = arith.constant 0 : index
    %c1_794 = arith.constant 1 : index
    %c0_795 = arith.constant 0 : index
    %c0_796 = arith.constant 0 : index
    %671 = vector.load %arg16[%c0_793, %c1_794, %c0_795, %c0_796] : memref<1x7x16x64xf32, #tpu.memory_space<vmem>>, vector<1x3x8x64xf32>
    %672 = vector.shape_cast %671 : vector<1x3x8x64xf32> to vector<24x64xf32>
    %673 = arith.truncf %672 : vector<24x64xf32> to vector<24x64xbf16>
    %c5_797 = arith.constant 5 : index
    %c0_798 = arith.constant 0 : index
    %c0_799 = arith.constant 0 : index
    %674 = vector.load %arg8[%c5_797, %c0_798, %c0_799] : memref<25x64x128xbf16, #tpu.memory_space<vmem>>, vector<1x64x128xbf16>
    %675 = vector.shape_cast %674 : vector<1x64x128xbf16> to vector<64x128xbf16>
    %cst_800 = arith.constant dense<0.000000e+00> : vector<24x128xf32>
    %676 = tpu.matmul %673, %675, %cst_800 {dimension_numbers = #tpu.dot_dimension_numbers<[1], [0], [0], [1], [0, 0, 1, 1], [], []>} : vector<24x64xbf16>, vector<64x128xbf16>, vector<24x128xf32> -> vector<24x128xf32>
    %677 = arith.addf %670, %676 : vector<24x128xf32>
    %c0_801 = arith.constant 0 : index
    %c1_802 = arith.constant 1 : index
    %c1_803 = arith.constant 1 : index
    %c0_804 = arith.constant 0 : index
    %678 = vector.load %arg16[%c0_801, %c1_802, %c1_803, %c0_804] : memref<1x7x16x64xf32, #tpu.memory_space<vmem>>, vector<1x3x8x64xf32>
    %679 = vector.shape_cast %678 : vector<1x3x8x64xf32> to vector<24x64xf32>
    %680 = arith.truncf %679 : vector<24x64xf32> to vector<24x64xbf16>
    %c6_805 = arith.constant 6 : index
    %c0_806 = arith.constant 0 : index
    %c0_807 = arith.constant 0 : index
    %681 = vector.load %arg8[%c6_805, %c0_806, %c0_807] : memref<25x64x128xbf16, #tpu.memory_space<vmem>>, vector<1x64x128xbf16>
    %682 = vector.shape_cast %681 : vector<1x64x128xbf16> to vector<64x128xbf16>
    %cst_808 = arith.constant dense<0.000000e+00> : vector<24x128xf32>
    %683 = tpu.matmul %680, %682, %cst_808 {dimension_numbers = #tpu.dot_dimension_numbers<[1], [0], [0], [1], [0, 0, 1, 1], [], []>} : vector<24x64xbf16>, vector<64x128xbf16>, vector<24x128xf32> -> vector<24x128xf32>
    %684 = arith.addf %677, %683 : vector<24x128xf32>
    %c0_809 = arith.constant 0 : index
    %c1_810 = arith.constant 1 : index
    %c2_811 = arith.constant 2 : index
    %c0_812 = arith.constant 0 : index
    %685 = vector.load %arg16[%c0_809, %c1_810, %c2_811, %c0_812] : memref<1x7x16x64xf32, #tpu.memory_space<vmem>>, vector<1x3x8x64xf32>
    %686 = vector.shape_cast %685 : vector<1x3x8x64xf32> to vector<24x64xf32>
    %687 = arith.truncf %686 : vector<24x64xf32> to vector<24x64xbf16>
    %c7_813 = arith.constant 7 : index
    %c0_814 = arith.constant 0 : index
    %c0_815 = arith.constant 0 : index
    %688 = vector.load %arg8[%c7_813, %c0_814, %c0_815] : memref<25x64x128xbf16, #tpu.memory_space<vmem>>, vector<1x64x128xbf16>
    %689 = vector.shape_cast %688 : vector<1x64x128xbf16> to vector<64x128xbf16>
    %cst_816 = arith.constant dense<0.000000e+00> : vector<24x128xf32>
    %690 = tpu.matmul %687, %689, %cst_816 {dimension_numbers = #tpu.dot_dimension_numbers<[1], [0], [0], [1], [0, 0, 1, 1], [], []>} : vector<24x64xbf16>, vector<64x128xbf16>, vector<24x128xf32> -> vector<24x128xf32>
    %691 = arith.addf %684, %690 : vector<24x128xf32>
    %c0_817 = arith.constant 0 : index
    %c1_818 = arith.constant 1 : index
    %c3_819 = arith.constant 3 : index
    %c0_820 = arith.constant 0 : index
    %692 = vector.load %arg16[%c0_817, %c1_818, %c3_819, %c0_820] : memref<1x7x16x64xf32, #tpu.memory_space<vmem>>, vector<1x3x8x64xf32>
    %693 = vector.shape_cast %692 : vector<1x3x8x64xf32> to vector<24x64xf32>
    %694 = arith.truncf %693 : vector<24x64xf32> to vector<24x64xbf16>
    %c8_821 = arith.constant 8 : index
    %c0_822 = arith.constant 0 : index
    %c0_823 = arith.constant 0 : index
    %695 = vector.load %arg8[%c8_821, %c0_822, %c0_823] : memref<25x64x128xbf16, #tpu.memory_space<vmem>>, vector<1x64x128xbf16>
    %696 = vector.shape_cast %695 : vector<1x64x128xbf16> to vector<64x128xbf16>
    %cst_824 = arith.constant dense<0.000000e+00> : vector<24x128xf32>
    %697 = tpu.matmul %694, %696, %cst_824 {dimension_numbers = #tpu.dot_dimension_numbers<[1], [0], [0], [1], [0, 0, 1, 1], [], []>} : vector<24x64xbf16>, vector<64x128xbf16>, vector<24x128xf32> -> vector<24x128xf32>
    %698 = arith.addf %691, %697 : vector<24x128xf32>
    %c0_825 = arith.constant 0 : index
    %c1_826 = arith.constant 1 : index
    %c4_827 = arith.constant 4 : index
    %c0_828 = arith.constant 0 : index
    %699 = vector.load %arg16[%c0_825, %c1_826, %c4_827, %c0_828] : memref<1x7x16x64xf32, #tpu.memory_space<vmem>>, vector<1x3x8x64xf32>
    %700 = vector.shape_cast %699 : vector<1x3x8x64xf32> to vector<24x64xf32>
    %701 = arith.truncf %700 : vector<24x64xf32> to vector<24x64xbf16>
    %c9_829 = arith.constant 9 : index
    %c0_830 = arith.constant 0 : index
    %c0_831 = arith.constant 0 : index
    %702 = vector.load %arg8[%c9_829, %c0_830, %c0_831] : memref<25x64x128xbf16, #tpu.memory_space<vmem>>, vector<1x64x128xbf16>
    %703 = vector.shape_cast %702 : vector<1x64x128xbf16> to vector<64x128xbf16>
    %cst_832 = arith.constant dense<0.000000e+00> : vector<24x128xf32>
    %704 = tpu.matmul %701, %703, %cst_832 {dimension_numbers = #tpu.dot_dimension_numbers<[1], [0], [0], [1], [0, 0, 1, 1], [], []>} : vector<24x64xbf16>, vector<64x128xbf16>, vector<24x128xf32> -> vector<24x128xf32>
    %705 = arith.addf %698, %704 : vector<24x128xf32>
    %c0_833 = arith.constant 0 : index
    %c2_834 = arith.constant 2 : index
    %c0_835 = arith.constant 0 : index
    %c0_836 = arith.constant 0 : index
    %706 = vector.load %arg16[%c0_833, %c2_834, %c0_835, %c0_836] : memref<1x7x16x64xf32, #tpu.memory_space<vmem>>, vector<1x3x8x64xf32>
    %707 = vector.shape_cast %706 : vector<1x3x8x64xf32> to vector<24x64xf32>
    %708 = arith.truncf %707 : vector<24x64xf32> to vector<24x64xbf16>
    %c10_837 = arith.constant 10 : index
    %c0_838 = arith.constant 0 : index
    %c0_839 = arith.constant 0 : index
    %709 = vector.load %arg8[%c10_837, %c0_838, %c0_839] : memref<25x64x128xbf16, #tpu.memory_space<vmem>>, vector<1x64x128xbf16>
    %710 = vector.shape_cast %709 : vector<1x64x128xbf16> to vector<64x128xbf16>
    %cst_840 = arith.constant dense<0.000000e+00> : vector<24x128xf32>
    %711 = tpu.matmul %708, %710, %cst_840 {dimension_numbers = #tpu.dot_dimension_numbers<[1], [0], [0], [1], [0, 0, 1, 1], [], []>} : vector<24x64xbf16>, vector<64x128xbf16>, vector<24x128xf32> -> vector<24x128xf32>
    %712 = arith.addf %705, %711 : vector<24x128xf32>
    %c0_841 = arith.constant 0 : index
    %c2_842 = arith.constant 2 : index
    %c1_843 = arith.constant 1 : index
    %c0_844 = arith.constant 0 : index
    %713 = vector.load %arg16[%c0_841, %c2_842, %c1_843, %c0_844] : memref<1x7x16x64xf32, #tpu.memory_space<vmem>>, vector<1x3x8x64xf32>
    %714 = vector.shape_cast %713 : vector<1x3x8x64xf32> to vector<24x64xf32>
    %715 = arith.truncf %714 : vector<24x64xf32> to vector<24x64xbf16>
    %c11_845 = arith.constant 11 : index
    %c0_846 = arith.constant 0 : index
    %c0_847 = arith.constant 0 : index
    %716 = vector.load %arg8[%c11_845, %c0_846, %c0_847] : memref<25x64x128xbf16, #tpu.memory_space<vmem>>, vector<1x64x128xbf16>
    %717 = vector.shape_cast %716 : vector<1x64x128xbf16> to vector<64x128xbf16>
    %cst_848 = arith.constant dense<0.000000e+00> : vector<24x128xf32>
    %718 = tpu.matmul %715, %717, %cst_848 {dimension_numbers = #tpu.dot_dimension_numbers<[1], [0], [0], [1], [0, 0, 1, 1], [], []>} : vector<24x64xbf16>, vector<64x128xbf16>, vector<24x128xf32> -> vector<24x128xf32>
    %719 = arith.addf %712, %718 : vector<24x128xf32>
    %c0_849 = arith.constant 0 : index
    %c2_850 = arith.constant 2 : index
    %c2_851 = arith.constant 2 : index
    %c0_852 = arith.constant 0 : index
    %720 = vector.load %arg16[%c0_849, %c2_850, %c2_851, %c0_852] : memref<1x7x16x64xf32, #tpu.memory_space<vmem>>, vector<1x3x8x64xf32>
    %721 = vector.shape_cast %720 : vector<1x3x8x64xf32> to vector<24x64xf32>
    %722 = arith.truncf %721 : vector<24x64xf32> to vector<24x64xbf16>
    %c12_853 = arith.constant 12 : index
    %c0_854 = arith.constant 0 : index
    %c0_855 = arith.constant 0 : index
    %723 = vector.load %arg8[%c12_853, %c0_854, %c0_855] : memref<25x64x128xbf16, #tpu.memory_space<vmem>>, vector<1x64x128xbf16>
    %724 = vector.shape_cast %723 : vector<1x64x128xbf16> to vector<64x128xbf16>
    %cst_856 = arith.constant dense<0.000000e+00> : vector<24x128xf32>
    %725 = tpu.matmul %722, %724, %cst_856 {dimension_numbers = #tpu.dot_dimension_numbers<[1], [0], [0], [1], [0, 0, 1, 1], [], []>} : vector<24x64xbf16>, vector<64x128xbf16>, vector<24x128xf32> -> vector<24x128xf32>
    %726 = arith.addf %719, %725 : vector<24x128xf32>
    %c0_857 = arith.constant 0 : index
    %c2_858 = arith.constant 2 : index
    %c3_859 = arith.constant 3 : index
    %c0_860 = arith.constant 0 : index
    %727 = vector.load %arg16[%c0_857, %c2_858, %c3_859, %c0_860] : memref<1x7x16x64xf32, #tpu.memory_space<vmem>>, vector<1x3x8x64xf32>
    %728 = vector.shape_cast %727 : vector<1x3x8x64xf32> to vector<24x64xf32>
    %729 = arith.truncf %728 : vector<24x64xf32> to vector<24x64xbf16>
    %c13_861 = arith.constant 13 : index
    %c0_862 = arith.constant 0 : index
    %c0_863 = arith.constant 0 : index
    %730 = vector.load %arg8[%c13_861, %c0_862, %c0_863] : memref<25x64x128xbf16, #tpu.memory_space<vmem>>, vector<1x64x128xbf16>
    %731 = vector.shape_cast %730 : vector<1x64x128xbf16> to vector<64x128xbf16>
    %cst_864 = arith.constant dense<0.000000e+00> : vector<24x128xf32>
    %732 = tpu.matmul %729, %731, %cst_864 {dimension_numbers = #tpu.dot_dimension_numbers<[1], [0], [0], [1], [0, 0, 1, 1], [], []>} : vector<24x64xbf16>, vector<64x128xbf16>, vector<24x128xf32> -> vector<24x128xf32>
    %733 = arith.addf %726, %732 : vector<24x128xf32>
    %c0_865 = arith.constant 0 : index
    %c2_866 = arith.constant 2 : index
    %c4_867 = arith.constant 4 : index
    %c0_868 = arith.constant 0 : index
    %734 = vector.load %arg16[%c0_865, %c2_866, %c4_867, %c0_868] : memref<1x7x16x64xf32, #tpu.memory_space<vmem>>, vector<1x3x8x64xf32>
    %735 = vector.shape_cast %734 : vector<1x3x8x64xf32> to vector<24x64xf32>
    %736 = arith.truncf %735 : vector<24x64xf32> to vector<24x64xbf16>
    %c14_869 = arith.constant 14 : index
    %c0_870 = arith.constant 0 : index
    %c0_871 = arith.constant 0 : index
    %737 = vector.load %arg8[%c14_869, %c0_870, %c0_871] : memref<25x64x128xbf16, #tpu.memory_space<vmem>>, vector<1x64x128xbf16>
    %738 = vector.shape_cast %737 : vector<1x64x128xbf16> to vector<64x128xbf16>
    %cst_872 = arith.constant dense<0.000000e+00> : vector<24x128xf32>
    %739 = tpu.matmul %736, %738, %cst_872 {dimension_numbers = #tpu.dot_dimension_numbers<[1], [0], [0], [1], [0, 0, 1, 1], [], []>} : vector<24x64xbf16>, vector<64x128xbf16>, vector<24x128xf32> -> vector<24x128xf32>
    %740 = arith.addf %733, %739 : vector<24x128xf32>
    %c0_873 = arith.constant 0 : index
    %c3_874 = arith.constant 3 : index
    %c0_875 = arith.constant 0 : index
    %c0_876 = arith.constant 0 : index
    %741 = vector.load %arg16[%c0_873, %c3_874, %c0_875, %c0_876] : memref<1x7x16x64xf32, #tpu.memory_space<vmem>>, vector<1x3x8x64xf32>
    %742 = vector.shape_cast %741 : vector<1x3x8x64xf32> to vector<24x64xf32>
    %743 = arith.truncf %742 : vector<24x64xf32> to vector<24x64xbf16>
    %c15_877 = arith.constant 15 : index
    %c0_878 = arith.constant 0 : index
    %c0_879 = arith.constant 0 : index
    %744 = vector.load %arg8[%c15_877, %c0_878, %c0_879] : memref<25x64x128xbf16, #tpu.memory_space<vmem>>, vector<1x64x128xbf16>
    %745 = vector.shape_cast %744 : vector<1x64x128xbf16> to vector<64x128xbf16>
    %cst_880 = arith.constant dense<0.000000e+00> : vector<24x128xf32>
    %746 = tpu.matmul %743, %745, %cst_880 {dimension_numbers = #tpu.dot_dimension_numbers<[1], [0], [0], [1], [0, 0, 1, 1], [], []>} : vector<24x64xbf16>, vector<64x128xbf16>, vector<24x128xf32> -> vector<24x128xf32>
    %747 = arith.addf %740, %746 : vector<24x128xf32>
    %c0_881 = arith.constant 0 : index
    %c3_882 = arith.constant 3 : index
    %c1_883 = arith.constant 1 : index
    %c0_884 = arith.constant 0 : index
    %748 = vector.load %arg16[%c0_881, %c3_882, %c1_883, %c0_884] : memref<1x7x16x64xf32, #tpu.memory_space<vmem>>, vector<1x3x8x64xf32>
    %749 = vector.shape_cast %748 : vector<1x3x8x64xf32> to vector<24x64xf32>
    %750 = arith.truncf %749 : vector<24x64xf32> to vector<24x64xbf16>
    %c16_885 = arith.constant 16 : index
    %c0_886 = arith.constant 0 : index
    %c0_887 = arith.constant 0 : index
    %751 = vector.load %arg8[%c16_885, %c0_886, %c0_887] : memref<25x64x128xbf16, #tpu.memory_space<vmem>>, vector<1x64x128xbf16>
    %752 = vector.shape_cast %751 : vector<1x64x128xbf16> to vector<64x128xbf16>
    %cst_888 = arith.constant dense<0.000000e+00> : vector<24x128xf32>
    %753 = tpu.matmul %750, %752, %cst_888 {dimension_numbers = #tpu.dot_dimension_numbers<[1], [0], [0], [1], [0, 0, 1, 1], [], []>} : vector<24x64xbf16>, vector<64x128xbf16>, vector<24x128xf32> -> vector<24x128xf32>
    %754 = arith.addf %747, %753 : vector<24x128xf32>
    %c0_889 = arith.constant 0 : index
    %c3_890 = arith.constant 3 : index
    %c2_891 = arith.constant 2 : index
    %c0_892 = arith.constant 0 : index
    %755 = vector.load %arg16[%c0_889, %c3_890, %c2_891, %c0_892] : memref<1x7x16x64xf32, #tpu.memory_space<vmem>>, vector<1x3x8x64xf32>
    %756 = vector.shape_cast %755 : vector<1x3x8x64xf32> to vector<24x64xf32>
    %757 = arith.truncf %756 : vector<24x64xf32> to vector<24x64xbf16>
    %c17_893 = arith.constant 17 : index
    %c0_894 = arith.constant 0 : index
    %c0_895 = arith.constant 0 : index
    %758 = vector.load %arg8[%c17_893, %c0_894, %c0_895] : memref<25x64x128xbf16, #tpu.memory_space<vmem>>, vector<1x64x128xbf16>
    %759 = vector.shape_cast %758 : vector<1x64x128xbf16> to vector<64x128xbf16>
    %cst_896 = arith.constant dense<0.000000e+00> : vector<24x128xf32>
    %760 = tpu.matmul %757, %759, %cst_896 {dimension_numbers = #tpu.dot_dimension_numbers<[1], [0], [0], [1], [0, 0, 1, 1], [], []>} : vector<24x64xbf16>, vector<64x128xbf16>, vector<24x128xf32> -> vector<24x128xf32>
    %761 = arith.addf %754, %760 : vector<24x128xf32>
    %c0_897 = arith.constant 0 : index
    %c3_898 = arith.constant 3 : index
    %c3_899 = arith.constant 3 : index
    %c0_900 = arith.constant 0 : index
    %762 = vector.load %arg16[%c0_897, %c3_898, %c3_899, %c0_900] : memref<1x7x16x64xf32, #tpu.memory_space<vmem>>, vector<1x3x8x64xf32>
    %763 = vector.shape_cast %762 : vector<1x3x8x64xf32> to vector<24x64xf32>
    %764 = arith.truncf %763 : vector<24x64xf32> to vector<24x64xbf16>
    %c18_901 = arith.constant 18 : index
    %c0_902 = arith.constant 0 : index
    %c0_903 = arith.constant 0 : index
    %765 = vector.load %arg8[%c18_901, %c0_902, %c0_903] : memref<25x64x128xbf16, #tpu.memory_space<vmem>>, vector<1x64x128xbf16>
    %766 = vector.shape_cast %765 : vector<1x64x128xbf16> to vector<64x128xbf16>
    %cst_904 = arith.constant dense<0.000000e+00> : vector<24x128xf32>
    %767 = tpu.matmul %764, %766, %cst_904 {dimension_numbers = #tpu.dot_dimension_numbers<[1], [0], [0], [1], [0, 0, 1, 1], [], []>} : vector<24x64xbf16>, vector<64x128xbf16>, vector<24x128xf32> -> vector<24x128xf32>
    %768 = arith.addf %761, %767 : vector<24x128xf32>
    %c0_905 = arith.constant 0 : index
    %c3_906 = arith.constant 3 : index
    %c4_907 = arith.constant 4 : index
    %c0_908 = arith.constant 0 : index
    %769 = vector.load %arg16[%c0_905, %c3_906, %c4_907, %c0_908] : memref<1x7x16x64xf32, #tpu.memory_space<vmem>>, vector<1x3x8x64xf32>
    %770 = vector.shape_cast %769 : vector<1x3x8x64xf32> to vector<24x64xf32>
    %771 = arith.truncf %770 : vector<24x64xf32> to vector<24x64xbf16>
    %c19_909 = arith.constant 19 : index
    %c0_910 = arith.constant 0 : index
    %c0_911 = arith.constant 0 : index
    %772 = vector.load %arg8[%c19_909, %c0_910, %c0_911] : memref<25x64x128xbf16, #tpu.memory_space<vmem>>, vector<1x64x128xbf16>
    %773 = vector.shape_cast %772 : vector<1x64x128xbf16> to vector<64x128xbf16>
    %cst_912 = arith.constant dense<0.000000e+00> : vector<24x128xf32>
    %774 = tpu.matmul %771, %773, %cst_912 {dimension_numbers = #tpu.dot_dimension_numbers<[1], [0], [0], [1], [0, 0, 1, 1], [], []>} : vector<24x64xbf16>, vector<64x128xbf16>, vector<24x128xf32> -> vector<24x128xf32>
    %775 = arith.addf %768, %774 : vector<24x128xf32>
    %c0_913 = arith.constant 0 : index
    %c4_914 = arith.constant 4 : index
    %c0_915 = arith.constant 0 : index
    %c0_916 = arith.constant 0 : index
    %776 = vector.load %arg16[%c0_913, %c4_914, %c0_915, %c0_916] : memref<1x7x16x64xf32, #tpu.memory_space<vmem>>, vector<1x3x8x64xf32>
    %777 = vector.shape_cast %776 : vector<1x3x8x64xf32> to vector<24x64xf32>
    %778 = arith.truncf %777 : vector<24x64xf32> to vector<24x64xbf16>
    %c20_917 = arith.constant 20 : index
    %c0_918 = arith.constant 0 : index
    %c0_919 = arith.constant 0 : index
    %779 = vector.load %arg8[%c20_917, %c0_918, %c0_919] : memref<25x64x128xbf16, #tpu.memory_space<vmem>>, vector<1x64x128xbf16>
    %780 = vector.shape_cast %779 : vector<1x64x128xbf16> to vector<64x128xbf16>
    %cst_920 = arith.constant dense<0.000000e+00> : vector<24x128xf32>
    %781 = tpu.matmul %778, %780, %cst_920 {dimension_numbers = #tpu.dot_dimension_numbers<[1], [0], [0], [1], [0, 0, 1, 1], [], []>} : vector<24x64xbf16>, vector<64x128xbf16>, vector<24x128xf32> -> vector<24x128xf32>
    %782 = arith.addf %775, %781 : vector<24x128xf32>
    %c0_921 = arith.constant 0 : index
    %c4_922 = arith.constant 4 : index
    %c1_923 = arith.constant 1 : index
    %c0_924 = arith.constant 0 : index
    %783 = vector.load %arg16[%c0_921, %c4_922, %c1_923, %c0_924] : memref<1x7x16x64xf32, #tpu.memory_space<vmem>>, vector<1x3x8x64xf32>
    %784 = vector.shape_cast %783 : vector<1x3x8x64xf32> to vector<24x64xf32>
    %785 = arith.truncf %784 : vector<24x64xf32> to vector<24x64xbf16>
    %c21_925 = arith.constant 21 : index
    %c0_926 = arith.constant 0 : index
    %c0_927 = arith.constant 0 : index
    %786 = vector.load %arg8[%c21_925, %c0_926, %c0_927] : memref<25x64x128xbf16, #tpu.memory_space<vmem>>, vector<1x64x128xbf16>
    %787 = vector.shape_cast %786 : vector<1x64x128xbf16> to vector<64x128xbf16>
    %cst_928 = arith.constant dense<0.000000e+00> : vector<24x128xf32>
    %788 = tpu.matmul %785, %787, %cst_928 {dimension_numbers = #tpu.dot_dimension_numbers<[1], [0], [0], [1], [0, 0, 1, 1], [], []>} : vector<24x64xbf16>, vector<64x128xbf16>, vector<24x128xf32> -> vector<24x128xf32>
    %789 = arith.addf %782, %788 : vector<24x128xf32>
    %c0_929 = arith.constant 0 : index
    %c4_930 = arith.constant 4 : index
    %c2_931 = arith.constant 2 : index
    %c0_932 = arith.constant 0 : index
    %790 = vector.load %arg16[%c0_929, %c4_930, %c2_931, %c0_932] : memref<1x7x16x64xf32, #tpu.memory_space<vmem>>, vector<1x3x8x64xf32>
    %791 = vector.shape_cast %790 : vector<1x3x8x64xf32> to vector<24x64xf32>
    %792 = arith.truncf %791 : vector<24x64xf32> to vector<24x64xbf16>
    %c22_933 = arith.constant 22 : index
    %c0_934 = arith.constant 0 : index
    %c0_935 = arith.constant 0 : index
    %793 = vector.load %arg8[%c22_933, %c0_934, %c0_935] : memref<25x64x128xbf16, #tpu.memory_space<vmem>>, vector<1x64x128xbf16>
    %794 = vector.shape_cast %793 : vector<1x64x128xbf16> to vector<64x128xbf16>
    %cst_936 = arith.constant dense<0.000000e+00> : vector<24x128xf32>
    %795 = tpu.matmul %792, %794, %cst_936 {dimension_numbers = #tpu.dot_dimension_numbers<[1], [0], [0], [1], [0, 0, 1, 1], [], []>} : vector<24x64xbf16>, vector<64x128xbf16>, vector<24x128xf32> -> vector<24x128xf32>
    %796 = arith.addf %789, %795 : vector<24x128xf32>
    %c0_937 = arith.constant 0 : index
    %c4_938 = arith.constant 4 : index
    %c3_939 = arith.constant 3 : index
    %c0_940 = arith.constant 0 : index
    %797 = vector.load %arg16[%c0_937, %c4_938, %c3_939, %c0_940] : memref<1x7x16x64xf32, #tpu.memory_space<vmem>>, vector<1x3x8x64xf32>
    %798 = vector.shape_cast %797 : vector<1x3x8x64xf32> to vector<24x64xf32>
    %799 = arith.truncf %798 : vector<24x64xf32> to vector<24x64xbf16>
    %c23_941 = arith.constant 23 : index
    %c0_942 = arith.constant 0 : index
    %c0_943 = arith.constant 0 : index
    %800 = vector.load %arg8[%c23_941, %c0_942, %c0_943] : memref<25x64x128xbf16, #tpu.memory_space<vmem>>, vector<1x64x128xbf16>
    %801 = vector.shape_cast %800 : vector<1x64x128xbf16> to vector<64x128xbf16>
    %cst_944 = arith.constant dense<0.000000e+00> : vector<24x128xf32>
    %802 = tpu.matmul %799, %801, %cst_944 {dimension_numbers = #tpu.dot_dimension_numbers<[1], [0], [0], [1], [0, 0, 1, 1], [], []>} : vector<24x64xbf16>, vector<64x128xbf16>, vector<24x128xf32> -> vector<24x128xf32>
    %803 = arith.addf %796, %802 : vector<24x128xf32>
    %c0_945 = arith.constant 0 : index
    %c4_946 = arith.constant 4 : index
    %c4_947 = arith.constant 4 : index
    %c0_948 = arith.constant 0 : index
    %804 = vector.load %arg16[%c0_945, %c4_946, %c4_947, %c0_948] : memref<1x7x16x64xf32, #tpu.memory_space<vmem>>, vector<1x3x8x64xf32>
    %805 = vector.shape_cast %804 : vector<1x3x8x64xf32> to vector<24x64xf32>
    %806 = arith.truncf %805 : vector<24x64xf32> to vector<24x64xbf16>
    %c24_949 = arith.constant 24 : index
    %c0_950 = arith.constant 0 : index
    %c0_951 = arith.constant 0 : index
    %807 = vector.load %arg8[%c24_949, %c0_950, %c0_951] : memref<25x64x128xbf16, #tpu.memory_space<vmem>>, vector<1x64x128xbf16>
    %808 = vector.shape_cast %807 : vector<1x64x128xbf16> to vector<64x128xbf16>
    %cst_952 = arith.constant dense<0.000000e+00> : vector<24x128xf32>
    %809 = tpu.matmul %806, %808, %cst_952 {dimension_numbers = #tpu.dot_dimension_numbers<[1], [0], [0], [1], [0, 0, 1, 1], [], []>} : vector<24x64xbf16>, vector<64x128xbf16>, vector<24x128xf32> -> vector<24x128xf32>
    %810 = arith.addf %803, %809 : vector<24x128xf32>
    %c0_953 = arith.constant 0 : index
    %c0_954 = arith.constant 0 : index
    %811 = vector.load %arg9[%c0_953, %c0_954] : memref<1x128xf32, #tpu.memory_space<vmem>>, vector<1x128xf32>
    %812 = vector.broadcast %811 : vector<1x128xf32> to vector<24x128xf32>
    %813 = arith.mulf %810, %812 : vector<24x128xf32>
    %c0_955 = arith.constant 0 : index
    %c0_956 = arith.constant 0 : index
    %814 = vector.load %arg10[%c0_955, %c0_956] : memref<1x128xf32, #tpu.memory_space<vmem>>, vector<1x128xf32>
    %815 = vector.broadcast %814 : vector<1x128xf32> to vector<24x128xf32>
    %816 = arith.addf %813, %815 : vector<24x128xf32>
    %cst_957 = arith.constant 0.000000e+00 : f32
    %817 = vector.broadcast %cst_957 : f32 to vector<24x128xf32>
    %818 = arith.maximumf %816, %817 : vector<24x128xf32>
    %819 = vector.shape_cast %818 : vector<24x128xf32> to vector<1x3x8x128xf32>
    %820 = vector.extract_strided_slice %819 {offsets = [0, 0, 0, 0], sizes = [1, 3, 3, 128], strides = [1, 1, 1, 1]} : vector<1x3x8x128xf32> to vector<1x3x3x128xf32>
    %c0_958 = arith.constant 0 : index
    %c0_959 = arith.constant 0 : index
    %c0_960 = arith.constant 0 : index
    %c0_961 = arith.constant 0 : index
    %821 = vector.load %arg11[%c0_958, %c0_959, %c0_960, %c0_961] : memref<1x3x3x128xf32, #tpu.memory_space<vmem>>, vector<1x3x3x128xf32>
    tpu.vector_store %arg11[%c0_958, %c0_959, %c0_960, %c0_961], %820 {strides = array<i32>} : memref<1x3x3x128xf32, #tpu.memory_space<vmem>>, vector<1x3x3x128xf32>,
    return
  }
  func.func @transform_0(%arg0: i32) -> (i32, i32, i32, i32) {
    %c0_i32 = arith.constant 0 : i32
    %c0_i32_0 = arith.constant 0 : i32
    %c0_i32_1 = arith.constant 0 : i32
    %c0_i32_2 = arith.constant 0 : i32
    return %arg0, %c0_i32, %c0_i32_0, %c0_i32_1 : i32, i32, i32, i32
  }
  func.func @transform_1(%arg0: i32) -> (i32, i32, i32) {
    %c0_i32 = arith.constant 0 : i32
    %c0_i32_0 = arith.constant 0 : i32
    %c0_i32_1 = arith.constant 0 : i32
    %c0_i32_2 = arith.constant 0 : i32
    return %c0_i32, %c0_i32_0, %c0_i32_1 : i32, i32, i32
  }
  func.func @transform_2(%arg0: i32) -> (i32, i32) {
    %c0_i32 = arith.constant 0 : i32
    %c0_i32_0 = arith.constant 0 : i32
    %c0_i32_1 = arith.constant 0 : i32
    return %c0_i32, %c0_i32_0 : i32, i32
  }
  func.func @transform_3(%arg0: i32) -> (i32, i32) {
    %c0_i32 = arith.constant 0 : i32
    %c0_i32_0 = arith.constant 0 : i32
    %c0_i32_1 = arith.constant 0 : i32
    return %c0_i32, %c0_i32_0 : i32, i32
  }
  func.func @transform_4(%arg0: i32) -> (i32, i32, i32) {
    %c0_i32 = arith.constant 0 : i32
    %c0_i32_0 = arith.constant 0 : i32
    %c0_i32_1 = arith.constant 0 : i32
    %c0_i32_2 = arith.constant 0 : i32
    return %c0_i32, %c0_i32_0, %c0_i32_1 : i32, i32, i32
  }
  func.func @transform_5(%arg0: i32) -> (i32, i32) {
    %c0_i32 = arith.constant 0 : i32
    %c0_i32_0 = arith.constant 0 : i32
    %c0_i32_1 = arith.constant 0 : i32
    return %c0_i32, %c0_i32_0 : i32, i32
  }
  func.func @transform_6(%arg0: i32) -> (i32, i32) {
    %c0_i32 = arith.constant 0 : i32
    %c0_i32_0 = arith.constant 0 : i32
    %c0_i32_1 = arith.constant 0 : i32
    return %c0_i32, %c0_i32_0 : i32, i32
  }
  func.func @transform_7(%arg0: i32) -> (i32, i32, i32) {
    %c0_i32 = arith.constant 0 : i32
    %c0_i32_0 = arith.constant 0 : i32
    %c0_i32_1 = arith.constant 0 : i32
    %c0_i32_2 = arith.constant 0 : i32
    return %c0_i32, %c0_i32_0, %c0_i32_1 : i32, i32, i32
  }
  func.func @transform_8(%arg0: i32) -> (i32, i32) {
    %c0_i32 = arith.constant 0 : i32
    %c0_i32_0 = arith.constant 0 : i32
    %c0_i32_1 = arith.constant 0 : i32
    return %c0_i32, %c0_i32_0 : i32, i32
  }
  func.func @transform_9(%arg0: i32) -> (i32, i32) {
    %c0_i32 = arith.constant 0 : i32
    %c0_i32_0 = arith.constant 0 : i32
    %c0_i32_1 = arith.constant 0 : i32
    return %c0_i32, %c0_i32_0 : i32, i32
  }
  func.func @transform_10(%arg0: i32) -> (i32, i32, i32, i32) {
    %c0_i32 = arith.constant 0 : i32
    %c0_i32_0 = arith.constant 0 : i32
    %c0_i32_1 = arith.constant 0 : i32
    %c0_i32_2 = arith.constant 0 : i32
    return %arg0, %c0_i32, %c0_i32_0, %c0_i32_1 : i32, i32, i32, i32
  }
}

</mosaic_0001>

<bundles_post_ra>
// kernel: _lambda_.1
= control target key start
LH: loop header
LB: loop body
LE: loop exit
PB: predicated region body
PF: predicated region fallthrough
CT: control target
= control target key end

     0   :  { %s14623_s13 = smov 0   ;;  %s17506_s0 = inlined_call_operand.vmem [shape: f32[2,28,24,15], index: 0, kind: input, shape index: {}]   ;;  %s17507_s1 = inlined_call_operand.vmem [shape: bf16[5,15,64], index: 1, kind: input, shape index: {}]   ;;  %s17508_s2 = inlined_call_operand.vmem [shape: f32[1,64], index: 2, kind: input, shape index: {}, may-alias: {2,5}]   ;;  %s17509_s3 = inlined_call_operand.vmem [shape: f32[1,64], index: 3, kind: input, shape index: {}, may-alias: {3,6}]   ;;  %s17510_s4 = inlined_call_operand.vmem [shape: bf16[25,64,64], index: 4, kind: input, shape index: {}]   ;;  %s17511_s5 = inlined_call_operand.vmem [shape: f32[1,64], index: 5, kind: input, shape index: {}, may-alias: {2,5}]   ;;  %s17512_s6 = inlined_call_operand.vmem [shape: f32[1,64], index: 6, kind: input, shape index: {}, may-alias: {3,6}]   ;;  %s17513_s7 = inlined_call_operand.vmem [shape: bf16[25,64,128], index: 7, kind: input, shape index: {}]   ;;  %s17514_s8 = inlined_call_operand.vmem [shape: f32[1,128], index: 8, kind: input, shape index: {}]   ;;  %s17515_s9 = inlined_call_operand.vmem [shape: f32[1,128], index: 9, kind: input, shape index: {}]   ;;  %s17516_s10 = inlined_call_operand.vmem [shape: f32[2,3,3,128], index: 10, kind: output, shape index: {}]  }
   0x1 LB: > { %s10806_s14 = sadd.s32 4294967295, %s14564_s13   ;;  %p10810_p0 = scmp.ge.s32.totalorder %s14564_s13, 1  ;;  %s14564_s13 = sphi %s14623_s13, %s20_s13  }
   0x2   : > { %p312_p1 = scmp.lt.s32.totalorder %s14564_s13, 3 }
   0x4   : > { %p313_p2 = pnand %p10810_p0, %p312_p1 }
   0x6   : > { %316 = sbr.rel (%p313_p2) target bundleno = 1889 (0x761), region = 60 }
   0xd   : > { %v14339_v0 = vld [vmem:[%s17507_s1 + $0x8] sm:$0xff]   ;;  %vm481_vm0 = vcmask 1046528   ;;  %vm482_vm1 = vcmask 1047552   ;;  %v14566_v1 = vmov 65535   ;;  %v14340_v3 = vld [vmem:[%s17507_s1 + $0x10] sm:$0xff]   ;;  %p350_p3 = scmp.lt.s32.totalorder %s10806_s14, 1 }
   0xe   : > { %v483_v2 = vsel %vm481_vm0, 4294967295, %v14566_v1  ;;  %v14341_v5 = vld [vmem:[%s17507_s1] sm:$0xff]   ;;  %v14342_v8 = vld [vmem:[%s17507_s1 + $0x18] sm:$0xff]   ;;  %vm444_vm2 = vcmask 121856   ;;  %v14346_v52 = vld [vmem:[%s17507_s1 + $0x8] sm:$0xff]   ;;  %vm1587_vm3 = vcmask 523264  }
   0xf   : > { %v14637_v4 = vsel %vm482_vm1, %v483_v2, 0  ;;  %s17608_s14 = smov (!%p350_p3, %s10806_s14), 1  ;;  %v14343_v11 = vld [vmem:[%s17507_s1 + $0x20] sm:$0xff]   ;;  %v14344_v63 = vld [vmem:[%s17507_s1 + $0x8] sm:$0xff]   ;;  %vm4403_vm4 = vcmask 516096  }
  0x10   : > { %v486_v6 = vand.u32 %v14339_v0, %v14637_v4  ;;  %v14644_v7 = vand.u32 %v14340_v3, %v14637_v4  ;;  %v659_v9 = vand.u32 %v14341_v5, %v14637_v4  ;;  %s14327_s23 = smul.u32 672, %s17608_s14  ;;  %v1109_v10 = vand.u32 %v14342_v8, %v14637_v4 }
  0x11   : > { %v1346_v27 = vand.u32 %v14343_v11, %v14637_v4  ;;  %v2975_v57 = vand.u32 %v14346_v52, %v14637_v4  ;;  %v1732_v2 = vand.u32 %v14344_v63, %v14637_v4 }
  0x12   : > { %12659 = vmatprep.subr.bf16.mxu1 %v486_v6  ;;  %12711 = vmatprep.subr.bf16.mxu0 %v14644_v7  ;;  %s14659_s26 = scalar_lea.vmem %s17506_s0, %s14327_s23 }
  0x13   : > { %12660 = vmatpush3.bf16.msra.mxu1 %v486_v6  ;;  %12712 = vmatpush3.bf16.msra.mxu0 %v14644_v7  ;;  %v14665_v12 = vld [vmem:[%s14659_s26 + $0x18] sm:$0xff]  ;;  %v14668_v13 = vld [vmem:[%s14659_s26 + $0x20] sm:$0xff]  ;;  %v10865_v14 = vld [vmem:[%s14659_s26 + $0x30] sm:$0xff] }
  0x14   : > { %12685 = vmatprep.subr.bf16.mxu1 %v659_v9  ;;  %12737 = vmatprep.subr.bf16.mxu0 %v1109_v10  ;;  %v424_v15 = vpack.c.bf16 %v14668_v13, %v14665_v12  ;;  %v10866_v16 = vld [vmem:[%s14659_s26 + $0x38] sm:$0xff]  ;;  %v14675_v17 = vld [vmem:[%s14659_s26 + $0x28] sm:$0xff]  ;;  %v10867_v18 = vld [vmem:[%s14659_s26 + $0x40] sm:$0xff] }
  0x15   : > { %v14678_v19 = vpack.c.bf16 %v10866_v16, %v10865_v14  ;;  %v425_v20 = vpack.c.bf16 %v10865_v14, %v14675_v17  ;;  %v10868_v21 = vld [vmem:[%s14659_s26 + $0x48] sm:$0xff]  ;;  %v426_v22 = vpack.c.bf16 %v10867_v18, %v10866_v16  ;;  %v10869_v23 = vld [vmem:[%s14659_s26 + $0x50] sm:$0xff]  ;;  %v10870_v24 = vld [vmem:[%s14659_s26 + $0x58] sm:$0xff]  ;;  %v387_v1 = vpack.c.bf16 %v14675_v17, %v14668_v13 }
  0x16   : > { %12661 = vmatprep.mubr.msk.bf16.mxu1 %vm444_vm2, %v424_v15  ;;  %v14685_v25 = vpack.c.bf16 %v10868_v21, %v10867_v18  ;;  %v14687_v26 = vpack.c.bf16 %v10870_v24, %v10869_v23  ;;  %v10871_v28 = vld [vmem:[%s14659_s26 + $0x60] sm:$0xff]  ;;  %v10872_v29 = vld [vmem:[%s14659_s26 + $0x68] sm:$0xff]  ;;  %v10873_v30 = vld [vmem:[%s14659_s26 + $0x70] sm:$0xff]  ;;  %v427_v32 = vpack.c.bf16 %v10869_v23, %v10868_v21 }
  0x17   : > { %12713 = vmatprep.mubr.msk.bf16.mxu0 %vm444_vm2, %v14678_v19  ;;  %12662 = vmatmul.mubr.msk.bf16.vlgmr.msra.gmra.mrb[0].mxu1 %vm444_vm2, %v425_v20  ;;  %v10874_v31 = vld [vmem:[%s14659_s26 + $0x78] sm:$0xff]  ;;  %v14703_v33 = vpack.c.bf16 %v10872_v29, %v10871_v28  ;;  %v428_v34 = vpack.c.bf16 %v10871_v28, %v10870_v24  ;;  %v10875_v36 = vld [vmem:[%s14659_s26 + $0x80] sm:$0xff]  ;;  %v10876_v37 = vld [vmem:[%s14659_s26 + $0x88] sm:$0xff]  ;;  %v429_v40 = vpack.c.bf16 %v10873_v30, %v10872_v29 }
  0x18   : > { %12686 = vmatpush3.bf16.msra.mxu1 %v659_v9  ;;  %12714 = vmatmul.mubr.msk.bf16.vlgmr.msra.gmra.mrb[0].mxu0 %vm444_vm2, %v14685_v25  ;;  %v14705_v35 = vpack.c.bf16 %v10874_v31, %v10873_v30  ;;  %v10877_v38 = vld [vmem:[%s14659_s26 + $0x90] sm:$0xff]  ;;  %v10878_v39 = vld [vmem:[%s14659_s26 + $0x98] sm:$0xff]  ;;  %v14717_v41 = vpack.c.bf16 %v10876_v37, %v10875_v36  ;;  %v430_v42 = vpack.c.bf16 %v10875_v36, %v10874_v31  ;;  %v10879_v44 = vld [vmem:[%s14659_s26 + $0xa0] sm:$0xff] }
  0x19   : > { %12665 = vmatprep.mubr.msk.bf16.mxu1 %vm444_vm2, %v426_v22  ;;  %12717 = vmatprep.mubr.msk.bf16.mxu0 %vm444_vm2, %v14687_v26  ;;  %v14719_v43 = vpack.c.bf16 %v10878_v39, %v10877_v38  ;;  %v10880_v45 = vld [vmem:[%s14659_s26 + $0xa8] sm:$0xff]  ;;  %v431_v46 = vpack.c.bf16 %v10877_v38, %v10876_v37  ;;  %v432_v48 = vpack.c.bf16 %v10879_v44, %v10878_v39  ;;  %v14736_v49 = vld [vmem:[%s14659_s26 + $0xb0] sm:$0xff]  ;;  %v14739_v50 = vld [vmem:[%s14659_s26 + $0xb8] sm:$0xff] }
  0x1a   : > { %12738 = vmatpush3.bf16.msra.mxu0 %v1109_v10  ;;  %13749 = vmatprep.subr.bf16.mxu1 %v14644_v7  ;;  %v14729_v47 = vpack.c.bf16 %v10880_v45, %v10879_v44  ;;  %v14742_v51 = vld [vmem:[%s14659_s26 + $0xc0] sm:$0xff]  ;;  %v433_v53 = vpack.c.bf16 %v14736_v49, %v10880_v45  ;;  %v14752_v55 = vld [vmem:[%s14659_s26 + $0xc8] sm:$0xff]  ;;  %v14755_v56 = vld [vmem:[%s14659_s26 + $0xd0] sm:$0xff]  ;;  %v396_v15 = vpack.c.bf16 %v14739_v50, %v14736_v49 }
  0x1b   : > { %12763 = vmatprep.subr.bf16.mxu0 %v1346_v27  ;;  %v434_v54 = vpack.c.bf16 %v14742_v51, %v14739_v50  ;;  %v361_v58 = vld [vmem:[%s14659_s26] sm:$0xff]  ;;  %v362_v59 = vld [vmem:[%s14659_s26 + $0x8] sm:$0xff]  ;;  %v435_v60 = vpack.c.bf16 %v14755_v56, %v14752_v55  ;;  %v363_v62 = vld [vmem:[%s14659_s26 + $0x10] sm:$0xff]  ;;  %v14836_v17 = vpack.c.bf16 %v14752_v55, %v14742_v51 }
  0x1c   : > { %v385_v61 = vpack.c.bf16 %v362_v59, %v361_v58  ;;  %v386_v0 = vpack.c.bf16 %v14665_v12, %v363_v62  ;;  %v10922_v3 = vld [vmem:[%s14659_s26 + $0xd8] sm:$0xff]  ;;  %v10923_v5 = vld [vmem:[%s14659_s26 + $0xe0] sm:$0xff]  ;;  %v10924_v6 = vld [vmem:[%s14659_s26 + $0xe8] sm:$0xff] }
  0x1d   : > { %v1061_v8 = vpack.c.bf16 %v10923_v5, %v10922_v3  ;;  %v10926_v10 = vld [vmem:[%s14659_s26 + $0xf8] sm:$0xff]  ;;  %v10927_v11 = vld [vmem:[%s14659_s26 + $0x100] sm:$0xff]  ;;  %v14839_v18 = vpack.c.bf16 %v10922_v3, %v14755_v56  ;;  %v14849_v20 = vpack.c.bf16 %v10924_v6, %v10923_v5  ;;  %v10964_v21 = vld [vmem:[%s14659_s26 + $0x108] sm:$0xff] }
  0x1e   : > { %v1063_v12 = vpack.c.bf16 %v10927_v11, %v10926_v10  ;;  %v14348_v13 = vld [vmem:[%s17507_s1] sm:$0xff]   ;;  %v14347_v22 = vld [vmem:[%s17507_s1 + $0x10] sm:$0xff]   ;;  %v14864_v24 = vpack.c.bf16 %v10964_v21, %v10927_v11  ;;  %v14878_v29 = vld [vmem:[%s14659_s26 + $0x198] sm:$0xff] }
  0x1f   : > { %12666 = vmatmul.mubr.msk.bf16.gmra.mrb[4].mxu1 %vm444_vm2, %v427_v32  ;;  %v14812_v14 = vand.u32 %v14348_v13, %v14637_v4  ;;  %v14345_v16 = vld [vmem:[%s17507_s1] sm:$0xff]   ;;  %v14902_v36 = vld [vmem:[%s14659_s26 + $0x130] sm:$0xff]  ;;  %v14907_v37 = vld [vmem:[%s14659_s26 + $0x1a8] sm:$0xff] }
  0x20   : > { %12718 = vmatmul.mubr.msk.bf16.gmra.mrb[4].mxu0 %vm444_vm2, %v14703_v33  ;;  %12669 = vmatprep.mubr.msk.bf16.mxu1 %vm444_vm2, %v428_v34  ;;  %v14873_v28 = vld [vmem:[%s14659_s26 + $0x120] sm:$0xff]  ;;  %v14910_v38 = vld [vmem:[%s14659_s26 + $0x1b0] sm:$0xff]  ;;  %v14913_v39 = vld [vmem:[%s14659_s26 + $0x138] sm:$0xff] }
  0x21   : > { %12721 = vmatprep.mubr.msk.bf16.mxu0 %vm444_vm2, %v14705_v35  ;;  %v14881_v30 = vld [vmem:[%s14659_s26 + $0x1a0] sm:$0xff]  ;;  %v14939_v45 = vpack.c.bf16 %v14910_v38, %v14907_v37  ;;  %v14953_v49 = vld [vmem:[%s14659_s26 + $0x150] sm:$0xff]  ;;  %v14961_v51 = vld [vmem:[%s14659_s26 + $0x1c8] sm:$0xff] }
  0x22   : > { %v14964_v52 = vld [vmem:[%s14659_s26 + $0x1d0] sm:$0xff]  ;;  %v14977_v55 = vld [vmem:[%s14659_s26 + $0x1d8] sm:$0xff]  ;;  %v14980_v56 = vld [vmem:[%s14659_s26 + $0x1e0] sm:$0xff] }
  0x23   : > { %17546 = vst [vmem:[#allocation8_spill] sm:$0xff] %v14939_v45  ;;  %v14992_v58 = vpack.c.bf16 %v14964_v52, %v14961_v51  ;;  %v15006_v62 = vld [vmem:[%s14659_s26 + $0x170] sm:$0xff]  ;;  %v15011_v63 = vld [vmem:[%s14659_s26 + $0x1e8] sm:$0xff]  ;;  %v15025_v3 = vld [vmem:[%s14659_s26 + $0x1f8] sm:$0xff] }
  0x24   : > { %v15028_v5 = vld [vmem:[%s14659_s26 + $0x200] sm:$0xff]  ;;  %v11031_v11 = vld [vmem:[%s14659_s26 + $0x190] sm:$0xff] }
  0x25   : > { %v15055_v13 = vld [vmem:[%s14659_s26 + $0x210] sm:$0xff] }
  0x27   : > { %12670 = vmatmul.mubr.msk.bf16.gmra.mrb[8].mxu1 %vm444_vm2, %v429_v40 }
  0x28   : > { %12722 = vmatmul.mubr.msk.bf16.gmra.mrb[8].mxu0 %vm444_vm2, %v14717_v41  ;;  %12673 = vmatprep.mubr.msk.bf16.mxu1 %vm444_vm2, %v430_v42 }
  0x29   : > { %12725 = vmatprep.mubr.msk.bf16.mxu0 %vm444_vm2, %v14719_v43 }
  0x2f   : > { %12674 = vmatmul.mubr.msk.bf16.gmra.mrb[12].mxu1 %vm444_vm2, %v431_v46 }
  0x30   : > { %12726 = vmatmul.mubr.msk.bf16.gmra.mrb[12].mxu0 %vm444_vm2, %v14729_v47  ;;  %12677 = vmatprep.mubr.msk.bf16.mxu1 %vm444_vm2, %v432_v48 }
  0x31   : > { %12739 = vmatprep.mubr.msk.bf16.mxu0 %vm444_vm2, %v427_v32 }
  0x37   : > { %12678 = vmatmul.mubr.msk.bf16.gmra.mrb[16].mxu1 %vm444_vm2, %v433_v53 }
  0x38   : > { %12740 = vmatmul.mubr.msk.bf16.vlgmr.msra.gmra.mrb[0].mxu0 %vm444_vm2, %v428_v34  ;;  %12681 = vmatprep.mubr.msk.bf16.mxu1 %vm444_vm2, %v434_v54  ;;  %v14896_v34 = vpack.c.bf16 %v14881_v30, %v14878_v29 }
  0x39   : > { %12743 = vmatprep.mubr.msk.bf16.mxu0 %vm444_vm2, %v429_v40  ;;  %12764 = vmatpush3.bf16.msra.mxu0 %v1346_v27  ;;  %v10966_v27 = vld [vmem:[%s14659_s26 + $0x118] sm:$0xff]  ;;  %v14916_v40 = vld [vmem:[%s14659_s26 + $0x140] sm:$0xff] }
  0x3a   : > { %12919 = vmatprep.subr.bf16.mxu0 %v2975_v57  ;;  %17545 = vst [vmem:[#allocation7_spill] sm:$0xff] %v14896_v34 }
  0x3f   : > { %12682 = vmatmul.mubr.msk.bf16.gmra.mrb[20].mxu1 %vm444_vm2, %v435_v60 }
  0x40   : > { %12744 = vmatmul.mubr.msk.bf16.gmra.mrb[4].mxu0 %vm444_vm2, %v430_v42  ;;  %12687 = vmatprep.mubr.msk.bf16.mxu1 %vm444_vm2, %v385_v61  ;;  %v14926_v42 = vld [vmem:[%s14659_s26 + $0x1c0] sm:$0xff]  ;;  %v15003_v61 = vld [vmem:[%s14659_s26 + $0x168] sm:$0xff] }
  0x41   : > { %12747 = vmatprep.mubr.msk.bf16.mxu0 %vm444_vm2, %v431_v46  ;;  %v14943_v46 = vpack.c.bf16 %v14916_v40, %v14913_v39 }
  0x47   : > { %12688 = vmatmul.mubr.msk.bf16.vlgmr.msra.gmra.mrb[0].mxu1 %vm444_vm2, %v386_v0  ;;  %v15014_v0 = vld [vmem:[%s14659_s26 + $0x1f0] sm:$0xff] }
  0x48   : > { %13750 = vmatpush3.bf16.msra.mxu1 %v14644_v7  ;;  %12748 = vmatmul.mubr.msk.bf16.gmra.mrb[8].mxu0 %vm444_vm2, %v432_v48  ;;  %v10925_v7 = vld [vmem:[%s14659_s26 + $0xf0] sm:$0xff]  ;;  %v14950_v48 = vld [vmem:[%s14659_s26 + $0x148] sm:$0xff] }
  0x49   : > { %12691 = vmatprep.mubr.msk.bf16.mxu1 %vm444_vm2, %v387_v1  ;;  %12751 = vmatprep.mubr.msk.bf16.mxu0 %vm444_vm2, %v433_v53  ;;  %v1062_v9 = vpack.c.bf16 %v10925_v7, %v10924_v6  ;;  %v14862_v23 = vpack.c.bf16 %v10926_v10, %v10925_v7  ;;  %v14967_v53 = vld [vmem:[%s14659_s26 + $0x158] sm:$0xff]  ;;  %v15034_v6 = vpack.c.bf16 %v15006_v62, %v15003_v61  ;;  %v11030_v10 = vld [vmem:[%s14659_s26 + $0x188] sm:$0xff] }
  0x4a   : > { %12789 = vmatprep.subr.bf16.mxu1 %v1732_v2  ;;  %v15017_v1 = vld [vmem:[%s14659_s26 + $0x178] sm:$0xff]  ;;  %v15038_v7 = vpack.c.bf16 %v15014_v0, %v15011_v63 }
  0x4f   : > { %12692 = vmatmul.mubr.msk.bf16.gmra.mrb[4].mxu1 %vm444_vm2, %v14678_v19  ;;  %v1905_v19 = vand.u32 %v14345_v16, %v14637_v4  ;;  %v15069_v16 = vpack.c.bf16 %v11031_v11, %v11030_v10 }
  0x50   : > { %12752 = vmatmul.mubr.msk.bf16.gmra.mrb[12].mxu0 %vm444_vm2, %v434_v54  ;;  %12695 = vmatprep.mubr.msk.bf16.mxu1 %vm444_vm2, %v14685_v25  ;;  %v10965_v25 = vld [vmem:[%s14659_s26 + $0x110] sm:$0xff]  ;;  %v14970_v54 = vld [vmem:[%s14659_s26 + $0x160] sm:$0xff] }
  0x51   : > { %12755 = vmatprep.mubr.msk.bf16.mxu0 %vm444_vm2, %v435_v60  ;;  %v14887_v31 = vpack.c.bf16 %v10965_v25, %v10964_v21  ;;  %v14889_v32 = vpack.c.bf16 %v10966_v27, %v10965_v25  ;;  %v14996_v59 = vpack.c.bf16 %v14970_v54, %v14967_v53  ;;  %v15000_v60 = vpack.c.bf16 %v14980_v56, %v14977_v55  ;;  %v15085_v25 = vld [vmem:[%s14659_s26 + $0x230] sm:$0xff] }
  0x57   : > { %12696 = vmatmul.mubr.msk.bf16.gmra.mrb[8].mxu1 %vm444_vm2, %v14687_v26  ;;  %v14868_v26 = vand.u32 %v14347_v22, %v14637_v4  ;;  %v15082_v22 = vld [vmem:[%s14659_s26 + $0x228] sm:$0xff] }
  0x58   : > { %12756 = vmatmul.mubr.msk.bf16.gmra.mrb[16].mxu0 %vm444_vm2, %v1061_v8  ;;  %12699 = vmatprep.mubr.msk.bf16.mxu1 %vm444_vm2, %v14703_v33 }
  0x59   : > { %12759 = vmatprep.mubr.msk.bf16.mxu0 %vm444_vm2, %v1062_v9 }
  0x5f   : > { %12700 = vmatmul.mubr.msk.bf16.gmra.mrb[12].mxu1 %vm444_vm2, %v14705_v35 }
  0x60   : > { %12760 = vmatmul.mubr.msk.bf16.gmra.mrb[20].mxu0 %vm444_vm2, %v1063_v12  ;;  %12703 = vmatprep.mubr.msk.bf16.mxu1 %vm444_vm2, %v14717_v41 }
  0x61   : > { %12765 = vmatprep.mubr.msk.bf16.mxu0 %vm444_vm2, %v14703_v33  ;;  %v14892_v33 = vpack.c.bf16 %v14873_v28, %v10966_v27  ;;  %v15092_v27 = vld [vmem:[%s14659_s26 + $0x238] sm:$0xff] }
  0x67   : > { %12704 = vmatmul.mubr.msk.bf16.gmra.mrb[16].mxu1 %vm444_vm2, %v14719_v43 }
  0x68   : > { %12766 = vmatmul.mubr.msk.bf16.vlgmr.msra.gmra.mrb[0].mxu0 %vm444_vm2, %v14705_v35  ;;  %12707 = vmatprep.mubr.msk.bf16.mxu1 %vm444_vm2, %v14729_v47  ;;  %v14899_v35 = vld [vmem:[%s14659_s26 + $0x128] sm:$0xff] }
  0x69   : > { %12769 = vmatprep.mubr.msk.bf16.mxu0 %vm444_vm2, %v14717_v41  ;;  %12920 = vmatpush3.bf16.msra.mxu0 %v2975_v57  ;;  %v14923_v41 = vld [vmem:[%s14659_s26 + $0x1b8] sm:$0xff]  ;;  %v14935_v44 = vpack.c.bf16 %v14902_v36, %v14899_v35  ;;  %v14988_v57 = vpack.c.bf16 %v14953_v49, %v14950_v48 }
  0x6a   : > { %12945 = vmatprep.subr.bf16.mxu0 %v14812_v14 }
  0x6f   : > { %12708 = vmatmul.mubr.msk.bf16.gmra.mrb[20].mxu1 %vm444_vm2, %v396_v15 }
  0x70   : > { %12770 = vmatmul.mubr.msk.bf16.gmra.mrb[4].mxu0 %vm444_vm2, %v14719_v43  ;;  %12729 = vmatprep.mubr.msk.bf16.mxu1 %vm444_vm2, %v396_v15  ;;  %v14350_v43 = vld [vmem:[%s17507_s1 + $0x10] sm:$0xff]  }
  0x71   : > { %12773 = vmatprep.mubr.msk.bf16.mxu0 %vm444_vm2, %v14729_v47  ;;  %v14947_v47 = vpack.c.bf16 %v14926_v42, %v14923_v41  ;;  %v14956_v50 = vand.u32 %v14350_v43, %v14637_v4  ;;  %v15095_v43 = vld [vmem:[%s14659_s26 + $0x240] sm:$0xff] }
  0x73   : > { %17547 = vst [vmem:[#allocation9_spill] sm:$0xff] %v14947_v47 }
  0x77   : > { %12730 = vmatmul.mubr.msk.bf16.vlgmr.msra.gmra.mrb[16].mxu1 %vm444_vm2, %v14836_v17 }
  0x78   : > { %12774 = vmatmul.mubr.msk.bf16.gmra.mrb[8].mxu0 %vm444_vm2, %v396_v15  ;;  %12790 = vmatpush3.bf16.msra.mxu1 %v1732_v2  ;;  %v11029_v2 = vld [vmem:[%s14659_s26 + $0x180] sm:$0xff] }
  0x79   : > { %12733 = vmatprep.mubr.msk.bf16.mxu1 %vm444_vm2, %v14839_v18  ;;  %12777 = vmatprep.mubr.msk.bf16.mxu0 %vm444_vm2, %v14836_v17  ;;  %v15065_v15 = vld [vmem:[%s14659_s26 + $0x220] sm:$0xff] }
  0x7a   : > { %12815 = vmatprep.subr.bf16.mxu1 %v1905_v19 }
  0x7f   : > { %12734 = vmatmul.mubr.msk.bf16.gmra.mrb[20].mxu1 %vm444_vm2, %v14849_v20 }
  0x80   : > { %12778 = vmatmul.mubr.msk.bf16.gmra.mrb[12].mxu0 %vm444_vm2, %v14839_v18  ;;  %12791 = vmatprep.mubr.msk.bf16.mxu1 %vm444_vm2, %v1061_v8  ;;  %v15041_v8 = vpack.c.bf16 %v11029_v2, %v15017_v1 }
  0x81   : > { %12781 = vmatprep.mubr.msk.bf16.mxu0 %vm444_vm2, %v14849_v20 }
  0x87   : > { %12792 = vmatmul.mubr.msk.bf16.vlgmr.msra.gmra.mrb[24].mxu1 %vm444_vm2, %v1062_v9  ;;  %v15045_v9 = vpack.c.bf16 %v15028_v5, %v15025_v3 }
  0x88   : > { %12782 = vmatmul.mubr.msk.bf16.gmra.mrb[16].mxu0 %vm444_vm2, %v14862_v23  ;;  %12816 = vmatpush3.bf16.msra.mxu1 %v1905_v19 }
  0x89   : > { %12785 = vmatprep.mubr.msk.bf16.mxu0 %vm444_vm2, %v14864_v24  ;;  %12795 = vmatprep.mubr.msk.bf16.mxu1 %vm444_vm2, %v1063_v12  ;;  %v15052_v12 = vld [vmem:[%s14659_s26 + $0x208] sm:$0xff] }
  0x8a   : > { %12841 = vmatprep.subr.bf16.mxu1 %v14868_v26  ;;  %v15073_v19 = vpack.c.bf16 %v15055_v13, %v15052_v12 }
  0x8c   : > { %17548 = vst [vmem:[#allocation10_spill] sm:$0xff] %v15073_v19 }
  0x8f   : > { %12796 = vmatmul.mubr.msk.bf16.gmra.mrb[28].mxu1 %vm444_vm2, %v14887_v31 }
  0x90   : > { %12786 = vmatmul.mubr.msk.bf16.gmra.mrb[20].mxu0 %vm444_vm2, %v14889_v32  ;;  %12799 = vmatprep.mubr.msk.bf16.mxu1 %vm444_vm2, %v14892_v33 }
  0x91   : > { %12921 = vmatprep.mubr.msk.bf16.mxu0 %vm444_vm2, %v14896_v34  ;;  %v15108_v34 = vpack.c.bf16 %v15095_v43, %v15092_v27 }
  0x97   : > { %12800 = vmatmul.mubr.msk.bf16.gmra.mrb[32].mxu1 %vm444_vm2, %v14935_v44 }
  0x98   : > { %12922 = vmatmul.mubr.msk.bf16.vlgmr.msra.gmra.mrb[24].mxu0 %vm444_vm2, %v14939_v45  ;;  %12803 = vmatprep.mubr.msk.bf16.mxu1 %vm444_vm2, %v14943_v46  ;;  %v15104_v45 = vpack.c.bf16 %v15085_v25, %v15082_v22 }
  0x99   : > { %12925 = vmatprep.mubr.msk.bf16.mxu0 %vm444_vm2, %v14947_v47  ;;  %12946 = vmatpush3.bf16.msra.mxu0 %v14812_v14  ;;  %v15062_v14 = vld [vmem:[%s14659_s26 + $0x218] sm:$0xff] }
  0x9a   : > { %12971 = vmatprep.subr.bf16.mxu0 %v14956_v50  ;;  %v15077_v21 = vpack.c.bf16 %v15065_v15, %v15062_v14  ;;  %v14349_v47 = vld [vmem:[%s17507_s1 + $0x18] sm:$0xff]  }
  0x9c   : > { %17549 = vst [vmem:[#allocation11_spill] sm:$0xff] %v15077_v21 }
  0x9f   : > { %12804 = vmatmul.mubr.msk.bf16.gmra.mrb[36].mxu1 %vm444_vm2, %v14988_v57 }
  0xa0   : > { %12926 = vmatmul.mubr.msk.bf16.gmra.mrb[28].mxu0 %vm444_vm2, %v14992_v58  ;;  %12807 = vmatprep.mubr.msk.bf16.mxu1 %vm444_vm2, %v14996_v59 }
  0xa1   : > { %12929 = vmatprep.mubr.msk.bf16.mxu0 %vm444_vm2, %v15000_v60 }
  0xa7   : > { %12808 = vmatmul.mubr.msk.bf16.gmra.mrb[40].mxu1 %vm444_vm2, %v15034_v6 }
  0xa8   : > { %12930 = vmatmul.mubr.msk.bf16.gmra.mrb[32].mxu0 %vm444_vm2, %v15038_v7  ;;  %12811 = vmatprep.mubr.msk.bf16.mxu1 %vm444_vm2, %v15041_v8 }
  0xa9   : > { %12933 = vmatprep.mubr.msk.bf16.mxu0 %vm444_vm2, %v15045_v9 }
  0xaf   : > { %12812 = vmatmul.mubr.msk.bf16.gmra.mrb[44].mxu1 %vm444_vm2, %v15069_v16 }
  0xb0   : > { %12934 = vmatmul.mubr.msk.bf16.gmra.mrb[36].mxu0 %vm444_vm2, %v15073_v19  ;;  %12817 = vmatprep.mubr.msk.bf16.mxu1 %vm444_vm2, %v14836_v17  ;;  %v15111_v17 = vand.u32 %v14349_v47, %v14637_v4  ;;  %v15126_v19 = vld [vmem:[%s14659_s26 + $0x250] sm:$0xff]  ;;  %v15147_v47 = vpack.c.bf16 %v14878_v29, %v11031_v11  ;;  %v15176_v29 = vpack.c.bf16 %v14923_v41, %v14910_v38 }
  0xb1   : > { %12937 = vmatprep.mubr.msk.bf16.mxu0 %vm444_vm2, %v15077_v21  ;;  %v15123_v21 = vld [vmem:[%s14659_s26 + $0x248] sm:$0xff]  ;;  %v15204_v38 = vpack.c.bf16 %v15003_v61, %v14970_v54  ;;  %v15224_v41 = vpack.c.bf16 %v15025_v3, %v15014_v0 }
  0xb7   : > { %12818 = vmatmul.mubr.msk.bf16.vlgmr.msra.gmra.mrb[24].mxu1 %vm444_vm2, %v14839_v18  ;;  %v15131_v18 = vpack.c.bf16 %v15126_v19, %v15123_v21 }
  0xb8   : > { %12842 = vmatpush3.bf16.msra.mxu1 %v14868_v26  ;;  %12938 = vmatmul.mubr.msk.bf16.gmra.mrb[40].mxu0 %vm444_vm2, %v15104_v45  ;;  %v15133_v26 = vpack.c.bf16 %v11030_v10, %v11029_v2  ;;  %v15151_v2 = vpack.c.bf16 %v14899_v35, %v14873_v28  ;;  %v15155_v10 = vpack.c.bf16 %v14907_v37, %v14881_v30 }
  0xb9   : > { %12821 = vmatprep.mubr.msk.bf16.mxu1 %vm444_vm2, %v14849_v20  ;;  %12941 = vmatprep.mubr.msk.bf16.mxu0 %vm444_vm2, %v15108_v34  ;;  %17550 = vst [vmem:[#allocation12_spill] sm:$0xff] %v15131_v18  ;;  %v14352_v20 = vld [vmem:[%s17507_s1 + $0x18] sm:$0xff]   ;;  %v15172_v28 = vpack.c.bf16 %v14913_v39, %v14902_v36  ;;  %v15180_v30 = vpack.c.bf16 %v14950_v48, %v14916_v40  ;;  %v14567_v48 = vmov 0.0  }
  0xba   : > { %12867 = vmatprep.subr.bf16.mxu1 %v15111_v17  ;;  %v15184_v35 = vpack.c.bf16 %v14961_v51, %v14926_v42  ;;  %v15196_v36 = vpack.c.bf16 %v14967_v53, %v14953_v49  ;;  %v15200_v37 = vpack.c.bf16 %v14977_v55, %v14964_v52  ;;  %v15208_v39 = vpack.c.bf16 %v15011_v63, %v14980_v56  ;;  %v15349_v55 = vld [vmem:[%s14659_s26 + $0x268] sm:$0xff] }
  0xbb   : > { %v15220_v40 = vpack.c.bf16 %v15017_v1, %v15006_v62  ;;  %v15228_v42 = vpack.c.bf16 %v15052_v12, %v15028_v5  ;;  %4326 = vst.msk [vmem:[#allocation4] sm:$0xff] %vm1587_vm3, %v14567_v48  ;;  %4327 = vst.msk [vmem:[#allocation4 + $0x8] sm:$0xff] %vm1587_vm3, %v14567_v48  ;;  %v2889_v49 = vpack.c.bf16 %v15062_v14, %v15055_v13  ;;  %v17552_v12 = vld [vmem:[#allocation7_spill] sm:$0xff]  ;;  %v15408_v14 = vld [vmem:[%s17508_s2] ss:$0 sm:$0xff] }
  0xbc   : > { %4328 = vst.msk [vmem:[#allocation4 + $0x10] sm:$0xff] %vm1587_vm3, %v14567_v48  ;;  %4329 = vst.msk [vmem:[#allocation4 + $0x18] sm:$0xff] %vm1587_vm3, %v14567_v48  ;;  %v2891_v52 = vpack.c.bf16 %v15092_v27, %v15085_v25  ;;  %v3313_v53 = vpack.c.bf16 %v15123_v21, %v15095_v43 }
  0xbd   : > { %4330 = vst.msk [vmem:[#allocation4 + $0x20] sm:$0xff] %vm1587_vm3, %v14567_v48  ;;  %4331 = vst.msk [vmem:[#allocation4 + $0x28] sm:$0xff] %vm1587_vm3, %v14567_v48 }
  0xbe   : > { %4332 = vst.msk [vmem:[#allocation4 + $0x30] sm:$0xff] %vm1587_vm3, %v14567_v48  ;;  %4333 = vst.msk [vmem:[#allocation4 + $0x38] sm:$0xff] %vm1587_vm3, %v14567_v48 }
  0xbf   : > { %12822 = vmatmul.mubr.msk.bf16.gmra.mrb[28].mxu1 %vm444_vm2, %v14862_v23  ;;  %4334 = vst.msk [vmem:[#allocation4 + $0x40] sm:$0xff] %vm1587_vm3, %v14567_v48  ;;  %4335 = vst.msk [vmem:[#allocation4 + $0x48] sm:$0xff] %vm1587_vm3, %v14567_v48 }
  0xc0   : > { %12942 = vmatmul.mubr.msk.bf16.gmra.mrb[44].mxu0 %vm444_vm2, %v15131_v18  ;;  %12825 = vmatprep.mubr.msk.bf16.mxu1 %vm444_vm2, %v14864_v24  ;;  %v15158_v18 = vand.u32 %v14352_v20, %v14637_v4  ;;  %4336 = vst.msk [vmem:[#allocation4 + $0x50] sm:$0xff] %vm1587_vm3, %v14567_v48  ;;  %4337 = vst.msk [vmem:[#allocation4 + $0x58] sm:$0xff] %vm1587_vm3, %v14567_v48 }
  0xc1   : > { %12947 = vmatprep.mubr.msk.bf16.mxu0 %vm444_vm2, %v15133_v26  ;;  %4338 = vst.msk [vmem:[#allocation4 + $0x60] sm:$0xff] %vm1587_vm3, %v14567_v48  ;;  %4339 = vst.msk [vmem:[#allocation4 + $0x68] sm:$0xff] %vm1587_vm3, %v14567_v48 }
  0xc2   : > { %4340 = vst.msk [vmem:[#allocation4 + $0x70] sm:$0xff] %vm1587_vm3, %v14567_v48  ;;  %4341 = vst.msk [vmem:[#allocation4 + $0x78] sm:$0xff] %vm1587_vm3, %v14567_v48 }
  0xc3   : > { %4342 = vst.msk [vmem:[#allocation4 + $0x80] sm:$0xff] %vm1587_vm3, %v14567_v48  ;;  %4343 = vst.msk [vmem:[#allocation4 + $0x88] sm:$0xff] %vm1587_vm3, %v14567_v48 }
  0xc4   : > { %4344 = vst.msk [vmem:[#allocation4 + $0x90] sm:$0xff] %vm1587_vm3, %v14567_v48  ;;  %4345 = vst.msk [vmem:[#allocation4 + $0x98] sm:$0xff] %vm1587_vm3, %v14567_v48 }
  0xc5   : > { %4346 = vst.msk [vmem:[#allocation4 + $0xa0] sm:$0xff] %vm1587_vm3, %v14567_v48  ;;  %4347 = vst.msk [vmem:[#allocation4 + $0xa8] sm:$0xff] %vm1587_vm3, %v14567_v48 }
  0xc6   : > { %8285 = vst.msk [vmem:[#allocation6] sm:$0xff] %vm1587_vm3, %v14567_v48  ;;  %8286 = vst.msk [vmem:[#allocation6 + $0x8] sm:$0xff] %vm1587_vm3, %v14567_v48 }
  0xc7   : > { %12826 = vmatmul.mubr.msk.bf16.gmra.mrb[32].mxu1 %vm444_vm2, %v14889_v32  ;;  %8287 = vst.msk [vmem:[#allocation6 + $0x10] sm:$0xff] %vm1587_vm3, %v14567_v48  ;;  %8288 = vst.msk [vmem:[#allocation6 + $0x18] sm:$0xff] %vm1587_vm3, %v14567_v48 }
  0xc8   : > { %12948 = vmatmul.mubr.msk.bf16.vlgmr.msra.gmra.mrb[24].mxu0 %vm444_vm2, %v15147_v47  ;;  %12829 = vmatprep.mubr.msk.bf16.mxu1 %vm444_vm2, %v15151_v2  ;;  %8289 = vst.msk [vmem:[#allocation6 + $0x20] sm:$0xff] %vm1587_vm3, %v14567_v48  ;;  %8290 = vst.msk [vmem:[#allocation6 + $0x28] sm:$0xff] %vm1587_vm3, %v14567_v48 }
  0xc9   : > { %12951 = vmatprep.mubr.msk.bf16.mxu0 %vm444_vm2, %v15155_v10  ;;  %12972 = vmatpush3.bf16.msra.mxu0 %v14956_v50  ;;  %8291 = vst.msk [vmem:[#allocation6 + $0x30] sm:$0xff] %vm1587_vm3, %v14567_v48  ;;  %8292 = vst.msk [vmem:[#allocation6 + $0x38] sm:$0xff] %vm1587_vm3, %v14567_v48  ;;  %v2890_v50 = vpack.c.bf16 %v15082_v22, %v15065_v15 }
  0xca   : > { %12997 = vmatprep.subr.bf16.mxu0 %v15158_v18  ;;  %8293 = vst.msk [vmem:[#allocation6 + $0x40] sm:$0xff] %vm1587_vm3, %v14567_v48  ;;  %8294 = vst.msk [vmem:[#allocation6 + $0x48] sm:$0xff] %vm1587_vm3, %v14567_v48 }
  0xcb   : > { %8295 = vst.msk [vmem:[#allocation6 + $0x50] sm:$0xff] %vm1587_vm3, %v14567_v48  ;;  %8296 = vst.msk [vmem:[#allocation6 + $0x58] sm:$0xff] %vm1587_vm3, %v14567_v48 }
  0xcc   : > { %8297 = vst.msk [vmem:[#allocation6 + $0x60] sm:$0xff] %vm1587_vm3, %v14567_v48  ;;  %8298 = vst.msk [vmem:[#allocation6 + $0x68] sm:$0xff] %vm1587_vm3, %v14567_v48 }
  0xcf   : > { %12830 = vmatmul.mubr.msk.bf16.gmra.mrb[36].mxu1 %vm444_vm2, %v15172_v28 }
  0xd0   : > { %12952 = vmatmul.mubr.msk.bf16.gmra.mrb[28].mxu0 %vm444_vm2, %v15176_v29  ;;  %12833 = vmatprep.mubr.msk.bf16.mxu1 %vm444_vm2, %v15180_v30 }
  0xd1   : > { %12955 = vmatprep.mubr.msk.bf16.mxu0 %vm444_vm2, %v15184_v35 }
  0xd7   : > { %12834 = vmatmul.mubr.msk.bf16.gmra.mrb[40].mxu1 %vm444_vm2, %v15196_v36 }
  0xd8   : > { %12956 = vmatmul.mubr.msk.bf16.gmra.mrb[32].mxu0 %vm444_vm2, %v15200_v37  ;;  %12837 = vmatprep.mubr.msk.bf16.mxu1 %vm444_vm2, %v15204_v38 }
  0xd9   : > { %12959 = vmatprep.mubr.msk.bf16.mxu0 %vm444_vm2, %v15208_v39 }
  0xdf   : > { %12838 = vmatmul.mubr.msk.bf16.gmra.mrb[44].mxu1 %vm444_vm2, %v15220_v40 }
  0xe0   : > { %12960 = vmatmul.mubr.msk.bf16.gmra.mrb[36].mxu0 %vm444_vm2, %v15224_v41  ;;  %12843 = vmatprep.mubr.msk.bf16.mxu1 %vm444_vm2, %v14862_v23  ;;  %v14351_v23 = vld [vmem:[%s17507_s1 + $0x20] sm:$0xff]  }
  0xe1   : > { %12963 = vmatprep.mubr.msk.bf16.mxu0 %vm444_vm2, %v15228_v42  ;;  %v2589_v51 = vand.u32 %v14351_v23, %v14637_v4 }
  0xe7   : > { %12844 = vmatmul.mubr.msk.bf16.vlgmr.msra.gmra.mrb[24].mxu1 %vm444_vm2, %v14864_v24  ;;  %v14353_v24 = vld [vmem:[%s17507_s1 + $0x20] sm:$0xff]  }
  0xe8   : > { %12868 = vmatpush3.bf16.msra.mxu1 %v15111_v17  ;;  %12964 = vmatmul.mubr.msk.bf16.gmra.mrb[40].mxu0 %vm444_vm2, %v2889_v49 }
  0xe9   : > { %12847 = vmatprep.mubr.msk.bf16.mxu1 %vm444_vm2, %v14889_v32  ;;  %12967 = vmatprep.mubr.msk.bf16.mxu0 %vm444_vm2, %v2890_v50  ;;  %v3832_v32 = vand.u32 %v14353_v24, %v14637_v4  ;;  %v15333_v4 = vld [vmem:[%s14659_s26 + $0x258] sm:$0xff] }
  0xea   : > { %12893 = vmatprep.subr.bf16.mxu1 %v2589_v51  ;;  %v3314_v54 = vpack.c.bf16 %v15333_v4, %v15126_v19  ;;  %v15413_v19 = vld [vmem:[%s17509_s3] ss:$0 sm:$0xff] }
  0xef   : > { %12848 = vmatmul.mubr.msk.bf16.gmra.mrb[28].mxu1 %vm444_vm2, %v15151_v2 }
  0xf0   : > { %12968 = vmatmul.mubr.msk.bf16.gmra.mrb[44].mxu0 %vm444_vm2, %v2891_v52  ;;  %12851 = vmatprep.mubr.msk.bf16.mxu1 %vm444_vm2, %v15172_v28 }
  0xf1   : > { %12973 = vmatprep.mubr.msk.bf16.mxu0 %vm444_vm2, %v15176_v29  ;;  %v17556_v29 = vld [vmem:[#allocation12_spill] sm:$0xff] }
  0xf7   : > { %12852 = vmatmul.mubr.msk.bf16.gmra.mrb[32].mxu1 %vm444_vm2, %v15180_v30 }
  0xf8   : > { %12974 = vmatmul.mubr.msk.bf16.vlgmr.msra.gmra.mrb[24].mxu0 %vm444_vm2, %v15184_v35  ;;  %12855 = vmatprep.mubr.msk.bf16.mxu1 %vm444_vm2, %v15196_v36 }
  0xf9   : > { %12977 = vmatprep.mubr.msk.bf16.mxu0 %vm444_vm2, %v15200_v37  ;;  %12998 = vmatpush3.bf16.msra.mxu0 %v15158_v18  ;;  %v17555_v18 = vld [vmem:[#allocation9_spill] sm:$0xff] }
  0xfa   : > { %13023 = vmatprep.subr.bf16.mxu0 %v3832_v32 }
  0xff   : > { %12856 = vmatmul.mubr.msk.bf16.gmra.mrb[36].mxu1 %vm444_vm2, %v15204_v38  ;;  %v15431_v38 = vld [vmem:[%s14659_s26 + $0x270] sm:$0xff] }
 0x100   : > { %12978 = vmatmul.mubr.msk.bf16.gmra.mrb[28].mxu0 %vm444_vm2, %v15208_v39  ;;  %12859 = vmatprep.mubr.msk.bf16.mxu1 %vm444_vm2, %v15220_v40 }
 0x101   : > { %12981 = vmatprep.mubr.msk.bf16.mxu0 %vm444_vm2, %v15224_v41 }
 0x107   : > { %12860 = vmatmul.mubr.msk.bf16.gmra.mrb[40].mxu1 %vm444_vm2, %v15133_v26 }
 0x108   : > { %12982 = vmatmul.mubr.msk.bf16.gmra.mrb[32].mxu0 %vm444_vm2, %v15228_v42  ;;  %12863 = vmatprep.mubr.msk.bf16.mxu1 %vm444_vm2, %v15147_v47 }
 0x109   : > { %12985 = vmatprep.mubr.msk.bf16.mxu0 %vm444_vm2, %v2889_v49 }
 0x10f   : > { %12864 = vmatmul.mubr.msk.bf16.gmra.mrb[44].mxu1 %vm444_vm2, %v15155_v10 }
 0x110   : > { %12986 = vmatmul.mubr.msk.bf16.gmra.mrb[36].mxu0 %vm444_vm2, %v2890_v50  ;;  %12869 = vmatprep.mubr.msk.bf16.mxu1 %vm444_vm2, %v14887_v31  ;;  %v15346_v31 = vld [vmem:[%s14659_s26 + $0x260] sm:$0xff] }
 0x111   : > { %12989 = vmatprep.mubr.msk.bf16.mxu0 %vm444_vm2, %v2891_v52  ;;  %v15353_v63 = vpack.c.bf16 %v15349_v55, %v15346_v31  ;;  %v3549_v48 = vpack.c.bf16 %v15346_v31, %v15333_v4 }
 0x117   : > { %12870 = vmatmul.mubr.msk.bf16.vlgmr.msra.gmra.mrb[24].mxu1 %vm444_vm2, %v14892_v33 }
 0x118   : > { %12894 = vmatpush3.bf16.msra.mxu1 %v2589_v51  ;;  %12990 = vmatmul.mubr.msk.bf16.gmra.mrb[40].mxu0 %vm444_vm2, %v3313_v53  ;;  %v3550_v51 = vpack.c.bf16 %v15431_v38, %v15349_v55 }
 0x119   : > { %12873 = vmatprep.mubr.msk.bf16.mxu1 %vm444_vm2, %v14935_v44  ;;  %12993 = vmatprep.mubr.msk.bf16.mxu0 %vm444_vm2, %v3314_v54 }
 0x11a   : > { %v12689_v56 = vpop.f32.mrb[0].mxu1 }
 0x11b   : > { %v695_v61 = vpop.f32.mrb[1].mxu1 }
 0x11c   : > { %v12690_v62 = vpop.f32.mrb[2].mxu1 }
 0x11d   : > { %v698_v33 = vpop.f32.mrb[3].mxu1 }
 0x11f   : > { %12874 = vmatmul.mubr.msk.bf16.gmra.mrb[28].mxu1 %vm444_vm2, %v14943_v46 }
 0x120   : > { %12994 = vmatmul.mubr.msk.bf16.gmra.mrb[44].mxu0 %vm444_vm2, %v15353_v63  ;;  %12877 = vmatprep.mubr.msk.bf16.mxu1 %vm444_vm2, %v14988_v57 }
 0x121   : > { %12999 = vmatprep.mubr.msk.bf16.mxu0 %vm444_vm2, %v14992_v58 }
 0x122   : > { %v12693_v44 = vpop.f32.mrb[4].mxu1 }
 0x123   : > { %v711_v0 = vpop.f32.mrb[5].mxu1 }
 0x124   : > { %v12694_v1 = vpop.f32.mrb[6].mxu1 }
 0x125   : > { %v15363_v3 = vpop.f32.mrb[7].mxu1 }
 0x127   : > { %12878 = vmatmul.mubr.msk.bf16.gmra.mrb[32].mxu1 %vm444_vm2, %v14996_v59  ;;  %v17551_v59 = vld [vmem:[#allocation10_spill] sm:$0xff] }
 0x128   : > { %13000 = vmatmul.mubr.msk.bf16.vlgmr.msra.gmra.mrb[24].mxu0 %vm444_vm2, %v15000_v60  ;;  %12881 = vmatprep.mubr.msk.bf16.mxu1 %vm444_vm2, %v15034_v6 }
 0x129   : > { %13003 = vmatprep.mubr.msk.bf16.mxu0 %vm444_vm2, %v15038_v7  ;;  %13024 = vmatpush3.bf16.msra.mxu0 %v3832_v32 }
 0x12a   : > { %v15373_v46 = vpop.f32.mrb[8].mxu1 }
 0x12b   : > { %v15375_v57 = vpop.f32.mrb[9].mxu1 }
 0x12c   : > { %v15377_v58 = vpop.f32.mrb[10].mxu1 }
 0x12d   : > { %v15379_v5 = vpop.f32.mrb[11].mxu1 }
 0x12f   : > { %12882 = vmatmul.mubr.msk.bf16.gmra.mrb[36].mxu1 %vm444_vm2, %v15041_v8  ;;  %v17553_v8 = vld [vmem:[#allocation11_spill] sm:$0xff] }
 0x130   : > { %13004 = vmatmul.mubr.msk.bf16.gmra.mrb[28].mxu0 %vm444_vm2, %v15045_v9  ;;  %12885 = vmatprep.mubr.msk.bf16.mxu1 %vm444_vm2, %v15069_v16  ;;  %v17554_v9 = vld [vmem:[#allocation8_spill] sm:$0xff] }
 0x131   : > { %13007 = vmatprep.mubr.msk.bf16.mxu0 %vm444_vm2, %v17551_v59  ;;  %v11333_v59 = vld [vmem:[%s14659_s26 + $0x1e0] sm:$0xff] }
 0x132   : > { %v15389_v60 = vpop.f32.mrb[12].mxu1 }
 0x133   : > { %v15391_v6 = vpop.f32.mrb[13].mxu1 }
 0x134   : > { %v15393_v7 = vpop.f32.mrb[14].mxu1 }
 0x135   : > { %v15395_v11 = vpop.f32.mrb[15].mxu1 }
 0x137   : > { %12886 = vmatmul.mubr.msk.bf16.gmra.mrb[40].mxu1 %vm444_vm2, %v17552_v12  ;;  %v11334_v12 = vld [vmem:[%s14659_s26 + $0x1e8] sm:$0xff] }
 0x138   : > { %13008 = vmatmul.mubr.msk.bf16.gmra.mrb[32].mxu0 %vm444_vm2, %v17553_v8  ;;  %12889 = vmatprep.mubr.msk.bf16.mxu1 %vm444_vm2, %v17554_v9 }
 0x139   : > { %13011 = vmatprep.mubr.msk.bf16.mxu0 %vm444_vm2, %v15104_v45 }
 0x13b   : > { %v12767_v13 = vpop.f32.mrb[0].mxu0 }
 0x13c   : > { %v13751_v15 = vadd.f32 %v12767_v13, %v12689_v56  ;;  %v1382_v16 = vpop.f32.mrb[1].mxu0  ;;  %v15453_v56 = vld [vmem:[%s14659_s26 + $0x278] sm:$0xff] }
 0x13d   : > { %v13752_v21 = vadd.f32 %v1382_v16, %v695_v61  ;;  %v12768_v22 = vpop.f32.mrb[2].mxu0 }
 0x13e   : > { %v1510_v25 = vmul.f32 %v13751_v15, %v15408_v14  ;;  %v13753_v27 = vadd.f32 %v12768_v22, %v12690_v62  ;;  %v1385_v45 = vpop.f32.mrb[3].mxu0 }
 0x13f   : > { %v1508_v43 = vmul.f32 %v13752_v21, %v15408_v14  ;;  %v13754_v17 = vadd.f32 %v1385_v45, %v698_v33  ;;  %12890 = vmatmul.mubr.msk.bf16.gmra.mrb[44].mxu1 %vm444_vm2, %v17555_v18  ;;  %v15459_v33 = vld [vmem:[%s14659_s26 + $0x280] sm:$0xff] }
 0x140   : > { %v1541_v26 = vadd.f32 %v15413_v19, %v1510_v25  ;;  %v1511_v20 = vmul.f32 %v13753_v27, %v15408_v14  ;;  %13012 = vmatmul.mubr.msk.bf16.gmra.mrb[36].mxu0 %vm444_vm2, %v15108_v34  ;;  %12895 = vmatprep.mubr.msk.bf16.mxu1 %vm444_vm2, %v15151_v2  ;;  %v3551_v25 = vpack.c.bf16 %v15459_v33, %v15453_v56 }
 0x141   : > { %v1539_v47 = vadd.f32 %v15413_v19, %v1508_v43  ;;  %v1509_v10 = vmul.f32 %v13754_v17, %v15408_v14  ;;  %13015 = vmatprep.mubr.msk.bf16.mxu0 %vm444_vm2, %v17556_v29 }
 0x142   : > { %v1565_v35 = vmax.f32 %v1541_v26, 0.0  ;;  %v1542_v37 = vadd.f32 %v15413_v19, %v1511_v20  ;;  %v3776_v26 = vpack.c.bf16 %v11334_v12, %v11333_v59 }
 0x143   : > { %v1563_v39 = vmax.f32 %v1539_v47, 0.0  ;;  %v1540_v40 = vadd.f32 %v15413_v19, %v1509_v10  ;;  %v12771_v41 = vpop.f32.mrb[4].mxu0 }
 0x144   : > { %1590 = vst.msk [vmem:[#allocation2 + $0x10] sm:$0xff] %vm1587_vm3, %v1565_v35  ;;  %v1566_v34 = vmax.f32 %v1542_v37, 0.0  ;;  %v13755_v2 = vadd.f32 %v12771_v41, %v12693_v44  ;;  %v1398_v42 = vpop.f32.mrb[5].mxu0  ;;  %v11147_v44 = vld [vmem:[%s14659_s26 + $0x168] sm:$0xff]  ;;  %v11148_v37 = vld [vmem:[%s14659_s26 + $0x170] sm:$0xff] }
 0x145   : > { %1588 = vst.msk [vmem:[#allocation2] sm:$0xff] %vm1587_vm3, %v1563_v39  ;;  %v1564_v23 = vmax.f32 %v1540_v40, 0.0  ;;  %v13756_v49 = vadd.f32 %v1398_v42, %v711_v0  ;;  %v12772_v50 = vpop.f32.mrb[6].mxu0  ;;  %v11149_v40 = vld [vmem:[%s14659_s26 + $0x178] sm:$0xff]  ;;  %v11335_v41 = vld [vmem:[%s14659_s26 + $0x1f0] sm:$0xff]  ;;  %v11151_v42 = vld [vmem:[%s14659_s26 + $0x188] sm:$0xff] }
 0x146   : > { %1591 = vst.msk [vmem:[#allocation2 + $0x18] sm:$0xff] %vm1587_vm3, %v1566_v34  ;;  %v1514_v52 = vmul.f32 %v13755_v2, %v15408_v14  ;;  %v13757_v24 = vadd.f32 %v12772_v50, %v12694_v1  ;;  %v1401_v32 = vpop.f32.mrb[7].mxu0  ;;  %v11336_v34 = vld [vmem:[%s14659_s26 + $0x1f8] sm:$0xff] }
 0x147   : > { %1589 = vst.msk [vmem:[#allocation2 + $0x8] sm:$0xff] %vm1587_vm3, %v1564_v23  ;;  %v1512_v53 = vmul.f32 %v13756_v49, %v15408_v14  ;;  %v13758_v54 = vadd.f32 %v1401_v32, %v15363_v3  ;;  %12896 = vmatmul.mubr.msk.bf16.vlgmr.msra.gmra.mrb[24].mxu1 %vm444_vm2, %v15172_v28  ;;  %v11146_v28 = vld [vmem:[%s14659_s26 + $0x160] sm:$0xff] }
 0x148   : > { %v1545_v31 = vadd.f32 %v15413_v19, %v1514_v52  ;;  %v1515_v55 = vmul.f32 %v13757_v24, %v15408_v14  ;;  %13016 = vmatmul.mubr.msk.bf16.gmra.mrb[40].mxu0 %vm444_vm2, %v3549_v48  ;;  %12899 = vmatprep.mubr.msk.bf16.mxu1 %vm444_vm2, %v15180_v30  ;;  %v2537_v27 = vpack.c.bf16 %v11147_v44, %v11146_v28  ;;  %v11338_v52 = vld [vmem:[%s14659_s26 + $0x208] sm:$0xff] }
 0x149   : > { %v1543_v61 = vadd.f32 %v15413_v19, %v1512_v53  ;;  %v1513_v62 = vmul.f32 %v13758_v54, %v15408_v14  ;;  %13019 = vmatprep.mubr.msk.bf16.mxu0 %vm444_vm2, %v3550_v51  ;;  %v11337_v51 = vld [vmem:[%s14659_s26 + $0x200] sm:$0xff] }
 0x14a   : > { %v1569_v0 = vmax.f32 %v1545_v31, 0.0  ;;  %v1546_v1 = vadd.f32 %v15413_v19, %v1515_v55  ;;  %v15464_v3 = vpop.f32.mrb[16].mxu1  ;;  %v2538_v55 = vpack.c.bf16 %v11149_v40, %v11148_v37  ;;  %v15557_v37 = vld [vmem:[%s14659_s26 + $0x1b0] sm:$0xff] }
 0x14b   : > { %v1567_v30 = vmax.f32 %v1543_v61, 0.0  ;;  %v1544_v8 = vadd.f32 %v15413_v19, %v1513_v62  ;;  %v12775_v9 = vpop.f32.mrb[8].mxu0  ;;  %v15469_v13 = vpop.f32.mrb[17].mxu1  ;;  %v3777_v61 = vpack.c.bf16 %v11336_v34, %v11335_v41  ;;  %v15566_v41 = vld [vmem:[%s14659_s26 + $0x1b8] sm:$0xff]  ;;  %v15569_v34 = vld [vmem:[%s14659_s26 + $0x230] sm:$0xff] }
 0x14c   : > { %1594 = vst.msk [vmem:[#allocation2 + $0x30] sm:$0xff] %vm1587_vm3, %v1569_v0  ;;  %v1570_v15 = vmax.f32 %v1546_v1, 0.0  ;;  %v13759_v16 = vadd.f32 %v12775_v9, %v15373_v46  ;;  %v1414_v21 = vpop.f32.mrb[9].mxu0  ;;  %v15473_v22 = vpop.f32.mrb[18].mxu1  ;;  %v4098_v10 = vld [vmem:[#allocation2] sm:$0xff] }
 0x14d   : > { %1592 = vst.msk [vmem:[#allocation2 + $0x20] sm:$0xff] %vm1587_vm3, %v1567_v30  ;;  %v1568_v45 = vmax.f32 %v1544_v8, 0.0  ;;  %v13760_v43 = vadd.f32 %v1414_v21, %v15375_v57  ;;  %v12776_v17 = vpop.f32.mrb[10].mxu0  ;;  %v15479_v18 = vpop.f32.mrb[19].mxu1  ;;  %v4102_v29 = vld [vmem:[#allocation2 + $0x18] sm:$0xff]  ;;  %v15518_v8 = vld [vmem:[%s14659_s26 + $0x190] sm:$0xff] }
 0x14e   : > { %1595 = vst.msk [vmem:[#allocation2 + $0x38] sm:$0xff] %vm1587_vm3, %v1570_v15  ;;  %v1518_v46 = vmul.f32 %v13759_v16, %v15408_v14  ;;  %v13761_v20 = vadd.f32 %v12776_v17, %v15377_v58  ;;  %v1417_v47 = vpop.f32.mrb[11].mxu0  ;;  %v4105_v48 = vmax.f32 %v4098_v10, %v4102_v29  ;;  %v4099_v62 = vld [vmem:[#allocation2 + $0x8] sm:$0xff] }
 0x14f   : > { %1593 = vst.msk [vmem:[#allocation2 + $0x28] sm:$0xff] %vm1587_vm3, %v1568_v45  ;;  %v1516_v57 = vmul.f32 %v13760_v43, %v15408_v14  ;;  %v13762_v35 = vadd.f32 %v1417_v47, %v15379_v5  ;;  %12900 = vmatmul.mubr.msk.bf16.gmra.mrb[28].mxu1 %vm444_vm2, %v15196_v36  ;;  %v11150_v36 = vld [vmem:[%s14659_s26 + $0x180] sm:$0xff]  ;;  %v15527_v45 = vld [vmem:[%s14659_s26 + $0x198] sm:$0xff]  ;;  %v15530_v43 = vld [vmem:[%s14659_s26 + $0x210] sm:$0xff] }
 0x150   : > { %v1549_v39 = vadd.f32 %v15413_v19, %v1518_v46  ;;  %v1519_v58 = vmul.f32 %v13761_v20, %v15408_v14  ;;  %13020 = vmatmul.mubr.msk.bf16.gmra.mrb[44].mxu0 %vm444_vm2, %v3551_v25  ;;  %12903 = vmatprep.mubr.msk.bf16.mxu1 %vm444_vm2, %v2537_v27  ;;  %v2539_v30 = vpack.c.bf16 %v11151_v42, %v11150_v36  ;;  %v15537_v46 = vld [vmem:[%s14659_s26 + $0x218] sm:$0xff]  ;;  %v15540_v20 = vld [vmem:[%s14659_s26 + $0x1a0] sm:$0xff]  ;;  %v15543_v47 = vld [vmem:[%s14659_s26 + $0x1a8] sm:$0xff] }
 0x151   : > { %v1547_v2 = vadd.f32 %v15413_v19, %v1516_v57  ;;  %v1517_v5 = vmul.f32 %v13762_v35, %v15408_v14  ;;  %13025 = vmatprep.mubr.msk.bf16.mxu0 %vm444_vm2, %v3776_v26  ;;  %v15554_v35 = vld [vmem:[%s14659_s26 + $0x228] sm:$0xff]  ;;  %v3779_v36 = vpack.c.bf16 %v15537_v46, %v15530_v43  ;;  %v15578_v42 = vld [vmem:[%s14659_s26 + $0x238] sm:$0xff] }
 0x152   : > { %v1573_v23 = vmax.f32 %v1549_v39, 0.0  ;;  %v1550_v49 = vadd.f32 %v15413_v19, %v1519_v58  ;;  %v15503_v50 = vpop.f32.mrb[20].mxu1 }
 0x153   : > { %v15507_v24 = vld [vmem:[#allocation2 + $0x30] sm:$0xff]  ;;  %v1571_v32 = vmax.f32 %v1547_v2, 0.0  ;;  %v1548_v53 = vadd.f32 %v15413_v19, %v1517_v5  ;;  %v12779_v54 = vpop.f32.mrb[12].mxu0  ;;  %v15510_v31 = vpop.f32.mrb[21].mxu1 }
 0x154   : > { %v4112_v28 = vmax.f32 %v4105_v48, %v15507_v24  ;;  %v4103_v44 = vld [vmem:[#allocation2 + $0x20] sm:$0xff]  ;;  %1598 = vst.msk [vmem:[#allocation2 + $0x50] sm:$0xff] %vm1587_vm3, %v1573_v23  ;;  %v1574_v0 = vmax.f32 %v1550_v49, 0.0  ;;  %v13763_v1 = vadd.f32 %v12779_v54, %v15389_v60  ;;  %v1430_v59 = vpop.f32.mrb[13].mxu0  ;;  %v15515_v12 = vpop.f32.mrb[22].mxu1  ;;  %v3778_v60 = vpack.c.bf16 %v11338_v52, %v11337_v51  ;;  %v15581_v48 = vld [vmem:[%s14659_s26 + $0x1c0] sm:$0xff] }
 0x155   : > { %v4106_v9 = vmax.f32 %v4099_v62, %v4103_v44  ;;  %v15520_v15 = vld [vmem:[#allocation2 + $0x38] sm:$0xff]  ;;  %1596 = vst.msk [vmem:[#allocation2 + $0x40] sm:$0xff] %vm1587_vm3, %v1571_v32  ;;  %v1572_v16 = vmax.f32 %v1548_v53, 0.0  ;;  %v13764_v21 = vadd.f32 %v1430_v59, %v15391_v6  ;;  %v12780_v25 = vpop.f32.mrb[14].mxu0  ;;  %v15524_v27 = vpop.f32.mrb[23].mxu1  ;;  %v15584_v23 = vld [vmem:[%s14659_s26 + $0x1c8] sm:$0xff]  ;;  %v2541_v32 = vpack.c.bf16 %v15543_v47, %v15540_v20 }
 0x156   : > { %4115 = vst.msk [vmem:[#allocation3] sm:$0xff] %vm1587_vm3, %v4112_v28  ;;  %1599 = vst.msk [vmem:[#allocation2 + $0x58] sm:$0xff] %vm1587_vm3, %v1574_v0  ;;  %v1522_v17 = vmul.f32 %v13763_v1, %v15408_v14  ;;  %v13765_v26 = vadd.f32 %v12780_v25, %v15393_v7  ;;  %v1433_v6 = vpop.f32.mrb[15].mxu0  ;;  %v15551_v7 = vld [vmem:[%s14659_s26 + $0x220] sm:$0xff]  ;;  %v4104_v39 = vld [vmem:[#allocation2 + $0x28] sm:$0xff]  ;;  %v2542_v1 = vpack.c.bf16 %v15566_v41, %v15557_v37 }
 0x157   : > { %v4113_v10 = vmax.f32 %v4106_v9, %v15520_v15  ;;  %1597 = vst.msk [vmem:[#allocation2 + $0x48] sm:$0xff] %vm1587_vm3, %v1572_v16  ;;  %v1520_v29 = vmul.f32 %v13764_v21, %v15408_v14  ;;  %v13766_v57 = vadd.f32 %v1433_v6, %v15395_v11  ;;  %12904 = vmatmul.mubr.msk.bf16.gmra.mrb[32].mxu1 %vm444_vm2, %v2538_v55  ;;  %v4100_v49 = vld [vmem:[#allocation2 + $0x10] sm:$0xff]  ;;  %v15592_v54 = vld [vmem:[%s14659_s26 + $0x240] sm:$0xff]  ;;  %v15595_v55 = vld [vmem:[%s14659_s26 + $0x248] sm:$0xff] }
 0x158   : > { %v1553_v58 = vadd.f32 %v15413_v19, %v1522_v17  ;;  %v1523_v40 = vmul.f32 %v13765_v26, %v15408_v14  ;;  %13026 = vmatmul.mubr.msk.bf16.vlgmr.msra.gmra.mrb[24].mxu0 %vm444_vm2, %v3777_v61  ;;  %12907 = vmatprep.mubr.msk.bf16.mxu1 %vm444_vm2, %v2539_v30  ;;  %v2540_v11 = vpack.c.bf16 %v15527_v45, %v15518_v8 }
 0x159   : > { %4116 = vst.msk [vmem:[#allocation3 + $0x8] sm:$0xff] %vm1587_vm3, %v4113_v10  ;;  %v1551_v2 = vadd.f32 %v15413_v19, %v1520_v29  ;;  %v1521_v5 = vmul.f32 %v13766_v57, %v15408_v14  ;;  %13029 = vmatprep.mubr.msk.bf16.mxu0 %vm444_vm2, %v3778_v60  ;;  %v3780_v53 = vpack.c.bf16 %v15554_v35, %v15551_v7 }
 0x15a   : > { %v1577_v51 = vmax.f32 %v1553_v58, 0.0  ;;  %v1554_v52 = vadd.f32 %v15413_v19, %v1523_v40  ;;  %v4107_v61 = vmax.f32 %v4100_v49, %v4104_v39  ;;  %v3781_v16 = vpack.c.bf16 %v15578_v42, %v15569_v34 }
 0x15b   : > { %v15597_v62 = vld [vmem:[#allocation2 + $0x50] sm:$0xff]  ;;  %v1575_v28 = vmax.f32 %v1551_v2, 0.0  ;;  %v1552_v44 = vadd.f32 %v15413_v19, %v1521_v5  ;;  %v12783_v0 = vpop.f32.mrb[16].mxu0  ;;  %v2543_v21 = vpack.c.bf16 %v15584_v23, %v15581_v48  ;;  %v3782_v26 = vpack.c.bf16 %v15595_v55, %v15592_v54 }
 0x15c   : > { %v15602_v59 = vld [vmem:[#allocation2 + $0x40] sm:$0xff]  ;;  %1602 = vst.msk [vmem:[#allocation2 + $0x70] sm:$0xff] %vm1587_vm3, %v1577_v51  ;;  %v1578_v30 = vmax.f32 %v1554_v52, 0.0  ;;  %v13767_v8 = vadd.f32 %v12783_v0, %v15464_v3  ;;  %v1446_v9 = vpop.f32.mrb[17].mxu0  ;;  %v4126_v6 = vmax.f32 %v15520_v15, %v15597_v62 }
 0x15d   : > { %v4114_v25 = vmax.f32 %v4107_v61, %v15602_v59  ;;  %v4124_v60 = vld [vmem:[#allocation2 + $0x58] sm:$0xff]  ;;  %1600 = vst.msk [vmem:[#allocation2 + $0x60] sm:$0xff] %vm1587_vm3, %v1575_v28  ;;  %v1576_v45 = vmax.f32 %v1552_v44, 0.0  ;;  %v13768_v43 = vadd.f32 %v1446_v9, %v15469_v13  ;;  %v12784_v17 = vpop.f32.mrb[18].mxu0  ;;  %v4415_v3 = vld [vmem:[#allocation3 + $0x2] sm:$0x1] }
 0x15e   : > { %v4127_v46 = vmax.f32 %v15602_v59, %v4124_v60  ;;  %v4122_v20 = vld [vmem:[#allocation2 + $0x48] sm:$0xff]  ;;  %1603 = vst.msk [vmem:[#allocation2 + $0x78] sm:$0xff] %vm1587_vm3, %v1578_v30  ;;  %v1526_v47 = vmul.f32 %v13767_v8, %v15408_v14  ;;  %v13769_v10 = vadd.f32 %v12784_v17, %v15473_v22  ;;  %v1449_v29 = vpop.f32.mrb[19].mxu0  ;;  %v4426_v57 = vld [vmem:[#allocation3 + $0x3] sm:$0x1] }
 0x15f   : > { %v4448_v13 = vld [vmem:[#allocation3 + $0x4] sm:$0x1]  ;;  %4117 = vst.msk [vmem:[#allocation3 + $0x10] sm:$0xff] %vm1587_vm3, %v4114_v25  ;;  %v4125_v7 = vmax.f32 %v15507_v24, %v4122_v20  ;;  %1601 = vst.msk [vmem:[#allocation2 + $0x68] sm:$0xff] %vm1587_vm3, %v1576_v45  ;;  %v1524_v35 = vmul.f32 %v13768_v43, %v15408_v14  ;;  %v13770_v39 = vadd.f32 %v1449_v29, %v15479_v18  ;;  %12908 = vmatmul.mubr.msk.bf16.gmra.mrb[36].mxu1 %vm444_vm2, %v2540_v11  ;;  %v4492_v2 = vld [vmem:[#allocation3 + $0x5] sm:$0x1] }
 0x160   : > { %v4437_v58 = vmax.f32 %v4415_v3, %v4426_v57  ;;  %v4481_v40 = vld [vmem:[#allocation3 + $0x4] sm:$0x1]  ;;  %v4514_v5 = vld [vmem:[#allocation3 + $0x6] sm:$0x1]  ;;  %v1557_v22 = vadd.f32 %v15413_v19, %v1526_v47  ;;  %v1527_v49 = vmul.f32 %v13769_v10, %v15408_v14  ;;  %13030 = vmatmul.mubr.msk.bf16.gmra.mrb[28].mxu0 %vm444_vm2, %v3779_v36  ;;  %12911 = vmatprep.mubr.msk.bf16.mxu1 %vm444_vm2, %v2541_v32  ;;  %v4558_v52 = vld [vmem:[#allocation3 + $0x7] sm:$0x1] }
 0x161   : > { %v4503_v24 = vmax.f32 %v4481_v40, %v4492_v2  ;;  %v4547_v51 = vld [vmem:[#allocation3 + $0x6] sm:$0x1]  ;;  %v4580_v61 = vld [vmem:[#allocation3 + $0x8] sm:$0x1]  ;;  %v1555_v18 = vadd.f32 %v15413_v19, %v1524_v35  ;;  %v1525_v11 = vmul.f32 %v13770_v39, %v15408_v14  ;;  %13033 = vmatprep.mubr.msk.bf16.mxu0 %vm444_vm2, %v3780_v53  ;;  %v4624_v59 = vld [vmem:[#allocation3 + $0x9] sm:$0x1] }
 0x162   : > { %v4459_v28 = vmax.f32 %v4437_v58, %v4448_v13  ;;  %v4569_v44 = vmax.f32 %v4547_v51, %v4558_v52  ;;  %v4613_v0 = vld [vmem:[#allocation3 + $0x8] sm:$0x1]  ;;  %v4646_v30 = vld [vmem:[#allocation3 + $0xa] sm:$0x1]  ;;  %v1581_v36 = vmax.f32 %v1557_v22, 0.0  ;;  %v1558_v8 = vadd.f32 %v15413_v19, %v1527_v49  ;;  %v15642_v20 = vld [vmem:[%s14659_s26 + $0x1d8] sm:$0xff] }
 0x163   : > { %v15636_v32 = vld [vmem:[%s14659_s26 + $0x1d0] sm:$0xff]  ;;  %v4525_v9 = vmax.f32 %v4503_v24, %v4514_v5  ;;  %v4635_v25 = vmax.f32 %v4613_v0, %v4624_v59  ;;  %v15638_v43 = vld [vmem:[#allocation2 + $0x70] sm:$0xff]  ;;  %v1579_v17 = vmax.f32 %v1555_v18, 0.0  ;;  %v1556_v53 = vadd.f32 %v15413_v19, %v1525_v11  ;;  %v12787_v3 = vpop.f32.mrb[20].mxu0  ;;  %v4359_v23 = vld [vmem:[#allocation3 + $0x1] sm:$0x1] }
 0x164   : > { %v4679_v60 = vld [vmem:[#allocation3 + $0xa] sm:$0x1]  ;;  %v4690_v45 = vld [vmem:[#allocation3 + $0xb] sm:$0x1]  ;;  %4470 = vst.msk [vmem:[#allocation4 + $0x1] sm:$0x1] %vm4403_vm4, %v4459_v28  ;;  %v4591_v47 = vmax.f32 %v4569_v44, %v4580_v61  ;;  %v4134_v57 = vmax.f32 %v4127_v46, %v15638_v43  ;;  %v13771_v39 = vadd.f32 %v12787_v3, %v15503_v50 }
 0x165   : > { %v4701_v10 = vmax.f32 %v4679_v60, %v4690_v45  ;;  %v4712_v29 = vld [vmem:[#allocation3 + $0xc] sm:$0x1]  ;;  %v15646_v13 = vld [vmem:[#allocation2 + $0x60] sm:$0xff]  ;;  %1606 = vst.msk [vmem:[#allocation2 + $0x90] sm:$0xff] %vm1587_vm3, %v1581_v36  ;;  %v1582_v35 = vmax.f32 %v1558_v8, 0.0  ;;  %v1462_v58 = vpop.f32.mrb[21].mxu0  ;;  %v4657_v2 = vmax.f32 %v4635_v25, %v4646_v30 }
 0x166   : > { %v15651_v40 = vld [vmem:[%s14659_s26 + $0x250] sm:$0xff]  ;;  %4536 = vst.msk [vmem:[#allocation4 + $0x2] sm:$0x1] %vm4403_vm4, %v4525_v9  ;;  %v4132_v22 = vmax.f32 %v4125_v7, %v15646_v13  ;;  %v1580_v49 = vmax.f32 %v1556_v53, 0.0  ;;  %v13772_v46 = vadd.f32 %v1462_v58, %v15510_v31  ;;  %v12788_v24 = vpop.f32.mrb[22].mxu0  ;;  %v4143_v50 = vld [vmem:[#allocation2 + $0x78] sm:$0xff]  ;;  %v1530_v18 = vmul.f32 %v13771_v39, %v15408_v14 }
 0x167   : > { %v4745_v5 = vld [vmem:[#allocation3 + $0xc] sm:$0x1]  ;;  %1604 = vst.msk [vmem:[#allocation2 + $0x80] sm:$0xff] %vm1587_vm3, %v1579_v17  ;;  %v4723_v51 = vmax.f32 %v4701_v10, %v4712_v29  ;;  %v4756_v52 = vld [vmem:[#allocation3 + $0xd] sm:$0x1]  ;;  %4138 = vst.msk [vmem:[#allocation3 + $0x28] sm:$0xff] %vm1587_vm3, %v4134_v57  ;;  %v13773_v7 = vadd.f32 %v12788_v24, %v15515_v12  ;;  %v2544_v31 = vpack.c.bf16 %v15642_v20, %v15636_v32  ;;  %12912 = vmatmul.mubr.msk.bf16.gmra.mrb[40].mxu1 %vm444_vm2, %v2542_v1 }
 0x168   : > { %4602 = vst.msk [vmem:[#allocation4 + $0x3] sm:$0x1] %vm4403_vm4, %v4591_v47  ;;  %v15659_v61 = vld [vmem:[#allocation2 + $0x68] sm:$0xff]  ;;  %v1465_v11 = vpop.f32.mrb[23].mxu0  ;;  %4668 = vst.msk [vmem:[#allocation4 + $0x4] sm:$0x1] %vm4403_vm4, %v4657_v2  ;;  %v4767_v28 = vmax.f32 %v4745_v5, %v4756_v52  ;;  %v1528_v59 = vmul.f32 %v13772_v46, %v15408_v14  ;;  %v3783_v30 = vpack.c.bf16 %v15333_v4, %v15651_v40  ;;  %13034 = vmatmul.mubr.msk.bf16.gmra.mrb[32].mxu0 %vm444_vm2, %v3781_v16 }
 0x169   : > { %1607 = vst.msk [vmem:[#allocation2 + $0x98] sm:$0xff] %vm1587_vm3, %v1582_v35  ;;  %v4811_v44 = vld [vmem:[#allocation3 + $0xe] sm:$0x1]  ;;  %4136 = vst.msk [vmem:[#allocation3 + $0x18] sm:$0xff] %vm1587_vm3, %v4132_v22  ;;  %v4133_v0 = vmax.f32 %v4126_v6, %v15659_v61  ;;  %v13774_v12 = vadd.f32 %v1465_v11, %v15524_v27  ;;  %v4822_v8 = vld [vmem:[#allocation3 + $0xf] sm:$0x1]  ;;  %v1561_v62 = vadd.f32 %v15413_v19, %v1530_v18  ;;  %12915 = vmatprep.mubr.msk.bf16.mxu1 %vm444_vm2, %v2543_v21 }
 0x16a   : > { %1605 = vst.msk [vmem:[#allocation2 + $0x88] sm:$0xff] %vm1587_vm3, %v1580_v49  ;;  %v4778_v36 = vld [vmem:[#allocation3 + $0xe] sm:$0x1]  ;;  %v4877_v15 = vld [vmem:[#allocation3 + $0x10] sm:$0x1]  ;;  %v1531_v6 = vmul.f32 %v13773_v7, %v15408_v14  ;;  %v1559_v9 = vadd.f32 %v15413_v19, %v1528_v59  ;;  %13037 = vmatprep.mubr.msk.bf16.mxu0 %vm444_vm2, %v3782_v26  ;;  %v4833_v34 = vmax.f32 %v4811_v44, %v4822_v8  ;;  %v11354_v4 = vld [vmem:[%s14659_s26 + $0x288] sm:$0xff] }
 0x16b   : > { %4734 = vst.msk [vmem:[#allocation4 + $0x5] sm:$0x1] %vm4403_vm4, %v4723_v51  ;;  %v4789_v27 = vmax.f32 %v4767_v28, %v4778_v36  ;;  %v4844_v37 = vld [vmem:[#allocation3 + $0x10] sm:$0x1]  ;;  %v4888_v41 = vld [vmem:[#allocation3 + $0x11] sm:$0x1]  ;;  %v1529_v25 = vmul.f32 %v13774_v12, %v15408_v14  ;;  %v4146_v21 = vmax.f32 %v15646_v13, %v4143_v50 }
 0x16c   : > { %v4348_v1 = vld [vmem:[#allocation3] sm:$0x1]  ;;  %4137 = vst.msk [vmem:[#allocation3 + $0x20] sm:$0xff] %vm1587_vm3, %v4133_v0  ;;  %v4899_v42 = vmax.f32 %v4877_v15, %v4888_v41  ;;  %v4910_v48 = vld [vmem:[#allocation3 + $0x12] sm:$0x1]  ;;  %v1585_v60 = vmax.f32 %v1561_v62, 0.0  ;;  %v1562_v45 = vadd.f32 %v15413_v19, %v1531_v6  ;;  %v4855_v26 = vmax.f32 %v4833_v34, %v4844_v37 }
 0x16d   : > { %v4943_v16 = vld [vmem:[#allocation3 + $0x12] sm:$0x1]  ;;  %4800 = vst.msk [vmem:[#allocation4 + $0x6] sm:$0x1] %vm4403_vm4, %v4789_v27  ;;  %v4370_v17 = vmax.f32 %v4348_v1, %v4359_v23  ;;  %v4381_v53 = vld [vmem:[#allocation3 + $0x2] sm:$0x1]  ;;  %v1560_v55 = vadd.f32 %v15413_v19, %v1529_v25 }
 0x16e   : > { %v4954_v3 = vld [vmem:[#allocation3 + $0x13] sm:$0x1]  ;;  %v1583_v54 = vmax.f32 %v1559_v9, 0.0  ;;  %v4921_v10 = vmax.f32 %v4899_v42, %v4910_v48  ;;  %v5009_v29 = vld [vmem:[#allocation3 + $0x14] sm:$0x1]  ;;  %v4144_v13 = vld [vmem:[#allocation2 + $0x80] sm:$0xff]  ;;  %v3785_v48 = vpack.c.bf16 %v15453_v56, %v15431_v38 }
 0x16f   : > { %v15702_v47 = vld [vmem:[#allocation2 + $0x90] sm:$0xff]  ;;  %1610 = vst.msk [vmem:[#allocation2 + $0xb0] sm:$0xff] %vm1587_vm3, %v1585_v60  ;;  %v1586_v39 = vmax.f32 %v1562_v45, 0.0  ;;  %v4392_v58 = vmax.f32 %v4370_v17, %v4381_v53  ;;  %v4965_v2 = vmax.f32 %v4943_v16, %v4954_v3  ;;  %v4147_v5 = vmax.f32 %v15659_v61, %v4144_v13  ;;  %12916 = vmatmul.mubr.msk.bf16.gmra.mrb[44].mxu1 %vm444_vm2, %v2544_v31  ;;  %v4878_v34 = vld [vmem:[#allocation3 + $0x28] sm:$0x1] }
 0x170   : > { %v5020_v57 = vld [vmem:[#allocation3 + $0x15] sm:$0x1]  ;;  %v4153_v35 = vmax.f32 %v4146_v21, %v15702_v47  ;;  %v15708_v22 = vld [vmem:[#allocation2 + $0x98] sm:$0xff]  ;;  %1608 = vst.msk [vmem:[#allocation2 + $0xa0] sm:$0xff] %vm1587_vm3, %v1583_v54  ;;  %v1584_v49 = vmax.f32 %v1560_v55, 0.0  ;;  %13038 = vmatmul.mubr.msk.bf16.gmra.mrb[36].mxu0 %vm444_vm2, %v3783_v30 }
 0x171   : > { %4866 = vst.msk [vmem:[#allocation4 + $0x7] sm:$0x1] %vm4403_vm4, %v4855_v26  ;;  %4932 = vst.msk [vmem:[#allocation4 + $0x8] sm:$0x1] %vm4403_vm4, %v4921_v10  ;;  %v4976_v46 = vld [vmem:[#allocation3 + $0x14] sm:$0x1]  ;;  %v5031_v24 = vmax.f32 %v5009_v29, %v5020_v57  ;;  %v4154_v7 = vmax.f32 %v4147_v5, %v15708_v22  ;;  %13041 = vmatprep.mubr.msk.bf16.mxu0 %vm444_vm2, %v15353_v63 }
 0x172   : > { %v5042_v51 = vld [vmem:[#allocation3 + $0x16] sm:$0x1]  ;;  %4157 = vst.msk [vmem:[#allocation3 + $0x30] sm:$0xff] %vm1587_vm3, %v4153_v35  ;;  %v4145_v52 = vld [vmem:[#allocation2 + $0x88] sm:$0xff]  ;;  %1611 = vst.msk [vmem:[#allocation2 + $0xb8] sm:$0xff] %vm1587_vm3, %v1586_v39  ;;  %v4987_v61 = vmax.f32 %v4965_v2, %v4976_v46 }
 0x173   : > { %v4416_v50 = vld [vmem:[#allocation3 + $0x1a] sm:$0x1]  ;;  %v4427_v18 = vld [vmem:[#allocation3 + $0x1b] sm:$0x1]  ;;  %4404 = vst.msk [vmem:[#allocation4] sm:$0x1] %vm4403_vm4, %v4392_v58  ;;  %v5053_v59 = vmax.f32 %v5031_v24, %v5042_v51  ;;  %v4148_v41 = vmax.f32 %v15638_v43, %v4145_v52  ;;  %v3786_v43 = vpack.c.bf16 %v11354_v4, %v15459_v33 }
 0x174   : > { %1609 = vst.msk [vmem:[#allocation2 + $0xa8] sm:$0xff] %vm1587_vm3, %v1584_v49  ;;  %v4438_v11 = vmax.f32 %v4416_v50, %v4427_v18  ;;  %v4449_v28 = vld [vmem:[#allocation3 + $0x1c] sm:$0x1]  ;;  %v4493_v0 = vld [vmem:[#allocation3 + $0x1d] sm:$0x1]  ;;  %4158 = vst.msk [vmem:[#allocation3 + $0x38] sm:$0xff] %vm1587_vm3, %v4154_v7 }
 0x175   : > { %v4482_v44 = vld [vmem:[#allocation3 + $0x1c] sm:$0x1]  ;;  %v4515_v36 = vld [vmem:[#allocation3 + $0x1e] sm:$0x1]  ;;  %v4559_v15 = vld [vmem:[#allocation3 + $0x1f] sm:$0x1] }
 0x176   : > { %v4504_v12 = vmax.f32 %v4482_v44, %v4493_v0  ;;  %v4548_v8 = vld [vmem:[#allocation3 + $0x1e] sm:$0x1]  ;;  %4998 = vst.msk [vmem:[#allocation4 + $0x9] sm:$0x1] %vm4403_vm4, %v4987_v61  ;;  %v4460_v32 = vmax.f32 %v4438_v11, %v4449_v28  ;;  %v4581_v31 = vld [vmem:[#allocation3 + $0x20] sm:$0x1] }
 0x177   : > { %v4570_v20 = vmax.f32 %v4548_v8, %v4559_v15  ;;  %v4614_v62 = vld [vmem:[#allocation3 + $0x20] sm:$0x1]  ;;  %v4625_v6 = vld [vmem:[#allocation3 + $0x21] sm:$0x1]  ;;  %5064 = vst.msk [vmem:[#allocation4 + $0xa] sm:$0x1] %vm4403_vm4, %v5053_v59 }
 0x178   : > { %v4526_v40 = vmax.f32 %v4504_v12, %v4515_v36  ;;  %v4636_v30 = vmax.f32 %v4614_v62, %v4625_v6  ;;  %v4680_v27 = vld [vmem:[#allocation3 + $0x22] sm:$0x1]  ;;  %v4691_v37 = vld [vmem:[#allocation3 + $0x23] sm:$0x1]  ;;  %4471 = vst.msk [vmem:[#allocation4 + $0x11] sm:$0x1] %vm4403_vm4, %v4460_v32  ;;  %13042 = vmatmul.mubr.msk.bf16.gmra.mrb[40].mxu0 %vm444_vm2, %v3785_v48 }
 0x179   : > { %v4592_v1 = vmax.f32 %v4570_v20, %v4581_v31  ;;  %v4647_v9 = vld [vmem:[#allocation3 + $0x22] sm:$0x1]  ;;  %v4702_v25 = vmax.f32 %v4680_v27, %v4691_v37  ;;  %v4746_v63 = vld [vmem:[#allocation3 + $0x24] sm:$0x1]  ;;  %v4757_v21 = vld [vmem:[#allocation3 + $0x25] sm:$0x1]  ;;  %13045 = vmatprep.mubr.msk.bf16.mxu0 %vm444_vm2, %v3786_v43 }
 0x17a   : > { %v15734_v42 = vld [vmem:[#allocation2 + $0xa0] sm:$0xff]  ;;  %4537 = vst.msk [vmem:[#allocation4 + $0x12] sm:$0x1] %vm4403_vm4, %v4526_v40  ;;  %v4658_v23 = vmax.f32 %v4636_v30, %v4647_v9  ;;  %v4768_v17 = vmax.f32 %v4746_v63, %v4757_v21  ;;  %v4845_v54 = vld [vmem:[#allocation3 + $0x28] sm:$0x1]  ;;  %v11356_v57 = vld [vmem:[%s14659_s26 + $0x298] sm:$0xff] }
 0x17b   : > { %v4713_v16 = vld [vmem:[#allocation3 + $0x24] sm:$0x1]  ;;  %v4155_v60 = vmax.f32 %v4148_v41, %v15734_v42  ;;  %4603 = vst.msk [vmem:[#allocation4 + $0x13] sm:$0x1] %vm4403_vm4, %v4592_v1  ;;  %v4812_v53 = vld [vmem:[#allocation3 + $0x26] sm:$0x1] }
 0x17c   : > { %v4724_v45 = vmax.f32 %v4702_v25, %v4713_v16  ;;  %v4823_v3 = vld [vmem:[#allocation3 + $0x27] sm:$0x1]  ;;  %4669 = vst.msk [vmem:[#allocation4 + $0x14] sm:$0x1] %vm4403_vm4, %v4658_v23  ;;  %v4779_v38 = vld [vmem:[#allocation3 + $0x26] sm:$0x1] }
 0x17d   : > { %v4834_v56 = vmax.f32 %v4812_v53, %v4823_v3  ;;  %v4889_v55 = vld [vmem:[#allocation3 + $0x29] sm:$0x1]  ;;  %4159 = vst.msk [vmem:[#allocation3 + $0x40] sm:$0xff] %vm1587_vm3, %v4155_v60  ;;  %v4790_v26 = vmax.f32 %v4768_v17, %v4779_v38  ;;  %v4911_v10 = vld [vmem:[#allocation3 + $0x2a] sm:$0x1] }
 0x17e   : > { %4735 = vst.msk [vmem:[#allocation4 + $0x15] sm:$0x1] %vm4403_vm4, %v4724_v45  ;;  %v4900_v33 = vmax.f32 %v4878_v34, %v4889_v55  ;;  %v11355_v29 = vld [vmem:[%s14659_s26 + $0x290] sm:$0xff]  ;;  %v4417_v35 = vld [vmem:[#allocation3 + $0x32] sm:$0x1]  ;;  %s14328_s26 = smul.u32 12, %s17608_s14 }
 0x17f   : > { %v4428_v13 = vld [vmem:[#allocation3 + $0x33] sm:$0x1]  ;;  %v4856_v39 = vmax.f32 %v4834_v56, %v4845_v54  ;;  %v4450_v2 = vld [vmem:[#allocation3 + $0x34] sm:$0x1]  ;;  %v4494_v49 = vld [vmem:[#allocation3 + $0x35] sm:$0x1]  ;;  %v3787_v8 = vpack.c.bf16 %v11356_v57, %v11355_v29 }
 0x180   : > { %v4439_v58 = vmax.f32 %v4417_v35, %v4428_v13  ;;  %v4483_v5 = vld [vmem:[#allocation3 + $0x34] sm:$0x1]  ;;  %4801 = vst.msk [vmem:[#allocation4 + $0x16] sm:$0x1] %vm4403_vm4, %v4790_v26  ;;  %v4922_v46 = vmax.f32 %v4900_v33, %v4911_v10  ;;  %v4516_v51 = vld [vmem:[#allocation3 + $0x36] sm:$0x1]  ;;  %s359_s22 = scalar_lea.vmem %s17516_s10, %s14328_s26 }
 0x181   : > { %v4505_v24 = vmax.f32 %v4483_v5, %v4494_v49  ;;  %v4549_v52 = vld [vmem:[#allocation3 + $0x36] sm:$0x1]  ;;  %v4560_v50 = vld [vmem:[#allocation3 + $0x37] sm:$0x1]  ;;  %4867 = vst.msk [vmem:[#allocation4 + $0x17] sm:$0x1] %vm4403_vm4, %v4856_v39  ;;  %13046 = vmatmul.mubr.msk.bf16.gmra.mrb[44].mxu0 %vm444_vm2, %v3787_v8 }
 0x182   : > { %v4461_v18 = vmax.f32 %v4439_v58, %v4450_v2  ;;  %v4571_v61 = vmax.f32 %v4549_v52, %v4560_v50  ;;  %v4582_v7 = vld [vmem:[#allocation3 + $0x38] sm:$0x1]  ;;  %v4626_v28 = vld [vmem:[#allocation3 + $0x39] sm:$0x1]  ;;  %4933 = vst.msk [vmem:[#allocation4 + $0x18] sm:$0x1] %vm4403_vm4, %v4922_v46 }
 0x183   : > { %v4615_v11 = vld [vmem:[#allocation3 + $0x38] sm:$0x1]  ;;  %v4527_v44 = vmax.f32 %v4505_v24, %v4516_v51  ;;  %v4648_v59 = vld [vmem:[#allocation3 + $0x3a] sm:$0x1]  ;;  %v4692_v36 = vld [vmem:[#allocation3 + $0x3b] sm:$0x1] }
 0x184   : > { %v4637_v0 = vmax.f32 %v4615_v11, %v4626_v28  ;;  %v4681_v12 = vld [vmem:[#allocation3 + $0x3a] sm:$0x1]  ;;  %4472 = vst.msk [vmem:[#allocation4 + $0x21] sm:$0x1] %vm4403_vm4, %v4461_v18  ;;  %v4593_v15 = vmax.f32 %v4571_v61, %v4582_v7  ;;  %v4714_v20 = vld [vmem:[#allocation3 + $0x3c] sm:$0x1] }
 0x185   : > { %v4703_v32 = vmax.f32 %v4681_v12, %v4692_v36  ;;  %v4747_v31 = vld [vmem:[#allocation3 + $0x3c] sm:$0x1]  ;;  %v4758_v62 = vld [vmem:[#allocation3 + $0x3d] sm:$0x1]  ;;  %4538 = vst.msk [vmem:[#allocation4 + $0x22] sm:$0x1] %vm4403_vm4, %v4527_v44 }
 0x186   : > { %v4659_v6 = vmax.f32 %v4637_v0, %v4648_v59  ;;  %v4769_v4 = vmax.f32 %v4747_v31, %v4758_v62  ;;  %v4780_v40 = vld [vmem:[#allocation3 + $0x3e] sm:$0x1]  ;;  %v4824_v27 = vld [vmem:[#allocation3 + $0x3f] sm:$0x1]  ;;  %4604 = vst.msk [vmem:[#allocation4 + $0x23] sm:$0x1] %vm4403_vm4, %v4593_v15 }
 0x187   : > { %v4813_v30 = vld [vmem:[#allocation3 + $0x3e] sm:$0x1]  ;;  %v4725_v37 = vmax.f32 %v4703_v32, %v4714_v20  ;;  %v4846_v1 = vld [vmem:[#allocation3 + $0x40] sm:$0x1]  ;;  %v4890_v25 = vld [vmem:[#allocation3 + $0x41] sm:$0x1] }
 0x188   : > { %v4835_v41 = vmax.f32 %v4813_v30, %v4824_v27  ;;  %v4879_v9 = vld [vmem:[#allocation3 + $0x40] sm:$0x1]  ;;  %4670 = vst.msk [vmem:[#allocation4 + $0x24] sm:$0x1] %vm4403_vm4, %v4659_v6  ;;  %v4791_v63 = vmax.f32 %v4769_v4, %v4780_v40  ;;  %v4349_v48 = vld [vmem:[#allocation3 + $0x18] sm:$0x1] }
 0x189   : > { %v4901_v34 = vmax.f32 %v4879_v9, %v4890_v25  ;;  %v4360_v23 = vld [vmem:[#allocation3 + $0x19] sm:$0x1]  ;;  %4736 = vst.msk [vmem:[#allocation4 + $0x25] sm:$0x1] %vm4403_vm4, %v4725_v37  ;;  %v4912_v21 = vld [vmem:[#allocation3 + $0x42] sm:$0x1] }
 0x18a   : > { %v4857_v16 = vmax.f32 %v4835_v41, %v4846_v1  ;;  %v4371_v60 = vmax.f32 %v4349_v48, %v4360_v23  ;;  %v4350_v43 = vld [vmem:[#allocation3 + $0x30] sm:$0x1]  ;;  %4802 = vst.msk [vmem:[#allocation4 + $0x26] sm:$0x1] %vm4403_vm4, %v4791_v63  ;;  %v4382_v17 = vld [vmem:[#allocation3 + $0x1a] sm:$0x1] }
 0x18b   : > { %v4923_v45 = vmax.f32 %v4901_v34, %v4912_v21  ;;  %v4361_v53 = vld [vmem:[#allocation3 + $0x31] sm:$0x1]  ;;  %v4944_v3 = vld [vmem:[#allocation3 + $0x2a] sm:$0x1]  ;;  %v5095_v56 = vld [vmem:[#allocation4 + $0x11] sm:$0xff] }
 0x18c   : > { %v5094_v38 = vld [vmem:[#allocation4 + $0x1] sm:$0xff]  ;;  %4868 = vst.msk [vmem:[#allocation4 + $0x27] sm:$0x1] %vm4403_vm4, %v4857_v16  ;;  %v4393_v54 = vmax.f32 %v4371_v60, %v4382_v17  ;;  %v4372_v55 = vmax.f32 %v4350_v43, %v4361_v53  ;;  %v4383_v10 = vld [vmem:[#allocation3 + $0x32] sm:$0x1]  ;;  %v14354_v44 = vld [vmem:[%s17510_s4 + $0x20] sm:$0xff]  }
 0x18d   : > { %v4955_v26 = vld [vmem:[#allocation3 + $0x2b] sm:$0x1]  ;;  %v5101_v33 = vpack.c.bf16 %v5095_v56, %v5094_v38  ;;  %4934 = vst.msk [vmem:[#allocation4 + $0x28] sm:$0x1] %vm4403_vm4, %v4923_v45  ;;  %v4945_v57 = vld [vmem:[#allocation3 + $0x42] sm:$0x1]  ;;  %13049 = vmatprep.subr.bf16.mxu1 %v14354_v44 }
 0x18e   : > { %v4966_v29 = vmax.f32 %v4944_v3, %v4955_v26  ;;  %v4956_v35 = vld [vmem:[#allocation3 + $0x43] sm:$0x1]  ;;  %4405 = vst.msk [vmem:[#allocation4 + $0x10] sm:$0x1] %vm4403_vm4, %v4393_v54  ;;  %v4394_v13 = vmax.f32 %v4372_v55, %v4383_v10  ;;  %v4977_v39 = vld [vmem:[#allocation3 + $0x2c] sm:$0x1]  ;;  %13050 = vmatpush3.bf16.msra.mxu1 %v14354_v44 }
 0x18f   : > { %v4967_v58 = vmax.f32 %v4945_v57, %v4956_v35  ;;  %v5010_v2 = vld [vmem:[#allocation3 + $0x2c] sm:$0x1]  ;;  %v5021_v5 = vld [vmem:[#allocation3 + $0x2d] sm:$0x1]  ;;  %13057 = vmatprep.mubr.msk.bf16.mxu1 %vm1587_vm3, %v5101_v33  ;;  %v4978_v46 = vld [vmem:[#allocation3 + $0x44] sm:$0x1] }
 0x190   : > { %v4988_v49 = vmax.f32 %v4966_v29, %v4977_v39  ;;  %v5032_v24 = vmax.f32 %v5010_v2, %v5021_v5  ;;  %v5011_v51 = vld [vmem:[#allocation3 + $0x44] sm:$0x1]  ;;  %4406 = vst.msk [vmem:[#allocation4 + $0x20] sm:$0x1] %vm4403_vm4, %v4394_v13  ;;  %v5043_v50 = vld [vmem:[#allocation3 + $0x2e] sm:$0x1] }
 0x191   : > { %v4989_v52 = vmax.f32 %v4967_v58, %v4978_v46  ;;  %v5022_v18 = vld [vmem:[#allocation3 + $0x45] sm:$0x1]  ;;  %v5044_v11 = vld [vmem:[#allocation3 + $0x46] sm:$0x1]  ;;  %v14356_v59 = vld [vmem:[%s17510_s4 + $0x30] sm:$0xff]  }
 0x192   : > { %4999 = vst.msk [vmem:[#allocation4 + $0x19] sm:$0x1] %vm4403_vm4, %v4988_v49  ;;  %v5054_v61 = vmax.f32 %v5032_v24, %v5043_v50  ;;  %v5033_v7 = vmax.f32 %v5011_v51, %v5022_v18  ;;  %v14355_v0 = vld [vmem:[%s17510_s4 + $0x28] sm:$0xff]   ;;  %v14357_v12 = vld [vmem:[%s17510_s4 + $0x38] sm:$0xff]   ;;  %v15783_v36 = vld [vmem:[%s17510_s4] sm:$0xff]  }
 0x193   : > { %5000 = vst.msk [vmem:[#allocation4 + $0x29] sm:$0x1] %vm4403_vm4, %v4989_v52  ;;  %13051 = vmatprep.subr.bf16.mxu1 %v14355_v0  ;;  %v15792_v6 = vld [vmem:[%s17508_s2] ss:$0 sm:$0xff]  ;;  %v4164_v60 = vld [vmem:[#allocation2 + $0xa8] sm:$0xff]  ;;  %v4165_v38 = vld [vmem:[#allocation2 + $0xb0] sm:$0xff] }
 0x194   : > { %5065 = vst.msk [vmem:[#allocation4 + $0x1a] sm:$0x1] %vm4403_vm4, %v5054_v61  ;;  %v5055_v28 = vmax.f32 %v5033_v7, %v5044_v11  ;;  %13052 = vmatpush3.bf16.msra.mxu1 %v14355_v0  ;;  %v15798_v30 = vld [vmem:[%s17509_s3] ss:$0 sm:$0xff]  ;;  %v4167_v33 = vmax.f32 %v15702_v47, %v4164_v60  ;;  %v4168_v2 = vmax.f32 %v15708_v22, %v4165_v38 }
 0x195   : > { %13053 = vmatprep.subr.bf16.mxu1 %v14356_v59  ;;  %v4166_v23 = vld [vmem:[#allocation2 + $0xb8] sm:$0xff] }
 0x196   : > { %5066 = vst.msk [vmem:[#allocation4 + $0x2a] sm:$0x1] %vm4403_vm4, %v5055_v28  ;;  %v4169_v56 = vmax.f32 %v15734_v42, %v4166_v23  ;;  %v15825_v42 = vld [vmem:[%s17508_s2] ss:$0 sm:$0xff] }
 0x197   : > { %v15835_v51 = vld [vmem:[%s17509_s3] ss:$0 sm:$0xff] }
 0x198   : > { %13054 = vmatpush3.bf16.msra.mxu1 %v14356_v59 }
 0x199   : > { %13055 = vmatprep.subr.bf16.mxu1 %v14357_v12 }
 0x19c   : > { %13056 = vmatpush3.bf16.msra.mxu1 %v14357_v12 }
 0x19d   : > { %13065 = vmatprep.subr.bf16.mxu1 %v15783_v36 }
 0x21a   : > { %v12897_v8 = vpop.f32.mrb[24].mxu1 }
 0x21b   : > { %v2753_v15 = vmul.f32 %v12897_v8, %v15408_v14  ;;  %v2625_v32 = vpop.f32.mrb[25].mxu1 }
 0x21c   : > { %v2751_v20 = vmul.f32 %v15408_v14, %v2625_v32  ;;  %v12898_v31 = vpop.f32.mrb[26].mxu1 }
 0x21d   : > { %v2784_v62 = vadd.f32 %v15413_v19, %v2753_v15  ;;  %v2754_v4 = vmul.f32 %v15792_v6, %v12898_v31  ;;  %v2628_v40 = vpop.f32.mrb[27].mxu1 }
 0x21e   : > { %v2782_v27 = vadd.f32 %v15798_v30, %v2751_v20  ;;  %v2752_v14 = vmul.f32 %v15792_v6, %v2628_v40 }
 0x21f   : > { %v2808_v37 = vmax.f32 %v2784_v62, 0.0  ;;  %v2785_v19 = vadd.f32 %v15798_v30, %v2754_v4 }
 0x220   : > { %v2806_v41 = vmax.f32 %v2782_v27, 0.0  ;;  %v2783_v1 = vadd.f32 %v15798_v30, %v2752_v14 }
 0x221   : > { %2833 = vst.msk [vmem:[#allocation2 + $0xd0] sm:$0xff] %vm1587_vm3, %v2808_v37  ;;  %v2809_v9 = vmax.f32 %v2785_v19, 0.0 }
 0x222   : > { %2831 = vst.msk [vmem:[#allocation2 + $0xc0] sm:$0xff] %vm1587_vm3, %v2806_v41  ;;  %v2807_v25 = vmax.f32 %v2783_v1, 0.0  ;;  %v12901_v63 = vpop.f32.mrb[28].mxu1 }
 0x223   : > { %2834 = vst.msk [vmem:[#allocation2 + $0xd8] sm:$0xff] %vm1587_vm3, %v2809_v9  ;;  %v2757_v34 = vmul.f32 %v15792_v6, %v12901_v63  ;;  %v2641_v48 = vpop.f32.mrb[29].mxu1 }
 0x224   : > { %2832 = vst.msk [vmem:[#allocation2 + $0xc8] sm:$0xff] %vm1587_vm3, %v2807_v25  ;;  %v2755_v16 = vmul.f32 %v15792_v6, %v2641_v48  ;;  %v12902_v21 = vpop.f32.mrb[30].mxu1 }
 0x225   : > { %v2788_v43 = vadd.f32 %v15798_v30, %v2757_v34  ;;  %v2758_v45 = vmul.f32 %v15792_v6, %v12902_v21  ;;  %v2644_v17 = vpop.f32.mrb[31].mxu1 }
 0x226   : > { %v2786_v53 = vadd.f32 %v15798_v30, %v2755_v16  ;;  %v2756_v3 = vmul.f32 %v15792_v6, %v2644_v17 }
 0x227   : > { %v2812_v54 = vmax.f32 %v2788_v43, 0.0  ;;  %v2789_v55 = vadd.f32 %v15798_v30, %v2758_v45 }
 0x228   : > { %v15816_v26 = vld [vmem:[#allocation2 + $0xd0] sm:$0xff]  ;;  %v2810_v10 = vmax.f32 %v2786_v53, 0.0  ;;  %v2787_v29 = vadd.f32 %v15798_v30, %v2756_v3 }
 0x229   : > { %v4175_v57 = vmax.f32 %v4169_v56, %v15816_v26  ;;  %v4170_v35 = vld [vmem:[#allocation2 + $0xc0] sm:$0xff]  ;;  %2837 = vst.msk [vmem:[#allocation2 + $0xf0] sm:$0xff] %vm1587_vm3, %v2812_v54  ;;  %v2813_v13 = vmax.f32 %v2789_v55, 0.0 }
 0x22a   : > { %v4173_v39 = vmax.f32 %v4167_v33, %v4170_v35  ;;  %v4184_v58 = vld [vmem:[#allocation2 + $0xd8] sm:$0xff]  ;;  %2835 = vst.msk [vmem:[#allocation2 + $0xe0] sm:$0xff] %vm1587_vm3, %v2810_v10  ;;  %v2811_v47 = vmax.f32 %v2787_v29, 0.0  ;;  %v12905_v5 = vpop.f32.mrb[32].mxu1 }
 0x22b   : > { %4179 = vst.msk [vmem:[#allocation3 + $0x58] sm:$0xff] %vm1587_vm3, %v4175_v57  ;;  %v4171_v49 = vld [vmem:[#allocation2 + $0xc8] sm:$0xff]  ;;  %2838 = vst.msk [vmem:[#allocation2 + $0xf8] sm:$0xff] %vm1587_vm3, %v2813_v13  ;;  %v2761_v46 = vmul.f32 %v15792_v6, %v12905_v5  ;;  %v13027_v24 = vpop.f32.mrb[24].mxu0  ;;  %v2657_v52 = vpop.f32.mrb[33].mxu1  ;;  %v4187_v11 = vmax.f32 %v4170_v35, %v4184_v58 }
 0x22c   : > { %4177 = vst.msk [vmem:[#allocation3 + $0x48] sm:$0xff] %vm1587_vm3, %v4173_v39  ;;  %v4174_v22 = vmax.f32 %v4168_v2, %v4171_v49  ;;  %2836 = vst.msk [vmem:[#allocation2 + $0xe8] sm:$0xff] %vm1587_vm3, %v2811_v47  ;;  %v3996_v50 = vmul.f32 %v13027_v24, %v15825_v42  ;;  %v2759_v18 = vmul.f32 %v15792_v6, %v2657_v52  ;;  %v3868_v61 = vpop.f32.mrb[25].mxu0  ;;  %v12906_v7 = vpop.f32.mrb[34].mxu1 }
 0x22d   : > { %v2792_v28 = vadd.f32 %v15798_v30, %v2761_v46  ;;  %v3994_v44 = vmul.f32 %v15825_v42, %v3868_v61  ;;  %v2762_v0 = vmul.f32 %v15792_v6, %v12906_v7  ;;  %v13028_v59 = vpop.f32.mrb[26].mxu0  ;;  %v2660_v12 = vpop.f32.mrb[35].mxu1 }
 0x22e   : > { %4178 = vst.msk [vmem:[#allocation3 + $0x50] sm:$0xff] %vm1587_vm3, %v4174_v22  ;;  %v4027_v8 = vadd.f32 %v15835_v51, %v3996_v50  ;;  %v2790_v15 = vadd.f32 %v15798_v30, %v2759_v18  ;;  %v3997_v32 = vmul.f32 %v13028_v59, %v15825_v42  ;;  %v2760_v20 = vmul.f32 %v15792_v6, %v2660_v12  ;;  %v3871_v31 = vpop.f32.mrb[27].mxu0 }
 0x22f   : > { %v2816_v62 = vmax.f32 %v2792_v28, 0.0  ;;  %v4025_v4 = vadd.f32 %v15835_v51, %v3994_v44  ;;  %v2793_v40 = vadd.f32 %v15798_v30, %v2762_v0  ;;  %v3995_v27 = vmul.f32 %v15825_v42, %v3871_v31 }
 0x230   : > { %v15852_v14 = vld [vmem:[#allocation2 + $0xf0] sm:$0xff]  ;;  %v4051_v37 = vmax.f32 %v4027_v8, 0.0  ;;  %v2814_v19 = vmax.f32 %v2790_v15, 0.0  ;;  %v4028_v41 = vadd.f32 %v15835_v51, %v3997_v32  ;;  %v2791_v1 = vadd.f32 %v15798_v30, %v2760_v20 }
 0x231   : > { %v4194_v9 = vmax.f32 %v4187_v11, %v15852_v14  ;;  %v4185_v25 = vld [vmem:[#allocation2 + $0xe0] sm:$0xff]  ;;  %2841 = vst.msk [vmem:[#allocation2 + $0x110] sm:$0xff] %vm1587_vm3, %v2816_v62  ;;  %v4049_v63 = vmax.f32 %v4025_v4, 0.0  ;;  %v2817_v34 = vmax.f32 %v2793_v40, 0.0  ;;  %v4026_v48 = vadd.f32 %v15835_v51, %v3995_v27 }
 0x232   : > { %v4188_v23 = vmax.f32 %v4171_v49, %v4185_v25  ;;  %v15859_v16 = vld [vmem:[#allocation2 + $0xf8] sm:$0xff]  ;;  %4076 = vst.msk [vmem:[#allocation2 + $0x190] sm:$0xff] %vm1587_vm3, %v4051_v37  ;;  %2839 = vst.msk [vmem:[#allocation2 + $0x100] sm:$0xff] %vm1587_vm3, %v2814_v19  ;;  %v4052_v21 = vmax.f32 %v4028_v41, 0.0  ;;  %v2815_v60 = vmax.f32 %v2791_v1, 0.0  ;;  %v12909_v43 = vpop.f32.mrb[36].mxu1 }
 0x233   : > { %4198 = vst.msk [vmem:[#allocation3 + $0x60] sm:$0xff] %vm1587_vm3, %v4194_v9  ;;  %v4186_v45 = vld [vmem:[#allocation2 + $0xe8] sm:$0xff]  ;;  %4074 = vst.msk [vmem:[#allocation2 + $0x180] sm:$0xff] %vm1587_vm3, %v4049_v63  ;;  %v4050_v17 = vmax.f32 %v4026_v48, 0.0  ;;  %v2765_v53 = vmul.f32 %v15792_v6, %v12909_v43  ;;  %v13031_v3 = vpop.f32.mrb[28].mxu0  ;;  %v2673_v38 = vpop.f32.mrb[37].mxu1 }
 0x234   : > { %2842 = vst.msk [vmem:[#allocation2 + $0x118] sm:$0xff] %vm1587_vm3, %v2817_v34  ;;  %v4418_v56 = vld [vmem:[#allocation3 + $0x4a] sm:$0x1]  ;;  %v4195_v54 = vmax.f32 %v4188_v23, %v15859_v16  ;;  %v4189_v55 = vmax.f32 %v15816_v26, %v4186_v45  ;;  %4077 = vst.msk [vmem:[#allocation2 + $0x198] sm:$0xff] %vm1587_vm3, %v4052_v21  ;;  %v4000_v33 = vmul.f32 %v13031_v3, %v15825_v42  ;;  %v3884_v29 = vpop.f32.mrb[29].mxu0  ;;  %v12910_v57 = vpop.f32.mrb[38].mxu1 }
 0x235   : > { %2840 = vst.msk [vmem:[#allocation2 + $0x108] sm:$0xff] %vm1587_vm3, %v2815_v60  ;;  %v2763_v10 = vmul.f32 %v15792_v6, %v2673_v38  ;;  %v4429_v35 = vld [vmem:[#allocation3 + $0x4b] sm:$0x1]  ;;  %4075 = vst.msk [vmem:[#allocation2 + $0x188] sm:$0xff] %vm1587_vm3, %v4050_v17  ;;  %v2796_v13 = vadd.f32 %v15798_v30, %v2765_v53  ;;  %v3998_v39 = vmul.f32 %v15825_v42, %v3884_v29  ;;  %v13032_v26 = vpop.f32.mrb[30].mxu0  ;;  %v2676_v2 = vpop.f32.mrb[39].mxu1 }
 0x236   : > { %v2766_v58 = vmul.f32 %v15792_v6, %v12910_v57  ;;  %v4440_v47 = vmax.f32 %v4418_v56, %v4429_v35  ;;  %4199 = vst.msk [vmem:[#allocation3 + $0x68] sm:$0xff] %vm1587_vm3, %v4195_v54  ;;  %v4031_v5 = vadd.f32 %v15835_v51, %v4000_v33  ;;  %v4001_v46 = vmul.f32 %v13032_v26, %v15825_v42  ;;  %v3887_v52 = vpop.f32.mrb[31].mxu0  ;;  %v4484_v7 = vld [vmem:[#allocation3 + $0x4c] sm:$0x1]  ;;  %v4495_v12 = vld [vmem:[#allocation3 + $0x4d] sm:$0x1] }
 0x237   : > { %v2794_v49 = vadd.f32 %v15798_v30, %v2763_v10  ;;  %v2764_v24 = vmul.f32 %v15792_v6, %v2676_v2  ;;  %v2820_v22 = vmax.f32 %v2796_v13, 0.0  ;;  %v4029_v50 = vadd.f32 %v15835_v51, %v3998_v39  ;;  %v4451_v62 = vld [vmem:[#allocation3 + $0x4c] sm:$0x1]  ;;  %v4517_v56 = vld [vmem:[#allocation3 + $0x4e] sm:$0x1] }
 0x238   : > { %v2797_v18 = vadd.f32 %v15798_v30, %v2766_v58  ;;  %v3999_v61 = vmul.f32 %v15825_v42, %v3887_v52  ;;  %v15885_v11 = vld [vmem:[#allocation2 + $0x110] sm:$0xff]  ;;  %v4055_v28 = vmax.f32 %v4031_v5, 0.0  ;;  %v4032_v0 = vadd.f32 %v15835_v51, %v4001_v46 }
 0x239   : > { %v2818_v44 = vmax.f32 %v2794_v49, 0.0  ;;  %v2795_v59 = vadd.f32 %v15798_v30, %v2764_v24  ;;  %v4209_v8 = vmax.f32 %v15859_v16, %v15885_v11  ;;  %v4193_v15 = vld [vmem:[#allocation2 + $0x100] sm:$0xff]  ;;  %2845 = vst.msk [vmem:[#allocation2 + $0x130] sm:$0xff] %vm1587_vm3, %v2820_v22  ;;  %v4053_v32 = vmax.f32 %v4029_v50, 0.0  ;;  %v15924_v50 = vld [vmem:[#allocation3 + $0x4e] sm:$0x1] }
 0x23a   : > { %v2821_v20 = vmax.f32 %v2797_v18, 0.0  ;;  %v4030_v31 = vadd.f32 %v15835_v51, %v3999_v61  ;;  %v4196_v4 = vmax.f32 %v4189_v55, %v4193_v15  ;;  %v15893_v40 = vld [vmem:[#allocation2 + $0x180] sm:$0xff]  ;;  %4080 = vst.msk [vmem:[#allocation2 + $0x1b0] sm:$0xff] %vm1587_vm3, %v4055_v28  ;;  %v4056_v37 = vmax.f32 %v4032_v0, 0.0  ;;  %v12913_v41 = vpop.f32.mrb[40].mxu1 }
 0x23b   : > { %v4207_v27 = vld [vmem:[#allocation2 + $0x118] sm:$0xff]  ;;  %2843 = vst.msk [vmem:[#allocation2 + $0x120] sm:$0xff] %vm1587_vm3, %v2818_v44  ;;  %v2819_v19 = vmax.f32 %v2795_v59, 0.0  ;;  %v4462_v1 = vmax.f32 %v4440_v47, %v4451_v62  ;;  %4078 = vst.msk [vmem:[#allocation2 + $0x1a0] sm:$0xff] %vm1587_vm3, %v4053_v32  ;;  %v2769_v48 = vmul.f32 %v15792_v6, %v12913_v41  ;;  %v13035_v23 = vpop.f32.mrb[32].mxu0  ;;  %v2689_v21 = vpop.f32.mrb[41].mxu1  ;;  %v4506_v60 = vmax.f32 %v4484_v7, %v4495_v12 }
 0x23c   : > { %v4210_v9 = vmax.f32 %v4193_v15, %v4207_v27  ;;  %v4267_v25 = vld [vmem:[#allocation2 + $0x198] sm:$0xff]  ;;  %v4205_v63 = vld [vmem:[#allocation2 + $0x108] sm:$0xff]  ;;  %2846 = vst.msk [vmem:[#allocation2 + $0x138] sm:$0xff] %vm1587_vm3, %v2821_v20  ;;  %v4054_v34 = vmax.f32 %v4030_v31, 0.0  ;;  %4200 = vst.msk [vmem:[#allocation3 + $0x70] sm:$0xff] %vm1587_vm3, %v4196_v4  ;;  %v4004_v17 = vmul.f32 %v13035_v23, %v15825_v42  ;;  %v2767_v53 = vmul.f32 %v15792_v6, %v2689_v21  ;;  %v3900_v3 = vpop.f32.mrb[33].mxu0 }
 0x23d   : > { %v4270_v43 = vmax.f32 %v15893_v40, %v4267_v25  ;;  %v4208_v45 = vmax.f32 %v15852_v14, %v4205_v63  ;;  %4081 = vst.msk [vmem:[#allocation2 + $0x1b8] sm:$0xff] %vm1587_vm3, %v4056_v37  ;;  %2844 = vst.msk [vmem:[#allocation2 + $0x128] sm:$0xff] %vm1587_vm3, %v2819_v19  ;;  %v12914_v38 = vpop.f32.mrb[42].mxu1  ;;  %v2800_v54 = vadd.f32 %v15798_v30, %v2769_v48  ;;  %v13036_v33 = vpop.f32.mrb[34].mxu0  ;;  %v4561_v59 = vld [vmem:[#allocation3 + $0x4f] sm:$0x1] }
 0x23e   : > { %4473 = vst.msk [vmem:[#allocation4 + $0x31] sm:$0x1] %vm4403_vm4, %v4462_v1  ;;  %v4002_v55 = vmul.f32 %v15825_v42, %v3900_v3  ;;  %v2770_v14 = vmul.f32 %v15792_v6, %v12914_v38  ;;  %v2692_v10 = vpop.f32.mrb[43].mxu1  ;;  %v4528_v29 = vmax.f32 %v4506_v60, %v4517_v56  ;;  %v4035_v57 = vadd.f32 %v15835_v51, %v4004_v17  ;;  %v3903_v58 = vpop.f32.mrb[35].mxu0  ;;  %v15933_v12 = vld [vmem:[#allocation2 + $0x188] sm:$0xff]  ;;  %v15954_v21 = vld [vmem:[#allocation2 + $0x190] sm:$0xff] }
 0x23f   : > { %4079 = vst.msk [vmem:[#allocation2 + $0x1a8] sm:$0xff] %vm1587_vm3, %v4054_v34  ;;  %v2798_v35 = vadd.f32 %v15798_v30, %v2767_v53  ;;  %v4005_v13 = vmul.f32 %v13036_v33, %v15825_v42  ;;  %v2768_v39 = vmul.f32 %v15792_v6, %v2692_v10  ;;  %v2824_v26 = vmax.f32 %v2800_v54, 0.0  ;;  %v4583_v37 = vld [vmem:[#allocation3 + $0x50] sm:$0x1]  ;;  %v4627_v56 = vld [vmem:[#allocation3 + $0x51] sm:$0x1] }
 0x240   : > { %v4033_v2 = vadd.f32 %v15835_v51, %v4002_v55  ;;  %v2801_v47 = vadd.f32 %v15798_v30, %v2770_v14  ;;  %v4003_v5 = vmul.f32 %v15825_v42, %v3903_v58  ;;  %4539 = vst.msk [vmem:[#allocation4 + $0x32] sm:$0x1] %vm4403_vm4, %v4528_v29  ;;  %v15920_v49 = vld [vmem:[#allocation2 + $0x130] sm:$0xff]  ;;  %v4059_v46 = vmax.f32 %v4035_v57, 0.0 }
 0x241   : > { %v2822_v24 = vmax.f32 %v2798_v35, 0.0  ;;  %v4036_v52 = vadd.f32 %v15835_v51, %v4005_v13  ;;  %v2799_v22 = vadd.f32 %v15798_v30, %v2768_v39  ;;  %v4217_v18 = vmax.f32 %v4210_v9, %v15920_v49  ;;  %v15927_v61 = vld [vmem:[#allocation2 + $0x1b0] sm:$0xff]  ;;  %2849 = vst.msk [vmem:[#allocation2 + $0x150] sm:$0xff] %vm1587_vm3, %v2824_v26 }
 0x242   : > { %v15929_v7 = vld [vmem:[#allocation2 + $0x120] sm:$0xff]  ;;  %v4057_v28 = vmax.f32 %v4033_v2, 0.0  ;;  %v2825_v44 = vmax.f32 %v2801_v47, 0.0  ;;  %v4034_v0 = vadd.f32 %v15835_v51, %v4003_v5  ;;  %v4277_v15 = vmax.f32 %v4270_v43, %v15927_v61  ;;  %4084 = vst.msk [vmem:[#allocation2 + $0x1d0] sm:$0xff] %vm1587_vm3, %v4059_v46  ;;  %v12917_v27 = vpop.f32.mrb[44].mxu1 }
 0x243   : > { %v4215_v32 = vmax.f32 %v4208_v45, %v15929_v7  ;;  %v4268_v20 = vld [vmem:[#allocation2 + $0x1a0] sm:$0xff]  ;;  %v15937_v31 = vld [vmem:[#allocation2 + $0x138] sm:$0xff]  ;;  %2847 = vst.msk [vmem:[#allocation2 + $0x140] sm:$0xff] %vm1587_vm3, %v2822_v24  ;;  %v4060_v62 = vmax.f32 %v4036_v52, 0.0  ;;  %v2823_v4 = vmax.f32 %v2799_v22, 0.0  ;;  %4221 = vst.msk [vmem:[#allocation3 + $0x88] sm:$0xff] %vm1587_vm3, %v4217_v18  ;;  %v2773_v34 = vmul.f32 %v15792_v6, %v12917_v27 }
 0x244   : > { %v15941_v19 = vld [vmem:[#allocation3 + $0x50] sm:$0x1]  ;;  %v4271_v41 = vmax.f32 %v15933_v12, %v4268_v20  ;;  %v4229_v1 = vmax.f32 %v15929_v7, %v15937_v31  ;;  %v15947_v9 = vld [vmem:[#allocation2 + $0x1b8] sm:$0xff]  ;;  %v15949_v25 = vld [vmem:[#allocation2 + $0x128] sm:$0xff]  ;;  %4082 = vst.msk [vmem:[#allocation2 + $0x1c0] sm:$0xff] %vm1587_vm3, %v4057_v28  ;;  %v4058_v63 = vmax.f32 %v4034_v0, 0.0  ;;  %v4572_v38 = vmax.f32 %v15924_v50, %v4561_v59 }
 0x245   : > { %2850 = vst.msk [vmem:[#allocation2 + $0x158] sm:$0xff] %vm1587_vm3, %v2825_v44  ;;  %v13039_v48 = vpop.f32.mrb[36].mxu0  ;;  %v2705_v23 = vpop.f32.mrb[45].mxu1  ;;  %4281 = vst.msk [vmem:[#allocation3 + $0xc0] sm:$0xff] %vm1587_vm3, %v4277_v15  ;;  %v4216_v60 = vmax.f32 %v4209_v8, %v15949_v25  ;;  %v2804_v16 = vadd.f32 %v15798_v30, %v2773_v34  ;;  %v4682_v14 = vld [vmem:[#allocation3 + $0x52] sm:$0x1]  ;;  %v4638_v24 = vmax.f32 %v15941_v19, %v4627_v56 }
 0x246   : > { %4219 = vst.msk [vmem:[#allocation3 + $0x78] sm:$0xff] %vm1587_vm3, %v4215_v32  ;;  %v4269_v43 = vld [vmem:[#allocation2 + $0x1a8] sm:$0xff]  ;;  %4085 = vst.msk [vmem:[#allocation2 + $0x1d8] sm:$0xff] %vm1587_vm3, %v4060_v62  ;;  %v4008_v45 = vmul.f32 %v13039_v48, %v15825_v42  ;;  %v2771_v17 = vmul.f32 %v15792_v6, %v2705_v23  ;;  %v3916_v53 = vpop.f32.mrb[37].mxu0  ;;  %v12918_v3 = vpop.f32.mrb[46].mxu1  ;;  %v4278_v54 = vmax.f32 %v4271_v41, %v15947_v9 }
 0x247   : > { %2848 = vst.msk [vmem:[#allocation2 + $0x148] sm:$0xff] %vm1587_vm3, %v2823_v4  ;;  %v4272_v55 = vmax.f32 %v15954_v21, %v4269_v43  ;;  %4083 = vst.msk [vmem:[#allocation2 + $0x1c8] sm:$0xff] %vm1587_vm3, %v4058_v63  ;;  %v4006_v11 = vmul.f32 %v15825_v42, %v3916_v53  ;;  %v13040_v8 = vpop.f32.mrb[38].mxu0  ;;  %v4693_v33 = vld [vmem:[#allocation3 + $0x53] sm:$0x1]  ;;  %v15972_v10 = vpop.f32.mrb[47].mxu1  ;;  %v2774_v35 = vmul.f32 %v15792_v6, %v12918_v3 }
 0x248   : > { %4220 = vst.msk [vmem:[#allocation3 + $0x80] sm:$0xff] %vm1587_vm3, %v4216_v60  ;;  %v4039_v29 = vadd.f32 %v15835_v51, %v4008_v45  ;;  %v2802_v57 = vadd.f32 %v15798_v30, %v2771_v17  ;;  %v4009_v13 = vmul.f32 %v13040_v8, %v15825_v42  ;;  %v4649_v39 = vld [vmem:[#allocation3 + $0x52] sm:$0x1]  ;;  %v4748_v58 = vld [vmem:[#allocation3 + $0x54] sm:$0x1]  ;;  %v15979_v2 = vpop.f32.mrb[39].mxu0  ;;  %v4594_v46 = vmax.f32 %v4572_v38, %v4583_v37 }
 0x249   : > { %v4759_v26 = vld [vmem:[#allocation3 + $0x55] sm:$0x1]  ;;  %4282 = vst.msk [vmem:[#allocation3 + $0xc8] sm:$0xff] %vm1587_vm3, %v4278_v54  ;;  %v2828_v47 = vmax.f32 %v2804_v16, 0.0  ;;  %v4037_v5 = vadd.f32 %v15835_v51, %v4006_v11  ;;  %v4814_v52 = vld [vmem:[#allocation3 + $0x56] sm:$0x1]  ;;  %v2805_v28 = vadd.f32 %v15798_v30, %v2774_v35  ;;  %v4660_v62 = vmax.f32 %v4638_v24, %v4649_v39 }
 0x24a   : > { %v4825_v22 = vld [vmem:[#allocation3 + $0x57] sm:$0x1]  ;;  %v4063_v18 = vmax.f32 %v4039_v29, 0.0  ;;  %v2826_v7 = vmax.f32 %v2802_v57, 0.0  ;;  %v4040_v44 = vadd.f32 %v15835_v51, %v4009_v13  ;;  %v4715_v0 = vld [vmem:[#allocation3 + $0x54] sm:$0x1]  ;;  %v4704_v4 = vmax.f32 %v4682_v14, %v4693_v33 }
 0x24b   : > { %v15984_v50 = vld [vmem:[#allocation2 + $0x150] sm:$0xff]  ;;  %v4880_v59 = vld [vmem:[#allocation3 + $0x58] sm:$0x1]  ;;  %v4227_v20 = vld [vmem:[#allocation2 + $0x140] sm:$0xff]  ;;  %2853 = vst.msk [vmem:[#allocation2 + $0x170] sm:$0xff] %vm1587_vm3, %v2828_v47  ;;  %v4061_v31 = vmax.f32 %v4037_v5, 0.0  ;;  %v4770_v17 = vmax.f32 %v4748_v58, %v4759_v26  ;;  %v4836_v53 = vmax.f32 %v4814_v52, %v4825_v22  ;;  %v4007_v47 = vmul.f32 %v15825_v42, %v15979_v2 }
 0x24c   : > { %v4236_v15 = vmax.f32 %v4229_v1, %v15984_v50  ;;  %v15989_v32 = vld [vmem:[#allocation2 + $0x1d0] sm:$0xff]  ;;  %4605 = vst.msk [vmem:[#allocation4 + $0x33] sm:$0x1] %vm4403_vm4, %v4594_v46  ;;  %v4891_v27 = vld [vmem:[#allocation3 + $0x59] sm:$0x1]  ;;  %v4230_v19 = vmax.f32 %v15949_v25, %v4227_v20  ;;  %v15996_v41 = vld [vmem:[#allocation2 + $0x1c0] sm:$0xff]  ;;  %v4726_v25 = vmax.f32 %v4704_v4, %v4715_v0 }
 0x24d   : > { %v4292_v37 = vmax.f32 %v15947_v9, %v15989_v32  ;;  %v15998_v63 = vld [vmem:[#allocation2 + $0x158] sm:$0xff]  ;;  %4088 = vst.msk [vmem:[#allocation2 + $0x1f0] sm:$0xff] %vm1587_vm3, %v4063_v18  ;;  %2851 = vst.msk [vmem:[#allocation2 + $0x160] sm:$0xff] %vm1587_vm3, %v2826_v7  ;;  %v2829_v1 = vmax.f32 %v2805_v28, 0.0  ;;  %v4064_v34 = vmax.f32 %v4040_v44, 0.0  ;;  %v4279_v60 = vmax.f32 %v4272_v55, %v15996_v41  ;;  %v13043_v38 = vpop.f32.mrb[40].mxu0 }
 0x24e   : > { %v4781_v48 = vld [vmem:[#allocation3 + $0x56] sm:$0x1]  ;;  %v4847_v23 = vld [vmem:[#allocation3 + $0x58] sm:$0x1]  ;;  %4240 = vst.msk [vmem:[#allocation3 + $0x90] sm:$0xff] %vm1587_vm3, %v4236_v15  ;;  %v4228_v45 = vld [vmem:[#allocation2 + $0x148] sm:$0xff]  ;;  %v4237_v56 = vmax.f32 %v4230_v19, %v15998_v63  ;;  %v4902_v55 = vmax.f32 %v4880_v59, %v4891_v27  ;;  %v4038_v2 = vadd.f32 %v15835_v51, %v4007_v47 }
 0x24f   : > { %v4290_v43 = vld [vmem:[#allocation2 + $0x1d8] sm:$0xff]  ;;  %4086 = vst.msk [vmem:[#allocation2 + $0x1e0] sm:$0xff] %vm1587_vm3, %v4061_v31  ;;  %v4231_v16 = vmax.f32 %v15920_v49, %v4228_v45  ;;  %v4288_v11 = vld [vmem:[#allocation2 + $0x1c8] sm:$0xff]  ;;  %2854 = vst.msk [vmem:[#allocation2 + $0x178] sm:$0xff] %vm1587_vm3, %v2829_v1  ;;  %v3932_v8 = vpop.f32.mrb[41].mxu0  ;;  %v4792_v57 = vmax.f32 %v4770_v17, %v4781_v48  ;;  %v4858_v35 = vmax.f32 %v4836_v53, %v4847_v23 }
 0x250   : > { %4671 = vst.msk [vmem:[#allocation4 + $0x34] sm:$0x1] %vm4403_vm4, %v4660_v62  ;;  %v4913_v3 = vld [vmem:[#allocation3 + $0x5a] sm:$0x1]  ;;  %v4293_v54 = vmax.f32 %v15996_v41, %v4290_v43  ;;  %v16011_v14 = vld [vmem:[#allocation3 + $0x62] sm:$0x1]  ;;  %v4291_v29 = vmax.f32 %v15927_v61, %v4288_v11  ;;  %v2772_v49 = vmul.f32 %v15792_v6, %v15972_v10  ;;  %v4012_v61 = vmul.f32 %v13043_v38, %v15825_v42 }
 0x251   : > { %4089 = vst.msk [vmem:[#allocation2 + $0x1f8] sm:$0xff] %vm1587_vm3, %v4064_v34  ;;  %v16013_v33 = vld [vmem:[#allocation3 + $0x63] sm:$0x1]  ;;  %4283 = vst.msk [vmem:[#allocation3 + $0xd0] sm:$0xff] %vm1587_vm3, %v4279_v60  ;;  %v13044_v13 = vpop.f32.mrb[42].mxu0  ;;  %v4924_v26 = vmax.f32 %v4902_v55, %v4913_v3  ;;  %v4010_v5 = vmul.f32 %v15825_v42, %v3932_v8  ;;  %v4062_v34 = vmax.f32 %v4038_v2, 0.0 }
 0x252   : > { %4737 = vst.msk [vmem:[#allocation4 + $0x35] sm:$0x1] %vm4403_vm4, %v4726_v25  ;;  %v16020_v39 = vld [vmem:[#allocation3 + $0x7a] sm:$0x1]  ;;  %v16022_v58 = vld [vmem:[#allocation3 + $0x7b] sm:$0x1]  ;;  %v2803_v6 = vadd.f32 %v15798_v30, %v2772_v49  ;;  %v4013_v10 = vmul.f32 %v13044_v13, %v15825_v42  ;;  %v4441_v52 = vmax.f32 %v16011_v14, %v16013_v33  ;;  %v4043_v18 = vadd.f32 %v15835_v51, %v4012_v61 }
 0x253   : > { %4241 = vst.msk [vmem:[#allocation3 + $0x98] sm:$0xff] %vm1587_vm3, %v4237_v56  ;;  %v3935_v46 = vpop.f32.mrb[43].mxu0  ;;  %v4248_v22 = vld [vmem:[#allocation2 + $0x170] sm:$0xff]  ;;  %v4041_v7 = vadd.f32 %v15835_v51, %v4010_v5  ;;  %v4442_v28 = vmax.f32 %v16020_v39, %v16022_v58  ;;  %v16042_v30 = vld [vmem:[#allocation3 + $0x64] sm:$0x1]  ;;  %4087 = vst.msk [vmem:[#allocation2 + $0x1e8] sm:$0xff] %vm1587_vm3, %v4062_v34 }
 0x254   : > { %4803 = vst.msk [vmem:[#allocation4 + $0x36] sm:$0x1] %vm4403_vm4, %v4792_v57  ;;  %4869 = vst.msk [vmem:[#allocation4 + $0x37] sm:$0x1] %vm4403_vm4, %v4858_v35  ;;  %v4011_v24 = vmul.f32 %v15825_v42, %v3935_v46  ;;  %v16044_v44 = vld [vmem:[#allocation3 + $0x65] sm:$0x1]  ;;  %v4251_v0 = vmax.f32 %v15998_v63, %v4248_v22  ;;  %v4044_v31 = vadd.f32 %v15835_v51, %v4013_v10 }
 0x255   : > { %4935 = vst.msk [vmem:[#allocation4 + $0x38] sm:$0x1] %vm4403_vm4, %v4924_v26  ;;  %v16047_v59 = vld [vmem:[#allocation2 + $0x1f0] sm:$0xff]  ;;  %v4235_v15 = vld [vmem:[#allocation2 + $0x160] sm:$0xff]  ;;  %v2827_v20 = vmax.f32 %v2803_v6, 0.0  ;;  %v4067_v48 = vmax.f32 %v4043_v18, 0.0  ;;  %v4507_v13 = vmax.f32 %v16042_v30, %v16044_v44 }
 0x256   : > { %v4042_v62 = vadd.f32 %v15835_v51, %v4011_v24  ;;  %v4486_v4 = vld [vmem:[#allocation3 + $0x7c] sm:$0x1]  ;;  %v4497_v27 = vld [vmem:[#allocation3 + $0x7d] sm:$0x1]  ;;  %v4300_v19 = vmax.f32 %v4293_v54, %v16047_v59  ;;  %v4238_v41 = vmax.f32 %v4231_v16, %v4235_v15  ;;  %v16052_v1 = vld [vmem:[#allocation2 + $0x1e0] sm:$0xff]  ;;  %v4257_v45 = vmax.f32 %v4251_v0, %v15933_v12  ;;  %v13047_v56 = vpop.f32.mrb[44].mxu0 }
 0x257   : > { %v4452_v23 = vld [vmem:[#allocation3 + $0x64] sm:$0x1]  ;;  %v4453_v60 = vld [vmem:[#allocation3 + $0x7c] sm:$0x1]  ;;  %v4551_v63 = vld [vmem:[#allocation3 + $0x66] sm:$0x1]  ;;  %v4298_v25 = vmax.f32 %v4291_v29, %v16052_v1  ;;  %v4508_v46 = vmax.f32 %v4486_v4, %v4497_v27 }
 0x258   : > { %v4562_v43 = vld [vmem:[#allocation3 + $0x67] sm:$0x1]  ;;  %v4249_v17 = vld [vmem:[#allocation2 + $0x178] sm:$0xff]  ;;  %2852 = vst.msk [vmem:[#allocation2 + $0x168] sm:$0xff] %vm1587_vm3, %v2827_v20  ;;  %v4065_v3 = vmax.f32 %v4041_v7, 0.0  ;;  %v4068_v38 = vmax.f32 %v4044_v31, 0.0  ;;  %v4463_v35 = vmax.f32 %v4441_v52, %v4452_v23  ;;  %v4464_v49 = vmax.f32 %v4442_v28, %v4453_v60 }
 0x259   : > { %v16056_v53 = vld [vmem:[#allocation2 + $0x1f8] sm:$0xff]  ;;  %4304 = vst.msk [vmem:[#allocation3 + $0xe8] sm:$0xff] %vm1587_vm3, %v4300_v19  ;;  %4242 = vst.msk [vmem:[#allocation3 + $0xa0] sm:$0xff] %vm1587_vm3, %v4238_v41  ;;  %v4252_v54 = vmax.f32 %v4235_v15, %v4249_v17  ;;  %v4066_v12 = vmax.f32 %v4042_v62, 0.0  ;;  %v3948_v11 = vpop.f32.mrb[45].mxu0  ;;  %v5096_v61 = vld [vmem:[#allocation4 + $0x21] sm:$0xff]  ;;  %v4573_v2 = vmax.f32 %v4551_v63, %v4562_v43 }
 0x25a   : > { %v4312_v16 = vmax.f32 %v16052_v1, %v16056_v53  ;;  %4092 = vst.msk [vmem:[#allocation2 + $0x210] sm:$0xff] %vm1587_vm3, %v4067_v48  ;;  %v4518_v55 = vld [vmem:[#allocation3 + $0x66] sm:$0x1]  ;;  %v4552_v8 = vld [vmem:[#allocation3 + $0x7e] sm:$0x1]  ;;  %4261 = vst.msk [vmem:[#allocation3 + $0xb0] sm:$0xff] %vm1587_vm3, %v4257_v45  ;;  %v4014_v29 = vmul.f32 %v15825_v42, %v3948_v11 }
 0x25b   : > { %v4563_v14 = vld [vmem:[#allocation3 + $0x7f] sm:$0x1]  ;;  %v4584_v33 = vld [vmem:[#allocation3 + $0x68] sm:$0x1]  ;;  %4302 = vst.msk [vmem:[#allocation3 + $0xd8] sm:$0xff] %vm1587_vm3, %v4298_v25  ;;  %4090 = vst.msk [vmem:[#allocation2 + $0x200] sm:$0xff] %vm1587_vm3, %v4065_v3  ;;  %v4258_v47 = vmax.f32 %v4252_v54, %v15954_v21  ;;  %v4529_v22 = vmax.f32 %v4507_v13, %v4518_v55 }
 0x25c   : > { %4093 = vst.msk [vmem:[#allocation2 + $0x218] sm:$0xff] %vm1587_vm3, %v4068_v38  ;;  %v13048_v57 = vpop.f32.mrb[46].mxu0  ;;  %v4519_v39 = vld [vmem:[#allocation3 + $0x7e] sm:$0x1]  ;;  %v4617_v58 = vld [vmem:[#allocation3 + $0x68] sm:$0x1]  ;;  %v4045_v52 = vadd.f32 %v15835_v51, %v4014_v29  ;;  %v4574_v15 = vmax.f32 %v4552_v8, %v4563_v14  ;;  %v4595_v20 = vmax.f32 %v4573_v2, %v4584_v33 }
 0x25d   : > { %v4618_v26 = vld [vmem:[#allocation3 + $0x80] sm:$0x1]  ;;  %4091 = vst.msk [vmem:[#allocation2 + $0x208] sm:$0xff] %vm1587_vm3, %v4066_v12  ;;  %v3951_v5 = vpop.f32.mrb[47].mxu0  ;;  %v4628_v10 = vld [vmem:[#allocation3 + $0x69] sm:$0x1]  ;;  %v4530_v28 = vmax.f32 %v4508_v46, %v4519_v39 }
 0x25e   : > { %v4585_v6 = vld [vmem:[#allocation3 + $0x80] sm:$0x1]  ;;  %v4629_v24 = vld [vmem:[#allocation3 + $0x81] sm:$0x1]  ;;  %4474 = vst.msk [vmem:[#allocation4 + $0x41] sm:$0x1] %vm4403_vm4, %v4463_v35  ;;  %v4639_v19 = vmax.f32 %v4617_v58, %v4628_v10 }
 0x25f   : > { %v5097_v42 = vld [vmem:[#allocation4 + $0x31] sm:$0xff]  ;;  %4475 = vst.msk [vmem:[#allocation4 + $0x51] sm:$0x1] %vm4403_vm4, %v4464_v49  ;;  %v4683_v18 = vld [vmem:[#allocation3 + $0x6a] sm:$0x1]  ;;  %v4069_v51 = vmax.f32 %v4045_v52, 0.0  ;;  %v4640_v41 = vmax.f32 %v4618_v26, %v4629_v24  ;;  %v4596_v3 = vmax.f32 %v4574_v15, %v4585_v6 }
 0x260   : > { %v4694_v7 = vld [vmem:[#allocation3 + $0x6b] sm:$0x1]  ;;  %4262 = vst.msk [vmem:[#allocation3 + $0xb8] sm:$0xff] %vm1587_vm3, %v4258_v47  ;;  %v5102_v21 = vpack.c.bf16 %v5097_v42, %v5096_v61  ;;  %v4684_v30 = vld [vmem:[#allocation3 + $0x82] sm:$0x1]  ;;  %v16111_v58 = vld [vmem:[%s17510_s4 + $0x18] sm:$0xff]  }
 0x261   : > { %v4695_v44 = vld [vmem:[#allocation3 + $0x83] sm:$0x1]  ;;  %4540 = vst.msk [vmem:[#allocation4 + $0x42] sm:$0x1] %vm4403_vm4, %v4529_v22  ;;  %v4650_v31 = vld [vmem:[#allocation3 + $0x6a] sm:$0x1]  ;;  %v4705_v34 = vmax.f32 %v4683_v18, %v4694_v7 }
 0x262   : > { %v16081_v0 = vld [vmem:[%s17510_s4 + $0x8] sm:$0xff]   ;;  %v4749_v4 = vld [vmem:[#allocation3 + $0x6c] sm:$0x1]  ;;  %13058 = vmatmul.mubr.msk.bf16.vlgmr.msra.gmra.mrb[48].mxu1 %vm1587_vm3, %v5102_v21  ;;  %4541 = vst.msk [vmem:[#allocation4 + $0x52] sm:$0x1] %vm4403_vm4, %v4530_v28  ;;  %v4316_v17 = vld [vmem:[#allocation2 + $0x210] sm:$0xff]  ;;  %v4706_v38 = vmax.f32 %v4684_v30, %v4695_v44  ;;  %v4661_v55 = vmax.f32 %v4639_v19, %v4650_v31 }
 0x263   : > { %v4651_v62 = vld [vmem:[#allocation3 + $0x82] sm:$0x1]  ;;  %v4247_v27 = vld [vmem:[#allocation2 + $0x168] sm:$0xff]  ;;  %v4717_v23 = vld [vmem:[#allocation3 + $0x84] sm:$0x1]  ;;  %4094 = vst.msk [vmem:[#allocation2 + $0x220] sm:$0xff] %vm1587_vm3, %v4069_v51  ;;  %13066 = vmatpush3.bf16.msra.mxu1 %v15783_v36  ;;  %v4319_v12 = vmax.f32 %v4312_v16, %v4316_v17 }
 0x264   : > { %v4716_v48 = vld [vmem:[#allocation3 + $0x6c] sm:$0x1]  ;;  %v4750_v60 = vld [vmem:[#allocation3 + $0x84] sm:$0x1]  ;;  %v4760_v63 = vld [vmem:[#allocation3 + $0x6d] sm:$0x1]  ;;  %v4250_v45 = vmax.f32 %v15984_v50, %v4247_v27  ;;  %v4662_v8 = vmax.f32 %v4640_v41, %v4651_v62  ;;  %13067 = vmatprep.subr.bf16.mxu1 %v16081_v0  ;;  %v4728_v9 = vmax.f32 %v4706_v38, %v4717_v23 }
 0x265   : > { %v16089_v43 = vld [vmem:[%s17510_s4 + $0x10] sm:$0xff]   ;;  %4606 = vst.msk [vmem:[#allocation4 + $0x43] sm:$0x1] %vm4403_vm4, %v4595_v20  ;;  %v4761_v56 = vld [vmem:[#allocation3 + $0x85] sm:$0x1]  ;;  %v4317_v11 = vld [vmem:[#allocation2 + $0x218] sm:$0xff]  ;;  %v4727_v36 = vmax.f32 %v4705_v34, %v4716_v48  ;;  %v4771_v53 = vmax.f32 %v4749_v4, %v4760_v63 }
 0x266   : > { %v4296_v25 = vld [vmem:[#allocation2 + $0x1e8] sm:$0xff]  ;;  %v4310_v50 = vld [vmem:[#allocation2 + $0x200] sm:$0xff]  ;;  %v4256_v33 = vmax.f32 %v4250_v45, %v15893_v40  ;;  %4607 = vst.msk [vmem:[#allocation4 + $0x53] sm:$0x1] %vm4403_vm4, %v4596_v3  ;;  %4672 = vst.msk [vmem:[#allocation4 + $0x44] sm:$0x1] %vm4403_vm4, %v4661_v55  ;;  %v4772_v40 = vmax.f32 %v4750_v60, %v4761_v56 }
 0x267   : > { %v4299_v54 = vmax.f32 %v4292_v37, %v4296_v25  ;;  %v4815_v14 = vld [vmem:[#allocation3 + $0x6e] sm:$0x1]  ;;  %v4313_v29 = vmax.f32 %v4296_v25, %v4310_v50  ;;  %v4783_v37 = vld [vmem:[#allocation3 + $0x86] sm:$0x1]  ;;  %v4826_v1 = vld [vmem:[#allocation3 + $0x6f] sm:$0x1]  ;;  %13068 = vmatpush3.bf16.msra.mxu1 %v16081_v0 }
 0x268   : > { %v4311_v57 = vld [vmem:[#allocation2 + $0x208] sm:$0xff]  ;;  %v4816_v35 = vld [vmem:[#allocation3 + $0x86] sm:$0x1]  ;;  %4323 = vst.msk [vmem:[#allocation3 + $0xf0] sm:$0xff] %vm1587_vm3, %v4319_v12  ;;  %v4827_v16 = vld [vmem:[#allocation3 + $0x87] sm:$0x1]  ;;  %v4837_v49 = vmax.f32 %v4815_v14, %v4826_v1  ;;  %v4794_v10 = vmax.f32 %v4772_v40, %v4783_v37  ;;  %13069 = vmatprep.subr.bf16.mxu1 %v16089_v43 }
 0x269   : > { %v4782_v32 = vld [vmem:[#allocation3 + $0x6e] sm:$0x1]  ;;  %4303 = vst.msk [vmem:[#allocation3 + $0xe0] sm:$0xff] %vm1587_vm3, %v4299_v54  ;;  %v4848_v13 = vld [vmem:[#allocation3 + $0x70] sm:$0x1]  ;;  %4260 = vst.msk [vmem:[#allocation3 + $0xa8] sm:$0xff] %vm1587_vm3, %v4256_v33  ;;  %v4320_v26 = vmax.f32 %v4313_v29, %v4317_v11  ;;  %v4838_v47 = vmax.f32 %v4816_v35, %v4827_v16  ;;  %v4314_v18 = vmax.f32 %v16047_v59, %v4311_v57 }
 0x26a   : > { %4673 = vst.msk [vmem:[#allocation4 + $0x54] sm:$0x1] %vm4403_vm4, %v4662_v8  ;;  %v4849_v39 = vld [vmem:[#allocation3 + $0x88] sm:$0x1]  ;;  %4738 = vst.msk [vmem:[#allocation4 + $0x45] sm:$0x1] %vm4403_vm4, %v4727_v36  ;;  %v4793_v6 = vmax.f32 %v4771_v53, %v4782_v32  ;;  %v4859_v24 = vmax.f32 %v4837_v49, %v4848_v13 }
 0x26b   : > { %4739 = vst.msk [vmem:[#allocation4 + $0x55] sm:$0x1] %vm4403_vm4, %v4728_v9  ;;  %v4881_v61 = vld [vmem:[#allocation3 + $0x70] sm:$0x1]  ;;  %v4882_v5 = vld [vmem:[#allocation3 + $0x88] sm:$0x1]  ;;  %v4860_v7 = vmax.f32 %v4838_v47, %v4849_v39  ;;  %13070 = vmatpush3.bf16.msra.mxu1 %v16089_v43 }
 0x26c   : > { %v4892_v46 = vld [vmem:[#allocation3 + $0x71] sm:$0x1]  ;;  %v4893_v42 = vld [vmem:[#allocation3 + $0x89] sm:$0x1]  ;;  %v4914_v22 = vld [vmem:[#allocation3 + $0x72] sm:$0x1]  ;;  %13071 = vmatprep.subr.bf16.mxu1 %v16111_v58 }
 0x26d   : > { %v4903_v52 = vmax.f32 %v4881_v61, %v4892_v46  ;;  %v4915_v2 = vld [vmem:[#allocation3 + $0x8a] sm:$0x1]  ;;  %4324 = vst.msk [vmem:[#allocation3 + $0xf8] sm:$0xff] %vm1587_vm3, %v4320_v26  ;;  %v4904_v21 = vmax.f32 %v4882_v5, %v4893_v42  ;;  %v4421_v28 = vld [vmem:[#allocation3 + $0x92] sm:$0x1]  ;;  %v4318_v51 = vld [vmem:[#allocation2 + $0x220] sm:$0xff] }
 0x26e   : > { %v4432_v30 = vld [vmem:[#allocation3 + $0x93] sm:$0x1]  ;;  %v4454_v44 = vld [vmem:[#allocation3 + $0x94] sm:$0x1]  ;;  %4804 = vst.msk [vmem:[#allocation4 + $0x46] sm:$0x1] %vm4403_vm4, %v4793_v6  ;;  %v4321_v62 = vmax.f32 %v4314_v18, %v4318_v51 }
 0x26f   : > { %4805 = vst.msk [vmem:[#allocation4 + $0x56] sm:$0x1] %vm4403_vm4, %v4794_v10  ;;  %4870 = vst.msk [vmem:[#allocation4 + $0x47] sm:$0x1] %vm4403_vm4, %v4859_v24  ;;  %v4925_v0 = vmax.f32 %v4903_v52, %v4914_v22  ;;  %v4443_v15 = vmax.f32 %v4421_v28, %v4432_v30  ;;  %v4487_v20 = vld [vmem:[#allocation3 + $0x94] sm:$0x1]  ;;  %v4926_v4 = vmax.f32 %v4904_v21, %v4915_v2  ;;  %13072 = vmatpush3.bf16.msra.mxu1 %v16111_v58 }
 0x270   : > { %v4498_v31 = vld [vmem:[#allocation3 + $0x95] sm:$0x1]  ;;  %v16126_v59 = vld [vmem:[%s17510_s4 + $0x40] sm:$0xff]   ;;  %4871 = vst.msk [vmem:[#allocation4 + $0x57] sm:$0x1] %vm4403_vm4, %v4860_v7 }
 0x271   : > { %v4509_v27 = vmax.f32 %v4487_v20, %v4498_v31  ;;  %v4520_v19 = vld [vmem:[#allocation3 + $0x96] sm:$0x1]  ;;  %v4564_v34 = vld [vmem:[#allocation3 + $0x97] sm:$0x1]  ;;  %4936 = vst.msk [vmem:[#allocation4 + $0x48] sm:$0x1] %vm4403_vm4, %v4925_v0  ;;  %v4465_v48 = vmax.f32 %v4443_v15, %v4454_v44  ;;  %13081 = vmatprep.subr.bf16.mxu1 %v16126_v59 }
 0x272   : > { %v4553_v41 = vld [vmem:[#allocation3 + $0x96] sm:$0x1]  ;;  %v4586_v60 = vld [vmem:[#allocation3 + $0x98] sm:$0x1]  ;;  %v4630_v45 = vld [vmem:[#allocation3 + $0x99] sm:$0x1] }
 0x273   : > { %v4575_v23 = vmax.f32 %v4553_v41, %v4564_v34  ;;  %v4619_v63 = vld [vmem:[#allocation3 + $0x98] sm:$0x1]  ;;  %4325 = vst.msk [vmem:[#allocation3 + $0x100] sm:$0xff] %vm1587_vm3, %v4321_v62  ;;  %v4531_v25 = vmax.f32 %v4509_v27, %v4520_v19  ;;  %v4652_v3 = vld [vmem:[#allocation3 + $0x9a] sm:$0x1] }
 0x274   : > { %4937 = vst.msk [vmem:[#allocation4 + $0x58] sm:$0x1] %vm4403_vm4, %v4926_v4  ;;  %v4641_v17 = vmax.f32 %v4619_v63, %v4630_v45  ;;  %v4685_v38 = vld [vmem:[#allocation3 + $0x9a] sm:$0x1]  ;;  %v4696_v56 = vld [vmem:[#allocation3 + $0x9b] sm:$0x1] }
 0x275   : > { %4476 = vst.msk [vmem:[#allocation4 + $0x61] sm:$0x1] %vm4403_vm4, %v4465_v48  ;;  %v4597_v43 = vmax.f32 %v4575_v23, %v4586_v60  ;;  %v4707_v54 = vmax.f32 %v4685_v38, %v4696_v56  ;;  %v4718_v12 = vld [vmem:[#allocation3 + $0x9c] sm:$0x1]  ;;  %v4762_v11 = vld [vmem:[#allocation3 + $0x9d] sm:$0x1] }
 0x276   : > { %v4751_v50 = vld [vmem:[#allocation3 + $0x9c] sm:$0x1]  ;;  %4542 = vst.msk [vmem:[#allocation4 + $0x62] sm:$0x1] %vm4403_vm4, %v4531_v25  ;;  %v4663_v55 = vmax.f32 %v4641_v17, %v4652_v3  ;;  %v4784_v14 = vld [vmem:[#allocation3 + $0x9e] sm:$0x1] }
 0x277   : > { %v4773_v8 = vmax.f32 %v4751_v50, %v4762_v11  ;;  %v4817_v33 = vld [vmem:[#allocation3 + $0x9e] sm:$0x1]  ;;  %v4828_v29 = vld [vmem:[#allocation3 + $0x9f] sm:$0x1]  ;;  %4608 = vst.msk [vmem:[#allocation4 + $0x63] sm:$0x1] %vm4403_vm4, %v4597_v43  ;;  %v4729_v57 = vmax.f32 %v4707_v54, %v4718_v12 }
 0x278   : > { %v4839_v36 = vmax.f32 %v4817_v33, %v4828_v29  ;;  %v4850_v9 = vld [vmem:[#allocation3 + $0xa0] sm:$0x1]  ;;  %v4894_v37 = vld [vmem:[#allocation3 + $0xa1] sm:$0x1]  ;;  %4674 = vst.msk [vmem:[#allocation4 + $0x64] sm:$0x1] %vm4403_vm4, %v4663_v55 }
 0x279   : > { %v4883_v32 = vld [vmem:[#allocation3 + $0xa0] sm:$0x1]  ;;  %v4795_v35 = vmax.f32 %v4773_v8, %v4784_v14  ;;  %v4351_v53 = vld [vmem:[#allocation3 + $0x48] sm:$0x1]  ;;  %v4362_v40 = vld [vmem:[#allocation3 + $0x49] sm:$0x1] }
 0x27a   : > { %v4905_v1 = vmax.f32 %v4883_v32, %v4894_v37  ;;  %4740 = vst.msk [vmem:[#allocation4 + $0x65] sm:$0x1] %vm4403_vm4, %v4729_v57  ;;  %v4861_v16 = vmax.f32 %v4839_v36, %v4850_v9  ;;  %v4916_v49 = vld [vmem:[#allocation3 + $0xa2] sm:$0x1]  ;;  %v4373_v13 = vmax.f32 %v4351_v53, %v4362_v40  ;;  %v4352_v39 = vld [vmem:[#allocation3 + $0x60] sm:$0x1] }
 0x27b   : > { %v4353_v58 = vld [vmem:[#allocation3 + $0x78] sm:$0x1]  ;;  %4806 = vst.msk [vmem:[#allocation4 + $0x66] sm:$0x1] %vm4403_vm4, %v4795_v35  ;;  %v4384_v47 = vld [vmem:[#allocation3 + $0x4a] sm:$0x1] }
 0x27c   : > { %v4927_v26 = vmax.f32 %v4905_v1, %v4916_v49  ;;  %v4363_v61 = vld [vmem:[#allocation3 + $0x61] sm:$0x1]  ;;  %v4364_v5 = vld [vmem:[#allocation3 + $0x79] sm:$0x1]  ;;  %v5098_v46 = vld [vmem:[#allocation4 + $0x41] sm:$0xff]  ;;  %v4395_v10 = vmax.f32 %v4373_v13, %v4384_v47 }
 0x27d   : > { %v16142_v6 = vld [vmem:[#allocation4 + $0x51] sm:$0xff]  ;;  %4872 = vst.msk [vmem:[#allocation4 + $0x67] sm:$0x1] %vm4403_vm4, %v4861_v16  ;;  %v4374_v24 = vmax.f32 %v4352_v39, %v4363_v61  ;;  %v4375_v42 = vmax.f32 %v4353_v58, %v4364_v5  ;;  %v4385_v52 = vld [vmem:[#allocation3 + $0x62] sm:$0x1]  ;;  %v5075_v9 = vld [vmem:[#allocation4] sm:$0xff] }
 0x27e   : > { %v5103_v22 = vpack.c.bf16 %v16142_v6, %v5098_v46  ;;  %4938 = vst.msk [vmem:[#allocation4 + $0x68] sm:$0x1] %vm4403_vm4, %v4927_v26  ;;  %v4386_v2 = vld [vmem:[#allocation3 + $0x7a] sm:$0x1]  ;;  %v4354_v18 = vld [vmem:[#allocation3 + $0x90] sm:$0x1] }
 0x27f   : > { %v4365_v7 = vld [vmem:[#allocation3 + $0x91] sm:$0x1]  ;;  %4407 = vst.msk [vmem:[#allocation4 + $0x30] sm:$0x1] %vm4403_vm4, %v4395_v10  ;;  %v4396_v21 = vmax.f32 %v4374_v24, %v4385_v52  ;;  %v4397_v28 = vmax.f32 %v4375_v42, %v4386_v2  ;;  %v4387_v44 = vld [vmem:[#allocation3 + $0x92] sm:$0x1] }
 0x280   : > { %v4376_v30 = vmax.f32 %v4354_v18, %v4365_v7  ;;  %v4946_v51 = vld [vmem:[#allocation3 + $0x5a] sm:$0x1]  ;;  %v4957_v0 = vld [vmem:[#allocation3 + $0x5b] sm:$0x1]  ;;  %13061 = vmatprep.mubr.msk.bf16.mxu1 %vm1587_vm3, %v5103_v22  ;;  %v4947_v20 = vld [vmem:[#allocation3 + $0x72] sm:$0x1] }
 0x281   : > { %v4968_v15 = vmax.f32 %v4946_v51, %v4957_v0  ;;  %v4948_v31 = vld [vmem:[#allocation3 + $0x8a] sm:$0x1]  ;;  %v4958_v62 = vld [vmem:[#allocation3 + $0x73] sm:$0x1]  ;;  %4408 = vst.msk [vmem:[#allocation4 + $0x40] sm:$0x1] %vm4403_vm4, %v4396_v21 }
 0x282   : > { %4409 = vst.msk [vmem:[#allocation4 + $0x50] sm:$0x1] %vm4403_vm4, %v4397_v28  ;;  %v4398_v4 = vmax.f32 %v4376_v30, %v4387_v44  ;;  %v4979_v27 = vld [vmem:[#allocation3 + $0x5c] sm:$0x1]  ;;  %v4959_v19 = vld [vmem:[#allocation3 + $0x8b] sm:$0x1]  ;;  %v4969_v41 = vmax.f32 %v4947_v20, %v4958_v62 }
 0x283   : > { %v4980_v34 = vld [vmem:[#allocation3 + $0x74] sm:$0x1]  ;;  %v16151_v48 = vld [vmem:[#allocation4 + $0x10] sm:$0xff]  ;;  %v4990_v23 = vmax.f32 %v4968_v15, %v4979_v27  ;;  %v4970_v60 = vmax.f32 %v4948_v31, %v4959_v19  ;;  %v4981_v63 = vld [vmem:[#allocation3 + $0x8c] sm:$0x1] }
 0x284   : > { %v4949_v45 = vld [vmem:[#allocation3 + $0xa2] sm:$0x1]  ;;  %v4960_v25 = vld [vmem:[#allocation3 + $0xa3] sm:$0x1]  ;;  %4410 = vst.msk [vmem:[#allocation4 + $0x60] sm:$0x1] %vm4403_vm4, %v4398_v4  ;;  %v4991_v17 = vmax.f32 %v4969_v41, %v4980_v34  ;;  %v5082_v40 = vpack.c.bf16 %v16151_v48, %v5075_v9 }
 0x285   : > { %v4971_v3 = vmax.f32 %v4949_v45, %v4960_v25  ;;  %v4982_v38 = vld [vmem:[#allocation3 + $0xa4] sm:$0x1]  ;;  %v5012_v56 = vld [vmem:[#allocation3 + $0x5c] sm:$0x1]  ;;  %v5023_v43 = vld [vmem:[#allocation3 + $0x5d] sm:$0x1]  ;;  %v4992_v54 = vmax.f32 %v4970_v60, %v4981_v63 }
 0x286   : > { %5001 = vst.msk [vmem:[#allocation4 + $0x39] sm:$0x1] %vm4403_vm4, %v4990_v23  ;;  %v5034_v12 = vmax.f32 %v5012_v56, %v5023_v43  ;;  %v5013_v50 = vld [vmem:[#allocation3 + $0x74] sm:$0x1]  ;;  %v5014_v11 = vld [vmem:[#allocation3 + $0x8c] sm:$0x1] }
 0x287   : > { %v5024_v55 = vld [vmem:[#allocation3 + $0x75] sm:$0x1]  ;;  %v16155_v8 = vld [vmem:[#allocation4 + $0x61] sm:$0xff]  ;;  %5002 = vst.msk [vmem:[#allocation4 + $0x49] sm:$0x1] %vm4403_vm4, %v4991_v17  ;;  %v4993_v14 = vmax.f32 %v4971_v3, %v4982_v38  ;;  %v16168_v61 = vld [vmem:[#allocation4 + $0x30] sm:$0xff] }
 0x288   : > { %v5045_v33 = vld [vmem:[#allocation3 + $0x5e] sm:$0x1]  ;;  %v5025_v29 = vld [vmem:[#allocation3 + $0x8d] sm:$0x1]  ;;  %v5035_v57 = vmax.f32 %v5013_v50, %v5024_v55  ;;  %v5104_v36 = vpack.c.bf16 %v16155_v8, %v16155_v8  ;;  %5003 = vst.msk [vmem:[#allocation4 + $0x59] sm:$0x1] %vm4403_vm4, %v4992_v54 }
 0x289   : > { %v5056_v32 = vmax.f32 %v5034_v12, %v5045_v33  ;;  %v5036_v37 = vmax.f32 %v5014_v11, %v5025_v29  ;;  %v5046_v35 = vld [vmem:[#allocation3 + $0x76] sm:$0x1]  ;;  %v5015_v1 = vld [vmem:[#allocation3 + $0xa4] sm:$0x1]  ;;  %5004 = vst.msk [vmem:[#allocation4 + $0x69] sm:$0x1] %vm4403_vm4, %v4993_v14 }
 0x28a   : > { %v5047_v16 = vld [vmem:[#allocation3 + $0x8e] sm:$0x1]  ;;  %v5057_v49 = vmax.f32 %v5035_v57, %v5046_v35  ;;  %v5026_v13 = vld [vmem:[#allocation3 + $0xa5] sm:$0x1]  ;;  %v4355_v39 = vld [vmem:[#allocation3 + $0xa8] sm:$0x1]  ;;  %13062 = vmatmul.mubr.msk.bf16.gmra.mrb[52].mxu1 %vm1587_vm3, %v5104_v36 }
 0x28b   : > { %5067 = vst.msk [vmem:[#allocation4 + $0x3a] sm:$0x1] %vm4403_vm4, %v5056_v32  ;;  %v5058_v58 = vmax.f32 %v5036_v37, %v5047_v16  ;;  %v5037_v26 = vmax.f32 %v5015_v1, %v5026_v13  ;;  %v4366_v47 = vld [vmem:[#allocation3 + $0xa9] sm:$0x1]  ;;  %13073 = vmatprep.mubr.msk.bf16.mxu1 %vm1587_vm3, %v5082_v40  ;;  %v5048_v5 = vld [vmem:[#allocation3 + $0xa6] sm:$0x1] }
 0x28c   : > { %5068 = vst.msk [vmem:[#allocation4 + $0x4a] sm:$0x1] %vm4403_vm4, %v5057_v49  ;;  %v4377_v46 = vmax.f32 %v4355_v39, %v4366_v47  ;;  %v4422_v10 = vld [vmem:[#allocation3 + $0xaa] sm:$0x1]  ;;  %v4433_v24 = vld [vmem:[#allocation3 + $0xab] sm:$0x1] }
 0x28d   : > { %v16171_v42 = vld [vmem:[#allocation4 + $0x50] sm:$0xff]  ;;  %5069 = vst.msk [vmem:[#allocation4 + $0x5a] sm:$0x1] %vm4403_vm4, %v5058_v58  ;;  %v5059_v52 = vmax.f32 %v5037_v26, %v5048_v5  ;;  %v4388_v22 = vld [vmem:[#allocation3 + $0xaa] sm:$0x1]  ;;  %v4444_v2 = vmax.f32 %v4422_v10, %v4433_v24  ;;  %v14363_v15 = vld [vmem:[%s17510_s4 + $0x48] sm:$0xff]  }
 0x28e   : > { %v4455_v18 = vld [vmem:[#allocation3 + $0xac] sm:$0x1]  ;;  %v16176_v28 = vld [vmem:[#allocation4 + $0x32] sm:$0xff]  ;;  %v4399_v30 = vmax.f32 %v4377_v46, %v4388_v22  ;;  %v4499_v44 = vld [vmem:[#allocation3 + $0xad] sm:$0x1] }
 0x28f   : > { %v4488_v7 = vld [vmem:[#allocation3 + $0xac] sm:$0x1]  ;;  %v4521_v51 = vld [vmem:[#allocation3 + $0xae] sm:$0x1]  ;;  %5070 = vst.msk [vmem:[#allocation4 + $0x6a] sm:$0x1] %vm4403_vm4, %v5059_v52  ;;  %v4466_v31 = vmax.f32 %v4444_v2, %v4455_v18 }
 0x290   : > { %v16174_v21 = vld [vmem:[#allocation4 + $0x20] sm:$0xff]  ;;  %v4510_v62 = vmax.f32 %v4488_v7, %v4499_v44  ;;  %v16186_v19 = vld [vmem:[#allocation4 + $0x52] sm:$0xff]  ;;  %4411 = vst.msk [vmem:[#allocation4 + $0x70] sm:$0x1] %vm4403_vm4, %v4399_v30  ;;  %v4587_v34 = vld [vmem:[#allocation3 + $0xb0] sm:$0x1] }
 0x291   : > { %v16178_v0 = vld [vmem:[#allocation4 + $0x40] sm:$0xff]  ;;  %v4620_v23 = vld [vmem:[#allocation3 + $0xb0] sm:$0x1]  ;;  %v16193_v63 = vpack.c.bf16 %v16168_v61, %v16174_v21  ;;  %4477 = vst.msk [vmem:[#allocation4 + $0x71] sm:$0x1] %vm4403_vm4, %v4466_v31  ;;  %v16230_v40 = vld [vmem:[#allocation4 + $0x12] sm:$0xff] }
 0x292   : > { %v16183_v20 = vld [vmem:[#allocation4 + $0x42] sm:$0xff]  ;;  %v4532_v25 = vmax.f32 %v4510_v62, %v4521_v51  ;;  %v4653_v3 = vld [vmem:[#allocation3 + $0xb2] sm:$0x1]  ;;  %v16200_v38 = vpack.c.bf16 %v16171_v42, %v16178_v0  ;;  %v16202_v56 = vld [vmem:[#allocation4 + $0x33] sm:$0xff] }
 0x293   : > { %v4554_v4 = vld [vmem:[#allocation3 + $0xae] sm:$0x1]  ;;  %v4565_v27 = vld [vmem:[#allocation3 + $0xaf] sm:$0x1]  ;;  %v4631_v17 = vld [vmem:[#allocation3 + $0xb1] sm:$0x1]  ;;  %13074 = vmatmul.mubr.msk.bf16.vlgmr.msra.gmra.mrb[48].mxu1 %vm1587_vm3, %v16193_v63 }
 0x294   : > { %v4576_v41 = vmax.f32 %v4554_v4, %v4565_v27  ;;  %v16195_v45 = vld [vmem:[#allocation4 + $0x62] sm:$0xff]  ;;  %v16204_v43 = vld [vmem:[#allocation4 + $0x34] sm:$0xff]  ;;  %v4642_v12 = vmax.f32 %v4620_v23, %v4631_v17  ;;  %v4686_v50 = vld [vmem:[#allocation3 + $0xb2] sm:$0x1]  ;;  %4543 = vst.msk [vmem:[#allocation4 + $0x72] sm:$0x1] %vm4403_vm4, %v4532_v25  ;;  %13082 = vmatpush3.bf16.msra.mxu1 %v16126_v59  ;;  %13077 = vmatprep.mubr.msk.bf16.mxu1 %vm1587_vm3, %v16200_v38 }
 0x295   : > { %v14364_v55 = vld [vmem:[%s17510_s4 + $0x50] sm:$0xff]   ;;  %v4697_v29 = vld [vmem:[#allocation3 + $0xb3] sm:$0x1]  ;;  %v16223_v36 = vld [vmem:[#allocation4 + $0x53] sm:$0xff]  ;;  %13083 = vmatprep.subr.bf16.mxu1 %v14363_v15 }
 0x296   : > { %v4598_v54 = vmax.f32 %v4576_v41, %v4587_v34  ;;  %v16213_v14 = vld [vmem:[#allocation4 + $0x43] sm:$0xff]  ;;  %v16225_v9 = vld [vmem:[#allocation4 + $0x54] sm:$0xff]  ;;  %v4664_v32 = vmax.f32 %v4642_v12, %v4653_v3  ;;  %v4708_v37 = vmax.f32 %v4686_v50, %v4697_v29  ;;  %v4719_v35 = vld [vmem:[#allocation3 + $0xb4] sm:$0x1] }
 0x297   : > { %v16215_v33 = vld [vmem:[#allocation4 + $0x44] sm:$0xff]  ;;  %v4752_v59 = vld [vmem:[#allocation3 + $0xb4] sm:$0x1]  ;;  %v4763_v16 = vld [vmem:[#allocation3 + $0xb5] sm:$0x1] }
 0x298   : > { %v16221_v57 = vld [vmem:[#allocation4 + $0x60] sm:$0xff]  ;;  %4609 = vst.msk [vmem:[#allocation4 + $0x73] sm:$0x1] %vm4403_vm4, %v4598_v54  ;;  %v4785_v49 = vld [vmem:[#allocation3 + $0xb6] sm:$0x1]  ;;  %v4730_v26 = vmax.f32 %v4708_v37, %v4719_v35  ;;  %v4774_v47 = vmax.f32 %v4752_v59, %v4763_v16  ;;  %13084 = vmatpush3.bf16.msra.mxu1 %v14363_v15  ;;  %v14366_v54 = vld [vmem:[%s17510_s4 + $0x60] sm:$0xff]  }
 0x299   : > { %v16234_v39 = vld [vmem:[#allocation4 + $0x63] sm:$0xff]  ;;  %4675 = vst.msk [vmem:[#allocation4 + $0x74] sm:$0x1] %vm4403_vm4, %v4664_v32  ;;  %v4818_v5 = vld [vmem:[#allocation3 + $0xb6] sm:$0x1]  ;;  %13085 = vmatprep.subr.bf16.mxu1 %v14364_v55  ;;  %v5085_v30 = vpack.c.bf16 %v16221_v57, %v16221_v57  ;;  %v14367_v37 = vld [vmem:[%s17510_s4 + $0x68] sm:$0xff]  }
 0x29a   : > { %v16236_v58 = vld [vmem:[#allocation4 + $0x64] sm:$0xff]  ;;  %v4829_v46 = vld [vmem:[#allocation3 + $0xb7] sm:$0x1]  ;;  %v4851_v10 = vld [vmem:[#allocation3 + $0xb8] sm:$0x1]  ;;  %v4796_v2 = vmax.f32 %v4774_v47, %v4785_v49 }
 0x29b   : > { %v4884_v24 = vld [vmem:[#allocation3 + $0xb8] sm:$0x1]  ;;  %4741 = vst.msk [vmem:[#allocation4 + $0x75] sm:$0x1] %vm4403_vm4, %v4730_v26  ;;  %v4840_v18 = vmax.f32 %v4818_v5, %v4829_v46  ;;  %v4895_v7 = vld [vmem:[#allocation3 + $0xb9] sm:$0x1]  ;;  %13078 = vmatmul.mubr.msk.bf16.gmra.mrb[52].mxu1 %vm1587_vm3, %v5085_v30 }
 0x29c   : > { %v5314_v44 = vld [vmem:[#allocation4 + $0x2] sm:$0xff]  ;;  %v4906_v31 = vmax.f32 %v4884_v24, %v4895_v7  ;;  %v4950_v62 = vld [vmem:[#allocation3 + $0xba] sm:$0x1]  ;;  %4807 = vst.msk [vmem:[#allocation4 + $0x76] sm:$0x1] %vm4403_vm4, %v4796_v2  ;;  %13086 = vmatpush3.bf16.msra.mxu1 %v14364_v55  ;;  %v5323_v7 = vpack.c.bf16 %v16186_v19, %v16183_v20 }
 0x29d   : > { %v14365_v51 = vld [vmem:[%s17510_s4 + $0x58] sm:$0xff]   ;;  %v5321_v4 = vpack.c.bf16 %v16230_v40, %v5314_v44  ;;  %v4862_v15 = vmax.f32 %v4840_v18, %v4851_v10  ;;  %v4917_v27 = vld [vmem:[#allocation3 + $0xba] sm:$0x1]  ;;  %v4961_v41 = vld [vmem:[#allocation3 + $0xbb] sm:$0x1] }
 0x29e   : > { %v4928_v34 = vmax.f32 %v4906_v31, %v4917_v27  ;;  %v4972_v23 = vmax.f32 %v4950_v62, %v4961_v41  ;;  %v4983_v25 = vld [vmem:[#allocation3 + $0xbc] sm:$0x1]  ;;  %v5027_v3 = vld [vmem:[#allocation3 + $0xbd] sm:$0x1]  ;;  %13087 = vmatprep.subr.bf16.mxu1 %v14365_v51  ;;  %v16258_v29 = vld [vmem:[#allocation4 + $0x22] sm:$0xff] }
 0x29f   : > { %13089 = vmatprep.mubr.msk.bf16.mxu1 %vm1587_vm3, %v5321_v4  ;;  %4873 = vst.msk [vmem:[#allocation4 + $0x77] sm:$0x1] %vm4403_vm4, %v4862_v15  ;;  %v5016_v17 = vld [vmem:[#allocation3 + $0xbc] sm:$0x1]  ;;  %v5049_v32 = vld [vmem:[#allocation3 + $0xbe] sm:$0x1]  ;;  %v5322_v46 = vpack.c.bf16 %v16176_v28, %v16258_v29 }
 0x2a0   : > { %4939 = vst.msk [vmem:[#allocation4 + $0x78] sm:$0x1] %vm4403_vm4, %v4928_v34  ;;  %v4994_v12 = vmax.f32 %v4972_v23, %v4983_v25  ;;  %v5038_v50 = vmax.f32 %v5016_v17, %v5027_v3  ;;  %v4356_v55 = vld [vmem:[#allocation3 + $0xc0] sm:$0x1]  ;;  %v4367_v59 = vld [vmem:[#allocation3 + $0xc1] sm:$0x1]  ;;  %13088 = vmatpush3.bf16.msra.mxu1 %v14365_v51 }
 0x2a1   : > { %v4423_v16 = vld [vmem:[#allocation3 + $0xc2] sm:$0x1]  ;;  %v4378_v49 = vmax.f32 %v4356_v55, %v4367_v59  ;;  %v4434_v47 = vld [vmem:[#allocation3 + $0xc3] sm:$0x1]  ;;  %v4456_v5 = vld [vmem:[#allocation3 + $0xc4] sm:$0x1]  ;;  %13097 = vmatprep.subr.bf16.mxu1 %v14366_v54 }
 0x2a2   : > { %5005 = vst.msk [vmem:[#allocation4 + $0x79] sm:$0x1] %vm4403_vm4, %v4994_v12  ;;  %v5060_v35 = vmax.f32 %v5038_v50, %v5049_v32  ;;  %v4389_v26 = vld [vmem:[#allocation3 + $0xc2] sm:$0x1]  ;;  %v4445_v10 = vmax.f32 %v4423_v16, %v4434_v47  ;;  %v4489_v24 = vld [vmem:[#allocation3 + $0xc4] sm:$0x1] }
 0x2a3   : > { %v4500_v2 = vld [vmem:[#allocation3 + $0xc5] sm:$0x1]  ;;  %v4522_v18 = vld [vmem:[#allocation3 + $0xc6] sm:$0x1]  ;;  %v4400_v30 = vmax.f32 %v4378_v49, %v4389_v26  ;;  %v4566_v31 = vld [vmem:[#allocation3 + $0xc7] sm:$0x1]  ;;  %13090 = vmatmul.mubr.msk.bf16.vlgmr.msra.gmra.mrb[48].mxu1 %vm1587_vm3, %v5322_v46 }
 0x2a4   : > { %5071 = vst.msk [vmem:[#allocation4 + $0x7a] sm:$0x1] %vm4403_vm4, %v5060_v35  ;;  %v4511_v44 = vmax.f32 %v4489_v24, %v4500_v2  ;;  %v4555_v51 = vld [vmem:[#allocation3 + $0xc6] sm:$0x1]  ;;  %v4588_v62 = vld [vmem:[#allocation3 + $0xc8] sm:$0x1]  ;;  %v4467_v15 = vmax.f32 %v4445_v10, %v4456_v5  ;;  %13098 = vmatpush3.bf16.msra.mxu1 %v14366_v54  ;;  %13093 = vmatprep.mubr.msk.bf16.mxu1 %vm1587_vm3, %v5323_v7 }
 0x2a5   : > { %v4577_v27 = vmax.f32 %v4555_v51, %v4566_v31  ;;  %v4621_v41 = vld [vmem:[#allocation3 + $0xc8] sm:$0x1]  ;;  %v4632_v34 = vld [vmem:[#allocation3 + $0xc9] sm:$0x1]  ;;  %4412 = vst.msk [vmem:[#allocation4 + $0x80] sm:$0x1] %vm4403_vm4, %v4400_v30  ;;  %13099 = vmatprep.subr.bf16.mxu1 %v14367_v37 }
 0x2a6   : > { %v16270_v4 = vld [vmem:[#allocation4 + $0x70] sm:$0xff]  ;;  %v14368_v23 = vld [vmem:[%s17510_s4 + $0x70] sm:$0xff]   ;;  %v4533_v17 = vmax.f32 %v4511_v44, %v4522_v18  ;;  %4478 = vst.msk [vmem:[#allocation4 + $0x81] sm:$0x1] %vm4403_vm4, %v4467_v15  ;;  %v4643_v50 = vmax.f32 %v4621_v41, %v4632_v34  ;;  %v14369_v47 = vld [vmem:[%s17510_s4 + $0x78] sm:$0xff]   ;;  %v5324_v15 = vpack.c.bf16 %v16195_v45, %v16195_v45 }
 0x2a7   : > { %v16279_v3 = vld [vmem:[#allocation4 + $0x13] sm:$0xff]  ;;  %v4599_v12 = vmax.f32 %v4577_v27, %v4588_v62  ;;  %v4654_v54 = vld [vmem:[#allocation3 + $0xca] sm:$0x1]  ;;  %v4698_v55 = vld [vmem:[#allocation3 + $0xcb] sm:$0x1] }
 0x2a8   : > { %v4687_v32 = vld [vmem:[#allocation3 + $0xca] sm:$0x1]  ;;  %4544 = vst.msk [vmem:[#allocation4 + $0x82] sm:$0x1] %vm4403_vm4, %v4533_v17  ;;  %v4753_v16 = vld [vmem:[#allocation3 + $0xcc] sm:$0x1]  ;;  %v4665_v46 = vmax.f32 %v4643_v50, %v4654_v54  ;;  %13100 = vmatpush3.bf16.msra.mxu1 %v14367_v37 }
 0x2a9   : > { %v16282_v35 = vld [vmem:[#allocation4 + $0x72] sm:$0xff]  ;;  %v4709_v59 = vmax.f32 %v4687_v32, %v4698_v55  ;;  %v4764_v49 = vld [vmem:[#allocation3 + $0xcd] sm:$0x1]  ;;  %4610 = vst.msk [vmem:[#allocation4 + $0x83] sm:$0x1] %vm4403_vm4, %v4599_v12  ;;  %13101 = vmatprep.subr.bf16.mxu1 %v14368_v23 }
 0x2aa   : > { %v5441_v26 = vld [vmem:[#allocation4 + $0x3] sm:$0xff]  ;;  %v16288_v5 = vld [vmem:[#allocation4 + $0x31] sm:$0xff]  ;;  %v4775_v24 = vmax.f32 %v4753_v16, %v4764_v49  ;;  %4676 = vst.msk [vmem:[#allocation4 + $0x84] sm:$0x1] %vm4403_vm4, %v4665_v46  ;;  %v4357_v16 = vld [vmem:[#allocation3 + $0xd8] sm:$0x1] }
 0x2ab   : > { %v4720_v10 = vld [vmem:[#allocation3 + $0xcc] sm:$0x1]  ;;  %v4819_v2 = vld [vmem:[#allocation3 + $0xce] sm:$0x1]  ;;  %v4830_v18 = vld [vmem:[#allocation3 + $0xcf] sm:$0x1]  ;;  %v5448_v12 = vpack.c.bf16 %v16279_v3, %v5441_v26  ;;  %13094 = vmatmul.mubr.msk.bf16.gmra.mrb[52].mxu1 %vm1587_vm3, %v5324_v15 }
 0x2ac   : > { %v16293_v30 = vld [vmem:[#allocation4 + $0x73] sm:$0xff]  ;;  %v4731_v51 = vmax.f32 %v4709_v59, %v4720_v10  ;;  %v4786_v31 = vld [vmem:[#allocation3 + $0xce] sm:$0x1]  ;;  %v4841_v62 = vmax.f32 %v4819_v2, %v4830_v18  ;;  %v4852_v41 = vld [vmem:[#allocation3 + $0xd0] sm:$0x1]  ;;  %13102 = vmatpush3.bf16.msra.mxu1 %v14368_v23 }
 0x2ad   : > { %v16295_v44 = vld [vmem:[#allocation4 + $0x74] sm:$0xff]  ;;  %v4797_v27 = vmax.f32 %v4775_v24, %v4786_v31  ;;  %v16300_v34 = vld [vmem:[#allocation4 + $0x41] sm:$0xff]  ;;  %v4896_v55 = vld [vmem:[#allocation3 + $0xd1] sm:$0x1]  ;;  %13105 = vmatprep.mubr.msk.bf16.mxu1 %vm1587_vm3, %v5448_v12  ;;  %13103 = vmatprep.subr.bf16.mxu1 %v14369_v47 }
 0x2ae   : > { %v16302_v17 = vld [vmem:[#allocation4 + $0x51] sm:$0xff]  ;;  %4742 = vst.msk [vmem:[#allocation4 + $0x85] sm:$0x1] %vm4403_vm4, %v4731_v51  ;;  %v4863_v50 = vmax.f32 %v4841_v62, %v4852_v41  ;;  %v16308_v54 = vld [vmem:[#allocation4 + $0x61] sm:$0xff]  ;;  %v4918_v24 = vld [vmem:[#allocation3 + $0xd2] sm:$0x1] }
 0x2af   : > { %17557 = vst [vmem:[#allocation10_spill] sm:$0xff] %v16308_v54  ;;  %v4885_v32 = vld [vmem:[#allocation3 + $0xd0] sm:$0x1]  ;;  %4808 = vst.msk [vmem:[#allocation4 + $0x86] sm:$0x1] %vm4403_vm4, %v4797_v27  ;;  %v16316_v46 = vld [vmem:[#allocation4 + $0x32] sm:$0xff] }
 0x2b0   : > { %v4907_v49 = vmax.f32 %v4885_v32, %v4896_v55  ;;  %17558 = vst [vmem:[#allocation7_spill] sm:$0xff] %v16316_v46  ;;  %v16318_v26 = vld [vmem:[#allocation4 + $0x42] sm:$0xff]  ;;  %4874 = vst.msk [vmem:[#allocation4 + $0x87] sm:$0x1] %vm4403_vm4, %v4863_v50  ;;  %v4951_v2 = vld [vmem:[#allocation3 + $0xd2] sm:$0x1]  ;;  %13104 = vmatpush3.bf16.msra.mxu1 %v14369_v47 }
 0x2b1   : > { %17559 = vst [vmem:[#allocation11_spill] sm:$0xff] %v16318_v26  ;;  %v14370_v51 = vld [vmem:[%s17510_s4 + $0x80] sm:$0xff]   ;;  %v4962_v62 = vld [vmem:[#allocation3 + $0xd3] sm:$0x1]  ;;  %v5017_v15 = vld [vmem:[#allocation3 + $0xd4] sm:$0x1] }
 0x2b2   : > { %v4929_v31 = vmax.f32 %v4907_v49, %v4918_v24  ;;  %v16329_v27 = vld [vmem:[#allocation4 + $0x23] sm:$0xff]  ;;  %v4973_v23 = vmax.f32 %v4951_v2, %v4962_v62  ;;  %v5028_v41 = vld [vmem:[#allocation3 + $0xd5] sm:$0x1]  ;;  %v4984_v12 = vld [vmem:[#allocation3 + $0xd4] sm:$0x1]  ;;  %13113 = vmatprep.subr.bf16.mxu1 %v14370_v51 }
 0x2b3   : > { %v5039_v50 = vmax.f32 %v5017_v15, %v5028_v41  ;;  %v16332_v32 = vld [vmem:[#allocation4 + $0x40] sm:$0xff]  ;;  %v16334_v55 = vld [vmem:[#allocation4 + $0x50] sm:$0xff]  ;;  %v5050_v10 = vld [vmem:[#allocation3 + $0xd6] sm:$0x1]  ;;  %v16340_v24 = vpack.c.bf16 %v16202_v56, %v16329_v27 }
 0x2b4   : > { %4940 = vst.msk [vmem:[#allocation4 + $0x88] sm:$0x1] %vm4403_vm4, %v4929_v31  ;;  %17560 = vst [vmem:[#allocation8_spill] sm:$0xff] %v16332_v32  ;;  %v4995_v18 = vmax.f32 %v4973_v23, %v4984_v12  ;;  %v4368_v59 = vld [vmem:[#allocation3 + $0xd9] sm:$0x1]  ;;  %v14371_v2 = vld [vmem:[%s17510_s4 + $0x88] sm:$0xff]   ;;  %v16347_v23 = vpack.c.bf16 %v16223_v36, %v16213_v14 }
 0x2b5   : > { %17561 = vst [vmem:[#allocation9_spill] sm:$0xff] %v16334_v55  ;;  %17562 = vst [vmem:[#allocation12_spill] sm:$0xff] %v16340_v24  ;;  %v5061_v31 = vmax.f32 %v5039_v50, %v5050_v10  ;;  %v4379_v62 = vmax.f32 %v4357_v16, %v4368_v59  ;;  %v4424_v15 = vld [vmem:[#allocation3 + $0xda] sm:$0x1]  ;;  %v4435_v47 = vld [vmem:[#allocation3 + $0xdb] sm:$0x1]  ;;  %13106 = vmatmul.mubr.msk.bf16.vlgmr.msra.gmra.mrb[48].mxu1 %vm1587_vm3, %v16340_v24 }
 0x2b6   : > { %17563 = vst [vmem:[#allocation13_spill] sm:$0xff] %v16347_v23  ;;  %v16349_v41 = vld [vmem:[#allocation4 + $0x71] sm:$0xff]  ;;  %5006 = vst.msk [vmem:[#allocation4 + $0x89] sm:$0x1] %vm4403_vm4, %v4995_v18  ;;  %v4446_v49 = vmax.f32 %v4424_v15, %v4435_v47  ;;  %13114 = vmatpush3.bf16.msra.mxu1 %v14370_v51  ;;  %13109 = vmatprep.mubr.msk.bf16.mxu1 %vm1587_vm3, %v16347_v23  ;;  %v4699_v18 = vld [vmem:[#allocation3 + $0xe3] sm:$0x1] }
 0x2b7   : > { %v4390_v12 = vld [vmem:[#allocation3 + $0xda] sm:$0x1]  ;;  %v4490_v37 = vld [vmem:[#allocation3 + $0xdc] sm:$0x1]  ;;  %v4501_v7 = vld [vmem:[#allocation3 + $0xdd] sm:$0x1]  ;;  %13115 = vmatprep.subr.bf16.mxu1 %v14371_v2 }
 0x2b8   : > { %v16354_v25 = vld [vmem:[#allocation4 + $0x80] sm:$0xff]  ;;  %5072 = vst.msk [vmem:[#allocation4 + $0x8a] sm:$0x1] %vm4403_vm4, %v5061_v31  ;;  %v4401_v59 = vmax.f32 %v4379_v62, %v4390_v12  ;;  %v4457_v16 = vld [vmem:[#allocation3 + $0xdc] sm:$0x1]  ;;  %v4512_v10 = vmax.f32 %v4490_v37, %v4501_v7 }
 0x2b9   : > { %v4556_v50 = vld [vmem:[#allocation3 + $0xde] sm:$0x1]  ;;  %v4468_v15 = vmax.f32 %v4446_v49, %v4457_v16  ;;  %v4567_v22 = vld [vmem:[#allocation3 + $0xdf] sm:$0x1]  ;;  %v4589_v13 = vld [vmem:[#allocation3 + $0xe0] sm:$0x1] }
 0x2ba   : > { %v4523_v47 = vld [vmem:[#allocation3 + $0xde] sm:$0x1]  ;;  %v14372_v31 = vld [vmem:[%s17510_s4 + $0x90] sm:$0xff]   ;;  %4413 = vst.msk [vmem:[#allocation4 + $0x90] sm:$0x1] %vm4403_vm4, %v4401_v59  ;;  %v4578_v37 = vmax.f32 %v4556_v50, %v4567_v22  ;;  %13116 = vmatpush3.bf16.msra.mxu1 %v14371_v2  ;;  %v14373_v59 = vld [vmem:[%s17510_s4 + $0x98] sm:$0xff]  }
 0x2bb   : > { %v16364_v62 = vld [vmem:[#allocation4 + $0x14] sm:$0xff]  ;;  %v4534_v7 = vmax.f32 %v4512_v10, %v4523_v47  ;;  %v16367_v52 = vld [vmem:[#allocation4 + $0x81] sm:$0xff]  ;;  %4479 = vst.msk [vmem:[#allocation4 + $0x91] sm:$0x1] %vm4403_vm4, %v4468_v15  ;;  %v4754_v55 = vld [vmem:[#allocation3 + $0xe4] sm:$0x1]  ;;  %13117 = vmatprep.subr.bf16.mxu1 %v14372_v31 }
 0x2bc   : > { %v4622_v51 = vld [vmem:[#allocation3 + $0xe0] sm:$0x1]  ;;  %v4633_v12 = vld [vmem:[#allocation3 + $0xe1] sm:$0x1]  ;;  %v4688_v16 = vld [vmem:[#allocation3 + $0xe2] sm:$0x1]  ;;  %v4600_v11 = vmax.f32 %v4578_v37, %v4589_v13  ;;  %v5451_v13 = vpack.c.bf16 %v16234_v39, %v16234_v39 }
 0x2bd   : > { %v4644_v49 = vmax.f32 %v4622_v51, %v4633_v12  ;;  %v5568_v1 = vld [vmem:[#allocation4 + $0x4] sm:$0xff]  ;;  %4545 = vst.msk [vmem:[#allocation4 + $0x92] sm:$0x1] %vm4403_vm4, %v4534_v7  ;;  %v4655_v60 = vld [vmem:[#allocation3 + $0xe2] sm:$0x1]  ;;  %v4710_v53 = vmax.f32 %v4688_v16, %v4699_v18 }
 0x2be   : > { %v4765_v32 = vld [vmem:[#allocation3 + $0xe5] sm:$0x1]  ;;  %v4721_v50 = vld [vmem:[#allocation3 + $0xe4] sm:$0x1]  ;;  %v4820_v47 = vld [vmem:[#allocation3 + $0xe6] sm:$0x1]  ;;  %v5575_v2 = vpack.c.bf16 %v16364_v62, %v5568_v1  ;;  %13110 = vmatmul.mubr.msk.bf16.gmra.mrb[52].mxu1 %vm1587_vm3, %v5451_v13 }
 0x2bf   : > { %v4666_v10 = vmax.f32 %v4644_v49, %v4655_v60  ;;  %v4776_v15 = vmax.f32 %v4754_v55, %v4765_v32  ;;  %v16378_v7 = vld [vmem:[#allocation4 + $0x82] sm:$0xff]  ;;  %4611 = vst.msk [vmem:[#allocation4 + $0x93] sm:$0x1] %vm4403_vm4, %v4600_v11  ;;  %v4732_v18 = vmax.f32 %v4710_v53, %v4721_v50  ;;  %v4787_v37 = vld [vmem:[#allocation3 + $0xe6] sm:$0x1]  ;;  %13118 = vmatpush3.bf16.msra.mxu1 %v14372_v31  ;;  %v14374_v13 = vld [vmem:[%s17510_s4 + $0xa0] sm:$0xff]  }
 0x2c0   : > { %v4831_v51 = vld [vmem:[#allocation3 + $0xe7] sm:$0x1]  ;;  %v16382_v12 = vld [vmem:[#allocation4 + $0x83] sm:$0xff]  ;;  %v4886_v55 = vld [vmem:[#allocation3 + $0xe8] sm:$0x1]  ;;  %13121 = vmatprep.mubr.msk.bf16.mxu1 %vm1587_vm3, %v5575_v2  ;;  %13119 = vmatprep.subr.bf16.mxu1 %v14373_v59 }
 0x2c1   : > { %v16384_v16 = vld [vmem:[#allocation4 + $0x84] sm:$0xff]  ;;  %4677 = vst.msk [vmem:[#allocation4 + $0x94] sm:$0x1] %vm4403_vm4, %v4666_v10  ;;  %v4798_v60 = vmax.f32 %v4776_v15, %v4787_v37  ;;  %v4842_v32 = vmax.f32 %v4820_v47, %v4831_v51  ;;  %4743 = vst.msk [vmem:[#allocation4 + $0x95] sm:$0x1] %vm4403_vm4, %v4732_v18  ;;  %v16403_v2 = vld [vmem:[#allocation4 + $0x53] sm:$0xff] }
 0x2c2   : > { %v4853_v53 = vld [vmem:[#allocation3 + $0xe8] sm:$0x1]  ;;  %v4897_v11 = vld [vmem:[#allocation3 + $0xe9] sm:$0x1]  ;;  %v4952_v47 = vld [vmem:[#allocation3 + $0xea] sm:$0x1] }
 0x2c3   : > { %4809 = vst.msk [vmem:[#allocation4 + $0x96] sm:$0x1] %vm4403_vm4, %v4798_v60  ;;  %v4864_v10 = vmax.f32 %v4842_v32, %v4853_v53  ;;  %v4908_v15 = vmax.f32 %v4886_v55, %v4897_v11  ;;  %v4963_v37 = vld [vmem:[#allocation3 + $0xeb] sm:$0x1]  ;;  %v4919_v18 = vld [vmem:[#allocation3 + $0xea] sm:$0x1]  ;;  %13120 = vmatpush3.bf16.msra.mxu1 %v14373_v59 }
 0x2c4   : > { %v4974_v51 = vmax.f32 %v4952_v47, %v4963_v37  ;;  %v4985_v1 = vld [vmem:[#allocation3 + $0xec] sm:$0x1]  ;;  %17565 = vst [vmem:[#allocation15_spill] sm:$0xff] %v16403_v2  ;;  %v5029_v55 = vld [vmem:[#allocation3 + $0xed] sm:$0x1]  ;;  %13129 = vmatprep.subr.bf16.mxu1 %v14374_v13 }
 0x2c5   : > { %4875 = vst.msk [vmem:[#allocation4 + $0x97] sm:$0x1] %vm4403_vm4, %v4864_v10  ;;  %v4930_v50 = vmax.f32 %v4908_v15, %v4919_v18  ;;  %v16401_v31 = vld [vmem:[#allocation4 + $0x43] sm:$0xff]  ;;  %v16412_v10 = vld [vmem:[#allocation4 + $0x54] sm:$0xff]  ;;  %v4436_v2 = vld [vmem:[#allocation3 + $0xf3] sm:$0x1] }
 0x2c6   : > { %17564 = vst [vmem:[#allocation14_spill] sm:$0xff] %v16401_v31  ;;  %v5018_v60 = vld [vmem:[#allocation3 + $0xec] sm:$0x1]  ;;  %v4996_v32 = vmax.f32 %v4974_v51, %v4985_v1  ;;  %17567 = vst [vmem:[#allocation17_spill] sm:$0xff] %v16412_v10  ;;  %v14375_v1 = vld [vmem:[%s17510_s4 + $0xa8] sm:$0xff]   ;;  %v16426_v51 = vpack.c.bf16 %v16225_v9, %v16215_v33 }
 0x2c7   : > { %v16407_v11 = vld [vmem:[#allocation4 + $0x24] sm:$0xff]  ;;  %4941 = vst.msk [vmem:[#allocation4 + $0x98] sm:$0x1] %vm4403_vm4, %v4930_v50  ;;  %v5040_v47 = vmax.f32 %v5018_v60, %v5029_v55  ;;  %v4491_v31 = vld [vmem:[#allocation3 + $0xf4] sm:$0x1] }
 0x2c8   : > { %v16410_v37 = vld [vmem:[#allocation4 + $0x44] sm:$0xff]  ;;  %v16416_v15 = vpack.c.bf16 %v16204_v43, %v16407_v11  ;;  %5007 = vst.msk [vmem:[#allocation4 + $0x99] sm:$0x1] %vm4403_vm4, %v4996_v32  ;;  %17569 = vst [vmem:[#allocation19_spill] sm:$0xff] %v16426_v51  ;;  %v4502_v50 = vld [vmem:[#allocation3 + $0xf5] sm:$0x1] }
 0x2c9   : > { %17566 = vst [vmem:[#allocation16_spill] sm:$0xff] %v16410_v37  ;;  %v5051_v59 = vld [vmem:[#allocation3 + $0xee] sm:$0x1]  ;;  %v4358_v18 = vld [vmem:[#allocation3 + $0xf0] sm:$0x1]  ;;  %v4513_v23 = vmax.f32 %v4491_v31, %v4502_v50 }
 0x2ca   : > { %17568 = vst [vmem:[#allocation18_spill] sm:$0xff] %v16416_v15  ;;  %v5062_v60 = vmax.f32 %v5040_v47, %v5051_v59  ;;  %v4369_v55 = vld [vmem:[#allocation3 + $0xf1] sm:$0x1]  ;;  %v4425_v53 = vld [vmem:[#allocation3 + $0xf2] sm:$0x1]  ;;  %13122 = vmatmul.mubr.msk.bf16.vlgmr.msra.gmra.mrb[48].mxu1 %vm1587_vm3, %v16416_v15  ;;  %v14376_v49 = vld [vmem:[%s17510_s4 + $0xb0] sm:$0xff]  }
 0x2cb   : > { %v4380_v32 = vmax.f32 %v4358_v18, %v4369_v55  ;;  %v4391_v22 = vld [vmem:[#allocation3 + $0xf2] sm:$0x1]  ;;  %13130 = vmatpush3.bf16.msra.mxu1 %v14374_v13  ;;  %13125 = vmatprep.mubr.msk.bf16.mxu1 %vm1587_vm3, %v16426_v51  ;;  %v4447_v47 = vmax.f32 %v4425_v53, %v4436_v2  ;;  %v4458_v59 = vld [vmem:[#allocation3 + $0xf4] sm:$0x1]  ;;  %v4524_v10 = vld [vmem:[#allocation3 + $0xf6] sm:$0x1] }
 0x2cc   : > { %5073 = vst.msk [vmem:[#allocation4 + $0x9a] sm:$0x1] %vm4403_vm4, %v5062_v60  ;;  %13131 = vmatprep.subr.bf16.mxu1 %v14375_v1  ;;  %v16436_v37 = vld [vmem:[#allocation4 + $0x90] sm:$0xff]  ;;  %v4557_v24 = vld [vmem:[#allocation3 + $0xf6] sm:$0x1] }
 0x2cd   : > { %v4402_v15 = vmax.f32 %v4380_v32, %v4391_v22  ;;  %v4568_v18 = vld [vmem:[#allocation3 + $0xf7] sm:$0x1]  ;;  %v4469_v13 = vmax.f32 %v4447_v47, %v4458_v59  ;;  %v4590_v46 = vld [vmem:[#allocation3 + $0xf8] sm:$0x1]  ;;  %v4634_v54 = vld [vmem:[#allocation3 + $0xf9] sm:$0x1]  ;;  %v4535_v22 = vmax.f32 %v4513_v23, %v4524_v10 }
 0x2ce   : > { %v4579_v26 = vmax.f32 %v4557_v24, %v4568_v18  ;;  %v4623_v51 = vld [vmem:[#allocation3 + $0xf8] sm:$0x1]  ;;  %v14377_v2 = vld [vmem:[%s17510_s4 + $0xb8] sm:$0xff]   ;;  %v16443_v53 = vld [vmem:[#allocation4 + $0x91] sm:$0xff]  ;;  %v5578_v18 = vpack.c.bf16 %v16236_v58, %v16236_v58 }
 0x2cf   : > { %4414 = vst.msk [vmem:[#allocation4 + $0xa0] sm:$0x1] %vm4403_vm4, %v4402_v15  ;;  %v4645_v31 = vmax.f32 %v4623_v51, %v4634_v54  ;;  %v4689_v50 = vld [vmem:[#allocation3 + $0xfa] sm:$0x1]  ;;  %13132 = vmatpush3.bf16.msra.mxu1 %v14375_v1  ;;  %4480 = vst.msk [vmem:[#allocation4 + $0xa1] sm:$0x1] %vm4403_vm4, %v4469_v13 }
 0x2d0   : > { %v16446_v60 = vld [vmem:[#allocation4 + $0x92] sm:$0xff]  ;;  %v4601_v24 = vmax.f32 %v4579_v26, %v4590_v46  ;;  %13133 = vmatprep.subr.bf16.mxu1 %v14376_v49  ;;  %4546 = vst.msk [vmem:[#allocation4 + $0xa2] sm:$0x1] %vm4403_vm4, %v4535_v22  ;;  %v5703_v46 = vpack.c.bf16 %v16174_v21, %v16151_v48 }
 0x2d1   : > { %v4656_v32 = vld [vmem:[#allocation3 + $0xfa] sm:$0x1]  ;;  %v4700_v47 = vld [vmem:[#allocation3 + $0xfb] sm:$0x1]  ;;  %v4722_v10 = vld [vmem:[#allocation3 + $0xfc] sm:$0x1]  ;;  %v7867_v51 = vpack.c.bf16 %v16446_v60, %v16378_v7 }
 0x2d2   : > { %v4667_v23 = vmax.f32 %v4645_v31, %v4656_v32  ;;  %v4711_v54 = vmax.f32 %v4689_v50, %v4700_v47  ;;  %v4755_v15 = vld [vmem:[#allocation3 + $0xfc] sm:$0x1]  ;;  %v4766_v1 = vld [vmem:[#allocation3 + $0xfd] sm:$0x1]  ;;  %4612 = vst.msk [vmem:[#allocation4 + $0xa3] sm:$0x1] %vm4403_vm4, %v4601_v24  ;;  %13126 = vmatmul.mubr.msk.bf16.gmra.mrb[52].mxu1 %vm1587_vm3, %v5578_v18 }
 0x2d3   : > { %v4777_v26 = vmax.f32 %v4755_v15, %v4766_v1  ;;  %v4788_v13 = vld [vmem:[#allocation3 + $0xfe] sm:$0x1]  ;;  %v4832_v55 = vld [vmem:[#allocation3 + $0xff] sm:$0x1]  ;;  %v4854_v47 = vld [vmem:[#allocation3 + $0x100] sm:$0x1]  ;;  %13134 = vmatpush3.bf16.msra.mxu1 %v14376_v49  ;;  %13137 = vmatprep.mubr.msk.bf16.mxu1 %vm1587_vm3, %v5703_v46 }
 0x2d4   : > { %v4821_v59 = vld [vmem:[#allocation3 + $0xfe] sm:$0x1]  ;;  %4678 = vst.msk [vmem:[#allocation4 + $0xa4] sm:$0x1] %vm4403_vm4, %v4667_v23  ;;  %v4733_v50 = vmax.f32 %v4711_v54, %v4722_v10  ;;  %v4887_v21 = vld [vmem:[#allocation3 + $0x100] sm:$0x1]  ;;  %13135 = vmatprep.subr.bf16.mxu1 %v14377_v2 }
 0x2d5   : > { %v16460_v22 = vld [vmem:[#allocation4 + $0x93] sm:$0xff]  ;;  %v4843_v32 = vmax.f32 %v4821_v59, %v4832_v55  ;;  %v4799_v48 = vmax.f32 %v4777_v26, %v4788_v13  ;;  %v4964_v54 = vld [vmem:[#allocation3 + $0x103] sm:$0x1]  ;;  %v5019_v46 = vld [vmem:[#allocation3 + $0x104] sm:$0x1] }
 0x2d6   : > { %v16462_v31 = vld [vmem:[#allocation4 + $0x94] sm:$0xff]  ;;  %4744 = vst.msk [vmem:[#allocation4 + $0xa5] sm:$0x1] %vm4403_vm4, %v4733_v50  ;;  %v7994_v23 = vpack.c.bf16 %v16460_v22, %v16382_v12  ;;  %v5030_v26 = vld [vmem:[#allocation3 + $0x105] sm:$0x1] }
 0x2d7   : > { %v14378_v24 = vld [vmem:[%s17510_s4 + $0xc0] sm:$0xff]   ;;  %v4865_v18 = vmax.f32 %v4843_v32, %v4854_v47  ;;  %v4898_v15 = vld [vmem:[#allocation3 + $0x101] sm:$0x1]  ;;  %v8121_v55 = vpack.c.bf16 %v16462_v31, %v16384_v16  ;;  %4810 = vst.msk [vmem:[#allocation4 + $0xa6] sm:$0x1] %vm4403_vm4, %v4799_v48  ;;  %13136 = vmatpush3.bf16.msra.mxu1 %v14377_v2  ;;  %v5041_v32 = vmax.f32 %v5019_v46, %v5030_v26 }
 0x2d8   : > { %v4909_v49 = vmax.f32 %v4887_v21, %v4898_v15  ;;  %v4953_v59 = vld [vmem:[#allocation3 + $0x102] sm:$0x1]  ;;  %v4986_v50 = vld [vmem:[#allocation3 + $0x104] sm:$0x1]  ;;  %13145 = vmatprep.subr.bf16.mxu1 %v14378_v24  ;;  %v5704_v47 = vpack.c.bf16 %v16178_v0, %v16168_v61  ;;  %v5052_v15 = vld [vmem:[#allocation3 + $0x106] sm:$0x1]  ;;  %v17570_v26 = vpack.c.bf16 %v16155_v8, %v16142_v6 }
 0x2d9   : > { %4876 = vst.msk [vmem:[#allocation4 + $0xa7] sm:$0x1] %vm4403_vm4, %v4865_v18  ;;  %v4920_v10 = vld [vmem:[#allocation3 + $0x102] sm:$0x1]  ;;  %v4975_v1 = vmax.f32 %v4953_v59, %v4964_v54  ;;  %v5705_v18 = vpack.c.bf16 %v16221_v57, %v16171_v42  ;;  %v5063_v59 = vmax.f32 %v5041_v32, %v5052_v15  ;;  %v14380_v61 = vld [vmem:[%s17510_s4 + $0xd0] sm:$0xff]   ;;  %v5706_v42 = vpack.c.bf16 %v16270_v4, %v16270_v4  ;;  %v5823_v2 = vld [vmem:[#allocation4 + $0x11] sm:$0xff] }
 0x2da   : > { %v4931_v13 = vmax.f32 %v4909_v49, %v4920_v10  ;;  %v14379_v48 = vld [vmem:[%s17510_s4 + $0xc8] sm:$0xff]   ;;  %13138 = vmatmul.mubr.msk.bf16.vlgmr.msra.gmra.mrb[48].mxu1 %vm1587_vm3, %v5704_v47  ;;  %v16491_v0 = vld [vmem:[#allocation4 + $0x21] sm:$0xff]  ;;  %v14382_v54 = vld [vmem:[%s17510_s4 + $0xe0] sm:$0xff]   ;;  %v5957_v47 = vpack.c.bf16 %v16258_v29, %v16230_v40  ;;  %v17572_v40 = vpack.c.bf16 %v16195_v45, %v16186_v19 }
 0x2db   : > { %v4997_v21 = vmax.f32 %v4975_v1, %v4986_v50  ;;  %13146 = vmatpush3.bf16.msra.mxu1 %v14378_v24  ;;  %13141 = vmatprep.mubr.msk.bf16.mxu1 %vm1587_vm3, %v5705_v18  ;;  %5074 = vst.msk [vmem:[#allocation4 + $0xaa] sm:$0x1] %vm4403_vm4, %v5063_v59  ;;  %v14381_v24 = vld [vmem:[%s17510_s4 + $0xd8] sm:$0xff]   ;;  %v5830_v49 = vpack.c.bf16 %v16491_v0, %v5823_v2  ;;  %v14383_v46 = vld [vmem:[%s17510_s4 + $0xe8] sm:$0xff]   ;;  %v14386_v6 = vld [vmem:[%s17510_s4 + $0x100] sm:$0xff]  }
 0x2dc   : > { %4942 = vst.msk [vmem:[#allocation4 + $0xa8] sm:$0x1] %vm4403_vm4, %v4931_v13  ;;  %13147 = vmatprep.subr.bf16.mxu1 %v14379_v48  ;;  %v14556_v10 = vld [vmem:[#allocation4 + $0x41] sm:$0xff]  ;;  %v5833_v50 = vpack.c.bf16 %v16349_v41, %v16349_v41  ;;  %v14387_v8 = vld [vmem:[%s17510_s4 + $0x108] sm:$0xff]   ;;  %v14390_v19 = vld [vmem:[%s17510_s4 + $0x120] sm:$0xff]   ;;  %v17573_v18 = vpack.c.bf16 %v16213_v14, %v16202_v56  ;;  %v6087_v59 = vpack.c.bf16 %v16293_v30, %v16293_v30 }
 0x2dd   : > { %5008 = vst.msk [vmem:[#allocation4 + $0xa9] sm:$0x1] %vm4403_vm4, %v4997_v21  ;;  %v5831_v1 = vpack.c.bf16 %v14556_v10, %v16288_v5  ;;  %v14384_v13 = vld [vmem:[%s17510_s4 + $0xf0] sm:$0xff]   ;;  %v14385_v32 = vld [vmem:[%s17510_s4 + $0xf8] sm:$0xff]   ;;  %v5960_v21 = vpack.c.bf16 %v16282_v35, %v16282_v35  ;;  %v14391_v15 = vld [vmem:[%s17510_s4 + $0x128] sm:$0xff]   ;;  %v6211_v14 = vpack.c.bf16 %v16407_v11, %v16364_v62  ;;  %v17576_v62 = vpack.c.bf16 %v16236_v58, %v16225_v9 }
 0x2de   : > { %v14388_v29 = vld [vmem:[%s17510_s4 + $0x110] sm:$0xff]   ;;  %v14393_v56 = vld [vmem:[%s17510_s4 + $0x138] sm:$0xff]   ;;  %v6214_v2 = vpack.c.bf16 %v16295_v44, %v16295_v44  ;;  %v14399_v9 = vld [vmem:[%s17510_s4 + $0x168] sm:$0xff]   ;;  %v16631_v10 = vpack.c.bf16 %v16302_v17, %v16300_v34 }
 0x2df   : > { %13148 = vmatpush3.bf16.msra.mxu1 %v14379_v48  ;;  %v17571_v48 = vpack.c.bf16 %v16183_v20, %v16176_v28  ;;  %v14389_v28 = vld [vmem:[%s17510_s4 + $0x118] sm:$0xff]   ;;  %v6084_v20 = vpack.c.bf16 %v16329_v27, %v16279_v3  ;;  %v17574_v3 = vpack.c.bf16 %v16234_v39, %v16223_v36  ;;  %v14392_v27 = vld [vmem:[%s17510_s4 + $0x130] sm:$0xff]   ;;  %v14394_v36 = vld [vmem:[%s17510_s4 + $0x140] sm:$0xff]  }
 0x2e0   : > { %13149 = vmatprep.subr.bf16.mxu1 %v14380_v61  ;;  %v14396_v11 = vld [vmem:[%s17510_s4 + $0x150] sm:$0xff]  }
 0x2e2   : > { %13142 = vmatmul.mubr.msk.bf16.gmra.mrb[52].mxu1 %vm1587_vm3, %v5706_v42  ;;  %v17575_v42 = vpack.c.bf16 %v16215_v33, %v16204_v43  ;;  %v14397_v43 = vld [vmem:[%s17510_s4 + $0x158] sm:$0xff]   ;;  %v14398_v33 = vld [vmem:[%s17510_s4 + $0x160] sm:$0xff]  }
 0x2e3   : > { %13150 = vmatpush3.bf16.msra.mxu1 %v14380_v61  ;;  %13153 = vmatprep.mubr.msk.bf16.mxu1 %vm1587_vm3, %v5830_v49  ;;  %v14395_v61 = vld [vmem:[%s17510_s4 + $0x148] sm:$0xff]   ;;  %v6342_v49 = vpack.c.bf16 %v16354_v25, %v16354_v25 }
 0x2e4   : > { %13151 = vmatprep.subr.bf16.mxu1 %v14381_v24 }
 0x2e7   : > { %13152 = vmatpush3.bf16.msra.mxu1 %v14381_v24  ;;  %v17577_v24 = vpack.c.bf16 %v16270_v4, %v16221_v57  ;;  %v14402_v57 = vld [vmem:[%s17510_s4 + $0x180] sm:$0xff]  }
 0x2e8   : > { %13161 = vmatprep.subr.bf16.mxu1 %v14382_v54 }
 0x2ea   : > { %13154 = vmatmul.mubr.msk.bf16.vlgmr.msra.gmra.mrb[48].mxu1 %vm1587_vm3, %v5831_v1  ;;  %v17578_v1 = vld [vmem:[#allocation10_spill] sm:$0xff] }
 0x2eb   : > { %13162 = vmatpush3.bf16.msra.mxu1 %v14382_v54  ;;  %13157 = vmatprep.mubr.msk.bf16.mxu1 %vm1587_vm3, %v17570_v26  ;;  %v6466_v54 = vpack.c.bf16 %v16288_v5, %v16491_v0  ;;  %v14403_v0 = vld [vmem:[%s17510_s4 + $0x188] sm:$0xff]   ;;  %v14404_v26 = vld [vmem:[%s17510_s4 + $0x190] sm:$0xff]  }
 0x2ec   : > { %13163 = vmatprep.subr.bf16.mxu1 %v14383_v46 }
 0x2ef   : > { %13164 = vmatpush3.bf16.msra.mxu1 %v14383_v46  ;;  %v6468_v46 = vpack.c.bf16 %v16349_v41, %v17578_v1 }
 0x2f0   : > { %13165 = vmatprep.subr.bf16.mxu1 %v14384_v13 }
 0x2f2   : > { %13158 = vmatmul.mubr.msk.bf16.gmra.mrb[52].mxu1 %vm1587_vm3, %v5833_v50  ;;  %v6586_v50 = vld [vmem:[#allocation4 + $0x22] sm:$0xff] }
 0x2f3   : > { %13166 = vmatpush3.bf16.msra.mxu1 %v14384_v13  ;;  %13169 = vmatprep.mubr.msk.bf16.mxu1 %vm1587_vm3, %v5957_v47  ;;  %v6469_v13 = vpack.c.bf16 %v16367_v52, %v16367_v52  ;;  %v17579_v47 = vld [vmem:[#allocation7_spill] sm:$0xff] }
 0x2f4   : > { %13167 = vmatprep.subr.bf16.mxu1 %v14385_v32 }
 0x2f7   : > { %13168 = vmatpush3.bf16.msra.mxu1 %v14385_v32  ;;  %v14405_v32 = vld [vmem:[%s17510_s4 + $0x198] sm:$0xff]  }
 0x2f8   : > { %13177 = vmatprep.subr.bf16.mxu1 %v14386_v6 }
 0x2fa   : > { %13170 = vmatmul.mubr.msk.bf16.vlgmr.msra.gmra.mrb[48].mxu1 %vm1587_vm3, %v17571_v48  ;;  %v16655_v48 = vld [vmem:[#allocation4 + $0x52] sm:$0xff] }
 0x2fb   : > { %13178 = vmatpush3.bf16.msra.mxu1 %v14386_v6  ;;  %13173 = vmatprep.mubr.msk.bf16.mxu1 %vm1587_vm3, %v17572_v40  ;;  %v6593_v6 = vpack.c.bf16 %v17579_v47, %v6586_v50  ;;  %v17580_v40 = vld [vmem:[#allocation11_spill] sm:$0xff]  ;;  %v14422_v50 = vld [vmem:[%s17510_s4 + $0x220] sm:$0xff]  }
 0x2fc   : > { %13179 = vmatprep.subr.bf16.mxu1 %v14387_v8 }
 0x2ff   : > { %13180 = vmatpush3.bf16.msra.mxu1 %v14387_v8  ;;  %v14406_v8 = vld [vmem:[%s17510_s4 + $0x1a0] sm:$0xff]  }
 0x300   : > { %13181 = vmatprep.subr.bf16.mxu1 %v14388_v29 }
 0x302   : > { %13174 = vmatmul.mubr.msk.bf16.gmra.mrb[52].mxu1 %vm1587_vm3, %v5960_v21  ;;  %v14407_v21 = vld [vmem:[%s17510_s4 + $0x1a8] sm:$0xff]  }
 0x303   : > { %13182 = vmatpush3.bf16.msra.mxu1 %v14388_v29  ;;  %13185 = vmatprep.mubr.msk.bf16.mxu1 %vm1587_vm3, %v6084_v20  ;;  %v16659_v29 = vpack.c.bf16 %v16655_v48, %v17580_v40  ;;  %v14408_v20 = vld [vmem:[%s17510_s4 + $0x1b0] sm:$0xff]  }
 0x304   : > { %13183 = vmatprep.subr.bf16.mxu1 %v14389_v28 }
 0x307   : > { %13184 = vmatpush3.bf16.msra.mxu1 %v14389_v28  ;;  %v17581_v28 = vpack.c.bf16 %v16282_v35, %v16195_v45  ;;  %v17582_v45 = vld [vmem:[#allocation12_spill] sm:$0xff] }
 0x308   : > { %13193 = vmatprep.subr.bf16.mxu1 %v14390_v19 }
 0x30a   : > { %13186 = vmatmul.mubr.msk.bf16.vlgmr.msra.gmra.mrb[48].mxu1 %vm1587_vm3, %v17573_v18  ;;  %v14410_v18 = vld [vmem:[%s17510_s4 + $0x1c0] sm:$0xff]  }
 0x30b   : > { %13194 = vmatpush3.bf16.msra.mxu1 %v14390_v19  ;;  %13189 = vmatprep.mubr.msk.bf16.mxu1 %vm1587_vm3, %v17574_v3  ;;  %v6596_v19 = vpack.c.bf16 %v16378_v7, %v16378_v7  ;;  %v14411_v3 = vld [vmem:[%s17510_s4 + $0x1c8] sm:$0xff]  }
 0x30c   : > { %13195 = vmatprep.subr.bf16.mxu1 %v14391_v15 }
 0x30f   : > { %13196 = vmatpush3.bf16.msra.mxu1 %v14391_v15  ;;  %v14409_v15 = vld [vmem:[%s17510_s4 + $0x1b8] sm:$0xff]  }
 0x310   : > { %13197 = vmatprep.subr.bf16.mxu1 %v14392_v27 }
 0x312   : > { %13190 = vmatmul.mubr.msk.bf16.gmra.mrb[52].mxu1 %vm1587_vm3, %v6087_v59  ;;  %v17584_v59 = vpack.c.bf16 %v16293_v30, %v16234_v39  ;;  %v17585_v39 = vld [vmem:[#allocation18_spill] sm:$0xff] }
 0x313   : > { %13198 = vmatpush3.bf16.msra.mxu1 %v14392_v27  ;;  %13201 = vmatprep.mubr.msk.bf16.mxu1 %vm1587_vm3, %v6211_v14  ;;  %v17583_v27 = vld [vmem:[#allocation13_spill] sm:$0xff]  ;;  %v6723_v14 = vpack.c.bf16 %v16382_v12, %v16382_v12 }
 0x314   : > { %13199 = vmatprep.subr.bf16.mxu1 %v14393_v56 }
 0x317   : > { %13200 = vmatpush3.bf16.msra.mxu1 %v14393_v56  ;;  %v14412_v56 = vld [vmem:[%s17510_s4 + $0x1d0] sm:$0xff]  }
 0x318   : > { %13209 = vmatprep.subr.bf16.mxu1 %v14394_v36 }
 0x31a   : > { %13202 = vmatmul.mubr.msk.bf16.vlgmr.msra.gmra.mrb[48].mxu1 %vm1587_vm3, %v17575_v42  ;;  %v14415_v42 = vld [vmem:[%s17510_s4 + $0x1e8] sm:$0xff]  }
 0x31b   : > { %13210 = vmatpush3.bf16.msra.mxu1 %v14394_v36  ;;  %13205 = vmatprep.mubr.msk.bf16.mxu1 %vm1587_vm3, %v17576_v62  ;;  %v14413_v36 = vld [vmem:[%s17510_s4 + $0x1d8] sm:$0xff]   ;;  %v17586_v62 = vld [vmem:[#allocation19_spill] sm:$0xff] }
 0x31c   : > { %13211 = vmatprep.subr.bf16.mxu1 %v14395_v61 }
 0x31f   : > { %13212 = vmatpush3.bf16.msra.mxu1 %v14395_v61  ;;  %v14414_v61 = vld [vmem:[%s17510_s4 + $0x1e0] sm:$0xff]  }
 0x320   : > { %13213 = vmatprep.subr.bf16.mxu1 %v14396_v11 }
 0x322   : > { %13206 = vmatmul.mubr.msk.bf16.gmra.mrb[52].mxu1 %vm1587_vm3, %v6214_v2  ;;  %v14416_v2 = vld [vmem:[%s17510_s4 + $0x1f0] sm:$0xff]  }
 0x323   : > { %13214 = vmatpush3.bf16.msra.mxu1 %v14396_v11  ;;  %13217 = vmatprep.mubr.msk.bf16.mxu1 %vm1587_vm3, %v16193_v63  ;;  %v14400_v63 = vld [vmem:[%s17510_s4 + $0x170] sm:$0xff]   ;;  %v17587_v11 = vpack.c.bf16 %v16295_v44, %v16236_v58  ;;  %v14418_v58 = vld [vmem:[%s17510_s4 + $0x200] sm:$0xff]  }
 0x324   : > { %13215 = vmatprep.subr.bf16.mxu1 %v14397_v43 }
 0x327   : > { %13216 = vmatpush3.bf16.msra.mxu1 %v14397_v43  ;;  %v6850_v43 = vpack.c.bf16 %v16384_v16, %v16384_v16 }
 0x328   : > { %13225 = vmatprep.subr.bf16.mxu1 %v14398_v33 }
 0x32a   : > { %13218 = vmatmul.mubr.msk.bf16.vlgmr.msra.gmra.mrb[48].mxu1 %vm1587_vm3, %v16200_v38  ;;  %v14401_v38 = vld [vmem:[%s17510_s4 + $0x178] sm:$0xff]  }
 0x32b   : > { %13226 = vmatpush3.bf16.msra.mxu1 %v14398_v33  ;;  %13221 = vmatprep.mubr.msk.bf16.mxu1 %vm1587_vm3, %v17577_v24  ;;  %v6968_v33 = vld [vmem:[#allocation4 + $0x30] sm:$0xff]  ;;  %v17588_v24 = vld [vmem:[#allocation8_spill] sm:$0xff] }
 0x32c   : > { %13227 = vmatprep.subr.bf16.mxu1 %v14399_v9 }
 0x32f   : > { %13228 = vmatpush3.bf16.msra.mxu1 %v14399_v9  ;;  %v14417_v9 = vld [vmem:[%s17510_s4 + $0x1f8] sm:$0xff]  }
 0x330   : > { %13229 = vmatprep.subr.bf16.mxu1 %v14400_v63 }
 0x332   : > { %13222 = vmatmul.mubr.msk.bf16.gmra.mrb[52].mxu1 %vm1587_vm3, %v6342_v49  ;;  %v16730_v49 = vld [vmem:[#allocation4 + $0x60] sm:$0xff] }
 0x333   : > { %13230 = vmatpush3.bf16.msra.mxu1 %v14400_v63  ;;  %13233 = vmatprep.mubr.msk.bf16.mxu1 %vm1587_vm3, %v6466_v54  ;;  %v6975_v63 = vpack.c.bf16 %v17588_v24, %v6968_v33  ;;  %v16843_v33 = vld [vmem:[#allocation4 + $0x64] sm:$0xff] }
 0x334   : > { %13231 = vmatprep.subr.bf16.mxu1 %v14401_v38 }
 0x337   : > { %13232 = vmatpush3.bf16.msra.mxu1 %v14401_v38  ;;  %v17589_v38 = vld [vmem:[#allocation9_spill] sm:$0xff] }
 0x338   : > { %13241 = vmatprep.subr.bf16.mxu1 %v14402_v57  ;;  %v6976_v54 = vpack.c.bf16 %v16730_v49, %v17589_v38 }
 0x33a   : > { %13234 = vmatmul.mubr.msk.bf16.vlgmr.msra.gmra.mrb[48].mxu1 %vm1587_vm3, %v16631_v10 }
 0x33b   : > { %13242 = vmatpush3.bf16.msra.mxu1 %v14402_v57  ;;  %13237 = vmatprep.mubr.msk.bf16.mxu1 %vm1587_vm3, %v6468_v46  ;;  %v14419_v57 = vld [vmem:[%s17510_s4 + $0x208] sm:$0xff]   ;;  %v14420_v46 = vld [vmem:[%s17510_s4 + $0x210] sm:$0xff]  }
 0x33c   : > { %13243 = vmatprep.subr.bf16.mxu1 %v14403_v0 }
 0x33f   : > { %13244 = vmatpush3.bf16.msra.mxu1 %v14403_v0  ;;  %v17590_v0 = vpack.c.bf16 %v16354_v25, %v16270_v4  ;;  %v17591_v4 = vpack.c.bf16 %v16300_v34, %v16288_v5  ;;  %v17593_v5 = vpack.c.bf16 %v16367_v52, %v16349_v41  ;;  %v14424_v34 = vld [vmem:[%s17510_s4 + $0x230] sm:$0xff]   ;;  %v14454_v41 = vld [vmem:[%s17513_s7 + $0x20] sm:$0xff]  }
 0x340   : > { %13245 = vmatprep.subr.bf16.mxu1 %v14404_v26  ;;  %13449 = vmatprep.subr.bf16.mxu0 %v14454_v41 }
 0x341   : > { %13450 = vmatpush3.bf16.msra.mxu0 %v14454_v41  ;;  %v7737_v41 = vld [vmem:[#allocation4 + $0xa1] sm:$0xff] }
 0x342   : > { %13238 = vmatmul.mubr.msk.bf16.gmra.mrb[52].mxu1 %vm1587_vm3, %v6469_v13  ;;  %v14421_v13 = vld [vmem:[%s17510_s4 + $0x218] sm:$0xff]  }
 0x343   : > { %13246 = vmatpush3.bf16.msra.mxu1 %v14404_v26  ;;  %13249 = vmatprep.mubr.msk.bf16.mxu1 %vm1587_vm3, %v6593_v6  ;;  %v6978_v26 = vpack.c.bf16 %v16436_v37, %v16436_v37  ;;  %v17592_v6 = vpack.c.bf16 %v17578_v1, %v16302_v17  ;;  %v14425_v17 = vld [vmem:[%s17510_s4 + $0x238] sm:$0xff]   ;;  %v14455_v1 = vld [vmem:[%s17513_s7 + $0x28] sm:$0xff]  }
 0x344   : > { %13247 = vmatprep.subr.bf16.mxu1 %v14405_v32  ;;  %13451 = vmatprep.subr.bf16.mxu0 %v14455_v1 }
 0x345   : > { %13452 = vmatpush3.bf16.msra.mxu0 %v14455_v1  ;;  %v7741_v1 = vpack.c.bf16 %v7737_v41, %v7737_v41 }
 0x347   : > { %13248 = vmatpush3.bf16.msra.mxu1 %v14405_v32  ;;  %v14423_v32 = vld [vmem:[%s17510_s4 + $0x228] sm:$0xff]  }
 0x348   : > { %13257 = vmatprep.subr.bf16.mxu1 %v14406_v8 }
 0x34a   : > { %13250 = vmatmul.mubr.msk.bf16.vlgmr.msra.gmra.mrb[48].mxu1 %vm1587_vm3, %v16659_v29 }
 0x34b   : > { %13258 = vmatpush3.bf16.msra.mxu1 %v14406_v8  ;;  %13253 = vmatprep.mubr.msk.bf16.mxu1 %vm1587_vm3, %v17581_v28  ;;  %v7105_v8 = vpack.c.bf16 %v16443_v53, %v16443_v53  ;;  %v14426_v28 = vld [vmem:[%s17510_s4 + $0x240] sm:$0xff]  }
 0x34c   : > { %13259 = vmatprep.subr.bf16.mxu1 %v14407_v21 }
 0x34f   : > { %13260 = vmatpush3.bf16.msra.mxu1 %v14407_v21  ;;  %v17594_v21 = vpack.c.bf16 %v17580_v40, %v17579_v47  ;;  %v14427_v47 = vld [vmem:[%s17510_s4 + $0x248] sm:$0xff]   ;;  %v17595_v40 = vpack.c.bf16 %v16378_v7, %v16282_v35  ;;  %v14430_v35 = vld [vmem:[%s17510_s4 + $0x260] sm:$0xff]  }
 0x350   : > { %13261 = vmatprep.subr.bf16.mxu1 %v14408_v20 }
 0x352   : > { %13254 = vmatmul.mubr.msk.bf16.gmra.mrb[52].mxu1 %vm1587_vm3, %v6596_v19 }
 0x353   : > { %13262 = vmatpush3.bf16.msra.mxu1 %v14408_v20  ;;  %13265 = vmatprep.mubr.msk.bf16.mxu1 %vm1587_vm3, %v17582_v45  ;;  %v16791_v20 = vld [vmem:[#allocation4 + $0x62] sm:$0xff]  ;;  %v7349_v45 = vld [vmem:[#allocation4 + $0x33] sm:$0xff] }
 0x354   : > { %13263 = vmatprep.subr.bf16.mxu1 %v14409_v15  ;;  %v7230_v19 = vpack.c.bf16 %v16791_v20, %v16655_v48  ;;  %v7232_v48 = vpack.c.bf16 %v16446_v60, %v16446_v60  ;;  %v14450_v60 = vld [vmem:[%s17510_s4 + $0x300] sm:$0xff]  }
 0x357   : > { %13264 = vmatpush3.bf16.msra.mxu1 %v14409_v15  ;;  %v14428_v15 = vld [vmem:[%s17510_s4 + $0x250] sm:$0xff]  }
 0x358   : > { %13273 = vmatprep.subr.bf16.mxu1 %v14410_v18 }
 0x35a   : > { %13266 = vmatmul.mubr.msk.bf16.vlgmr.msra.gmra.mrb[48].mxu1 %vm1587_vm3, %v17583_v27 }
 0x35b   : > { %13274 = vmatpush3.bf16.msra.mxu1 %v14410_v18  ;;  %13269 = vmatprep.mubr.msk.bf16.mxu1 %vm1587_vm3, %v17584_v59  ;;  %v14429_v18 = vld [vmem:[%s17510_s4 + $0x258] sm:$0xff]  }
 0x35c   : > { %13275 = vmatprep.subr.bf16.mxu1 %v14411_v3  ;;  %v16817_v59 = vld [vmem:[#allocation4 + $0x63] sm:$0xff] }
 0x35f   : > { %13276 = vmatpush3.bf16.msra.mxu1 %v14411_v3  ;;  %v17596_v3 = vld [vmem:[#allocation14_spill] sm:$0xff] }
 0x360   : > { %13277 = vmatprep.subr.bf16.mxu1 %v14412_v56  ;;  %v7356_v27 = vpack.c.bf16 %v17596_v3, %v7349_v45  ;;  %v14452_v45 = vld [vmem:[%s17510_s4 + $0x310] sm:$0xff]  }
 0x362   : > { %13270 = vmatmul.mubr.msk.bf16.gmra.mrb[52].mxu1 %vm1587_vm3, %v6723_v14 }
 0x363   : > { %13278 = vmatpush3.bf16.msra.mxu1 %v14412_v56  ;;  %13281 = vmatprep.mubr.msk.bf16.mxu1 %vm1587_vm3, %v17585_v39  ;;  %v17597_v56 = vld [vmem:[#allocation15_spill] sm:$0xff]  ;;  %v17598_v39 = vpack.c.bf16 %v16382_v12, %v16293_v30  ;;  %v14434_v30 = vld [vmem:[%s17510_s4 + $0x280] sm:$0xff]  }
 0x364   : > { %13279 = vmatprep.subr.bf16.mxu1 %v14413_v36  ;;  %v7357_v14 = vpack.c.bf16 %v16817_v59, %v17597_v56  ;;  %v17605_v7 = vpack.c.bf16 %v17597_v56, %v17596_v3  ;;  %v14456_v56 = vld [vmem:[%s17513_s7 + $0x30] sm:$0xff]  }
 0x365   : > { %13453 = vmatprep.subr.bf16.mxu0 %v14456_v56 }
 0x366   : > { %13454 = vmatpush3.bf16.msra.mxu0 %v14456_v56 }
 0x367   : > { %13280 = vmatpush3.bf16.msra.mxu1 %v14413_v36  ;;  %v14431_v36 = vld [vmem:[%s17510_s4 + $0x268] sm:$0xff]  }
 0x368   : > { %13289 = vmatprep.subr.bf16.mxu1 %v14414_v61 }
 0x36a   : > { %13282 = vmatmul.mubr.msk.bf16.vlgmr.msra.gmra.mrb[48].mxu1 %vm1587_vm3, %v17586_v62  ;;  %v7476_v62 = vld [vmem:[#allocation4 + $0x34] sm:$0xff] }
 0x36b   : > { %13290 = vmatpush3.bf16.msra.mxu1 %v14414_v61  ;;  %13285 = vmatprep.mubr.msk.bf16.mxu1 %vm1587_vm3, %v17587_v11  ;;  %v14432_v61 = vld [vmem:[%s17510_s4 + $0x270] sm:$0xff]   ;;  %v14433_v11 = vld [vmem:[%s17510_s4 + $0x278] sm:$0xff]  }
 0x36c   : > { %13291 = vmatprep.subr.bf16.mxu1 %v14415_v42 }
 0x36f   : > { %13292 = vmatpush3.bf16.msra.mxu1 %v14415_v42  ;;  %v7359_v42 = vpack.c.bf16 %v16460_v22, %v16460_v22  ;;  %v8115_v22 = vld [vmem:[#allocation4 + $0x74] sm:$0xff] }
 0x370   : > { %13293 = vmatprep.subr.bf16.mxu1 %v14416_v2 }
 0x372   : > { %13286 = vmatmul.mubr.msk.bf16.gmra.mrb[52].mxu1 %vm1587_vm3, %v6850_v43 }
 0x373   : > { %13294 = vmatpush3.bf16.msra.mxu1 %v14416_v2  ;;  %13297 = vmatprep.mubr.msk.bf16.mxu1 %vm1587_vm3, %v6975_v63  ;;  %v17599_v2 = vld [vmem:[#allocation16_spill] sm:$0xff] }
 0x374   : > { %13295 = vmatprep.subr.bf16.mxu1 %v14417_v9  ;;  %v7483_v43 = vpack.c.bf16 %v17599_v2, %v7476_v62 }
 0x377   : > { %13296 = vmatpush3.bf16.msra.mxu1 %v14417_v9  ;;  %v17600_v9 = vld [vmem:[#allocation17_spill] sm:$0xff] }
 0x378   : > { %13305 = vmatprep.subr.bf16.mxu1 %v14418_v58  ;;  %v7484_v63 = vpack.c.bf16 %v16843_v33, %v17600_v9  ;;  %v17606_v12 = vpack.c.bf16 %v17600_v9, %v17599_v2 }
 0x37a   : > { %13298 = vmatmul.mubr.msk.bf16.vlgmr.msra.gmra.mrb[48].mxu1 %vm1587_vm3, %v6976_v54  ;;  %v17601_v54 = vpack.c.bf16 %v16384_v16, %v16295_v44  ;;  %v17602_v44 = vpack.c.bf16 %v17589_v38, %v17588_v24  ;;  %v17603_v24 = vpack.c.bf16 %v16436_v37, %v16354_v25  ;;  %v14440_v38 = vld [vmem:[%s17510_s4 + $0x2b0] sm:$0xff]   ;;  %v14442_v25 = vld [vmem:[%s17510_s4 + $0x2c0] sm:$0xff]  }
 0x37b   : > { %13306 = vmatpush3.bf16.msra.mxu1 %v14418_v58  ;;  %13301 = vmatprep.mubr.msk.bf16.mxu1 %vm1587_vm3, %v17590_v0  ;;  %v14435_v58 = vld [vmem:[%s17510_s4 + $0x288] sm:$0xff]   ;;  %v7486_v0 = vpack.c.bf16 %v16462_v31, %v16462_v31  ;;  %v16975_v31 = vld [vmem:[%s17513_s7] sm:$0xff]  }
 0x37c   : > { %13307 = vmatprep.subr.bf16.mxu1 %v14419_v57  ;;  %v7734_v37 = vld [vmem:[#allocation4 + $0x71] sm:$0xff] }
 0x37f   : > { %13308 = vmatpush3.bf16.msra.mxu1 %v14419_v57  ;;  %v14436_v57 = vld [vmem:[%s17510_s4 + $0x290] sm:$0xff]  }
 0x380   : > { %13309 = vmatprep.subr.bf16.mxu1 %v14420_v46 }
 0x382   : > { %13302 = vmatmul.mubr.msk.bf16.gmra.mrb[52].mxu1 %vm1587_vm3, %v6978_v26  ;;  %v14438_v26 = vld [vmem:[%s17510_s4 + $0x2a0] sm:$0xff]  }
 0x383   : > { %13310 = vmatpush3.bf16.msra.mxu1 %v14420_v46  ;;  %13313 = vmatprep.mubr.msk.bf16.mxu1 %vm1587_vm3, %v17591_v4  ;;  %v14437_v46 = vld [vmem:[%s17510_s4 + $0x298] sm:$0xff]  }
 0x384   : > { %13311 = vmatprep.subr.bf16.mxu1 %v14421_v13 }
 0x387   : > { %13312 = vmatpush3.bf16.msra.mxu1 %v14421_v13  ;;  %v7607_v13 = vld [vmem:[#allocation4 + $0x70] sm:$0xff] }
 0x388   : > { %13321 = vmatprep.subr.bf16.mxu1 %v14422_v50  ;;  %v7612_v4 = vpack.c.bf16 %v7607_v13, %v16730_v49 }
 0x38a   : > { %13314 = vmatmul.mubr.msk.bf16.vlgmr.msra.gmra.mrb[48].mxu1 %vm1587_vm3, %v17592_v6  ;;  %v14441_v6 = vld [vmem:[%s17510_s4 + $0x2b8] sm:$0xff]  }
 0x38b   : > { %13322 = vmatpush3.bf16.msra.mxu1 %v14422_v50  ;;  %13317 = vmatprep.mubr.msk.bf16.mxu1 %vm1587_vm3, %v17593_v5  ;;  %v14439_v50 = vld [vmem:[%s17510_s4 + $0x2a8] sm:$0xff]   ;;  %v14557_v5 = vld [vmem:[#allocation4 + $0x61] sm:$0xff] }
 0x38c   : > { %13323 = vmatprep.subr.bf16.mxu1 %v14423_v32 }
 0x38f   : > { %13324 = vmatpush3.bf16.msra.mxu1 %v14423_v32  ;;  %v7610_v32 = vld [vmem:[#allocation4 + $0xa0] sm:$0xff] }
 0x390   : > { %13325 = vmatprep.subr.bf16.mxu1 %v14424_v34  ;;  %v7614_v49 = vpack.c.bf16 %v7610_v32, %v7610_v32 }
 0x392   : > { %13318 = vmatmul.mubr.msk.bf16.gmra.mrb[52].mxu1 %vm1587_vm3, %v7105_v8  ;;  %v14443_v8 = vld [vmem:[%s17510_s4 + $0x2c8] sm:$0xff]  }
 0x393   : > { %13326 = vmatpush3.bf16.msra.mxu1 %v14424_v34  ;;  %13329 = vmatprep.mubr.msk.bf16.mxu1 %vm1587_vm3, %v17594_v21  ;;  %v7739_v34 = vpack.c.bf16 %v7734_v37, %v14557_v5  ;;  %v14445_v21 = vld [vmem:[%s17510_s4 + $0x2d8] sm:$0xff]  }
 0x394   : > { %13327 = vmatprep.subr.bf16.mxu1 %v14425_v17 }
 0x397   : > { %13328 = vmatpush3.bf16.msra.mxu1 %v14425_v17  ;;  %v14444_v17 = vld [vmem:[%s17510_s4 + $0x2d0] sm:$0xff]  }
 0x398   : > { %13337 = vmatprep.subr.bf16.mxu1 %v14426_v28 }
 0x39a   : > { %13330 = vmatmul.mubr.msk.bf16.vlgmr.msra.gmra.mrb[48].mxu1 %vm1587_vm3, %v7230_v19  ;;  %v14447_v19 = vld [vmem:[%s17510_s4 + $0x2e8] sm:$0xff]  }
 0x39b   : > { %13338 = vmatpush3.bf16.msra.mxu1 %v14426_v28  ;;  %13333 = vmatprep.mubr.msk.bf16.mxu1 %vm1587_vm3, %v17595_v40  ;;  %v14449_v40 = vld [vmem:[%s17510_s4 + $0x2f8] sm:$0xff]  }
 0x39c   : > { %13339 = vmatprep.subr.bf16.mxu1 %v14427_v47 }
 0x39f   : > { %13340 = vmatpush3.bf16.msra.mxu1 %v14427_v47  ;;  %v7864_v47 = vld [vmem:[#allocation4 + $0xa2] sm:$0xff] }
 0x3a0   : > { %13341 = vmatprep.subr.bf16.mxu1 %v14428_v15 }
 0x3a2   : > { %13334 = vmatmul.mubr.msk.bf16.gmra.mrb[52].mxu1 %vm1587_vm3, %v7232_v48  ;;  %v14451_v48 = vld [vmem:[%s17510_s4 + $0x308] sm:$0xff]  }
 0x3a3   : > { %13342 = vmatpush3.bf16.msra.mxu1 %v14428_v15  ;;  %13345 = vmatprep.mubr.msk.bf16.mxu1 %vm1587_vm3, %v7356_v27  ;;  %v14453_v27 = vld [vmem:[%s17510_s4 + $0x318] sm:$0xff]  }
 0x3a4   : > { %13343 = vmatprep.subr.bf16.mxu1 %v14429_v18 }
 0x3a7   : > { %13344 = vmatpush3.bf16.msra.mxu1 %v14429_v18  ;;  %v7991_v18 = vld [vmem:[#allocation4 + $0xa3] sm:$0xff] }
 0x3a8   : > { %13353 = vmatprep.subr.bf16.mxu1 %v14430_v35  ;;  %v7995_v3 = vpack.c.bf16 %v7991_v18, %v7991_v18 }
 0x3aa   : > { %13346 = vmatmul.mubr.msk.bf16.vlgmr.msra.gmra.mrb[48].mxu1 %vm1587_vm3, %v7357_v14  ;;  %v14457_v14 = vld [vmem:[%s17513_s7 + $0x38] sm:$0xff]  }
 0x3ab   : > { %13354 = vmatpush3.bf16.msra.mxu1 %v14430_v35  ;;  %13349 = vmatprep.mubr.msk.bf16.mxu1 %vm1587_vm3, %v17598_v39  ;;  %v8118_v35 = vld [vmem:[#allocation4 + $0xa4] sm:$0xff]  ;;  %v16968_v39 = vld [vmem:[#allocation6 + $0x11] sm:$0xff] }
 0x3ac   : > { %13355 = vmatprep.subr.bf16.mxu1 %v14431_v36  ;;  %13455 = vmatprep.subr.bf16.mxu0 %v14457_v14 }
 0x3ad   : > { %13456 = vmatpush3.bf16.msra.mxu0 %v14457_v14 }
 0x3ae   : > { %13461 = vmatprep.subr.bf16.mxu0 %v16975_v31 }
 0x3af   : > { %13356 = vmatpush3.bf16.msra.mxu1 %v14431_v36  ;;  %v8367_v36 = vld [vmem:[#allocation6 + $0x1] sm:$0xff] }
 0x3b0   : > { %13357 = vmatprep.subr.bf16.mxu1 %v14432_v61  ;;  %v8370_v16 = vpack.c.bf16 %v16968_v39, %v8367_v36 }
 0x3b2   : > { %13350 = vmatmul.mubr.msk.bf16.gmra.mrb[52].mxu1 %vm1587_vm3, %v7359_v42  ;;  %13457 = vmatprep.mubr.msk.bf16.mxu0 %vm1587_vm3, %v8370_v16  ;;  %v11767_v42 = vld [vmem:[%s17512_s6] ss:$0 sm:$0xff] }
 0x3b3   : > { %13358 = vmatpush3.bf16.msra.mxu1 %v14432_v61  ;;  %13361 = vmatprep.mubr.msk.bf16.mxu1 %vm1587_vm3, %v7483_v43 }
 0x3b4   : > { %13359 = vmatprep.subr.bf16.mxu1 %v14433_v11 }
 0x3b7   : > { %13360 = vmatpush3.bf16.msra.mxu1 %v14433_v11 }
 0x3b8   : > { %13369 = vmatprep.subr.bf16.mxu1 %v14434_v30 }
 0x3ba   : > { %13362 = vmatmul.mubr.msk.bf16.vlgmr.msra.gmra.mrb[48].mxu1 %vm1587_vm3, %v7484_v63 }
 0x3bb   : > { %13370 = vmatpush3.bf16.msra.mxu1 %v14434_v30  ;;  %13365 = vmatprep.mubr.msk.bf16.mxu1 %vm1587_vm3, %v17601_v54 }
 0x3bc   : > { %13371 = vmatprep.subr.bf16.mxu1 %v14435_v58 }
 0x3bf   : > { %13372 = vmatpush3.bf16.msra.mxu1 %v14435_v58 }
 0x3c0   : > { %13373 = vmatprep.subr.bf16.mxu1 %v14436_v57 }
 0x3c2   : > { %13366 = vmatmul.mubr.msk.bf16.gmra.mrb[52].mxu1 %vm1587_vm3, %v7486_v0 }
 0x3c3   : > { %13374 = vmatpush3.bf16.msra.mxu1 %v14436_v57  ;;  %13377 = vmatprep.mubr.msk.bf16.mxu1 %vm1587_vm3, %v17602_v44 }
 0x3c4   : > { %13375 = vmatprep.subr.bf16.mxu1 %v14437_v46 }
 0x3c7   : > { %13376 = vmatpush3.bf16.msra.mxu1 %v14437_v46 }
 0x3c8   : > { %13385 = vmatprep.subr.bf16.mxu1 %v14438_v26 }
 0x3ca   : > { %13378 = vmatmul.mubr.msk.bf16.vlgmr.msra.gmra.mrb[48].mxu1 %vm1587_vm3, %v7612_v4 }
 0x3cb   : > { %13386 = vmatpush3.bf16.msra.mxu1 %v14438_v26  ;;  %13381 = vmatprep.mubr.msk.bf16.mxu1 %vm1587_vm3, %v17603_v24 }
 0x3cc   : > { %13387 = vmatprep.subr.bf16.mxu1 %v14439_v50 }
 0x3cf   : > { %13388 = vmatpush3.bf16.msra.mxu1 %v14439_v50 }
 0x3d0   : > { %13389 = vmatprep.subr.bf16.mxu1 %v14440_v38 }
 0x3d2   : > { %13382 = vmatmul.mubr.msk.bf16.gmra.mrb[52].mxu1 %vm1587_vm3, %v7614_v49 }
 0x3d3   : > { %13390 = vmatpush3.bf16.msra.mxu1 %v14440_v38  ;;  %13393 = vmatprep.mubr.msk.bf16.mxu1 %vm1587_vm3, %v16631_v10  ;;  %v17604_v10 = vpack.c.bf16 %v16443_v53, %v16367_v52  ;;  %v14446_v52 = vld [vmem:[%s17510_s4 + $0x2e0] sm:$0xff]  }
 0x3d4   : > { %13391 = vmatprep.subr.bf16.mxu1 %v14441_v6  ;;  %v7861_v53 = vld [vmem:[#allocation4 + $0x72] sm:$0xff] }
 0x3d5   : > { %v7866_v28 = vpack.c.bf16 %v7861_v53, %v16791_v20  ;;  %v7868_v20 = vpack.c.bf16 %v7864_v47, %v7864_v47 }
 0x3d7   : > { %13392 = vmatpush3.bf16.msra.mxu1 %v14441_v6 }
 0x3d8   : > { %13401 = vmatprep.subr.bf16.mxu1 %v14442_v25 }
 0x3da   : > { %13394 = vmatmul.mubr.msk.bf16.vlgmr.msra.gmra.mrb[48].mxu1 %vm1587_vm3, %v7739_v34 }
 0x3db   : > { %13402 = vmatpush3.bf16.msra.mxu1 %v14442_v25  ;;  %13397 = vmatprep.mubr.msk.bf16.mxu1 %vm1587_vm3, %v17604_v10 }
 0x3dc   : > { %13403 = vmatprep.subr.bf16.mxu1 %v14443_v8 }
 0x3df   : > { %13404 = vmatpush3.bf16.msra.mxu1 %v14443_v8 }
 0x3e0   : > { %13405 = vmatprep.subr.bf16.mxu1 %v14444_v17 }
 0x3e2   : > { %13398 = vmatmul.mubr.msk.bf16.gmra.mrb[52].mxu1 %vm1587_vm3, %v7741_v1 }
 0x3e3   : > { %13406 = vmatpush3.bf16.msra.mxu1 %v14444_v17  ;;  %13409 = vmatprep.mubr.msk.bf16.mxu1 %vm1587_vm3, %v16659_v29  ;;  %v14448_v29 = vld [vmem:[%s17510_s4 + $0x2f0] sm:$0xff]  }
 0x3e4   : > { %13407 = vmatprep.subr.bf16.mxu1 %v14445_v21 }
 0x3e7   : > { %13408 = vmatpush3.bf16.msra.mxu1 %v14445_v21 }
 0x3e8   : > { %13417 = vmatprep.subr.bf16.mxu1 %v14446_v52 }
 0x3ea   : > { %13410 = vmatmul.mubr.msk.bf16.vlgmr.msra.gmra.mrb[48].mxu1 %vm1587_vm3, %v7866_v28 }
 0x3eb   : > { %13418 = vmatpush3.bf16.msra.mxu1 %v14446_v52  ;;  %13413 = vmatprep.mubr.msk.bf16.mxu1 %vm1587_vm3, %v7867_v51  ;;  %v7988_v51 = vld [vmem:[#allocation4 + $0x73] sm:$0xff] }
 0x3ec   : > { %13419 = vmatprep.subr.bf16.mxu1 %v14447_v19  ;;  %v7993_v15 = vpack.c.bf16 %v7988_v51, %v16817_v59  ;;  %v8122_v59 = vpack.c.bf16 %v8118_v35, %v8118_v35 }
 0x3ef   : > { %13420 = vmatpush3.bf16.msra.mxu1 %v14447_v19 }
 0x3f0   : > { %13421 = vmatprep.subr.bf16.mxu1 %v14448_v29 }
 0x3f2   : > { %13414 = vmatmul.mubr.msk.bf16.gmra.mrb[52].mxu1 %vm1587_vm3, %v7868_v20 }
 0x3f3   : > { %13422 = vmatpush3.bf16.msra.mxu1 %v14448_v29  ;;  %13425 = vmatprep.mubr.msk.bf16.mxu1 %vm1587_vm3, %v17605_v7 }
 0x3f4   : > { %13423 = vmatprep.subr.bf16.mxu1 %v14449_v40 }
 0x3f7   : > { %13424 = vmatpush3.bf16.msra.mxu1 %v14449_v40 }
 0x3f8   : > { %13433 = vmatprep.subr.bf16.mxu1 %v14450_v60 }
 0x3fa   : > { %13426 = vmatmul.mubr.msk.bf16.vlgmr.msra.gmra.mrb[48].mxu1 %vm1587_vm3, %v7993_v15 }
 0x3fb   : > { %13434 = vmatpush3.bf16.msra.mxu1 %v14450_v60  ;;  %13429 = vmatprep.mubr.msk.bf16.mxu1 %vm1587_vm3, %v7994_v23  ;;  %v8120_v23 = vpack.c.bf16 %v8115_v22, %v16843_v33 }
 0x3fc   : > { %13435 = vmatprep.subr.bf16.mxu1 %v14451_v48 }
 0x3ff   : > { %13436 = vmatpush3.bf16.msra.mxu1 %v14451_v48 }
 0x400   : > { %13437 = vmatprep.subr.bf16.mxu1 %v14452_v45 }
 0x402   : > { %13430 = vmatmul.mubr.msk.bf16.gmra.mrb[52].mxu1 %vm1587_vm3, %v7995_v3 }
 0x403   : > { %13438 = vmatpush3.bf16.msra.mxu1 %v14452_v45  ;;  %13441 = vmatprep.mubr.msk.bf16.mxu1 %vm1587_vm3, %v17606_v12 }
 0x404   : > { %13439 = vmatprep.subr.bf16.mxu1 %v14453_v27 }
 0x407   : > { %13440 = vmatpush3.bf16.msra.mxu1 %v14453_v27 }
 0x40a   : > { %13442 = vmatmul.mubr.msk.bf16.vlgmr.msra.gmra.mrb[48].mxu1 %vm1587_vm3, %v8120_v23 }
 0x40b   : > { %13445 = vmatprep.mubr.msk.bf16.mxu1 %vm1587_vm3, %v8121_v55  ;;  %v11766_v55 = vld [vmem:[%s17511_s5] ss:$0 sm:$0xff] }
 0x412   : > { %13446 = vmatmul.mubr.msk.bf16.gmra.mrb[52].mxu1 %vm1587_vm3, %v8122_v59 }
 0x4dd   : > { %v13443_v61 = vpop.f32.mrb[48].mxu1 }
 0x4de   : > { %v8248_v62 = vmul.f32 %v13443_v61, %v11766_v55  ;;  %v8202_v11 = vpop.f32.mrb[49].mxu1 }
 0x4df   : > { %v8246_v2 = vmul.f32 %v11766_v55, %v8202_v11  ;;  %v13444_v43 = vpop.f32.mrb[50].mxu1 }
 0x4e0   : > { %v8262_v30 = vadd.f32 %v11767_v42, %v8248_v62  ;;  %v8249_v33 = vmul.f32 %v13444_v43, %v11766_v55  ;;  %v8205_v9 = vpop.f32.mrb[51].mxu1 }
 0x4e1   : > { %v8260_v63 = vadd.f32 %v11767_v42, %v8246_v2  ;;  %v8247_v58 = vmul.f32 %v11766_v55, %v8205_v9 }
 0x4e2   : > { %v8263_v54 = vadd.f32 %v11767_v42, %v8249_v33  ;;  %v8269_v0 = vmax.f32 %v8262_v30, 0.0 }
 0x4e3   : > { %v8261_v57 = vadd.f32 %v11767_v42, %v8247_v58  ;;  %v8267_v44 = vmax.f32 %v8260_v63, 0.0 }
 0x4e4   : > { %v8270_v46 = vmax.f32 %v8263_v54, 0.0 }
 0x4e5   : > { %v8268_v26 = vmax.f32 %v8261_v57, 0.0  ;;  %v13447_v13 = vpop.f32.mrb[52].mxu1 }
 0x4e6   : > { %v8277_v4 = vmax.f32 %v8269_v0, %v8270_v46  ;;  %v8218_v50 = vpop.f32.mrb[53].mxu1  ;;  %v8252_v38 = vmul.f32 %v13447_v13, %v11766_v55 }
 0x4e7   : > { %v8274_v24 = vmax.f32 %v8267_v44, %v8268_v26  ;;  %v8250_v32 = vmul.f32 %v11766_v55, %v8218_v50  ;;  %v13448_v49 = vpop.f32.mrb[54].mxu1  ;;  %v8354_v26 = vld [vmem:[#allocation6] sm:$0xff] }
 0x4e8   : > { %v8221_v6 = vpop.f32.mrb[55].mxu1  ;;  %v8266_v34 = vadd.f32 %v11767_v42, %v8252_v38 }
 0x4e9   : > { %v8275_v25 = vmax.f32 %v8274_v24, %v8269_v0  ;;  %v8264_v37 = vadd.f32 %v11767_v42, %v8250_v32  ;;  %v8251_v5 = vmul.f32 %v11766_v55, %v8221_v6  ;;  %v16994_v24 = vld [vmem:[#allocation6 + $0x10] sm:$0xff] }
 0x4ea   : > { %v8273_v1 = vmax.f32 %v8266_v34, 0.0  ;;  %v8357_v32 = vpack.c.bf16 %v16994_v24, %v8354_v26  ;;  %v14459_v6 = vld [vmem:[%s17513_s7 + $0x8] sm:$0xff]   ;;  %v14476_v26 = vld [vmem:[%s17513_s7 + $0xb0] sm:$0xff]  }
 0x4eb   : > { %8276 = vst.msk [vmem:[#allocation5] sm:$0xff] %vm1587_vm3, %v8275_v25  ;;  %v8271_v8 = vmax.f32 %v8264_v37, 0.0  ;;  %v8265_v10 = vadd.f32 %v11767_v42, %v8251_v5  ;;  %v14460_v25 = vld [vmem:[%s17513_s7 + $0x10] sm:$0xff]  }
 0x4ed   : > { %v8278_v17 = vmax.f32 %v8277_v4, %v8271_v8  ;;  %v8272_v41 = vmax.f32 %v8265_v10, 0.0 }
 0x4ef   : > { %8280 = vst.msk [vmem:[#allocation5 + $0x8] sm:$0xff] %vm1587_vm3, %v8278_v17  ;;  %v8281_v21 = vmax.f32 %v8271_v8, %v8272_v41 }
 0x4f1   : > { %v8282_v52 = vmax.f32 %v8281_v21, %v8273_v1 }
 0x4f2   : > { %v8299_v53 = vld [vmem:[#allocation5] sm:$0x1]  ;;  %v8302_v28 = vld [vmem:[#allocation5 + $0x1] sm:$0x1]  ;;  %v8318_v29 = vld [vmem:[#allocation5 + $0x2] sm:$0x1] }
 0x4f3   : > { %v8305_v19 = vmax.f32 %v8299_v53, %v8302_v28  ;;  %v8321_v47 = vld [vmem:[#allocation5 + $0x3] sm:$0x1]  ;;  %8284 = vst.msk [vmem:[#allocation5 + $0x10] sm:$0xff] %vm1587_vm3, %v8282_v52  ;;  %v8308_v20 = vld [vmem:[#allocation5 + $0x2] sm:$0x1] }
 0x4f4   : > { %v8324_v40 = vmax.f32 %v8318_v29, %v8321_v47  ;;  %v8336_v7 = vld [vmem:[#allocation5 + $0x4] sm:$0x1]  ;;  %v8339_v60 = vld [vmem:[#allocation5 + $0x5] sm:$0x1]  ;;  %v8345_v18 = vld [vmem:[#allocation5 + $0x6] sm:$0x1] }
 0x4f5   : > { %v8311_v51 = vmax.f32 %v8305_v19, %v8308_v20  ;;  %v8327_v15 = vld [vmem:[#allocation5 + $0x4] sm:$0x1]  ;;  %v8342_v48 = vmax.f32 %v8336_v7, %v8339_v60  ;;  %v14461_v29 = vld [vmem:[%s17513_s7 + $0x18] sm:$0xff]  }
 0x4f6   : > { %v8330_v45 = vmax.f32 %v8324_v40, %v8327_v15  ;;  %v8300_v3 = vld [vmem:[#allocation5 + $0x8] sm:$0x1]  ;;  %v8303_v27 = vld [vmem:[#allocation5 + $0x9] sm:$0x1]  ;;  %v8319_v23 = vld [vmem:[#allocation5 + $0xa] sm:$0x1] }
 0x4f7   : > { %8315 = vst.msk [vmem:[#allocation6 + $0x22] sm:$0x1] %vm4403_vm4, %v8311_v51  ;;  %v8348_v12 = vmax.f32 %v8342_v48, %v8345_v18  ;;  %v8306_v22 = vmax.f32 %v8300_v3, %v8303_v27  ;;  %v8322_v35 = vld [vmem:[#allocation5 + $0xb] sm:$0x1]  ;;  %v8309_v59 = vld [vmem:[#allocation5 + $0xa] sm:$0x1] }
 0x4f8   : > { %8333 = vst.msk [vmem:[#allocation6 + $0x23] sm:$0x1] %vm4403_vm4, %v8330_v45  ;;  %v8325_v56 = vmax.f32 %v8319_v23, %v8322_v35  ;;  %v8337_v14 = vld [vmem:[#allocation5 + $0xc] sm:$0x1]  ;;  %v8340_v36 = vld [vmem:[#allocation5 + $0xd] sm:$0x1] }
 0x4f9   : > { %8351 = vst.msk [vmem:[#allocation6 + $0x24] sm:$0x1] %vm4403_vm4, %v8348_v12  ;;  %v8312_v16 = vmax.f32 %v8306_v22, %v8309_v59  ;;  %v8328_v55 = vld [vmem:[#allocation5 + $0xc] sm:$0x1]  ;;  %v8343_v61 = vmax.f32 %v8337_v14, %v8340_v36  ;;  %v8346_v62 = vld [vmem:[#allocation5 + $0xe] sm:$0x1] }
 0x4fa   : > { %v8331_v42 = vmax.f32 %v8325_v56, %v8328_v55  ;;  %v8301_v11 = vld [vmem:[#allocation5 + $0x10] sm:$0x1]  ;;  %v8304_v2 = vld [vmem:[#allocation5 + $0x11] sm:$0x1]  ;;  %v8320_v33 = vld [vmem:[#allocation5 + $0x12] sm:$0x1] }
 0x4fb   : > { %v8349_v43 = vmax.f32 %v8343_v61, %v8346_v62  ;;  %8316 = vst.msk [vmem:[#allocation6 + $0x32] sm:$0x1] %vm4403_vm4, %v8312_v16  ;;  %v8307_v30 = vmax.f32 %v8301_v11, %v8304_v2  ;;  %v8323_v9 = vld [vmem:[#allocation5 + $0x13] sm:$0x1]  ;;  %v8310_v63 = vld [vmem:[#allocation5 + $0x12] sm:$0x1] }
 0x4fc   : > { %8334 = vst.msk [vmem:[#allocation6 + $0x33] sm:$0x1] %vm4403_vm4, %v8331_v42  ;;  %v8326_v58 = vmax.f32 %v8320_v33, %v8323_v9  ;;  %v8338_v54 = vld [vmem:[#allocation5 + $0x14] sm:$0x1]  ;;  %v8341_v57 = vld [vmem:[#allocation5 + $0x15] sm:$0x1] }
 0x4fd   : > { %8352 = vst.msk [vmem:[#allocation6 + $0x34] sm:$0x1] %vm4403_vm4, %v8349_v43  ;;  %v8313_v0 = vmax.f32 %v8307_v30, %v8310_v63  ;;  %v8329_v46 = vld [vmem:[#allocation5 + $0x14] sm:$0x1]  ;;  %v8344_v44 = vmax.f32 %v8338_v54, %v8341_v57  ;;  %v8347_v4 = vld [vmem:[#allocation5 + $0x16] sm:$0x1] }
 0x4fe   : > { %v8332_v13 = vmax.f32 %v8326_v58, %v8329_v46  ;;  %v14462_v3 = vld [vmem:[%s17513_s7 + $0x40] sm:$0xff]   ;;  %v17066_v12 = vld [vmem:[#allocation6 + $0x12] sm:$0xff]  ;;  %v14465_v56 = vld [vmem:[%s17513_s7 + $0x58] sm:$0xff]  }
 0x4ff   : > { %v8350_v50 = vmax.f32 %v8344_v44, %v8347_v4  ;;  %8317 = vst.msk [vmem:[#allocation6 + $0x42] sm:$0x1] %vm4403_vm4, %v8313_v0  ;;  %v8537_v27 = vld [vmem:[#allocation6 + $0x2] sm:$0xff]  ;;  %v14463_v35 = vld [vmem:[%s17513_s7 + $0x48] sm:$0xff]   ;;  %v14464_v59 = vld [vmem:[%s17513_s7 + $0x50] sm:$0xff]  }
 0x500   : > { %8335 = vst.msk [vmem:[#allocation6 + $0x43] sm:$0x1] %vm4403_vm4, %v8332_v13  ;;  %v16997_v38 = vld [vmem:[#allocation6 + $0x21] sm:$0xff]  ;;  %v8540_v22 = vpack.c.bf16 %v17066_v12, %v8537_v27  ;;  %v17085_v16 = vld [vmem:[#allocation6 + $0x13] sm:$0xff] }
 0x501   : > { %8353 = vst.msk [vmem:[#allocation6 + $0x44] sm:$0x1] %vm4403_vm4, %v8350_v50  ;;  %v8371_v49 = vpack.c.bf16 %v16997_v38, %v16997_v38  ;;  %v17010_v37 = vld [vmem:[#allocation6 + $0x20] sm:$0xff]  ;;  %v14466_v14 = vld [vmem:[%s17513_s7 + $0x60] sm:$0xff]   ;;  %v14467_v42 = vld [vmem:[%s17513_s7 + $0x68] sm:$0xff]  }
 0x502   : > { %v17020_v10 = vld [vmem:[#allocation6 + $0x22] sm:$0xff]  ;;  %v8358_v23 = vpack.c.bf16 %v17010_v37, %v17010_v37  ;;  %v14468_v62 = vld [vmem:[%s17513_s7 + $0x70] sm:$0xff]   ;;  %v14471_v63 = vld [vmem:[%s17513_s7 + $0x88] sm:$0xff]   ;;  %v8826_v44 = vpack.c.bf16 %v17010_v37, %v16994_v24 }
 0x503   : > { %13458 = vmatmul.mubr.msk.bf16.vlgmr.msra.gmra.mrb[48].mxu0 %vm1587_vm3, %v8371_v49  ;;  %v17028_v21 = vld [vmem:[#allocation6 + $0x23] sm:$0xff]  ;;  %v8541_v61 = vpack.c.bf16 %v17020_v10, %v17020_v10  ;;  %v17104_v30 = vld [vmem:[#allocation6 + $0x14] sm:$0xff] }
 0x504   : > { %13462 = vmatpush3.bf16.msra.mxu0 %v16975_v31  ;;  %13469 = vmatprep.mubr.msk.bf16.mxu0 %vm1587_vm3, %v8357_v32  ;;  %v17014_v5 = vld [vmem:[#allocation6 + $0x30] sm:$0xff]  ;;  %v17030_v31 = vld [vmem:[#allocation6 + $0x24] sm:$0xff]  ;;  %v8636_v9 = vpack.c.bf16 %v17028_v21, %v17028_v21  ;;  %v14472_v58 = vld [vmem:[%s17513_s7 + $0x90] sm:$0xff]   ;;  %v8921_v32 = vpack.c.bf16 %v16997_v38, %v16968_v39 }
 0x505   : > { %v17016_v34 = vld [vmem:[#allocation6 + $0x31] sm:$0xff]  ;;  %13463 = vmatprep.subr.bf16.mxu0 %v14459_v6  ;;  %v9301_v1 = vpack.c.bf16 %v17014_v5, %v17010_v37  ;;  %v8632_v36 = vld [vmem:[#allocation6 + $0x3] sm:$0xff]  ;;  %v8731_v0 = vpack.c.bf16 %v17030_v31, %v17030_v31  ;;  %v8827_v50 = vpack.c.bf16 %v17014_v5, %v17014_v5 }
 0x506   : > { %v17018_v8 = vld [vmem:[#allocation6 + $0x32] sm:$0xff]  ;;  %v9396_v52 = vpack.c.bf16 %v17016_v34, %v16997_v38  ;;  %v8635_v55 = vpack.c.bf16 %v17085_v16, %v8632_v36  ;;  %v14469_v11 = vld [vmem:[%s17513_s7 + $0x78] sm:$0xff]   ;;  %v14470_v2 = vld [vmem:[%s17513_s7 + $0x80] sm:$0xff]  }
 0x507   : > { %v17022_v17 = vld [vmem:[#allocation6 + $0x33] sm:$0xff]  ;;  %v9491_v53 = vpack.c.bf16 %v17018_v8, %v17020_v10  ;;  %v8727_v43 = vld [vmem:[#allocation6 + $0x4] sm:$0xff] }
 0x508   : > { %v17024_v41 = vld [vmem:[#allocation6 + $0x34] sm:$0xff]  ;;  %v9586_v28 = vpack.c.bf16 %v17022_v17, %v17028_v21  ;;  %13464 = vmatpush3.bf16.msra.mxu0 %v14459_v6  ;;  %v17043_v47 = vld [vmem:[#allocation6 + $0x40] sm:$0xff]  ;;  %v8730_v33 = vpack.c.bf16 %v17104_v30, %v8727_v43  ;;  %v14474_v57 = vld [vmem:[%s17513_s7 + $0xa0] sm:$0xff]  }
 0x509   : > { %v9681_v19 = vpack.c.bf16 %v17024_v41, %v17030_v31  ;;  %v17045_v20 = vld [vmem:[#allocation6 + $0x41] sm:$0xff]  ;;  %13465 = vmatprep.subr.bf16.mxu0 %v14460_v25  ;;  %v9777_v51 = vpack.c.bf16 %v17043_v47, %v17014_v5  ;;  %v14475_v46 = vld [vmem:[%s17513_s7 + $0xa8] sm:$0xff]   ;;  %v14480_v49 = vld [vmem:[%s17513_s7 + $0xd0] sm:$0xff]   ;;  %v9302_v37 = vpack.c.bf16 %v17043_v47, %v17043_v47 }
 0x50a   : > { %v17047_v40 = vld [vmem:[#allocation6 + $0x42] sm:$0xff]  ;;  %v9872_v15 = vpack.c.bf16 %v17045_v20, %v17016_v34  ;;  %v14479_v24 = vld [vmem:[%s17513_s7 + $0xc8] sm:$0xff]   ;;  %v14484_v27 = vld [vmem:[%s17513_s7 + $0xf0] sm:$0xff]   ;;  %v9397_v38 = vpack.c.bf16 %v17045_v20, %v17045_v20 }
 0x50b   : > { %v17049_v7 = vld [vmem:[#allocation6 + $0x43] sm:$0xff]  ;;  %v9967_v48 = vpack.c.bf16 %v17047_v40, %v17018_v8  ;;  %v14495_v43 = vld [vmem:[%s17513_s7 + $0x148] sm:$0xff]  }
 0x50c   : > { %v17051_v60 = vld [vmem:[#allocation6 + $0x44] sm:$0xff]  ;;  %v10062_v45 = vpack.c.bf16 %v17049_v7, %v17022_v17  ;;  %13466 = vmatpush3.bf16.msra.mxu0 %v14460_v25  ;;  %v8922_v25 = vpack.c.bf16 %v17016_v34, %v17016_v34  ;;  %v17327_v5 = vld [vmem:[#allocation6 + $0x50] sm:$0xff] }
 0x50d   : > { %v10157_v18 = vpack.c.bf16 %v17051_v60, %v17024_v41  ;;  %13467 = vmatprep.subr.bf16.mxu0 %v14461_v29  ;;  %v14473_v54 = vld [vmem:[%s17513_s7 + $0x98] sm:$0xff]   ;;  %v14478_v4 = vld [vmem:[%s17513_s7 + $0xc0] sm:$0xff]   ;;  %v17348_v34 = vld [vmem:[#allocation6 + $0x51] sm:$0xff] }
 0x50e   : > { %v14477_v13 = vld [vmem:[%s17513_s7 + $0xb8] sm:$0xff]   ;;  %v14482_v39 = vld [vmem:[%s17513_s7 + $0xe0] sm:$0xff]  }
 0x50f   : > { %v14481_v6 = vld [vmem:[%s17513_s7 + $0xd8] sm:$0xff]   ;;  %v14490_v36 = vld [vmem:[%s17513_s7 + $0x120] sm:$0xff]  }
 0x510   : > { %13468 = vmatpush3.bf16.msra.mxu0 %v14461_v29  ;;  %v14483_v29 = vld [vmem:[%s17513_s7 + $0xe8] sm:$0xff]  }
 0x511   : > { %13473 = vmatprep.subr.bf16.mxu0 %v14462_v3 }
 0x513   : > { %13470 = vmatmul.mubr.msk.bf16.vlgmr.msra.gmra.mrb[48].mxu0 %vm1587_vm3, %v8358_v23  ;;  %v9017_v23 = vpack.c.bf16 %v17018_v8, %v17018_v8  ;;  %v17369_v8 = vld [vmem:[#allocation6 + $0x52] sm:$0xff] }
 0x514   : > { %13474 = vmatpush3.bf16.msra.mxu0 %v14462_v3  ;;  %13481 = vmatprep.mubr.msk.bf16.mxu0 %vm1587_vm3, %v8540_v22  ;;  %v9016_v3 = vpack.c.bf16 %v17020_v10, %v17066_v12  ;;  %v14485_v22 = vld [vmem:[%s17513_s7 + $0xf8] sm:$0xff]   ;;  %v14486_v12 = vld [vmem:[%s17513_s7 + $0x100] sm:$0xff]   ;;  %v9492_v10 = vpack.c.bf16 %v17047_v40, %v17047_v40 }
 0x515   : > { %13475 = vmatprep.subr.bf16.mxu0 %v14463_v35 }
 0x518   : > { %13476 = vmatpush3.bf16.msra.mxu0 %v14463_v35  ;;  %v14487_v35 = vld [vmem:[%s17513_s7 + $0x108] sm:$0xff]  }
 0x519   : > { %13477 = vmatprep.subr.bf16.mxu0 %v14464_v59 }
 0x51c   : > { %13478 = vmatpush3.bf16.msra.mxu0 %v14464_v59  ;;  %v9111_v59 = vpack.c.bf16 %v17028_v21, %v17085_v16  ;;  %v9112_v16 = vpack.c.bf16 %v17022_v17, %v17022_v17  ;;  %v9587_v21 = vpack.c.bf16 %v17049_v7, %v17049_v7  ;;  %v17390_v17 = vld [vmem:[#allocation6 + $0x53] sm:$0xff] }
 0x51d   : > { %13479 = vmatprep.subr.bf16.mxu0 %v14465_v56 }
 0x520   : > { %13480 = vmatpush3.bf16.msra.mxu0 %v14465_v56  ;;  %v14488_v56 = vld [vmem:[%s17513_s7 + $0x110] sm:$0xff]  }
 0x521   : > { %13485 = vmatprep.subr.bf16.mxu0 %v14466_v14 }
 0x523   : > { %13482 = vmatmul.mubr.msk.bf16.vlgmr.msra.gmra.mrb[48].mxu0 %vm1587_vm3, %v8541_v61  ;;  %v9206_v61 = vpack.c.bf16 %v17030_v31, %v17104_v30  ;;  %v14496_v30 = vld [vmem:[%s17513_s7 + $0x150] sm:$0xff]   ;;  %v9682_v31 = vpack.c.bf16 %v17051_v60, %v17051_v60 }
 0x524   : > { %13486 = vmatpush3.bf16.msra.mxu0 %v14466_v14  ;;  %13493 = vmatprep.mubr.msk.bf16.mxu0 %vm1587_vm3, %v8635_v55  ;;  %v14489_v14 = vld [vmem:[%s17513_s7 + $0x118] sm:$0xff]   ;;  %v14491_v55 = vld [vmem:[%s17513_s7 + $0x128] sm:$0xff]  }
 0x525   : > { %13487 = vmatprep.subr.bf16.mxu0 %v14467_v42 }
 0x528   : > { %13488 = vmatpush3.bf16.msra.mxu0 %v14467_v42  ;;  %v14492_v42 = vld [vmem:[%s17513_s7 + $0x130] sm:$0xff]  }
 0x529   : > { %13489 = vmatprep.subr.bf16.mxu0 %v14468_v62 }
 0x52c   : > { %13490 = vmatpush3.bf16.msra.mxu0 %v14468_v62  ;;  %v14493_v62 = vld [vmem:[%s17513_s7 + $0x138] sm:$0xff]  }
 0x52d   : > { %13491 = vmatprep.subr.bf16.mxu0 %v14469_v11 }
 0x530   : > { %13492 = vmatpush3.bf16.msra.mxu0 %v14469_v11  ;;  %v14494_v11 = vld [vmem:[%s17513_s7 + $0x140] sm:$0xff]  }
 0x531   : > { %13497 = vmatprep.subr.bf16.mxu0 %v14470_v2 }
 0x533   : > { %13494 = vmatmul.mubr.msk.bf16.vlgmr.msra.gmra.mrb[48].mxu0 %vm1587_vm3, %v8636_v9  ;;  %v14498_v9 = vld [vmem:[%s17513_s7 + $0x160] sm:$0xff]  }
 0x534   : > { %13498 = vmatpush3.bf16.msra.mxu0 %v14470_v2  ;;  %13505 = vmatprep.mubr.msk.bf16.mxu0 %vm1587_vm3, %v8730_v33  ;;  %v9207_v2 = vpack.c.bf16 %v17024_v41, %v17024_v41  ;;  %v14497_v33 = vld [vmem:[%s17513_s7 + $0x158] sm:$0xff]   ;;  %v17411_v41 = vld [vmem:[#allocation6 + $0x54] sm:$0xff] }
 0x535   : > { %13499 = vmatprep.subr.bf16.mxu0 %v14471_v63 }
 0x538   : > { %13500 = vmatpush3.bf16.msra.mxu0 %v14471_v63  ;;  %v14500_v63 = vld [vmem:[%s17513_s7 + $0x170] sm:$0xff]  }
 0x539   : > { %13501 = vmatprep.subr.bf16.mxu0 %v14472_v58 }
 0x53c   : > { %13502 = vmatpush3.bf16.msra.mxu0 %v14472_v58  ;;  %v14501_v58 = vld [vmem:[%s17513_s7 + $0x178] sm:$0xff]  }
 0x53d   : > { %13503 = vmatprep.subr.bf16.mxu0 %v14473_v54 }
 0x540   : > { %13504 = vmatpush3.bf16.msra.mxu0 %v14473_v54  ;;  %v14502_v54 = vld [vmem:[%s17513_s7 + $0x180] sm:$0xff]  }
 0x541   : > { %13509 = vmatprep.subr.bf16.mxu0 %v14474_v57 }
 0x543   : > { %13506 = vmatmul.mubr.msk.bf16.vlgmr.msra.gmra.mrb[48].mxu0 %vm1587_vm3, %v8731_v0  ;;  %v14505_v0 = vld [vmem:[%s17513_s7 + $0x198] sm:$0xff]  }
 0x544   : > { %13510 = vmatpush3.bf16.msra.mxu0 %v14474_v57  ;;  %13517 = vmatprep.mubr.msk.bf16.mxu0 %vm1587_vm3, %v8826_v44  ;;  %v14504_v57 = vld [vmem:[%s17513_s7 + $0x190] sm:$0xff]  }
 0x545   : > { %13511 = vmatprep.subr.bf16.mxu0 %v14475_v46  ;;  %v14508_v44 = vld [vmem:[%s17513_s7 + $0x1b0] sm:$0xff]  }
 0x548   : > { %13512 = vmatpush3.bf16.msra.mxu0 %v14475_v46  ;;  %v14506_v46 = vld [vmem:[%s17513_s7 + $0x1a0] sm:$0xff]  }
 0x549   : > { %13513 = vmatprep.subr.bf16.mxu0 %v14476_v26 }
 0x54c   : > { %13514 = vmatpush3.bf16.msra.mxu0 %v14476_v26  ;;  %v14509_v26 = vld [vmem:[%s17513_s7 + $0x1b8] sm:$0xff]  }
 0x54d   : > { %13515 = vmatprep.subr.bf16.mxu0 %v14477_v13 }
 0x550   : > { %13516 = vmatpush3.bf16.msra.mxu0 %v14477_v13  ;;  %v14510_v13 = vld [vmem:[%s17513_s7 + $0x1c0] sm:$0xff]  }
 0x551   : > { %13521 = vmatprep.subr.bf16.mxu0 %v14478_v4 }
 0x553   : > { %13518 = vmatmul.mubr.msk.bf16.vlgmr.msra.gmra.mrb[48].mxu0 %vm1587_vm3, %v8827_v50  ;;  %v14513_v50 = vld [vmem:[%s17513_s7 + $0x1d8] sm:$0xff]  }
 0x554   : > { %13522 = vmatpush3.bf16.msra.mxu0 %v14478_v4  ;;  %13529 = vmatprep.mubr.msk.bf16.mxu0 %vm1587_vm3, %v8921_v32  ;;  %v14512_v4 = vld [vmem:[%s17513_s7 + $0x1d0] sm:$0xff]  }
 0x555   : > { %13523 = vmatprep.subr.bf16.mxu0 %v14479_v24  ;;  %v14516_v32 = vld [vmem:[%s17513_s7 + $0x1f0] sm:$0xff]  }
 0x558   : > { %13524 = vmatpush3.bf16.msra.mxu0 %v14479_v24  ;;  %v14514_v24 = vld [vmem:[%s17513_s7 + $0x1e0] sm:$0xff]  }
 0x559   : > { %13525 = vmatprep.subr.bf16.mxu0 %v14480_v49 }
 0x55c   : > { %13526 = vmatpush3.bf16.msra.mxu0 %v14480_v49  ;;  %v14517_v49 = vld [vmem:[%s17513_s7 + $0x1f8] sm:$0xff]  }
 0x55d   : > { %13527 = vmatprep.subr.bf16.mxu0 %v14481_v6 }
 0x560   : > { %13528 = vmatpush3.bf16.msra.mxu0 %v14481_v6  ;;  %v14518_v6 = vld [vmem:[%s17513_s7 + $0x200] sm:$0xff]  }
 0x561   : > { %13533 = vmatprep.subr.bf16.mxu0 %v14482_v39 }
 0x563   : > { %13530 = vmatmul.mubr.msk.bf16.vlgmr.msra.gmra.mrb[48].mxu0 %vm1587_vm3, %v8922_v25  ;;  %v14520_v25 = vld [vmem:[%s17513_s7 + $0x210] sm:$0xff]  }
 0x564   : > { %13534 = vmatpush3.bf16.msra.mxu0 %v14482_v39  ;;  %13541 = vmatprep.mubr.msk.bf16.mxu0 %vm1587_vm3, %v9016_v3  ;;  %v14519_v39 = vld [vmem:[%s17513_s7 + $0x208] sm:$0xff]   ;;  %v14522_v3 = vld [vmem:[%s17513_s7 + $0x220] sm:$0xff]  }
 0x565   : > { %13535 = vmatprep.subr.bf16.mxu0 %v14483_v29 }
 0x568   : > { %13536 = vmatpush3.bf16.msra.mxu0 %v14483_v29  ;;  %v14521_v29 = vld [vmem:[%s17513_s7 + $0x218] sm:$0xff]  }
 0x569   : > { %13537 = vmatprep.subr.bf16.mxu0 %v14484_v27 }
 0x56c   : > { %13538 = vmatpush3.bf16.msra.mxu0 %v14484_v27  ;;  %v14523_v27 = vld [vmem:[%s17513_s7 + $0x228] sm:$0xff]  }
 0x56d   : > { %13539 = vmatprep.subr.bf16.mxu0 %v14485_v22 }
 0x570   : > { %13540 = vmatpush3.bf16.msra.mxu0 %v14485_v22  ;;  %v14524_v22 = vld [vmem:[%s17513_s7 + $0x230] sm:$0xff]  }
 0x571   : > { %13545 = vmatprep.subr.bf16.mxu0 %v14486_v12 }
 0x573   : > { %13542 = vmatmul.mubr.msk.bf16.vlgmr.msra.gmra.mrb[48].mxu0 %vm1587_vm3, %v9017_v23  ;;  %v14526_v23 = vld [vmem:[%s17513_s7 + $0x240] sm:$0xff]  }
 0x574   : > { %13546 = vmatpush3.bf16.msra.mxu0 %v14486_v12  ;;  %13553 = vmatprep.mubr.msk.bf16.mxu0 %vm1587_vm3, %v9111_v59  ;;  %v14525_v12 = vld [vmem:[%s17513_s7 + $0x238] sm:$0xff]   ;;  %v14528_v59 = vld [vmem:[%s17513_s7 + $0x250] sm:$0xff]  }
 0x575   : > { %13547 = vmatprep.subr.bf16.mxu0 %v14487_v35 }
 0x578   : > { %13548 = vmatpush3.bf16.msra.mxu0 %v14487_v35  ;;  %v14527_v35 = vld [vmem:[%s17513_s7 + $0x248] sm:$0xff]  }
 0x579   : > { %13549 = vmatprep.subr.bf16.mxu0 %v14488_v56 }
 0x57c   : > { %13550 = vmatpush3.bf16.msra.mxu0 %v14488_v56  ;;  %v14529_v56 = vld [vmem:[%s17513_s7 + $0x258] sm:$0xff]  }
 0x57d   : > { %13551 = vmatprep.subr.bf16.mxu0 %v14489_v14 }
 0x580   : > { %13552 = vmatpush3.bf16.msra.mxu0 %v14489_v14  ;;  %v14530_v14 = vld [vmem:[%s17513_s7 + $0x260] sm:$0xff]  }
 0x581   : > { %13557 = vmatprep.subr.bf16.mxu0 %v14490_v36 }
 0x583   : > { %13554 = vmatmul.mubr.msk.bf16.vlgmr.msra.gmra.mrb[48].mxu0 %vm1587_vm3, %v9112_v16  ;;  %v14532_v16 = vld [vmem:[%s17513_s7 + $0x270] sm:$0xff]  }
 0x584   : > { %13558 = vmatpush3.bf16.msra.mxu0 %v14490_v36  ;;  %13565 = vmatprep.mubr.msk.bf16.mxu0 %vm1587_vm3, %v9206_v61  ;;  %v14531_v36 = vld [vmem:[%s17513_s7 + $0x268] sm:$0xff]   ;;  %v14534_v61 = vld [vmem:[%s17513_s7 + $0x280] sm:$0xff]  }
 0x585   : > { %13559 = vmatprep.subr.bf16.mxu0 %v14491_v55 }
 0x588   : > { %13560 = vmatpush3.bf16.msra.mxu0 %v14491_v55  ;;  %v14533_v55 = vld [vmem:[%s17513_s7 + $0x278] sm:$0xff]  }
 0x589   : > { %13561 = vmatprep.subr.bf16.mxu0 %v14492_v42 }
 0x58c   : > { %13562 = vmatpush3.bf16.msra.mxu0 %v14492_v42  ;;  %v14535_v42 = vld [vmem:[%s17513_s7 + $0x288] sm:$0xff]  }
 0x58d   : > { %13563 = vmatprep.subr.bf16.mxu0 %v14493_v62 }
 0x590   : > { %13564 = vmatpush3.bf16.msra.mxu0 %v14493_v62  ;;  %v10253_v62 = vpack.c.bf16 %v17327_v5, %v17043_v47  ;;  %v14538_v47 = vld [vmem:[%s17513_s7 + $0x2a0] sm:$0xff]  }
 0x591   : > { %13569 = vmatprep.subr.bf16.mxu0 %v14494_v11 }
 0x593   : > { %13566 = vmatmul.mubr.msk.bf16.vlgmr.msra.gmra.mrb[48].mxu0 %vm1587_vm3, %v9207_v2  ;;  %v14537_v2 = vld [vmem:[%s17513_s7 + $0x298] sm:$0xff]  }
 0x594   : > { %13570 = vmatpush3.bf16.msra.mxu0 %v14494_v11  ;;  %13577 = vmatprep.mubr.msk.bf16.mxu0 %vm1587_vm3, %v9301_v1  ;;  %v14499_v1 = vld [vmem:[%s17513_s7 + $0x168] sm:$0xff]   ;;  %v14536_v11 = vld [vmem:[%s17513_s7 + $0x290] sm:$0xff]  }
 0x595   : > { %13571 = vmatprep.subr.bf16.mxu0 %v14495_v43 }
 0x598   : > { %13572 = vmatpush3.bf16.msra.mxu0 %v14495_v43  ;;  %v10252_v43 = vld [vmem:[#allocation6 + $0x60] sm:$0xff] }
 0x599   : > { %13573 = vmatprep.subr.bf16.mxu0 %v14496_v30 }
 0x59c   : > { %13574 = vmatpush3.bf16.msra.mxu0 %v14496_v30  ;;  %v10254_v30 = vpack.c.bf16 %v10252_v43, %v10252_v43 }
 0x59d   : > { %13575 = vmatprep.subr.bf16.mxu0 %v14497_v33 }
 0x5a0   : > { %13576 = vmatpush3.bf16.msra.mxu0 %v14497_v33  ;;  %v14539_v33 = vld [vmem:[%s17513_s7 + $0x2a8] sm:$0xff]  }
 0x5a1   : > { %13581 = vmatprep.subr.bf16.mxu0 %v14498_v9 }
 0x5a3   : > { %13578 = vmatmul.mubr.msk.bf16.vlgmr.msra.gmra.mrb[48].mxu0 %vm1587_vm3, %v9302_v37  ;;  %v14540_v37 = vld [vmem:[%s17513_s7 + $0x2b0] sm:$0xff]  }
 0x5a4   : > { %13582 = vmatpush3.bf16.msra.mxu0 %v14498_v9  ;;  %13589 = vmatprep.mubr.msk.bf16.mxu0 %vm1587_vm3, %v9396_v52  ;;  %v14503_v52 = vld [vmem:[%s17513_s7 + $0x188] sm:$0xff]   ;;  %v10348_v9 = vpack.c.bf16 %v17348_v34, %v17045_v20  ;;  %v14542_v20 = vld [vmem:[%s17513_s7 + $0x2c0] sm:$0xff]  }
 0x5a5   : > { %13583 = vmatprep.subr.bf16.mxu0 %v14499_v1 }
 0x5a8   : > { %13584 = vmatpush3.bf16.msra.mxu0 %v14499_v1  ;;  %v14541_v1 = vld [vmem:[%s17513_s7 + $0x2b8] sm:$0xff]  }
 0x5a9   : > { %13585 = vmatprep.subr.bf16.mxu0 %v14500_v63 }
 0x5ac   : > { %13586 = vmatpush3.bf16.msra.mxu0 %v14500_v63  ;;  %v10347_v63 = vld [vmem:[#allocation6 + $0x61] sm:$0xff] }
 0x5ad   : > { %13587 = vmatprep.subr.bf16.mxu0 %v14501_v58 }
 0x5b0   : > { %13588 = vmatpush3.bf16.msra.mxu0 %v14501_v58  ;;  %v10349_v58 = vpack.c.bf16 %v10347_v63, %v10347_v63 }
 0x5b1   : > { %13593 = vmatprep.subr.bf16.mxu0 %v14502_v54 }
 0x5b3   : > { %13590 = vmatmul.mubr.msk.bf16.vlgmr.msra.gmra.mrb[48].mxu0 %vm1587_vm3, %v9397_v38  ;;  %v10443_v38 = vpack.c.bf16 %v17369_v8, %v17047_v40  ;;  %v14546_v40 = vld [vmem:[%s17513_s7 + $0x2e0] sm:$0xff]  }
 0x5b4   : > { %13594 = vmatpush3.bf16.msra.mxu0 %v14502_v54  ;;  %13601 = vmatprep.mubr.msk.bf16.mxu0 %vm1587_vm3, %v9491_v53  ;;  %v14507_v53 = vld [vmem:[%s17513_s7 + $0x1a8] sm:$0xff]  }
 0x5b5   : > { %13595 = vmatprep.subr.bf16.mxu0 %v14503_v52  ;;  %v14543_v54 = vld [vmem:[%s17513_s7 + $0x2c8] sm:$0xff]  }
 0x5b8   : > { %13596 = vmatpush3.bf16.msra.mxu0 %v14503_v52  ;;  %v14544_v52 = vld [vmem:[%s17513_s7 + $0x2d0] sm:$0xff]  }
 0x5b9   : > { %13597 = vmatprep.subr.bf16.mxu0 %v14504_v57 }
 0x5bc   : > { %13598 = vmatpush3.bf16.msra.mxu0 %v14504_v57  ;;  %v14545_v57 = vld [vmem:[%s17513_s7 + $0x2d8] sm:$0xff]  }
 0x5bd   : > { %13599 = vmatprep.subr.bf16.mxu0 %v14505_v0 }
 0x5c0   : > { %13600 = vmatpush3.bf16.msra.mxu0 %v14505_v0  ;;  %v10442_v0 = vld [vmem:[#allocation6 + $0x62] sm:$0xff] }
 0x5c1   : > { %13605 = vmatprep.subr.bf16.mxu0 %v14506_v46 }
 0x5c3   : > { %13602 = vmatmul.mubr.msk.bf16.vlgmr.msra.gmra.mrb[48].mxu0 %vm1587_vm3, %v9492_v10  ;;  %v14547_v10 = vld [vmem:[%s17513_s7 + $0x2e8] sm:$0xff]  }
 0x5c4   : > { %13606 = vmatpush3.bf16.msra.mxu0 %v14506_v46  ;;  %13613 = vmatprep.mubr.msk.bf16.mxu0 %vm1587_vm3, %v9586_v28  ;;  %v14511_v28 = vld [vmem:[%s17513_s7 + $0x1c8] sm:$0xff]   ;;  %v10444_v46 = vpack.c.bf16 %v10442_v0, %v10442_v0 }
 0x5c5   : > { %13607 = vmatprep.subr.bf16.mxu0 %v14507_v53 }
 0x5c8   : > { %13608 = vmatpush3.bf16.msra.mxu0 %v14507_v53  ;;  %v10538_v53 = vpack.c.bf16 %v17390_v17, %v17049_v7  ;;  %v14550_v7 = vld [vmem:[%s17513_s7 + $0x300] sm:$0xff]  }
 0x5c9   : > { %13609 = vmatprep.subr.bf16.mxu0 %v14508_v44 }
 0x5cc   : > { %13610 = vmatpush3.bf16.msra.mxu0 %v14508_v44  ;;  %v14548_v44 = vld [vmem:[%s17513_s7 + $0x2f0] sm:$0xff]  }
 0x5cd   : > { %13611 = vmatprep.subr.bf16.mxu0 %v14509_v26 }
 0x5d0   : > { %13612 = vmatpush3.bf16.msra.mxu0 %v14509_v26  ;;  %v14549_v26 = vld [vmem:[%s17513_s7 + $0x2f8] sm:$0xff]  }
 0x5d1   : > { %13617 = vmatprep.subr.bf16.mxu0 %v14510_v13 }
 0x5d3   : > { %13614 = vmatmul.mubr.msk.bf16.vlgmr.msra.gmra.mrb[48].mxu0 %vm1587_vm3, %v9587_v21 }
 0x5d4   : > { %13618 = vmatpush3.bf16.msra.mxu0 %v14510_v13  ;;  %13625 = vmatprep.mubr.msk.bf16.mxu0 %vm1587_vm3, %v9681_v19  ;;  %v14515_v19 = vld [vmem:[%s17513_s7 + $0x1e8] sm:$0xff]   ;;  %v10537_v13 = vld [vmem:[#allocation6 + $0x63] sm:$0xff] }
 0x5d5   : > { %13619 = vmatprep.subr.bf16.mxu0 %v14511_v28  ;;  %v10539_v21 = vpack.c.bf16 %v10537_v13, %v10537_v13 }
 0x5d8   : > { %13620 = vmatpush3.bf16.msra.mxu0 %v14511_v28  ;;  %v14551_v28 = vld [vmem:[%s17513_s7 + $0x308] sm:$0xff]  }
 0x5d9   : > { %13621 = vmatprep.subr.bf16.mxu0 %v14512_v4 }
 0x5dc   : > { %13622 = vmatpush3.bf16.msra.mxu0 %v14512_v4  ;;  %v10633_v4 = vpack.c.bf16 %v17411_v41, %v17051_v60 }
 0x5dd   : > { %13623 = vmatprep.subr.bf16.mxu0 %v14513_v50 }
 0x5e0   : > { %13624 = vmatpush3.bf16.msra.mxu0 %v14513_v50  ;;  %v14552_v50 = vld [vmem:[%s17513_s7 + $0x310] sm:$0xff]  }
 0x5e1   : > { %13629 = vmatprep.subr.bf16.mxu0 %v14514_v24 }
 0x5e3   : > { %13626 = vmatmul.mubr.msk.bf16.vlgmr.msra.gmra.mrb[48].mxu0 %vm1587_vm3, %v9682_v31  ;;  %v10632_v31 = vld [vmem:[#allocation6 + $0x64] sm:$0xff] }
 0x5e4   : > { %13630 = vmatpush3.bf16.msra.mxu0 %v14514_v24  ;;  %13637 = vmatprep.mubr.msk.bf16.mxu0 %vm1587_vm3, %v9777_v51  ;;  %v9778_v51 = vpack.c.bf16 %v17327_v5, %v17327_v5  ;;  %v14553_v24 = vld [vmem:[%s17513_s7 + $0x318] sm:$0xff]   ;;  %v10634_v60 = vpack.c.bf16 %v10632_v31, %v10632_v31 }
 0x5e5   : > { %13631 = vmatprep.subr.bf16.mxu0 %v14515_v19 }
 0x5e8   : > { %13632 = vmatpush3.bf16.msra.mxu0 %v14515_v19  ;;  %v12110_v19 = vld [vmem:[%s17514_s8] ss:$0 sm:$0xff] }
 0x5e9   : > { %13633 = vmatprep.subr.bf16.mxu0 %v14516_v32 }
 0x5ec   : > { %13634 = vmatpush3.bf16.msra.mxu0 %v14516_v32 }
 0x5ed   : > { %13635 = vmatprep.subr.bf16.mxu0 %v14517_v49 }
 0x5f0   : > { %13636 = vmatpush3.bf16.msra.mxu0 %v14517_v49  ;;  %v12111_v49 = vld [vmem:[%s17515_s9] ss:$0 sm:$0xff] }
 0x5f1   : > { %13641 = vmatprep.subr.bf16.mxu0 %v14518_v6 }
 0x5f3   : > { %13638 = vmatmul.mubr.msk.bf16.vlgmr.msra.gmra.mrb[48].mxu0 %vm1587_vm3, %v9778_v51 }
 0x5f4   : > { %13642 = vmatpush3.bf16.msra.mxu0 %v14518_v6  ;;  %13649 = vmatprep.mubr.msk.bf16.mxu0 %vm1587_vm3, %v9872_v15  ;;  %v9873_v15 = vpack.c.bf16 %v17348_v34, %v17348_v34 }
 0x5f5   : > { %13643 = vmatprep.subr.bf16.mxu0 %v14519_v39 }
 0x5f8   : > { %13644 = vmatpush3.bf16.msra.mxu0 %v14519_v39 }
 0x5f9   : > { %13645 = vmatprep.subr.bf16.mxu0 %v14520_v25 }
 0x5fc   : > { %13646 = vmatpush3.bf16.msra.mxu0 %v14520_v25 }
 0x5fd   : > { %13647 = vmatprep.subr.bf16.mxu0 %v14521_v29 }
 0x600   : > { %13648 = vmatpush3.bf16.msra.mxu0 %v14521_v29 }
 0x601   : > { %13653 = vmatprep.subr.bf16.mxu0 %v14522_v3 }
 0x603   : > { %13650 = vmatmul.mubr.msk.bf16.vlgmr.msra.gmra.mrb[48].mxu0 %vm1587_vm3, %v9873_v15 }
 0x604   : > { %13654 = vmatpush3.bf16.msra.mxu0 %v14522_v3  ;;  %13661 = vmatprep.mubr.msk.bf16.mxu0 %vm1587_vm3, %v9967_v48  ;;  %v9968_v48 = vpack.c.bf16 %v17369_v8, %v17369_v8 }
 0x605   : > { %13655 = vmatprep.subr.bf16.mxu0 %v14523_v27 }
 0x608   : > { %13656 = vmatpush3.bf16.msra.mxu0 %v14523_v27 }
 0x609   : > { %13657 = vmatprep.subr.bf16.mxu0 %v14524_v22 }
 0x60c   : > { %13658 = vmatpush3.bf16.msra.mxu0 %v14524_v22 }
 0x60d   : > { %13659 = vmatprep.subr.bf16.mxu0 %v14525_v12 }
 0x610   : > { %13660 = vmatpush3.bf16.msra.mxu0 %v14525_v12 }
 0x611   : > { %13665 = vmatprep.subr.bf16.mxu0 %v14526_v23 }
 0x613   : > { %13662 = vmatmul.mubr.msk.bf16.vlgmr.msra.gmra.mrb[48].mxu0 %vm1587_vm3, %v9968_v48 }
 0x614   : > { %13666 = vmatpush3.bf16.msra.mxu0 %v14526_v23  ;;  %13673 = vmatprep.mubr.msk.bf16.mxu0 %vm1587_vm3, %v10062_v45  ;;  %v10063_v45 = vpack.c.bf16 %v17390_v17, %v17390_v17 }
 0x615   : > { %13667 = vmatprep.subr.bf16.mxu0 %v14527_v35 }
 0x618   : > { %13668 = vmatpush3.bf16.msra.mxu0 %v14527_v35 }
 0x619   : > { %13669 = vmatprep.subr.bf16.mxu0 %v14528_v59 }
 0x61c   : > { %13670 = vmatpush3.bf16.msra.mxu0 %v14528_v59 }
 0x61d   : > { %13671 = vmatprep.subr.bf16.mxu0 %v14529_v56 }
 0x620   : > { %13672 = vmatpush3.bf16.msra.mxu0 %v14529_v56 }
 0x621   : > { %13677 = vmatprep.subr.bf16.mxu0 %v14530_v14 }
 0x623   : > { %13674 = vmatmul.mubr.msk.bf16.vlgmr.msra.gmra.mrb[48].mxu0 %vm1587_vm3, %v10063_v45 }
 0x624   : > { %13678 = vmatpush3.bf16.msra.mxu0 %v14530_v14  ;;  %13685 = vmatprep.mubr.msk.bf16.mxu0 %vm1587_vm3, %v10157_v18  ;;  %v10158_v18 = vpack.c.bf16 %v17411_v41, %v17411_v41 }
 0x625   : > { %13679 = vmatprep.subr.bf16.mxu0 %v14531_v36 }
 0x628   : > { %13680 = vmatpush3.bf16.msra.mxu0 %v14531_v36 }
 0x629   : > { %13681 = vmatprep.subr.bf16.mxu0 %v14532_v16 }
 0x62c   : > { %13682 = vmatpush3.bf16.msra.mxu0 %v14532_v16 }
 0x62d   : > { %13683 = vmatprep.subr.bf16.mxu0 %v14533_v55 }
 0x630   : > { %13684 = vmatpush3.bf16.msra.mxu0 %v14533_v55 }
 0x631   : > { %13689 = vmatprep.subr.bf16.mxu0 %v14534_v61 }
 0x633   : > { %13686 = vmatmul.mubr.msk.bf16.vlgmr.msra.gmra.mrb[48].mxu0 %vm1587_vm3, %v10158_v18 }
 0x634   : > { %13690 = vmatpush3.bf16.msra.mxu0 %v14534_v61  ;;  %13697 = vmatprep.mubr.msk.bf16.mxu0 %vm1587_vm3, %v10253_v62 }
 0x635   : > { %13691 = vmatprep.subr.bf16.mxu0 %v14535_v42 }
 0x638   : > { %13692 = vmatpush3.bf16.msra.mxu0 %v14535_v42 }
 0x639   : > { %13693 = vmatprep.subr.bf16.mxu0 %v14536_v11 }
 0x63c   : > { %13694 = vmatpush3.bf16.msra.mxu0 %v14536_v11 }
 0x63d   : > { %13695 = vmatprep.subr.bf16.mxu0 %v14537_v2 }
 0x640   : > { %13696 = vmatpush3.bf16.msra.mxu0 %v14537_v2 }
 0x641   : > { %13701 = vmatprep.subr.bf16.mxu0 %v14538_v47 }
 0x643   : > { %13698 = vmatmul.mubr.msk.bf16.vlgmr.msra.gmra.mrb[48].mxu0 %vm1587_vm3, %v10254_v30 }
 0x644   : > { %13702 = vmatpush3.bf16.msra.mxu0 %v14538_v47  ;;  %13709 = vmatprep.mubr.msk.bf16.mxu0 %vm1587_vm3, %v10348_v9 }
 0x645   : > { %13703 = vmatprep.subr.bf16.mxu0 %v14539_v33 }
 0x648   : > { %13704 = vmatpush3.bf16.msra.mxu0 %v14539_v33 }
 0x649   : > { %13705 = vmatprep.subr.bf16.mxu0 %v14540_v37 }
 0x64c   : > { %13706 = vmatpush3.bf16.msra.mxu0 %v14540_v37 }
 0x64d   : > { %13707 = vmatprep.subr.bf16.mxu0 %v14541_v1 }
 0x650   : > { %13708 = vmatpush3.bf16.msra.mxu0 %v14541_v1 }
 0x651   : > { %13713 = vmatprep.subr.bf16.mxu0 %v14542_v20 }
 0x653   : > { %13710 = vmatmul.mubr.msk.bf16.vlgmr.msra.gmra.mrb[48].mxu0 %vm1587_vm3, %v10349_v58 }
 0x654   : > { %13714 = vmatpush3.bf16.msra.mxu0 %v14542_v20  ;;  %13721 = vmatprep.mubr.msk.bf16.mxu0 %vm1587_vm3, %v10443_v38 }
 0x655   : > { %13715 = vmatprep.subr.bf16.mxu0 %v14543_v54 }
 0x658   : > { %13716 = vmatpush3.bf16.msra.mxu0 %v14543_v54 }
 0x659   : > { %13717 = vmatprep.subr.bf16.mxu0 %v14544_v52 }
 0x65c   : > { %13718 = vmatpush3.bf16.msra.mxu0 %v14544_v52 }
 0x65d   : > { %13719 = vmatprep.subr.bf16.mxu0 %v14545_v57 }
 0x660   : > { %13720 = vmatpush3.bf16.msra.mxu0 %v14545_v57 }
 0x661   : > { %13725 = vmatprep.subr.bf16.mxu0 %v14546_v40 }
 0x663   : > { %13722 = vmatmul.mubr.msk.bf16.vlgmr.msra.gmra.mrb[48].mxu0 %vm1587_vm3, %v10444_v46 }
 0x664   : > { %13726 = vmatpush3.bf16.msra.mxu0 %v14546_v40  ;;  %13733 = vmatprep.mubr.msk.bf16.mxu0 %vm1587_vm3, %v10538_v53 }
 0x665   : > { %13727 = vmatprep.subr.bf16.mxu0 %v14547_v10 }
 0x668   : > { %13728 = vmatpush3.bf16.msra.mxu0 %v14547_v10 }
 0x669   : > { %13729 = vmatprep.subr.bf16.mxu0 %v14548_v44 }
 0x66c   : > { %13730 = vmatpush3.bf16.msra.mxu0 %v14548_v44 }
 0x66d   : > { %13731 = vmatprep.subr.bf16.mxu0 %v14549_v26 }
 0x670   : > { %13732 = vmatpush3.bf16.msra.mxu0 %v14549_v26 }
 0x671   : > { %13737 = vmatprep.subr.bf16.mxu0 %v14550_v7 }
 0x673   : > { %13734 = vmatmul.mubr.msk.bf16.vlgmr.msra.gmra.mrb[48].mxu0 %vm1587_vm3, %v10539_v21 }
 0x674   : > { %13738 = vmatpush3.bf16.msra.mxu0 %v14550_v7  ;;  %13745 = vmatprep.mubr.msk.bf16.mxu0 %vm1587_vm3, %v10633_v4 }
 0x675   : > { %13739 = vmatprep.subr.bf16.mxu0 %v14551_v28 }
 0x678   : > { %13740 = vmatpush3.bf16.msra.mxu0 %v14551_v28 }
 0x679   : > { %13741 = vmatprep.subr.bf16.mxu0 %v14552_v50 }
 0x67c   : > { %13742 = vmatpush3.bf16.msra.mxu0 %v14552_v50 }
 0x67d   : > { %13743 = vmatprep.subr.bf16.mxu0 %v14553_v24 }
 0x680   : > { %13744 = vmatpush3.bf16.msra.mxu0 %v14553_v24 }
 0x683   : > { %13746 = vmatmul.mubr.msk.bf16.vlgmr.msra.gmra.mrb[48].mxu0 %vm1587_vm3, %v10634_v60 }
 0x756   : > { %v13747_v32 = vpop.f32.mrb[48].mxu0 }
 0x757   : > { %v10734_v6 = vmul.f32 %v13747_v32, %v12110_v19  ;;  %v10708_v5 = vpop.f32.mrb[49].mxu0 }
 0x758   : > { %v10732_v51 = vmul.f32 %v12110_v19, %v10708_v5  ;;  %v13748_v39 = vpop.f32.mrb[50].mxu0 }
 0x759   : > { %v10744_v25 = vadd.f32 %v12111_v49, %v10734_v6  ;;  %v10711_v29 = vpop.f32.mrb[51].mxu0 }
 0x75a   : > { %v10742_v3 = vadd.f32 %v12111_v49, %v10732_v51  ;;  %v10733_v34 = vmul.f32 %v12110_v19, %v10711_v29 }
 0x75b   : > { %v10747_v15 = vmax.f32 %v10744_v25, 0.0 }
 0x75c   : > { %v10745_v27 = vmax.f32 %v10742_v3, 0.0  ;;  %v10743_v22 = vadd.f32 %v12111_v49, %v10733_v34 }
 0x75d   : > { %10750 = vst [vmem:[%s359_s22 + $0x8] sm:$0x7] %v10747_v15 }
 0x75e   : > { %10748 = vst [vmem:[%s359_s22] sm:$0x7] %v10745_v27  ;;  %v10746_v12 = vmax.f32 %v10743_v22, 0.0 }
 0x760   : > { %10749 = vst [vmem:[%s359_s22 + $0x4] sm:$0x7] %v10746_v12 }
 0x761 PF: > { %s20_s13 = sadd.s32 1, %s14564_s13  }
 0x762   : > { %p17_p4 = scmp.ge.s32.totalorder %s20_s13, 4  }
 0x764   :  { %19 = sbr.rel (!%p17_p4) target bundleno = 1 (0x1), region = 198 }

</bundles_post_ra>
